<compile_context>
chip_gen: v5e
topology: v5e:2x2
jax: 0.10.0
libtpu: 0.0.40
codegen_flags: <defaults>
</compile_context>

<pallas_src>
import math

import jax
import jax.numpy as jnp
from jax.experimental import pallas as pl
from jax.experimental.pallas import tpu as pltpu

LANE = 128
MAX_ROW_TILE = 1024
OMEGA = 30.0
# Keep f32 operands for exact parity with the PyTorch module (sin(30x) is
# precision sensitive).  Flip to bf16 on v6e/v7x only after validating accuracy.
MATMUL_DTYPE = jnp.float32


def _round_up(x, m):
    return pl.cdiv(x, m) * m


def _pick_row_tile(m):
    for t in (MAX_ROW_TILE, 512, 256, 128):
        if m % t == 0:
            return t
    return m  # m is always a multiple of LANE here


# ---------------------------------------------------------------------------
# Pallas kernel factory: fused SIREN MLP with N un-concatenated inputs and an
# optional fused residual add.
#   out = W3 @ sin(W2' @ sin(sum_k W1'_k @ x_k + b1') + b2') + b3 [+ residual]
# (omega folded into W1', b1', W2', b2' at init time.)
# ---------------------------------------------------------------------------
def _make_siren_kernel(n_in, has_res):
    def kernel(*refs):
        i = 0
        xs = refs[i:i + n_in]; i += n_in
        res_ref = None
        if has_res:
            res_ref = refs[i]; i += 1
        w1s = refs[i:i + n_in]; i += n_in
        b1_ref, w2_ref, b2_ref, w3_ref, b3_ref, o_ref = refs[i:i + 6]

        # layer 1: sum of per-piece matmuls replaces the concatenated input
        h = b1_ref[...]                                   # [H, 1] lane-broadcast
        for x_ref, w_ref in zip(xs, w1s):
            h = h + jnp.dot(w_ref[...].astype(MATMUL_DTYPE),
                            x_ref[...].astype(MATMUL_DTYPE),
                            preferred_element_type=jnp.float32)
        h = jnp.sin(h)                                    # omega already in W1/b1
        h = jnp.sin(jnp.dot(w2_ref[...].astype(MATMUL_DTYPE),
                            h.astype(MATMUL_DTYPE),
                            preferred_element_type=jnp.float32) + b2_ref[...])
        out = jnp.dot(w3_ref[...].astype(MATMUL_DTYPE),
                      h.astype(MATMUL_DTYPE),
                      preferred_element_type=jnp.float32) + b3_ref[...]
        if has_res:
            out = out + res_ref[...]
        o_ref[...] = out.astype(o_ref.dtype)

    return kernel


def siren_apply(xs, params, residual=None):
    """xs: list of [B, Di, M] feature-first arrays (same B, M; M % 128 == 0).
    Returns [B, Dout, M].  residual (optional): [B, Dout, M], added in-kernel."""
    B, _, M = xs[0].shape
    Dout = params["w3"].shape[0]
    n_in = len(xs)
    has_res = residual is not None
    row_tile = _pick_row_tile(M)
    grid = (B, M // row_tile)

    inputs = list(xs)
    in_specs = [pl.BlockSpec((None, int(x.shape[1]), row_tile),
                             lambda b, i: (b, 0, i))
                for x in xs]
    if has_res:
        inputs.append(residual)
        in_specs.append(pl.BlockSpec((None, Dout, row_tile), lambda b, i: (b, 0, i)))
    for w in params["w1"]:                                # resident weights
        inputs.append(w)
        in_specs.append(pl.BlockSpec(w.shape, lambda b, i: (0, 0)))
    for p in (params["b1"], params["w2"], params["b2"], params["w3"], params["b3"]):
        inputs.append(p)
        in_specs.append(pl.BlockSpec(p.shape, lambda b, i: (0, 0)))

    return pl.pallas_call(
        _make_siren_kernel(n_in, has_res),
        out_shape=jax.ShapeDtypeStruct((B, Dout, M), jnp.float32),
        grid=grid,
        in_specs=in_specs,
        out_specs=pl.BlockSpec((None, Dout, row_tile), lambda b, i: (b, 0, i)),
        compiler_params=pltpu.CompilerParams(
            dimension_semantics=("parallel", "parallel")),
    )(*inputs)


# ---------------------------------------------------------------------------
# Parameter init (deterministic; mirrors the PyTorch init ranges).
# omega is folded into the two sine layers; W1 is pre-split per input piece.
# ---------------------------------------------------------------------------
def init_siren(key, in_sizes, nout, hidden):
    nin = sum(in_sizes)
    ks = jax.random.split(key, 6)
    w1 = jax.random.uniform(ks[0], (hidden, nin), jnp.float32, -1.0 / nin, 1.0 / nin)
    b1 = jax.random.uniform(ks[1], (hidden, 1), jnp.float32,
                            -1.0 / math.sqrt(nin), 1.0 / math.sqrt(nin))
    lim_w = math.sqrt(6.0 / hidden) / OMEGA
    lim_b = 1.0 / math.sqrt(hidden)
    w2 = jax.random.uniform(ks[2], (hidden, hidden), jnp.float32, -lim_w, lim_w)
    b2 = jax.random.uniform(ks[3], (hidden, 1), jnp.float32, -lim_b, lim_b)
    w3 = jax.random.uniform(ks[4], (nout, hidden), jnp.float32, -lim_w, lim_w)
    b3 = jax.random.uniform(ks[5], (nout, 1), jnp.float32, -lim_b, lim_b)

    # one-time constant transform: sin(w*(Wx+b)) == sin((wW)x + wb)
    w1, b1, w2, b2 = OMEGA * w1, OMEGA * b1, OMEGA * w2, OMEGA * b2

    splits, acc = [], 0
    for s in in_sizes[:-1]:
        acc += s
        splits.append(acc)
    w1_parts = tuple(jnp.split(w1, splits, axis=1)) if splits else (w1,)
    return {"w1": w1_parts, "b1": b1, "w2": w2, "b2": b2, "w3": w3, "b3": b3}


def init_graphnet(key, node_dim, edge_dim, out_dim, hidden_dim, n_layers):
    keys = jax.random.split(key, 3 + 2 * n_layers)
    H = hidden_dim
    return {
        "node_enc": init_siren(keys[0], (node_dim,), H, H),
        "edge_enc": init_siren(keys[1], (edge_dim,), H, H),
        "edge_blk": [init_siren(keys[2 + 2 * i], (H, H, H), H, H)
                     for i in range(n_layers)],
        "node_blk": [init_siren(keys[3 + 2 * i], (H, H), H, H)
                     for i in range(n_layers)],
        "node_dec": init_siren(keys[2 + 2 * n_layers], (H,), out_dim, H),
    }


# ---------------------------------------------------------------------------
# Graph glue (index plumbing) in plain JAX, feature-first layout.
# TODO(synk): for very large graphs, pull the gather into the edge-block kernel
# via PrefetchScalarGridSpec + pl.Element row index_map instead of XLA gather.
# ---------------------------------------------------------------------------
def gather_nodes_hf(nodes_hf, idx):
    # nodes_hf: [B, H, Np], idx: [B, Ep] -> [B, H, Ep]
    B, H, _ = nodes_hf.shape
    Ep = idx.shape[1]
    idx_b = jnp.broadcast_to(idx[:, None, :], (B, H, Ep))
    return jnp.take_along_axis(nodes_hf, idx_b, axis=2)


def scatter_mean_hf(edges_hf, receivers, num_nodes_pad):
    # edges_hf: [B, H, Ep], receivers: [B, Ep].  Padding rows carry id
    # num_nodes_pad (out of range) -> zero one-hot row -> contribute nothing.
    onehot = jax.nn.one_hot(receivers, num_nodes_pad, dtype=edges_hf.dtype)  # [B,Ep,Np]
    sums = jnp.einsum("bhe,ben->bhn", edges_hf, onehot)
    counts = jnp.sum(onehot, axis=1)                                         # [B, Np]
    return sums / jnp.maximum(counts, 1.0)[:, None, :]


# ---------------------------------------------------------------------------
# graphNet forward
# ---------------------------------------------------------------------------
def graphnet_forward(params, nodes, edges, senders, receivers, n_layers):
    B, N, _ = nodes.shape
    E = edges.shape[1]
    N_pad = _round_up(N, LANE)
    E_pad = _round_up(E, LANE)

    # feature-first layout; pad the item axis to a lane multiple ONCE.
    nodes_hf = jnp.transpose(nodes.astype(jnp.float32), (0, 2, 1))
    edges_hf = jnp.transpose(edges.astype(jnp.float32), (0, 2, 1))
    if N_pad != N:
        nodes_hf = jnp.pad(nodes_hf, ((0, 0), (0, 0), (0, N_pad - N)))
    if E_pad != E:
        edges_hf = jnp.pad(edges_hf, ((0, 0), (0, 0), (0, E_pad - E)))

    snd = senders[..., 0]
    rcv = receivers[..., 0]
    if E_pad != E:
        pad_e = ((0, 0), (0, E_pad - E))
        snd_g = jnp.pad(snd, pad_e)                            # gather pad -> node 0 (harmless)
        rcv_g = jnp.pad(rcv, pad_e)
        rcv_s = jnp.pad(rcv, pad_e, constant_values=N_pad)     # scatter pad -> out of range
    else:
        snd_g, rcv_g, rcv_s = snd, rcv, rcv

    nodes_h = siren_apply([nodes_hf], params["node_enc"])
    edges_h = siren_apply([edges_hf], params["edge_enc"])
    for i in range(n_layers):
        s_feat = gather_nodes_hf(nodes_h, snd_g)
        r_feat = gather_nodes_hf(nodes_h, rcv_g)
        # concat-free fused edge MLP; residual add fused into the kernel
        edges_h = siren_apply([s_feat, r_feat, edges_h], params["edge_blk"][i],
                              residual=edges_h)
        agg = scatter_mean_hf(edges_h, rcv_s, N_pad)
        nodes_h = siren_apply([nodes_h, agg], params["node_blk"][i],
                              residual=nodes_h)
    out_hf = siren_apply([nodes_h], params["node_dec"])          # [B, out_dim, N_pad]
    return jnp.transpose(out_hf[:, :, :N], (0, 2, 1))            # [B, N, out_dim]


if __name__ == "__main__":
    # Small, module-consistent shapes.
    B, N, E = 2, 16, 32
    node_dim, edge_dim, out_dim, hidden_dim, n_layers = 4, 4, 3, 32, 2

    key = jax.random.PRNGKey(0)
    k_par, k_n, k_e, k_s, k_r = jax.random.split(key, 5)

    params = init_graphnet(k_par, node_dim, edge_dim, out_dim, hidden_dim, n_layers)

    nodes = jax.random.normal(k_n, (B, N, node_dim), jnp.float32)
    edges = jax.random.normal(k_e, (B, E, edge_dim), jnp.float32)
    senders = jax.random.randint(k_s, (B, E, 1), 0, N, jnp.int32)
    receivers = jax.random.randint(k_r, (B, E, 1), 0, N, jnp.int32)

    fwd = jax.jit(lambda p, n, e, s, r: graphnet_forward(p, n, e, s, r, n_layers))
    out = fwd(params, nodes, edges, senders, receivers)
    jax.block_until_ready(out)

    assert out.shape == (B, N, out_dim), out.shape
    assert bool(jnp.all(jnp.isfinite(out))), "non-finite output"
    print("KERNEL_OK")
</pallas_src>

<mosaic_0001>
module attributes {stable_mosaic.version = 11 : i64} {
  func.func @kernel(%arg0: i32, %arg1: i32, %arg2: memref<1x4x128xf32, #tpu.memory_space<vmem>>, %arg3: memref<32x4xf32, #tpu.memory_space<vmem>>, %arg4: memref<32x1xf32, #tpu.memory_space<vmem>>, %arg5: memref<32x32xf32, #tpu.memory_space<vmem>>, %arg6: memref<32x1xf32, #tpu.memory_space<vmem>>, %arg7: memref<32x32xf32, #tpu.memory_space<vmem>>, %arg8: memref<32x1xf32, #tpu.memory_space<vmem>>, %arg9: memref<1x32x128xf32, #tpu.memory_space<vmem>>) attributes {dimension_semantics = [#tpu.dimension_semantics<parallel>, #tpu.dimension_semantics<parallel>], iteration_bounds = array<i64: 2, 1>, scalar_prefetch = 0 : i64, scratch_operands = 0 : i64, tpu.core_type = #tpu.core_type<tc>, window_params = [{transform_indices = @transform_0, window_bounds = array<i64: 1, 4, 128>}, {pipeline_mode = #tpu.pipeline_mode<synchronous>, transform_indices = @transform_1, window_bounds = array<i64: 32, 4>}, {pipeline_mode = #tpu.pipeline_mode<synchronous>, transform_indices = @transform_2, window_bounds = array<i64: 32, 1>}, {pipeline_mode = #tpu.pipeline_mode<synchronous>, transform_indices = @transform_3, window_bounds = array<i64: 32, 32>}, {pipeline_mode = #tpu.pipeline_mode<synchronous>, transform_indices = @transform_4, window_bounds = array<i64: 32, 1>}, {pipeline_mode = #tpu.pipeline_mode<synchronous>, transform_indices = @transform_5, window_bounds = array<i64: 32, 32>}, {pipeline_mode = #tpu.pipeline_mode<synchronous>, transform_indices = @transform_6, window_bounds = array<i64: 32, 1>}, {transform_indices = @transform_7, window_bounds = array<i64: 1, 32, 128>}]} {
    %c0 = arith.constant 0 : index
    %c0_0 = arith.constant 0 : index
    %0 = vector.load %arg4[%c0, %c0_0] : memref<32x1xf32, #tpu.memory_space<vmem>>, vector<32x1xf32>
    %c0_1 = arith.constant 0 : index
    %c0_2 = arith.constant 0 : index
    %1 = vector.load %arg3[%c0_1, %c0_2] : memref<32x4xf32, #tpu.memory_space<vmem>>, vector<32x4xf32>
    %c0_3 = arith.constant 0 : index
    %c0_4 = arith.constant 0 : index
    %c0_5 = arith.constant 0 : index
    %2 = vector.load %arg2[%c0_3, %c0_4, %c0_5] : memref<1x4x128xf32, #tpu.memory_space<vmem>>, vector<1x4x128xf32>
    %3 = vector.shape_cast %2 : vector<1x4x128xf32> to vector<4x128xf32>
    %cst = arith.constant dense<0.000000e+00> : vector<32x128xf32>
    %4 = tpu.matmul %1, %3, %cst {dimension_numbers = #tpu.dot_dimension_numbers<[1], [0], [0], [1], [0, 0, 1, 1], [], []>} : vector<32x4xf32>, vector<4x128xf32>, vector<32x128xf32> -> vector<32x128xf32>
    %5 = vector.broadcast %0 : vector<32x1xf32> to vector<32x128xf32>
    %6 = arith.addf %5, %4 : vector<32x128xf32>
    %7 = math.sin %6 : vector<32x128xf32>
    %c0_6 = arith.constant 0 : index
    %c0_7 = arith.constant 0 : index
    %8 = vector.load %arg5[%c0_6, %c0_7] : memref<32x32xf32, #tpu.memory_space<vmem>>, vector<32x32xf32>
    %cst_8 = arith.constant dense<0.000000e+00> : vector<32x128xf32>
    %9 = tpu.matmul %8, %7, %cst_8 {dimension_numbers = #tpu.dot_dimension_numbers<[1], [0], [0], [1], [0, 0, 1, 1], [], []>} : vector<32x32xf32>, vector<32x128xf32>, vector<32x128xf32> -> vector<32x128xf32>
    %c0_9 = arith.constant 0 : index
    %c0_10 = arith.constant 0 : index
    %10 = vector.load %arg6[%c0_9, %c0_10] : memref<32x1xf32, #tpu.memory_space<vmem>>, vector<32x1xf32>
    %11 = vector.broadcast %10 : vector<32x1xf32> to vector<32x128xf32>
    %12 = arith.addf %9, %11 : vector<32x128xf32>
    %13 = math.sin %12 : vector<32x128xf32>
    %c0_11 = arith.constant 0 : index
    %c0_12 = arith.constant 0 : index
    %14 = vector.load %arg7[%c0_11, %c0_12] : memref<32x32xf32, #tpu.memory_space<vmem>>, vector<32x32xf32>
    %cst_13 = arith.constant dense<0.000000e+00> : vector<32x128xf32>
    %15 = tpu.matmul %14, %13, %cst_13 {dimension_numbers = #tpu.dot_dimension_numbers<[1], [0], [0], [1], [0, 0, 1, 1], [], []>} : vector<32x32xf32>, vector<32x128xf32>, vector<32x128xf32> -> vector<32x128xf32>
    %c0_14 = arith.constant 0 : index
    %c0_15 = arith.constant 0 : index
    %16 = vector.load %arg8[%c0_14, %c0_15] : memref<32x1xf32, #tpu.memory_space<vmem>>, vector<32x1xf32>
    %17 = vector.broadcast %16 : vector<32x1xf32> to vector<32x128xf32>
    %18 = arith.addf %15, %17 : vector<32x128xf32>
    %c0_16 = arith.constant 0 : index
    %c0_17 = arith.constant 0 : index
    %c0_18 = arith.constant 0 : index
    %19 = vector.load %arg9[%c0_16, %c0_17, %c0_18] : memref<1x32x128xf32, #tpu.memory_space<vmem>>, vector<1x32x128xf32>
    %20 = vector.shape_cast %19 : vector<1x32x128xf32> to vector<32x128xf32>
    %21 = vector.shape_cast %18 : vector<32x128xf32> to vector<1x32x128xf32>
    tpu.vector_store %arg9[%c0_16, %c0_17, %c0_18], %21 {strides = array<i32>} : memref<1x32x128xf32, #tpu.memory_space<vmem>>, vector<1x32x128xf32>,
    return
  }
  func.func @transform_0(%arg0: i32, %arg1: i32) -> (i32, i32, i32) {
    %c0_i32 = arith.constant 0 : i32
    %c0_i32_0 = arith.constant 0 : i32
    return %arg0, %c0_i32, %arg1 : i32, i32, i32
  }
  func.func @transform_1(%arg0: i32, %arg1: i32) -> (i32, i32) {
    %c0_i32 = arith.constant 0 : i32
    %c0_i32_0 = arith.constant 0 : i32
    %c0_i32_1 = arith.constant 0 : i32
    return %c0_i32, %c0_i32_0 : i32, i32
  }
  func.func @transform_2(%arg0: i32, %arg1: i32) -> (i32, i32) {
    %c0_i32 = arith.constant 0 : i32
    %c0_i32_0 = arith.constant 0 : i32
    %c0_i32_1 = arith.constant 0 : i32
    return %c0_i32, %c0_i32_0 : i32, i32
  }
  func.func @transform_3(%arg0: i32, %arg1: i32) -> (i32, i32) {
    %c0_i32 = arith.constant 0 : i32
    %c0_i32_0 = arith.constant 0 : i32
    %c0_i32_1 = arith.constant 0 : i32
    return %c0_i32, %c0_i32_0 : i32, i32
  }
  func.func @transform_4(%arg0: i32, %arg1: i32) -> (i32, i32) {
    %c0_i32 = arith.constant 0 : i32
    %c0_i32_0 = arith.constant 0 : i32
    %c0_i32_1 = arith.constant 0 : i32
    return %c0_i32, %c0_i32_0 : i32, i32
  }
  func.func @transform_5(%arg0: i32, %arg1: i32) -> (i32, i32) {
    %c0_i32 = arith.constant 0 : i32
    %c0_i32_0 = arith.constant 0 : i32
    %c0_i32_1 = arith.constant 0 : i32
    return %c0_i32, %c0_i32_0 : i32, i32
  }
  func.func @transform_6(%arg0: i32, %arg1: i32) -> (i32, i32) {
    %c0_i32 = arith.constant 0 : i32
    %c0_i32_0 = arith.constant 0 : i32
    %c0_i32_1 = arith.constant 0 : i32
    return %c0_i32, %c0_i32_0 : i32, i32
  }
  func.func @transform_7(%arg0: i32, %arg1: i32) -> (i32, i32, i32) {
    %c0_i32 = arith.constant 0 : i32
    %c0_i32_0 = arith.constant 0 : i32
    return %arg0, %c0_i32, %arg1 : i32, i32, i32
  }
}

module attributes {stable_mosaic.version = 11 : i64} {
  func.func @kernel(%arg0: i32, %arg1: i32, %arg2: memref<1x32x128xf32, #tpu.memory_space<vmem>>, %arg3: memref<1x32x128xf32, #tpu.memory_space<vmem>>, %arg4: memref<1x32x128xf32, #tpu.memory_space<vmem>>, %arg5: memref<1x32x128xf32, #tpu.memory_space<vmem>>, %arg6: memref<32x32xf32, #tpu.memory_space<vmem>>, %arg7: memref<32x32xf32, #tpu.memory_space<vmem>>, %arg8: memref<32x32xf32, #tpu.memory_space<vmem>>, %arg9: memref<32x1xf32, #tpu.memory_space<vmem>>, %arg10: memref<32x32xf32, #tpu.memory_space<vmem>>, %arg11: memref<32x1xf32, #tpu.memory_space<vmem>>, %arg12: memref<32x32xf32, #tpu.memory_space<vmem>>, %arg13: memref<32x1xf32, #tpu.memory_space<vmem>>, %arg14: memref<1x32x128xf32, #tpu.memory_space<vmem>>) attributes {dimension_semantics = [#tpu.dimension_semantics<parallel>, #tpu.dimension_semantics<parallel>], iteration_bounds = array<i64: 2, 1>, scalar_prefetch = 0 : i64, scratch_operands = 0 : i64, tpu.core_type = #tpu.core_type<tc>, window_params = [{transform_indices = @transform_0, window_bounds = array<i64: 1, 32, 128>}, {transform_indices = @transform_1, window_bounds = array<i64: 1, 32, 128>}, {transform_indices = @transform_2, window_bounds = array<i64: 1, 32, 128>}, {transform_indices = @transform_3, window_bounds = array<i64: 1, 32, 128>}, {pipeline_mode = #tpu.pipeline_mode<synchronous>, transform_indices = @transform_4, window_bounds = array<i64: 32, 32>}, {pipeline_mode = #tpu.pipeline_mode<synchronous>, transform_indices = @transform_5, window_bounds = array<i64: 32, 32>}, {pipeline_mode = #tpu.pipeline_mode<synchronous>, transform_indices = @transform_6, window_bounds = array<i64: 32, 32>}, {pipeline_mode = #tpu.pipeline_mode<synchronous>, transform_indices = @transform_7, window_bounds = array<i64: 32, 1>}, {pipeline_mode = #tpu.pipeline_mode<synchronous>, transform_indices = @transform_8, window_bounds = array<i64: 32, 32>}, {pipeline_mode = #tpu.pipeline_mode<synchronous>, transform_indices = @transform_9, window_bounds = array<i64: 32, 1>}, {pipeline_mode = #tpu.pipeline_mode<synchronous>, transform_indices = @transform_10, window_bounds = array<i64: 32, 32>}, {pipeline_mode = #tpu.pipeline_mode<synchronous>, transform_indices = @transform_11, window_bounds = array<i64: 32, 1>}, {transform_indices = @transform_12, window_bounds = array<i64: 1, 32, 128>}]} {
    %c0 = arith.constant 0 : index
    %c0_0 = arith.constant 0 : index
    %0 = vector.load %arg9[%c0, %c0_0] : memref<32x1xf32, #tpu.memory_space<vmem>>, vector<32x1xf32>
    %c0_1 = arith.constant 0 : index
    %c0_2 = arith.constant 0 : index
    %1 = vector.load %arg6[%c0_1, %c0_2] : memref<32x32xf32, #tpu.memory_space<vmem>>, vector<32x32xf32>
    %c0_3 = arith.constant 0 : index
    %c0_4 = arith.constant 0 : index
    %c0_5 = arith.constant 0 : index
    %2 = vector.load %arg2[%c0_3, %c0_4, %c0_5] : memref<1x32x128xf32, #tpu.memory_space<vmem>>, vector<1x32x128xf32>
    %3 = vector.shape_cast %2 : vector<1x32x128xf32> to vector<32x128xf32>
    %cst = arith.constant dense<0.000000e+00> : vector<32x128xf32>
    %4 = tpu.matmul %1, %3, %cst {dimension_numbers = #tpu.dot_dimension_numbers<[1], [0], [0], [1], [0, 0, 1, 1], [], []>} : vector<32x32xf32>, vector<32x128xf32>, vector<32x128xf32> -> vector<32x128xf32>
    %5 = vector.broadcast %0 : vector<32x1xf32> to vector<32x128xf32>
    %6 = arith.addf %5, %4 : vector<32x128xf32>
    %c0_6 = arith.constant 0 : index
    %c0_7 = arith.constant 0 : index
    %7 = vector.load %arg7[%c0_6, %c0_7] : memref<32x32xf32, #tpu.memory_space<vmem>>, vector<32x32xf32>
    %c0_8 = arith.constant 0 : index
    %c0_9 = arith.constant 0 : index
    %c0_10 = arith.constant 0 : index
    %8 = vector.load %arg3[%c0_8, %c0_9, %c0_10] : memref<1x32x128xf32, #tpu.memory_space<vmem>>, vector<1x32x128xf32>
    %9 = vector.shape_cast %8 : vector<1x32x128xf32> to vector<32x128xf32>
    %cst_11 = arith.constant dense<0.000000e+00> : vector<32x128xf32>
    %10 = tpu.matmul %7, %9, %cst_11 {dimension_numbers = #tpu.dot_dimension_numbers<[1], [0], [0], [1], [0, 0, 1, 1], [], []>} : vector<32x32xf32>, vector<32x128xf32>, vector<32x128xf32> -> vector<32x128xf32>
    %11 = arith.addf %6, %10 : vector<32x128xf32>
    %c0_12 = arith.constant 0 : index
    %c0_13 = arith.constant 0 : index
    %12 = vector.load %arg8[%c0_12, %c0_13] : memref<32x32xf32, #tpu.memory_space<vmem>>, vector<32x32xf32>
    %c0_14 = arith.constant 0 : index
    %c0_15 = arith.constant 0 : index
    %c0_16 = arith.constant 0 : index
    %13 = vector.load %arg4[%c0_14, %c0_15, %c0_16] : memref<1x32x128xf32, #tpu.memory_space<vmem>>, vector<1x32x128xf32>
    %14 = vector.shape_cast %13 : vector<1x32x128xf32> to vector<32x128xf32>
    %cst_17 = arith.constant dense<0.000000e+00> : vector<32x128xf32>
    %15 = tpu.matmul %12, %14, %cst_17 {dimension_numbers = #tpu.dot_dimension_numbers<[1], [0], [0], [1], [0, 0, 1, 1], [], []>} : vector<32x32xf32>, vector<32x128xf32>, vector<32x128xf32> -> vector<32x128xf32>
    %16 = arith.addf %11, %15 : vector<32x128xf32>
    %17 = math.sin %16 : vector<32x128xf32>
    %c0_18 = arith.constant 0 : index
    %c0_19 = arith.constant 0 : index
    %18 = vector.load %arg10[%c0_18, %c0_19] : memref<32x32xf32, #tpu.memory_space<vmem>>, vector<32x32xf32>
    %cst_20 = arith.constant dense<0.000000e+00> : vector<32x128xf32>
    %19 = tpu.matmul %18, %17, %cst_20 {dimension_numbers = #tpu.dot_dimension_numbers<[1], [0], [0], [1], [0, 0, 1, 1], [], []>} : vector<32x32xf32>, vector<32x128xf32>, vector<32x128xf32> -> vector<32x128xf32>
    %c0_21 = arith.constant 0 : index
    %c0_22 = arith.constant 0 : index
    %20 = vector.load %arg11[%c0_21, %c0_22] : memref<32x1xf32, #tpu.memory_space<vmem>>, vector<32x1xf32>
    %21 = vector.broadcast %20 : vector<32x1xf32> to vector<32x128xf32>
    %22 = arith.addf %19, %21 : vector<32x128xf32>
    %23 = math.sin %22 : vector<32x128xf32>
    %c0_23 = arith.constant 0 : index
    %c0_24 = arith.constant 0 : index
    %24 = vector.load %arg12[%c0_23, %c0_24] : memref<32x32xf32, #tpu.memory_space<vmem>>, vector<32x32xf32>
    %cst_25 = arith.constant dense<0.000000e+00> : vector<32x128xf32>
    %25 = tpu.matmul %24, %23, %cst_25 {dimension_numbers = #tpu.dot_dimension_numbers<[1], [0], [0], [1], [0, 0, 1, 1], [], []>} : vector<32x32xf32>, vector<32x128xf32>, vector<32x128xf32> -> vector<32x128xf32>
    %c0_26 = arith.constant 0 : index
    %c0_27 = arith.constant 0 : index
    %26 = vector.load %arg13[%c0_26, %c0_27] : memref<32x1xf32, #tpu.memory_space<vmem>>, vector<32x1xf32>
    %27 = vector.broadcast %26 : vector<32x1xf32> to vector<32x128xf32>
    %28 = arith.addf %25, %27 : vector<32x128xf32>
    %c0_28 = arith.constant 0 : index
    %c0_29 = arith.constant 0 : index
    %c0_30 = arith.constant 0 : index
    %29 = vector.load %arg5[%c0_28, %c0_29, %c0_30] : memref<1x32x128xf32, #tpu.memory_space<vmem>>, vector<1x32x128xf32>
    %30 = vector.shape_cast %29 : vector<1x32x128xf32> to vector<32x128xf32>
    %31 = arith.addf %28, %30 : vector<32x128xf32>
    %c0_31 = arith.constant 0 : index
    %c0_32 = arith.constant 0 : index
    %c0_33 = arith.constant 0 : index
    %32 = vector.load %arg14[%c0_31, %c0_32, %c0_33] : memref<1x32x128xf32, #tpu.memory_space<vmem>>, vector<1x32x128xf32>
    %33 = vector.shape_cast %32 : vector<1x32x128xf32> to vector<32x128xf32>
    %34 = vector.shape_cast %31 : vector<32x128xf32> to vector<1x32x128xf32>
    tpu.vector_store %arg14[%c0_31, %c0_32, %c0_33], %34 {strides = array<i32>} : memref<1x32x128xf32, #tpu.memory_space<vmem>>, vector<1x32x128xf32>,
    return
  }
  func.func @transform_0(%arg0: i32, %arg1: i32) -> (i32, i32, i32) {
    %c0_i32 = arith.constant 0 : i32
    %c0_i32_0 = arith.constant 0 : i32
    return %arg0, %c0_i32, %arg1 : i32, i32, i32
  }
  func.func @transform_1(%arg0: i32, %arg1: i32) -> (i32, i32, i32) {
    %c0_i32 = arith.constant 0 : i32
    %c0_i32_0 = arith.constant 0 : i32
    return %arg0, %c0_i32, %arg1 : i32, i32, i32
  }
  func.func @transform_2(%arg0: i32, %arg1: i32) -> (i32, i32, i32) {
    %c0_i32 = arith.constant 0 : i32
    %c0_i32_0 = arith.constant 0 : i32
    return %arg0, %c0_i32, %arg1 : i32, i32, i32
  }
  func.func @transform_3(%arg0: i32, %arg1: i32) -> (i32, i32, i32) {
    %c0_i32 = arith.constant 0 : i32
    %c0_i32_0 = arith.constant 0 : i32
    return %arg0, %c0_i32, %arg1 : i32, i32, i32
  }
  func.func @transform_4(%arg0: i32, %arg1: i32) -> (i32, i32) {
    %c0_i32 = arith.constant 0 : i32
    %c0_i32_0 = arith.constant 0 : i32
    %c0_i32_1 = arith.constant 0 : i32
    return %c0_i32, %c0_i32_0 : i32, i32
  }
  func.func @transform_5(%arg0: i32, %arg1: i32) -> (i32, i32) {
    %c0_i32 = arith.constant 0 : i32
    %c0_i32_0 = arith.constant 0 : i32
    %c0_i32_1 = arith.constant 0 : i32
    return %c0_i32, %c0_i32_0 : i32, i32
  }
  func.func @transform_6(%arg0: i32, %arg1: i32) -> (i32, i32) {
    %c0_i32 = arith.constant 0 : i32
    %c0_i32_0 = arith.constant 0 : i32
    %c0_i32_1 = arith.constant 0 : i32
    return %c0_i32, %c0_i32_0 : i32, i32
  }
  func.func @transform_7(%arg0: i32, %arg1: i32) -> (i32, i32) {
    %c0_i32 = arith.constant 0 : i32
    %c0_i32_0 = arith.constant 0 : i32
    %c0_i32_1 = arith.constant 0 : i32
    return %c0_i32, %c0_i32_0 : i32, i32
  }
  func.func @transform_8(%arg0: i32, %arg1: i32) -> (i32, i32) {
    %c0_i32 = arith.constant 0 : i32
    %c0_i32_0 = arith.constant 0 : i32
    %c0_i32_1 = arith.constant 0 : i32
    return %c0_i32, %c0_i32_0 : i32, i32
  }
  func.func @transform_9(%arg0: i32, %arg1: i32) -> (i32, i32) {
    %c0_i32 = arith.constant 0 : i32
    %c0_i32_0 = arith.constant 0 : i32
    %c0_i32_1 = arith.constant 0 : i32
    return %c0_i32, %c0_i32_0 : i32, i32
  }
  func.func @transform_10(%arg0: i32, %arg1: i32) -> (i32, i32) {
    %c0_i32 = arith.constant 0 : i32
    %c0_i32_0 = arith.constant 0 : i32
    %c0_i32_1 = arith.constant 0 : i32
    return %c0_i32, %c0_i32_0 : i32, i32
  }
  func.func @transform_11(%arg0: i32, %arg1: i32) -> (i32, i32) {
    %c0_i32 = arith.constant 0 : i32
    %c0_i32_0 = arith.constant 0 : i32
    %c0_i32_1 = arith.constant 0 : i32
    return %c0_i32, %c0_i32_0 : i32, i32
  }
  func.func @transform_12(%arg0: i32, %arg1: i32) -> (i32, i32, i32) {
    %c0_i32 = arith.constant 0 : i32
    %c0_i32_0 = arith.constant 0 : i32
    return %arg0, %c0_i32, %arg1 : i32, i32, i32
  }
}

module attributes {stable_mosaic.version = 11 : i64} {
  func.func @kernel(%arg0: i32, %arg1: i32, %arg2: memref<1x32x128xf32, #tpu.memory_space<vmem>>, %arg3: memref<1x32x128xf32, #tpu.memory_space<vmem>>, %arg4: memref<1x32x128xf32, #tpu.memory_space<vmem>>, %arg5: memref<32x32xf32, #tpu.memory_space<vmem>>, %arg6: memref<32x32xf32, #tpu.memory_space<vmem>>, %arg7: memref<32x1xf32, #tpu.memory_space<vmem>>, %arg8: memref<32x32xf32, #tpu.memory_space<vmem>>, %arg9: memref<32x1xf32, #tpu.memory_space<vmem>>, %arg10: memref<32x32xf32, #tpu.memory_space<vmem>>, %arg11: memref<32x1xf32, #tpu.memory_space<vmem>>, %arg12: memref<1x32x128xf32, #tpu.memory_space<vmem>>) attributes {dimension_semantics = [#tpu.dimension_semantics<parallel>, #tpu.dimension_semantics<parallel>], iteration_bounds = array<i64: 2, 1>, scalar_prefetch = 0 : i64, scratch_operands = 0 : i64, tpu.core_type = #tpu.core_type<tc>, window_params = [{transform_indices = @transform_0, window_bounds = array<i64: 1, 32, 128>}, {transform_indices = @transform_1, window_bounds = array<i64: 1, 32, 128>}, {transform_indices = @transform_2, window_bounds = array<i64: 1, 32, 128>}, {pipeline_mode = #tpu.pipeline_mode<synchronous>, transform_indices = @transform_3, window_bounds = array<i64: 32, 32>}, {pipeline_mode = #tpu.pipeline_mode<synchronous>, transform_indices = @transform_4, window_bounds = array<i64: 32, 32>}, {pipeline_mode = #tpu.pipeline_mode<synchronous>, transform_indices = @transform_5, window_bounds = array<i64: 32, 1>}, {pipeline_mode = #tpu.pipeline_mode<synchronous>, transform_indices = @transform_6, window_bounds = array<i64: 32, 32>}, {pipeline_mode = #tpu.pipeline_mode<synchronous>, transform_indices = @transform_7, window_bounds = array<i64: 32, 1>}, {pipeline_mode = #tpu.pipeline_mode<synchronous>, transform_indices = @transform_8, window_bounds = array<i64: 32, 32>}, {pipeline_mode = #tpu.pipeline_mode<synchronous>, transform_indices = @transform_9, window_bounds = array<i64: 32, 1>}, {transform_indices = @transform_10, window_bounds = array<i64: 1, 32, 128>}]} {
    %c0 = arith.constant 0 : index
    %c0_0 = arith.constant 0 : index
    %0 = vector.load %arg7[%c0, %c0_0] : memref<32x1xf32, #tpu.memory_space<vmem>>, vector<32x1xf32>
    %c0_1 = arith.constant 0 : index
    %c0_2 = arith.constant 0 : index
    %1 = vector.load %arg5[%c0_1, %c0_2] : memref<32x32xf32, #tpu.memory_space<vmem>>, vector<32x32xf32>
    %c0_3 = arith.constant 0 : index
    %c0_4 = arith.constant 0 : index
    %c0_5 = arith.constant 0 : index
    %2 = vector.load %arg2[%c0_3, %c0_4, %c0_5] : memref<1x32x128xf32, #tpu.memory_space<vmem>>, vector<1x32x128xf32>
    %3 = vector.shape_cast %2 : vector<1x32x128xf32> to vector<32x128xf32>
    %cst = arith.constant dense<0.000000e+00> : vector<32x128xf32>
    %4 = tpu.matmul %1, %3, %cst {dimension_numbers = #tpu.dot_dimension_numbers<[1], [0], [0], [1], [0, 0, 1, 1], [], []>} : vector<32x32xf32>, vector<32x128xf32>, vector<32x128xf32> -> vector<32x128xf32>
    %5 = vector.broadcast %0 : vector<32x1xf32> to vector<32x128xf32>
    %6 = arith.addf %5, %4 : vector<32x128xf32>
    %c0_6 = arith.constant 0 : index
    %c0_7 = arith.constant 0 : index
    %7 = vector.load %arg6[%c0_6, %c0_7] : memref<32x32xf32, #tpu.memory_space<vmem>>, vector<32x32xf32>
    %c0_8 = arith.constant 0 : index
    %c0_9 = arith.constant 0 : index
    %c0_10 = arith.constant 0 : index
    %8 = vector.load %arg3[%c0_8, %c0_9, %c0_10] : memref<1x32x128xf32, #tpu.memory_space<vmem>>, vector<1x32x128xf32>
    %9 = vector.shape_cast %8 : vector<1x32x128xf32> to vector<32x128xf32>
    %cst_11 = arith.constant dense<0.000000e+00> : vector<32x128xf32>
    %10 = tpu.matmul %7, %9, %cst_11 {dimension_numbers = #tpu.dot_dimension_numbers<[1], [0], [0], [1], [0, 0, 1, 1], [], []>} : vector<32x32xf32>, vector<32x128xf32>, vector<32x128xf32> -> vector<32x128xf32>
    %11 = arith.addf %6, %10 : vector<32x128xf32>
    %12 = math.sin %11 : vector<32x128xf32>
    %c0_12 = arith.constant 0 : index
    %c0_13 = arith.constant 0 : index
    %13 = vector.load %arg8[%c0_12, %c0_13] : memref<32x32xf32, #tpu.memory_space<vmem>>, vector<32x32xf32>
    %cst_14 = arith.constant dense<0.000000e+00> : vector<32x128xf32>
    %14 = tpu.matmul %13, %12, %cst_14 {dimension_numbers = #tpu.dot_dimension_numbers<[1], [0], [0], [1], [0, 0, 1, 1], [], []>} : vector<32x32xf32>, vector<32x128xf32>, vector<32x128xf32> -> vector<32x128xf32>
    %c0_15 = arith.constant 0 : index
    %c0_16 = arith.constant 0 : index
    %15 = vector.load %arg9[%c0_15, %c0_16] : memref<32x1xf32, #tpu.memory_space<vmem>>, vector<32x1xf32>
    %16 = vector.broadcast %15 : vector<32x1xf32> to vector<32x128xf32>
    %17 = arith.addf %14, %16 : vector<32x128xf32>
    %18 = math.sin %17 : vector<32x128xf32>
    %c0_17 = arith.constant 0 : index
    %c0_18 = arith.constant 0 : index
    %19 = vector.load %arg10[%c0_17, %c0_18] : memref<32x32xf32, #tpu.memory_space<vmem>>, vector<32x32xf32>
    %cst_19 = arith.constant dense<0.000000e+00> : vector<32x128xf32>
    %20 = tpu.matmul %19, %18, %cst_19 {dimension_numbers = #tpu.dot_dimension_numbers<[1], [0], [0], [1], [0, 0, 1, 1], [], []>} : vector<32x32xf32>, vector<32x128xf32>, vector<32x128xf32> -> vector<32x128xf32>
    %c0_20 = arith.constant 0 : index
    %c0_21 = arith.constant 0 : index
    %21 = vector.load %arg11[%c0_20, %c0_21] : memref<32x1xf32, #tpu.memory_space<vmem>>, vector<32x1xf32>
    %22 = vector.broadcast %21 : vector<32x1xf32> to vector<32x128xf32>
    %23 = arith.addf %20, %22 : vector<32x128xf32>
    %c0_22 = arith.constant 0 : index
    %c0_23 = arith.constant 0 : index
    %c0_24 = arith.constant 0 : index
    %24 = vector.load %arg4[%c0_22, %c0_23, %c0_24] : memref<1x32x128xf32, #tpu.memory_space<vmem>>, vector<1x32x128xf32>
    %25 = vector.shape_cast %24 : vector<1x32x128xf32> to vector<32x128xf32>
    %26 = arith.addf %23, %25 : vector<32x128xf32>
    %c0_25 = arith.constant 0 : index
    %c0_26 = arith.constant 0 : index
    %c0_27 = arith.constant 0 : index
    %27 = vector.load %arg12[%c0_25, %c0_26, %c0_27] : memref<1x32x128xf32, #tpu.memory_space<vmem>>, vector<1x32x128xf32>
    %28 = vector.shape_cast %27 : vector<1x32x128xf32> to vector<32x128xf32>
    %29 = vector.shape_cast %26 : vector<32x128xf32> to vector<1x32x128xf32>
    tpu.vector_store %arg12[%c0_25, %c0_26, %c0_27], %29 {strides = array<i32>} : memref<1x32x128xf32, #tpu.memory_space<vmem>>, vector<1x32x128xf32>,
    return
  }
  func.func @transform_0(%arg0: i32, %arg1: i32) -> (i32, i32, i32) {
    %c0_i32 = arith.constant 0 : i32
    %c0_i32_0 = arith.constant 0 : i32
    return %arg0, %c0_i32, %arg1 : i32, i32, i32
  }
  func.func @transform_1(%arg0: i32, %arg1: i32) -> (i32, i32, i32) {
    %c0_i32 = arith.constant 0 : i32
    %c0_i32_0 = arith.constant 0 : i32
    return %arg0, %c0_i32, %arg1 : i32, i32, i32
  }
  func.func @transform_2(%arg0: i32, %arg1: i32) -> (i32, i32, i32) {
    %c0_i32 = arith.constant 0 : i32
    %c0_i32_0 = arith.constant 0 : i32
    return %arg0, %c0_i32, %arg1 : i32, i32, i32
  }
  func.func @transform_3(%arg0: i32, %arg1: i32) -> (i32, i32) {
    %c0_i32 = arith.constant 0 : i32
    %c0_i32_0 = arith.constant 0 : i32
    %c0_i32_1 = arith.constant 0 : i32
    return %c0_i32, %c0_i32_0 : i32, i32
  }
  func.func @transform_4(%arg0: i32, %arg1: i32) -> (i32, i32) {
    %c0_i32 = arith.constant 0 : i32
    %c0_i32_0 = arith.constant 0 : i32
    %c0_i32_1 = arith.constant 0 : i32
    return %c0_i32, %c0_i32_0 : i32, i32
  }
  func.func @transform_5(%arg0: i32, %arg1: i32) -> (i32, i32) {
    %c0_i32 = arith.constant 0 : i32
    %c0_i32_0 = arith.constant 0 : i32
    %c0_i32_1 = arith.constant 0 : i32
    return %c0_i32, %c0_i32_0 : i32, i32
  }
  func.func @transform_6(%arg0: i32, %arg1: i32) -> (i32, i32) {
    %c0_i32 = arith.constant 0 : i32
    %c0_i32_0 = arith.constant 0 : i32
    %c0_i32_1 = arith.constant 0 : i32
    return %c0_i32, %c0_i32_0 : i32, i32
  }
  func.func @transform_7(%arg0: i32, %arg1: i32) -> (i32, i32) {
    %c0_i32 = arith.constant 0 : i32
    %c0_i32_0 = arith.constant 0 : i32
    %c0_i32_1 = arith.constant 0 : i32
    return %c0_i32, %c0_i32_0 : i32, i32
  }
  func.func @transform_8(%arg0: i32, %arg1: i32) -> (i32, i32) {
    %c0_i32 = arith.constant 0 : i32
    %c0_i32_0 = arith.constant 0 : i32
    %c0_i32_1 = arith.constant 0 : i32
    return %c0_i32, %c0_i32_0 : i32, i32
  }
  func.func @transform_9(%arg0: i32, %arg1: i32) -> (i32, i32) {
    %c0_i32 = arith.constant 0 : i32
    %c0_i32_0 = arith.constant 0 : i32
    %c0_i32_1 = arith.constant 0 : i32
    return %c0_i32, %c0_i32_0 : i32, i32
  }
  func.func @transform_10(%arg0: i32, %arg1: i32) -> (i32, i32, i32) {
    %c0_i32 = arith.constant 0 : i32
    %c0_i32_0 = arith.constant 0 : i32
    return %arg0, %c0_i32, %arg1 : i32, i32, i32
  }
}

module attributes {stable_mosaic.version = 11 : i64} {
  func.func @kernel(%arg0: i32, %arg1: i32, %arg2: memref<1x32x128xf32, #tpu.memory_space<vmem>>, %arg3: memref<32x32xf32, #tpu.memory_space<vmem>>, %arg4: memref<32x1xf32, #tpu.memory_space<vmem>>, %arg5: memref<32x32xf32, #tpu.memory_space<vmem>>, %arg6: memref<32x1xf32, #tpu.memory_space<vmem>>, %arg7: memref<3x32xf32, #tpu.memory_space<vmem>>, %arg8: memref<3x1xf32, #tpu.memory_space<vmem>>, %arg9: memref<1x3x128xf32, #tpu.memory_space<vmem>>) attributes {dimension_semantics = [#tpu.dimension_semantics<parallel>, #tpu.dimension_semantics<parallel>], iteration_bounds = array<i64: 2, 1>, scalar_prefetch = 0 : i64, scratch_operands = 0 : i64, tpu.core_type = #tpu.core_type<tc>, window_params = [{transform_indices = @transform_0, window_bounds = array<i64: 1, 32, 128>}, {pipeline_mode = #tpu.pipeline_mode<synchronous>, transform_indices = @transform_1, window_bounds = array<i64: 32, 32>}, {pipeline_mode = #tpu.pipeline_mode<synchronous>, transform_indices = @transform_2, window_bounds = array<i64: 32, 1>}, {pipeline_mode = #tpu.pipeline_mode<synchronous>, transform_indices = @transform_3, window_bounds = array<i64: 32, 32>}, {pipeline_mode = #tpu.pipeline_mode<synchronous>, transform_indices = @transform_4, window_bounds = array<i64: 32, 1>}, {pipeline_mode = #tpu.pipeline_mode<synchronous>, transform_indices = @transform_5, window_bounds = array<i64: 3, 32>}, {pipeline_mode = #tpu.pipeline_mode<synchronous>, transform_indices = @transform_6, window_bounds = array<i64: 3, 1>}, {transform_indices = @transform_7, window_bounds = array<i64: 1, 3, 128>}]} {
    %c0 = arith.constant 0 : index
    %c0_0 = arith.constant 0 : index
    %0 = vector.load %arg4[%c0, %c0_0] : memref<32x1xf32, #tpu.memory_space<vmem>>, vector<32x1xf32>
    %c0_1 = arith.constant 0 : index
    %c0_2 = arith.constant 0 : index
    %1 = vector.load %arg3[%c0_1, %c0_2] : memref<32x32xf32, #tpu.memory_space<vmem>>, vector<32x32xf32>
    %c0_3 = arith.constant 0 : index
    %c0_4 = arith.constant 0 : index
    %c0_5 = arith.constant 0 : index
    %2 = vector.load %arg2[%c0_3, %c0_4, %c0_5] : memref<1x32x128xf32, #tpu.memory_space<vmem>>, vector<1x32x128xf32>
    %3 = vector.shape_cast %2 : vector<1x32x128xf32> to vector<32x128xf32>
    %cst = arith.constant dense<0.000000e+00> : vector<32x128xf32>
    %4 = tpu.matmul %1, %3, %cst {dimension_numbers = #tpu.dot_dimension_numbers<[1], [0], [0], [1], [0, 0, 1, 1], [], []>} : vector<32x32xf32>, vector<32x128xf32>, vector<32x128xf32> -> vector<32x128xf32>
    %5 = vector.broadcast %0 : vector<32x1xf32> to vector<32x128xf32>
    %6 = arith.addf %5, %4 : vector<32x128xf32>
    %7 = math.sin %6 : vector<32x128xf32>
    %c0_6 = arith.constant 0 : index
    %c0_7 = arith.constant 0 : index
    %8 = vector.load %arg5[%c0_6, %c0_7] : memref<32x32xf32, #tpu.memory_space<vmem>>, vector<32x32xf32>
    %cst_8 = arith.constant dense<0.000000e+00> : vector<32x128xf32>
    %9 = tpu.matmul %8, %7, %cst_8 {dimension_numbers = #tpu.dot_dimension_numbers<[1], [0], [0], [1], [0, 0, 1, 1], [], []>} : vector<32x32xf32>, vector<32x128xf32>, vector<32x128xf32> -> vector<32x128xf32>
    %c0_9 = arith.constant 0 : index
    %c0_10 = arith.constant 0 : index
    %10 = vector.load %arg6[%c0_9, %c0_10] : memref<32x1xf32, #tpu.memory_space<vmem>>, vector<32x1xf32>
    %11 = vector.broadcast %10 : vector<32x1xf32> to vector<32x128xf32>
    %12 = arith.addf %9, %11 : vector<32x128xf32>
    %13 = math.sin %12 : vector<32x128xf32>
    %c0_11 = arith.constant 0 : index
    %c0_12 = arith.constant 0 : index
    %14 = vector.load %arg7[%c0_11, %c0_12] : memref<3x32xf32, #tpu.memory_space<vmem>>, vector<3x32xf32>
    %cst_13 = arith.constant dense<0.000000e+00> : vector<3x128xf32>
    %15 = tpu.matmul %14, %13, %cst_13 {dimension_numbers = #tpu.dot_dimension_numbers<[1], [0], [0], [1], [0, 0, 1, 1], [], []>} : vector<3x32xf32>, vector<32x128xf32>, vector<3x128xf32> -> vector<3x128xf32>
    %c0_14 = arith.constant 0 : index
    %c0_15 = arith.constant 0 : index
    %16 = vector.load %arg8[%c0_14, %c0_15] : memref<3x1xf32, #tpu.memory_space<vmem>>, vector<3x1xf32>
    %17 = vector.broadcast %16 : vector<3x1xf32> to vector<3x128xf32>
    %18 = arith.addf %15, %17 : vector<3x128xf32>
    %c0_16 = arith.constant 0 : index
    %c0_17 = arith.constant 0 : index
    %c0_18 = arith.constant 0 : index
    %19 = vector.load %arg9[%c0_16, %c0_17, %c0_18] : memref<1x3x128xf32, #tpu.memory_space<vmem>>, vector<1x3x128xf32>
    %20 = vector.shape_cast %19 : vector<1x3x128xf32> to vector<3x128xf32>
    %21 = vector.shape_cast %18 : vector<3x128xf32> to vector<1x3x128xf32>
    tpu.vector_store %arg9[%c0_16, %c0_17, %c0_18], %21 {strides = array<i32>} : memref<1x3x128xf32, #tpu.memory_space<vmem>>, vector<1x3x128xf32>,
    return
  }
  func.func @transform_0(%arg0: i32, %arg1: i32) -> (i32, i32, i32) {
    %c0_i32 = arith.constant 0 : i32
    %c0_i32_0 = arith.constant 0 : i32
    return %arg0, %c0_i32, %arg1 : i32, i32, i32
  }
  func.func @transform_1(%arg0: i32, %arg1: i32) -> (i32, i32) {
    %c0_i32 = arith.constant 0 : i32
    %c0_i32_0 = arith.constant 0 : i32
    %c0_i32_1 = arith.constant 0 : i32
    return %c0_i32, %c0_i32_0 : i32, i32
  }
  func.func @transform_2(%arg0: i32, %arg1: i32) -> (i32, i32) {
    %c0_i32 = arith.constant 0 : i32
    %c0_i32_0 = arith.constant 0 : i32
    %c0_i32_1 = arith.constant 0 : i32
    return %c0_i32, %c0_i32_0 : i32, i32
  }
  func.func @transform_3(%arg0: i32, %arg1: i32) -> (i32, i32) {
    %c0_i32 = arith.constant 0 : i32
    %c0_i32_0 = arith.constant 0 : i32
    %c0_i32_1 = arith.constant 0 : i32
    return %c0_i32, %c0_i32_0 : i32, i32
  }
  func.func @transform_4(%arg0: i32, %arg1: i32) -> (i32, i32) {
    %c0_i32 = arith.constant 0 : i32
    %c0_i32_0 = arith.constant 0 : i32
    %c0_i32_1 = arith.constant 0 : i32
    return %c0_i32, %c0_i32_0 : i32, i32
  }
  func.func @transform_5(%arg0: i32, %arg1: i32) -> (i32, i32) {
    %c0_i32 = arith.constant 0 : i32
    %c0_i32_0 = arith.constant 0 : i32
    %c0_i32_1 = arith.constant 0 : i32
    return %c0_i32, %c0_i32_0 : i32, i32
  }
  func.func @transform_6(%arg0: i32, %arg1: i32) -> (i32, i32) {
    %c0_i32 = arith.constant 0 : i32
    %c0_i32_0 = arith.constant 0 : i32
    %c0_i32_1 = arith.constant 0 : i32
    return %c0_i32, %c0_i32_0 : i32, i32
  }
  func.func @transform_7(%arg0: i32, %arg1: i32) -> (i32, i32, i32) {
    %c0_i32 = arith.constant 0 : i32
    %c0_i32_0 = arith.constant 0 : i32
    return %arg0, %c0_i32, %arg1 : i32, i32, i32
  }
}

</mosaic_0001>

<bundles_post_ra>
// kernel: _lambda_.7
= control target key start
LH: loop header
LB: loop body
LE: loop exit
PB: predicated region body
PF: predicated region fallthrough
CT: control target
= control target key end

     0   :  { %s2010_s24 = smov 0   ;;  %s2012_s25 = smov 0   ;;  %s3054_s0 = inlined_call_operand.vmem [shape: f32[2,4,128], index: 0, kind: input, shape index: {}]   ;;  %s3055_s1 = inlined_call_operand.vmem [shape: f32[32,4], index: 1, kind: input, shape index: {}]   ;;  %s3056_s2 = inlined_call_operand.vmem [shape: f32[32,1], index: 2, kind: input, shape index: {}]   ;;  %s3057_s3 = inlined_call_operand.vmem [shape: f32[32,32], index: 3, kind: input, shape index: {}]   ;;  %s3058_s4 = inlined_call_operand.vmem [shape: f32[32,1], index: 4, kind: input, shape index: {}]   ;;  %s3059_s5 = inlined_call_operand.vmem [shape: f32[32,32], index: 5, kind: input, shape index: {}]   ;;  %s3060_s6 = inlined_call_operand.vmem [shape: f32[32,1], index: 6, kind: input, shape index: {}]   ;;  %s3061_s7 = inlined_call_operand.vmem [shape: f32[2,32,128], index: 7, kind: output, shape index: {}]  }
   0x1   :  { %s2014_s26 = smov 0  }
   0x2 LB: > { %s29_s27 = sadd.s32 1, %s1957_s25  ;;  %p1853_p0 = scmp.ge.s32.totalorder %s1961_s26, 1  ;;  %s1961_s26 = sphi %s2014_s26, %s17_s26   ;;  %s1957_s25 = sphi %s2012_s25, %s3087_s25   ;;  %s1953_s24 = sphi %s2010_s24, %s3086_s24  }
   0x3   : > { %p31_p1 = scmp.ge.s32.totalorder %s29_s27, 2  ;;  %p255_p2 = scmp.lt.s32.totalorder %s1961_s26, 3 }
   0x5   : > { %s3089_s27 = smov (%p31_p1, %s29_s27), 0  ;;  %p256_p3 = pnand %p1853_p0, %p255_p2 }
   0x6   : > { %p292_p4 = scmp.lt.s32.totalorder (!%p256_p3), %s1953_s24, 1 }
   0x7   : > { %259 = sbr.rel (%p256_p3) target bundleno = 837 (0x345), region = 48 }
   0xc   : > { %v308_v0 = vld [vmem:[%s3056_s2 + $0x8] sm:$0xff]  ;;  %v1963_v1 = vmov 0   ;;  %v310_v2 = vld [vmem:[%s3056_s2 + $0x18] sm:$0xff]  ;;  %s3091_s24 = smov (!%p292_p4, %s1953_s24), 1  ;;  %vm329_vm0 = vcmask 1043456   ;;  %v311_v3 = vld [vmem:[%s3055_s1] sm:$0xff] }
   0xd   : > { %1937 = vset.pattern.permute.xlu1 %v1963_v1  ;;  %1936 = vset.pattern.permute.xlu0 %v1963_v1  ;;  %s1854_s9 = sshll.u32 %s3091_s24, 2  ;;  %vm316_vm1 = vcmask 31744   ;;  %v307_v5 = vld [vmem:[%s3056_s2] sm:$0xff]  ;;  %v309_v6 = vld [vmem:[%s3056_s2 + $0x10] sm:$0xff]  ;;  %v312_v7 = vld [vmem:[%s3055_s1 + $0x8] sm:$0xff]  ;;  %s1896_s19 = sshll.u32 %s3091_s24, 5 }
   0xe   : > { %369 = vperm.xlu1 %1937, %v308_v0   ;;  %379 = vperm.xlu0 %1936, %v310_v2   ;;  %s298_s12 = scalar_lea.vmem %s3054_s0, %s1854_s9  ;;  %v1011_v8 = vld [vmem:[%s3058_s4 + $0x8] sm:$0xff]  ;;  %v1010_v9 = vld [vmem:[%s3058_s4] sm:$0xff]  ;;  %v313_v10 = vld [vmem:[%s3055_s1 + $0x10] sm:$0xff]  ;;  %v1964_v51 = vmov 2102212464   ;;  %s306_s22 = scalar_lea.vmem %s3061_s7, %s1896_s19 }
   0xf   : > { %1938 = vset.pattern.permute.xlu2 %v1963_v1  ;;  %v315_v4 = vld [vmem:[%s298_s12] sm:$0xf]  ;;  %v1701_v11 = vld [vmem:[%s3060_s6 + $0x8] sm:$0xff]  ;;  %v1702_v12 = vld [vmem:[%s3060_s6 + $0x10] sm:$0xff]  ;;  %v3065_v55 = vmov 920167782  }
  0x10   : > { %1857 = vmatpush.msk.msra.mxu0 %vm329_vm0, %v315_v4  ;;  %v314_v13 = vld [vmem:[%s3055_s1 + $0x18] sm:$0xff]  ;;  %v1966_v2 = vmov 1326507024  }
  0x11   : > { %1858 = vmatmul.msk.f32.vlgmr.msra.gmra.mxu0 %vm316_vm1, %v311_v3 }
  0x16   : > { %364 = vperm.xlu1 %1937, %v307_v5   ;;  %374 = vperm.xlu0 %1936, %v309_v6   ;;  %v1967_v5 = vmov 683565275  }
  0x19   : > { %1859 = vmatmul.msk.f32.gmra.mxu0 %vm316_vm1, %v312_v7 }
  0x1e   : > { %1021 = vperm.xlu0 %1936, %v1011_v8   ;;  %1016 = vperm.xlu1 %1937, %v1010_v9  }
  0x21   : > { %1860 = vmatmul.msk.f32.gmra.mxu0 %vm316_vm1, %v313_v10  ;;  %v1968_v10 = vmov 2475754826  }
  0x26   : > { %1711 = vperm.xlu0 %1936, %v1701_v11   ;;  %1716 = vperm.xlu1 %1937, %v1702_v12  }
  0x29   : > { %1861 = vmatmul.msk.f32.gmra.mxu0 %vm316_vm1, %v314_v13 }
  0x80   : > { %v370_v14 = vpop.permute.xlu1 %369  ;;  %v380_v20 = vpop.permute.xlu0 %379 }
  0x88   : > { %v365_v15 = vpop.permute.xlu1 %364  ;;  %v375_v27 = vpop.permute.xlu0 %374 }
  0x8e   : > { %v350_v16 = vpop.f32.mrf.mxu0 }
  0x8f   : > { %v2077_v17 = vadd.f32 %v365_v15, %v350_v16 }
  0x91   : > { %v389_v18 = vand.u32 2139095040, %v2077_v17 }
  0x93   : > { %v390_v19 = vshrl.u32 %v389_v18, 23 }
  0x95   : > { %v1862_v21 = vadd.s32 4294967169, %v390_v19 }
  0x96   : > { %v353_v22 = vpop.f32.mrf.mxu0 }
  0x97   : > { %v2080_v23 = vadd.f32 %v370_v14, %v353_v22  ;;  %v396_v24 = vadd.s32 1, %v1862_v21 }
  0x99   : > { %v544_v25 = vand.u32 2139095040, %v2080_v23  ;;  %vm397_vm2 = vcmp.gt.s32.totalorder %v396_v24, 0  ;;  %v3062_v34 = vand.u32 2147483647, %v2080_v23 }
  0x9a   : > { %v398_v31 = vsel %vm397_vm2, %v396_v24, 0 }
  0x9b   : > { %v545_v26 = vshrl.u32 %v544_v25, 23  ;;  %v2087_v35 = vand.u32 31, %v398_v31  ;;  %v2094_v42 = vand.u32 8388607, %v3062_v34  ;;  %v2110_v50 = vshrl.u32 %v398_v31, 5 }
  0x9d   : > { %v1865_v28 = vadd.s32 4294967169, %v545_v26  ;;  %v2097_v43 = vsub.s32 32, %v2087_v35  ;;  %v2114_v52 = vshll.u32 %v1964_v51, %v2087_v35 }
  0x9e   : > { %v356_v29 = vpop.f32.mrf.mxu0 }
  0x9f   : > { %v2083_v30 = vadd.f32 %v375_v27, %v356_v29  ;;  %v551_v32 = vadd.s32 1, %v1865_v28  ;;  %v2119_v56 = vshrl.u32 %v3065_v55, %v2097_v43 }
  0xa1   : > { %v699_v33 = vand.u32 2139095040, %v2083_v30  ;;  %vm552_vm3 = vcmp.gt.s32.totalorder %v551_v32, 0  ;;  %v3063_v38 = vand.u32 2147483647, %v2083_v30 }
  0xa2   : > { %v553_v36 = vsel %vm552_vm3, %v551_v32, 0 }
  0xa3   : > { %v700_v37 = vshrl.u32 %v699_v33, 23  ;;  %v2090_v39 = vand.u32 31, %v553_v36  ;;  %v2103_v46 = vand.u32 8388607, %v3063_v38  ;;  %v2121_v57 = vshrl.u32 %v553_v36, 5 }
  0xa5   : > { %v1868_v40 = vadd.s32 4294967169, %v700_v37  ;;  %v2106_v47 = vsub.s32 32, %v2090_v39  ;;  %v567_v60 = vshll.u32 %v1964_v51, %v2090_v39  ;;  %v2127_v61 = vshll.u32 %v3065_v55, %v2090_v39 }
  0xa6   : > { %v359_v41 = vpop.f32.mrf.mxu0  ;;  %v704_v63 = vor.u32 8388608, %v2103_v46  ;;  %v558_v6 = vshll.u32 %v1967_v5, %v2090_v39  ;;  %vm576_vm3 = vcmp.lt.s32.totalorder %v2121_v57, 4 }
  0xa7   : > { %v706_v44 = vadd.s32 1, %v1868_v40  ;;  %v2099_v45 = vadd.f32 %v380_v20, %v359_v41  ;;  %v568_v0 = vshrl.u32 %v3065_v55, %v2106_v47  ;;  %v2136_v3 = vshrl.u32 %v1966_v2, %v2106_v47 }
  0xa8   : > { %v559_v11 = vshrl.u32 %v1968_v10, %v2106_v47  ;;  %v1969_v20 = vmov 2131351028  }
  0xa9   : > { %vm707_vm4 = vcmp.gt.s32.totalorder %v706_v44, 0  ;;  %v854_v48 = vand.u32 2139095040, %v2099_v45  ;;  %v3064_v49 = vand.u32 2147483647, %v2099_v45  ;;  %v2156_v27 = vor.u32 %v568_v0, %v567_v60 }
  0xaa   : > { %v708_v53 = vsel %vm707_vm4, %v706_v44, 0  ;;  %v572_v28 = vor.u32 %v2136_v3, %v2127_v61  ;;  %v2165_v36 = vor.u32 %v559_v11, %v558_v6 }
  0xab   : > { %v710_v58 = vand.u32 31, %v708_v53  ;;  %v855_v59 = vshrl.u32 %v854_v48, 23  ;;  %v858_v62 = vand.u32 8388607, %v3064_v49  ;;  %v2147_v16 = vshrl.u32 %v708_v53, 5 }
  0xad   : > { %v711_v4 = vsub.s32 32, %v710_v58  ;;  %v722_v7 = vshll.u32 %v1964_v51, %v710_v58  ;;  %v1871_v8 = vadd.s32 4294967169, %v855_v59  ;;  %v859_v9 = vor.u32 8388608, %v858_v62 }
  0xae   : > { %v725_v13 = vshll.u32 %v3065_v55, %v710_v58  ;;  %v713_v19 = vshll.u32 %v1967_v5, %v710_v58  ;;  %v716_v26 = vshll.u32 %v1968_v10, %v710_v58  ;;  %vm731_vm6 = vcmp.lt.s32.totalorder %v2147_v16, 4 }
  0xaf   : > { %v723_v12 = vshrl.u32 %v3065_v55, %v711_v4  ;;  %v726_v14 = vshrl.u32 %v1966_v2, %v711_v4  ;;  %v714_v15 = vshrl.u32 %v1968_v10, %v711_v4  ;;  %v861_v18 = vadd.s32 1, %v1871_v8 }
  0xb0   : > { %v717_v21 = vshrl.u32 %v1969_v20, %v711_v4  ;;  %v2153_v25 = vshll.u32 %v859_v9, 8  ;;  %v720_v29 = vshrl.u32 %v1964_v51, %v711_v4  ;;  %v2169_v40 = vshrl.u32 %v1967_v5, %v711_v4 }
  0xb1   : > { %v2151_v22 = vor.u32 %v723_v12, %v722_v7  ;;  %v727_v24 = vor.u32 %v726_v14, %v725_v13  ;;  %vm862_vm5 = vcmp.gt.s32.totalorder %v861_v18, 0  ;;  %v2161_v32 = vor.u32 %v714_v15, %v713_v19 }
  0xb2   : > { %v863_v31 = vsel %vm862_vm5, %v861_v18, 0  ;;  %v2163_v33 = vor.u32 %v717_v21, %v716_v26  ;;  %v719_v41 = vshll.u32 %v1969_v20, %v710_v58  ;;  %v900_v53 = vand.u32 65535, %v2153_v25 }
  0xb3   : > { %v865_v37 = vand.u32 31, %v863_v31  ;;  %v737_v44 = vsel %vm731_vm6, %v2151_v22, 920167782  ;;  %v741_v48 = vsel %vm731_vm6, %v727_v24, 1326507024  ;;  %v901_v59 = vshrl.u32 %v2153_v25, 16 }
  0xb4   : > { %v864_v60 = vshrl.u32 %v863_v31, 5  ;;  %v721_v0 = vor.u32 %v720_v29, %v719_v41  ;;  %vm728_vm7 = vcmp.lt.s32.totalorder %v2147_v16, 1  ;;  %vm730_vm8 = vcmp.lt.s32.totalorder %v2147_v16, 3 }
  0xb5   : > { %v866_v62 = vsub.s32 32, %v865_v37  ;;  %v877_v4 = vshll.u32 %v1964_v51, %v865_v37  ;;  %v880_v58 = vshll.u32 %v3065_v55, %v865_v37  ;;  %v736_v6 = vsel %vm728_vm7, %v2161_v32, %v2163_v33 }
  0xb6   : > { %v868_v9 = vshll.u32 %v1967_v5, %v865_v37  ;;  %v871_v12 = vshll.u32 %v1968_v10, %v865_v37  ;;  %v874_v14 = vshll.u32 %v1969_v20, %v865_v37  ;;  %vm886_vm9 = vcmp.lt.s32.totalorder %v864_v60, 4 }
  0xb7   : > { %v878_v7 = vshrl.u32 %v3065_v55, %v866_v62  ;;  %v881_v8 = vshrl.u32 %v1966_v2, %v866_v62  ;;  %v869_v11 = vshrl.u32 %v1968_v10, %v866_v62  ;;  %v872_v13 = vshrl.u32 %v1969_v20, %v866_v62 }
  0xb8   : > { %v875_v15 = vshrl.u32 %v1964_v51, %v866_v62  ;;  %v867_v24 = vshrl.u32 %v1967_v5, %v866_v62  ;;  %vm883_vm10 = vcmp.lt.s32.totalorder %v864_v60, 1  ;;  %vm884_vm11 = vcmp.lt.s32.totalorder %v864_v60, 2 }
  0xb9   : > { %v879_v18 = vor.u32 %v878_v7, %v877_v4  ;;  %v882_v19 = vor.u32 %v881_v8, %v880_v58  ;;  %v870_v21 = vor.u32 %v869_v11, %v868_v9  ;;  %v873_v26 = vor.u32 %v872_v13, %v871_v12 }
  0xba   : > { %v876_v29 = vor.u32 %v875_v15, %v874_v14  ;;  %vm885_vm12 = vcmp.lt.s32.totalorder %v864_v60, 3  ;;  %v738_v58 = vsel %vm730_vm8, %v721_v0, %v737_v44  ;;  %vm729_vm13 = vcmp.lt.s32.totalorder %v2147_v16, 2 }
  0xbb   : > { %v892_v31 = vsel %vm886_vm9, %v879_v18, 920167782  ;;  %v896_v41 = vsel %vm886_vm9, %v882_v19, 1326507024  ;;  %v891_v38 = vsel %vm883_vm10, %v870_v21, %v873_v26  ;;  %v887_v37 = vsel %vm883_vm10, %v867_v24, %v870_v21 }
  0xbc   : > { %v888_v34 = vsel %vm886_vm9, %v876_v29, 2102212464  ;;  %v893_v49 = vsel %vm885_vm12, %v876_v29, %v892_v31  ;;  %v895_v55 = vsel %vm883_vm10, %v873_v26, %v876_v29  ;;  %v897_v4 = vsel %vm885_vm12, %v879_v18, %v896_v41 }
  0xbd   : > { %v894_v54 = vsel %vm884_vm11, %v891_v38, %v893_v49  ;;  %v889_v7 = vsel %vm885_vm12, %v873_v26, %v888_v34  ;;  %v898_v62 = vsel %vm884_vm11, %v895_v55, %v897_v4  ;;  %v2203_v13 = vsel %vm731_vm6, %v721_v0, 2102212464 }
  0xbe   : > { %v924_v8 = vand.u32 65535, %v894_v54  ;;  %v925_v9 = vshrl.u32 %v894_v54, 16  ;;  %v902_v11 = vand.u32 65535, %v898_v62  ;;  %v903_v12 = vshrl.u32 %v898_v62, 16 }
  0xbf   : > { %v2207_v38 = vsel %vm729_vm13, %v736_v6, %v738_v58  ;;  %v740_v34 = vsel %vm728_vm7, %v2163_v33, %v721_v0  ;;  %v2213_v49 = vsel %vm884_vm11, %v887_v37, %v889_v7  ;;  %v742_v44 = vsel %vm730_vm8, %v2151_v22, %v741_v48 }
  0xc0   : > { %v927_v14 = vmul.u32 %v925_v9, %v900_v53  ;;  %v928_v15 = vmul.u32 %v924_v8, %v901_v59  ;;  %v905_v54 = vmul.u32 %v903_v12, %v900_v53  ;;  %v906_v55 = vmul.u32 %v902_v11, %v901_v59 }
  0xc1   : > { %v904_v18 = vmul.u32 %v902_v11, %v900_v53  ;;  %v926_v19 = vmul.u32 %v924_v8, %v900_v53  ;;  %v929_v21 = vmul.u32 %v925_v9, %v901_v59  ;;  %v907_v26 = vmul.u32 %v903_v12, %v901_v59 }
  0xc2   : > { %v930_v24 = vshll.u32 %v927_v14, 16  ;;  %v908_v6 = vshll.u32 %v905_v54, 16  ;;  %v931_v29 = vshrl.u32 %v927_v14, 16  ;;  %v932_v31 = vshll.u32 %v928_v15, 16 }
  0xc3   : > { %v743_v60 = vsel %vm729_vm13, %v740_v34, %v742_v44  ;;  %v2222_v0 = vshll.u32 %v704_v63, 8  ;;  %v910_v37 = vshll.u32 %v906_v55, 16  ;;  %v909_v11 = vshrl.u32 %v905_v54, 16 }
  0xc4   : > { %vm934_vm14 = vc.u32 %v926_v19, %v930_v24  ;;  %v936_v41 = vadd.s32 %v930_v24, %v926_v19  ;;  %vm912_vm15 = vc.u32 %v904_v18, %v908_v6  ;;  %v914_v22 = vadd.s32 %v908_v6, %v904_v18 }
  0xc5   : > { %v935_v48 = vsel %vm934_vm14, 1, %v1963_v1  ;;  %v913_v53 = vsel %vm912_vm15, 1, %v1963_v1  ;;  %v747_v4 = vand.u32 65535, %v743_v60  ;;  %v745_v62 = vand.u32 65535, %v2222_v0 }
  0xc6   : > { %v937_v59 = vadd.s32 %v935_v48, %v929_v21  ;;  %vm938_vm0 = vc.u32 %v936_v41, %v932_v31  ;;  %v915_v58 = vadd.s32 %v913_v53, %v907_v26  ;;  %vm916_vm1 = vc.u32 %v914_v22, %v910_v37 }
  0xc7   : > { %v939_v7 = vsel %vm938_vm0, 1, %v1963_v1  ;;  %v917_v46 = vsel %vm916_vm1, 1, %v1963_v1  ;;  %v746_v8 = vshrl.u32 %v2222_v0, 16  ;;  %v748_v9 = vshrl.u32 %v743_v60, 16 }
  0xc8   : > { %v941_v63 = vadd.s32 %v939_v7, %v937_v59  ;;  %v919_v12 = vadd.s32 %v917_v46, %v915_v58  ;;  %v769_v14 = vand.u32 65535, %v2207_v38  ;;  %v770_v34 = vshrl.u32 %v2207_v38, 16 }
  0xc9   : > { %v933_v44 = vshrl.u32 %v928_v15, 16  ;;  %v750_v19 = vmul.u32 %v748_v9, %v745_v62  ;;  %v751_v21 = vmul.u32 %v747_v4, %v746_v8  ;;  %v911_v24 = vshrl.u32 %v906_v55, 16 }
  0xca   : > { %v942_v18 = vadd.s32 %v941_v63, %v931_v29  ;;  %v920_v26 = vadd.s32 %v919_v12, %v909_v11  ;;  %v944_v6 = vmul.u32 %v2153_v25, %v2213_v49  ;;  %v772_v37 = vmul.u32 %v770_v34, %v745_v62 }
  0xcb   : > { %v749_v48 = vmul.u32 %v747_v4, %v745_v62  ;;  %v753_v53 = vshll.u32 %v750_v19, 16  ;;  %v773_v60 = vmul.u32 %v769_v14, %v746_v8  ;;  %v2236_v59 = vadd.s32 %v936_v41, %v932_v31 }
  0xcc   : > { %v943_v22 = vadd.s32 %v942_v18, %v933_v44  ;;  %v2234_v54 = vadd.s32 %v920_v26, %v911_v24  ;;  %v752_v58 = vmul.u32 %v748_v9, %v746_v8  ;;  %v775_v38 = vshll.u32 %v772_v37, 16 }
  0xcd   : > { %v755_v29 = vshll.u32 %v751_v21, 16  ;;  %vm757_vm2 = vc.u32 %v749_v48, %v753_v53  ;;  %v759_v7 = vadd.s32 %v753_v53, %v749_v48  ;;  %v771_v49 = vmul.u32 %v769_v14, %v745_v62 }
  0xce   : > { %v947_v15 = vadd.s32 1, %v943_v22  ;;  %vm946_vm4 = vc.u32 %v2234_v54, %v2236_v59  ;;  %v758_v25 = vsel %vm757_vm2, 1, %v1963_v1  ;;  %v774_v55 = vmul.u32 %v770_v34, %v746_v8 }
  0xcf   : > { %v760_v46 = vadd.s32 %v758_v25, %v752_v58  ;;  %vm761_vm5 = vc.u32 %v759_v7, %v755_v29  ;;  %v777_v31 = vshll.u32 %v773_v60, 16  ;;  %vm779_vm6 = vc.u32 %v771_v49, %v775_v38 }
  0xd0   : > { %v948_v4 = vsel %vm946_vm4, %v947_v15, %v943_v22  ;;  %v762_v63 = vsel %vm761_vm5, 1, %v1963_v1  ;;  %v781_v9 = vadd.s32 %v775_v38, %v771_v49  ;;  %v754_v11 = vshrl.u32 %v750_v19, 16 }
  0xd1   : > { %v949_v41 = vadd.s32 %v948_v4, %v944_v6  ;;  %v756_v12 = vshrl.u32 %v751_v21, 16  ;;  %v764_v44 = vadd.s32 %v762_v63, %v760_v46  ;;  %v780_v18 = vsel %vm779_vm6, 1, %v1963_v1 }
  0xd2   : > { %v776_v26 = vshrl.u32 %v772_v37, 16  ;;  %v782_v48 = vadd.s32 %v780_v18, %v774_v55  ;;  %vm783_vm9 = vc.u32 %v781_v9, %v777_v31  ;;  %v561_v14 = vshll.u32 %v1968_v10, %v2090_v39 }
  0xd3   : > { %v950_v24 = vadd.s32 536870912, %v949_v41  ;;  %v765_v62 = vadd.s32 %v764_v44, %v754_v11  ;;  %v784_v8 = vsel %vm783_vm9, 1, %v1963_v1  ;;  %v562_v34 = vshrl.u32 %v1969_v20, %v2106_v47 }
  0xd4   : > { %v786_v19 = vadd.s32 %v784_v8, %v782_v48  ;;  %v564_v21 = vshll.u32 %v1969_v20, %v2090_v39  ;;  %v565_v37 = vshrl.u32 %v1964_v51, %v2106_v47  ;;  %v732_v22 = vsel %vm728_vm7, %v2169_v40, %v2161_v32 }
  0xd5   : > { %v2249_v6 = vshrl.u32 %v950_v24, 30  ;;  %v734_v53 = vsel %vm730_vm8, %v2163_v33, %v2203_v13  ;;  %v766_v58 = vadd.s32 %v765_v62, %v756_v12  ;;  %v2263_v38 = vor.u32 %v562_v34, %v561_v14 }
  0xd6   : > { %v778_v29 = vshrl.u32 %v773_v60, 16  ;;  %v787_v39 = vadd.s32 %v786_v19, %v776_v26  ;;  %v2266_v7 = vor.u32 %v565_v37, %v564_v21  ;;  %v2270_v25 = vshrl.u32 %v1966_v2, %v2097_v43 }
  0xd7   : > { %v952_v15 = vshll.u32 %v2249_v6, 30  ;;  %v582_v32 = vsel %vm576_vm3, %v2156_v27, 920167782  ;;  %v586_v33 = vsel %vm576_vm3, %v572_v28, 1326507024  ;;  %v785_v40 = vadd.s32 %v781_v9, %v777_v31 }
  0xd8   : > { %v735_v60 = vsel %vm729_vm13, %v732_v22, %v734_v53  ;;  %v788_v49 = vadd.s32 %v787_v39, %v778_v29  ;;  %vm573_vm7 = vcmp.lt.s32.totalorder %v2121_v57, 1  ;;  %vm575_vm10 = vcmp.lt.s32.totalorder %v2121_v57, 3 }
  0xd9   : > { %v953_v13 = vsub.s32 %v949_v41, %v952_v15  ;;  %vm791_vm8 = vc.u32 %v766_v58, %v785_v40  ;;  %v581_v55 = vsel %vm573_vm7, %v2165_v36, %v2263_v38  ;;  %v585_v61 = vsel %vm573_vm7, %v2263_v38, %v2266_v7 }
  0xda   : > { %v792_v16 = vadd.s32 1, %v788_v49  ;;  %v583_v28 = vsel %vm575_vm10, %v2266_v7, %v582_v32  ;;  %v789_v4 = vmul.u32 %v2222_v0, %v735_v60  ;;  %vm574_vm12 = vcmp.lt.s32.totalorder %v2121_v57, 2 }
  0xdb   : > { %vm954_vm11 = vcmp.lt.s32.totalorder %v953_v13, 0  ;;  %v955_v3 = vsub.s32 0, %v953_v13  ;;  %v587_v46 = vsel %vm575_vm10, %v2156_v27, %v586_v33  ;;  %v3067_v31 = vor.u32 8388608, %v2094_v42 }
  0xdc   : > { %v3068_v63 = vmov 920167782   ;;  %v793_v12 = vsel %vm791_vm8, %v792_v16, %v788_v49  ;;  %v588_v44 = vsel %vm574_vm12, %v585_v61, %v587_v46  ;;  %v2312_v0 = vor.u32 %v2119_v56, %v2114_v52 }
  0xdd   : > { %v2302_v41 = vshll.u32 %v3067_v31, 8  ;;  %v2306_v9 = vshll.u32 %v3068_v63, %v2087_v35  ;;  %v956_v11 = vsel %vm954_vm11, %v955_v3, %v953_v13  ;;  %v794_v24 = vadd.s32 %v793_v12, %v789_v4 }
  0xde   : > { %v957_v18 = vclz %v956_v11  ;;  %v2316_v42 = vsel %vm574_vm12, %v581_v55, %v583_v28  ;;  %vm853_vm13 = vcmp.lt.s32.totalorder %v2099_v45, 0  ;;  %v557_v26 = vshrl.u32 %v1967_v5, %v2106_v47 }
  0xdf   : > { %v417_v27 = vor.u32 %v2270_v25, %v2306_v9  ;;  %v592_v48 = vand.u32 65535, %v588_v44  ;;  %v795_v8 = vadd.s32 536870912, %v794_v24  ;;  %v590_v52 = vand.u32 65535, %v2302_v41 }
  0xe0   : > { %v1872_v62 = vadd.s32 4294967294, %v957_v18  ;;  %v593_v56 = vshrl.u32 %v588_v44, 16  ;;  %v3069_v14 = vand.u32 2147483647, %v2099_v45  ;;  %v975_v19 = vsub.s32 4, %v2249_v6 }
  0xe1   : > { %v591_v21 = vshrl.u32 %v2302_v41, 16  ;;  %v615_v37 = vshrl.u32 %v2316_v42, 16  ;;  %v945_v47 = vadd.s32 %v2236_v59, %v2234_v54  ;;  %v2335_v22 = vshrl.u32 %v795_v8, 30 }
  0xe2   : > { %vm2326_vm14 = vcmp.le.f32.partialorder %v3069_v14, 0.7853982  ;;  %vm1873_vm15 = vcmp.lt.s32.totalorder %v1872_v62, 0  ;;  %v595_v53 = vmul.u32 %v593_v56, %v590_v52  ;;  %v2337_v29 = vadd.s32 %v785_v40, %v766_v58 }
  0xe3   : > { %v960_v15 = vsel %vm1873_vm15, 0, %v1872_v62  ;;  %v2339_v39 = vmul.u32 %v592_v48, %v591_v21  ;;  %v614_v32 = vand.u32 65535, %v2316_v42  ;;  %v797_v49 = vshll.u32 %v2335_v22, 30 }
  0xe4   : > { %v961_v33 = vsub.s32 32, %v960_v15  ;;  %v965_v60 = vsub.s32 4294967266, %v960_v15  ;;  %v2346_v55 = vsel %vm573_vm7, %v557_v26, %v2165_v36  ;;  %v976_v54 = vsel %vm853_vm13, %v975_v19, %v2249_v6 }
  0xe5   : > { %v594_v59 = vmul.u32 %v592_v48, %v590_v52  ;;  %v598_v58 = vshll.u32 %v595_v53, 16  ;;  %v617_v40 = vmul.u32 %v615_v37, %v590_v52  ;;  %v962_v61 = vshll.u32 %v953_v13, %v960_v15 }
  0xe6   : > { %v963_v3 = vshrl.u32 %v945_v47, %v961_v33  ;;  %v966_v16 = vadd.s32 127, %v965_v60  ;;  %v798_v28 = vsub.s32 %v794_v24, %v797_v49  ;;  %v600_v4 = vshll.u32 %v2339_v39, 16 }
  0xe7   : > { %vm602_vm0 = vc.u32 %v594_v59, %v598_v58  ;;  %v604_v46 = vadd.s32 %v598_v58, %v594_v59  ;;  %v618_v31 = vmul.u32 %v614_v32, %v591_v21  ;;  %v597_v44 = vmul.u32 %v593_v56, %v591_v21 }
  0xe8   : > { %v964_v11 = vor.u32 %v963_v3, %v962_v61  ;;  %v967_v12 = vshll.u32 %v966_v16, 23  ;;  %vm799_vm1 = vcmp.lt.s32.totalorder %v798_v28, 0  ;;  %v800_v36 = vsub.s32 0, %v798_v28 }
  0xe9   : > { %v603_v18 = vsel %vm602_vm0, 1, %v1963_v1  ;;  %vm606_vm2 = vc.u32 %v604_v46, %v600_v4  ;;  %v620_v6 = vshll.u32 %v617_v40, 16  ;;  %v978_v13 = vsel %vm2326_vm14, 0, %v976_v54 }
  0xea   : > { %v968_v42 = vor.u32 4788187, %v967_v12  ;;  %v801_v26 = vsel %vm799_vm1, %v800_v36, %v798_v28  ;;  %v578_v24 = vsel %vm576_vm3, %v2266_v7, 2102212464  ;;  %v605_v62 = vadd.s32 %v603_v18, %v597_v44 }
  0xeb   : > { %v802_v48 = vclz %v801_v26  ;;  %v607_v8 = vsel %vm606_vm2, 1, %v1963_v1  ;;  %v616_v14 = vmul.u32 %v614_v32, %v590_v52  ;;  %v971_v56 = vcvt.s32.f32 %v964_v11 }
  0xec   : > { %v969_v19 = vand.u32 2147483647, %v968_v42  ;;  %v599_v47 = vshrl.u32 %v595_v53, 16  ;;  %v622_v15 = vshll.u32 %v618_v31, 16  ;;  %v609_v60 = vadd.s32 %v607_v8, %v605_v62 }
  0xed   : > { %v1869_v33 = vadd.s32 4294967294, %v802_v48  ;;  %vm624_vm4 = vc.u32 %v616_v14, %v620_v6  ;;  %v626_v49 = vadd.s32 %v620_v6, %v616_v14  ;;  %v995_v54 = vadd.s32 3, %v978_v13 }
  0xee   : > { %v972_v59 = vmul.f32 %v971_v56, %v969_v19  ;;  %v579_v58 = vsel %vm575_vm10, %v2263_v38, %v578_v24  ;;  %v619_v7 = vmul.u32 %v615_v37, %v591_v21  ;;  %v610_v61 = vadd.s32 %v609_v60, %v599_v47 }
  0xef   : > { %vm1870_vm3 = vcmp.lt.s32.totalorder %v1869_v33, 0  ;;  %v625_v3 = vsel %vm624_vm4, 1, %v1963_v1  ;;  %vm628_vm5 = vc.u32 %v626_v49, %v622_v15  ;;  %vm421_vm6 = vcmp.lt.s32.totalorder %v2110_v50, 4 }
  0xf0   : > { %v973_v52 = vxor.u32 2147483648, %v972_v59  ;;  %v805_v32 = vsel %vm1870_vm3, 0, %v1869_v33  ;;  %v627_v53 = vadd.s32 %v625_v3, %v619_v7  ;;  %v629_v16 = vsel %vm628_vm5, 1, %v1963_v1 }
  0xf1   : > { %v806_v4 = vsub.s32 32, %v805_v32  ;;  %v810_v46 = vsub.s32 4294967266, %v805_v32  ;;  %v820_v11 = vsub.s32 4, %v2335_v22  ;;  %v601_v12 = vshrl.u32 %v2339_v39, 16 }
  0xf2   : > { %v974_v38 = vsel %vm853_vm13, %v973_v52, %v972_v59  ;;  %v807_v21 = vshll.u32 %v798_v28, %v805_v32  ;;  %v621_v37 = vshrl.u32 %v617_v40, 16  ;;  %v631_v36 = vadd.s32 %v629_v16, %v627_v53 }
  0xf3   : > { %v2372_v44 = vsel %vm2326_vm14, %v2099_v45, %v974_v38  ;;  %v808_v18 = vshrl.u32 %v2337_v29, %v806_v4  ;;  %v811_v6 = vadd.s32 127, %v810_v46  ;;  %v2375_v42 = vadd.s32 %v610_v61, %v601_v12 }
  0xf4   : > { %v979_v13 = vmul.f32 %v2372_v44, %v2372_v44  ;;  %vm698_vm9 = vcmp.lt.s32.totalorder %v2083_v30, 0  ;;  %v623_v39 = vshrl.u32 %v618_v31, 16  ;;  %v632_v26 = vadd.s32 %v631_v36, %v621_v37 }
  0xf5   : > { %v809_v28 = vor.u32 %v808_v18, %v807_v21  ;;  %v812_v40 = vshll.u32 %v811_v6, 23  ;;  %v580_v34 = vsel %vm574_vm12, %v2346_v55, %v579_v58  ;;  %v2383_v24 = vadd.s32 %v626_v49, %v622_v15 }
  0xf6   : > { %v980_v48 = vmul.f32 -0.001358992, %v979_v13  ;;  %v987_v29 = vmul.f32 -0.00019511016, %v979_v13  ;;  %v821_v62 = vsel %vm698_vm9, %v820_v11, %v2335_v22  ;;  %v633_v8 = vadd.s32 %v632_v26, %v623_v39 }
  0xf7   : > { %v2388_v14 = vand.u32 3, %v995_v54  ;;  %v3072_v31 = vand.u32 2147483647, %v2083_v30  ;;  %v813_v56 = vor.u32 4788187, %v812_v40  ;;  %vm636_vm8 = vc.u32 %v2375_v42, %v2383_v24 }
  0xf8   : > { %v981_v57 = vadd.f32 0.041655596, %v980_v48  ;;  %v988_v55 = vadd.f32 0.008332121, %v987_v29  ;;  %v634_v47 = vmul.u32 %v2302_v41, %v580_v34  ;;  %v637_v15 = vadd.s32 1, %v633_v8 }
  0xf9   : > { %vm2392_vm7 = vcmp.le.f32.partialorder %v3072_v31, 0.7853982  ;;  %v814_v33 = vand.u32 2147483647, %v813_v56  ;;  %v816_v22 = vcvt.s32.f32 %v809_v28  ;;  %v386_v49 = vand.u32 2147483647, %v2077_v17 }
  0xfa   : > { %v823_v60 = vsel %vm2392_vm7, 0, %v821_v62  ;;  %v427_v59 = vsel %vm421_vm6, %v2312_v0, 920167782  ;;  %v982_v54 = vmul.f32 %v981_v57, %v979_v13  ;;  %v989_v58 = vmul.f32 %v988_v55, %v979_v13 }
  0xfb   : > { %v638_v7 = vsel %vm636_vm8, %v637_v15, %v633_v8  ;;  %v431_v41 = vsel %vm421_vm6, %v417_v27, 1326507024  ;;  %v817_v61 = vmul.f32 %v816_v22, %v814_v33  ;;  %v404_v52 = vshrl.u32 %v1968_v10, %v2097_v43 }
  0xfc   : > { %v639_v3 = vadd.s32 %v638_v7, %v634_v47  ;;  %v983_v32 = vadd.f32 -0.4999988, %v982_v54  ;;  %v990_v53 = vadd.f32 -0.16666654, %v989_v58  ;;  %v840_v16 = vadd.s32 3, %v823_v60 }
  0xfd   : > { %v407_v4 = vshrl.u32 %v1969_v20, %v2097_v43  ;;  %vm998_vm10 = vcmp.eq.s32.totalorder %v2388_v14, 0  ;;  %vm1001_vm11 = vcmp.eq.s32.totalorder %v2388_v14, 2  ;;  %v818_v46 = vxor.u32 2147483648, %v817_v61 }
  0xfe   : > { %v640_v25 = vadd.s32 536870912, %v639_v3  ;;  %v393_v9 = vand.u32 8388607, %v386_v49  ;;  %v403_v27 = vshll.u32 %v1967_v5, %v2087_v35  ;;  %v984_v11 = vmul.f32 %v983_v32, %v979_v13 }
  0xff   : > { %v991_v12 = vmul.f32 %v990_v53, %v979_v13  ;;  %vm997_vm12 = vcmp.lt.s32.totalorder %v2388_v14, 2  ;;  %v406_v38 = vshll.u32 %v1968_v10, %v2087_v35  ;;  %v410_v21 = vshrl.u32 %v1964_v51, %v2097_v43 }
 0x100   : > { %vm994_vm13 = vweird.f32 %v2099_v45  ;;  %v819_v37 = vsel %vm698_vm9, %v818_v46, %v817_v61  ;;  %v2428_v36 = vshrl.u32 %v640_v25, 30  ;;  %v2430_v18 = vor.u32 %v404_v52, %v403_v27 }
 0x101   : > { %v409_v6 = vshll.u32 %v1969_v20, %v2087_v35  ;;  %v985_v13 = vadd.f32 1.0, %v984_v11  ;;  %v992_v39 = vadd.f32 1.0, %v991_v12  ;;  %v822_v26 = vsel %vm2392_vm7, %v2083_v30, %v819_v37 }
 0x102   : > { %v2437_v28 = vor.u32 %v407_v4, %v406_v38  ;;  %v824_v40 = vmul.f32 %v822_v26, %v822_v26  ;;  %v2439_v34 = vand.u32 3, %v840_v16  ;;  %v642_v48 = vshll.u32 %v2428_v36, 30 }
 0x103   : > { %v394_v29 = vor.u32 8388608, %v393_v9  ;;  %v993_v62 = vmul.f32 %v992_v39, %v2372_v44  ;;  %v1002_v8 = vxor.u32 2147483648, %v985_v13  ;;  %v2443_v31 = vor.u32 %v410_v21, %v409_v6 }
 0x104   : > { %vm418_vm14 = vcmp.lt.s32.totalorder %v2110_v50, 1  ;;  %v825_v35 = vmul.f32 -0.001358992, %v824_v40  ;;  %v832_v56 = vmul.f32 -0.00019511016, %v824_v40  ;;  %v643_v57 = vsub.s32 %v639_v3, %v642_v48 }
 0x105   : > { %vm420_vm15 = vcmp.lt.s32.totalorder %v2110_v50, 3  ;;  %v999_v19 = vxor.u32 2147483648, %v993_v62  ;;  %vm419_vm0 = vcmp.lt.s32.totalorder %v2110_v50, 2  ;;  %v426_v55 = vsel %vm418_vm14, %v2430_v18, %v2437_v28 }
 0x106   : > { %v432_v44 = vsel %vm420_vm15, %v2312_v0, %v431_v41  ;;  %v826_v47 = vadd.f32 0.041655596, %v825_v35  ;;  %v833_v15 = vadd.f32 0.008332121, %v832_v56  ;;  %vm644_vm1 = vcmp.lt.s32.totalorder %v643_v57, 0 }
 0x107   : > { %v645_v33 = vsub.s32 0, %v643_v57  ;;  %v1000_v22 = vsel %vm998_vm10, %v985_v13, %v999_v19  ;;  %v1003_v60 = vsel %vm1001_vm11, %v1002_v8, %v993_v62  ;;  %v428_v54 = vsel %vm420_vm15, %v2443_v31, %v427_v59 }
 0x108   : > { %v430_v58 = vsel %vm418_vm14, %v2437_v28, %v2443_v31  ;;  %v1004_v0 = vsel %vm997_vm12, %v1000_v22, %v1003_v60  ;;  %v827_v7 = vmul.f32 %v826_v47, %v824_v40  ;;  %v834_v41 = vmul.f32 %v833_v15, %v824_v40 }
 0x109   : > { %v646_v61 = vsel %vm644_vm1, %v645_v33, %v643_v57  ;;  %v1005_v3 = vsel %vm994_vm13, nan, %v1004_v0  ;;  %v433_v32 = vsel %vm419_vm0, %v430_v58, %v432_v44  ;;  %v2472_v53 = vshll.u32 %v394_v29, 8 }
 0x10a   : > { %v647_v52 = vclz %v646_v61  ;;  %1059 = vmatpush.msra.mxu1 %v1005_v3  ;;  %1897 = vmatpush.msra.mxu3 %v1005_v3  ;;  %v828_v59 = vadd.f32 -0.4999988, %v827_v7  ;;  %v835_v16 = vadd.f32 -0.16666654, %v834_v41  ;;  %vm843_vm2 = vcmp.eq.s32.totalorder %v2439_v34, 0 }
 0x10b   : > { %v429_v4 = vsel %vm419_vm0, %v426_v55, %v428_v54  ;;  %vm842_vm4 = vcmp.lt.s32.totalorder %v2439_v34, 2  ;;  %v437_v45 = vand.u32 65535, %v433_v32  ;;  %v438_v9 = vshrl.u32 %v433_v32, 16 }
 0x10c   : > { %v1866_v14 = vadd.s32 4294967294, %v647_v52  ;;  %v829_v46 = vmul.f32 %v828_v59, %v824_v40  ;;  %v836_v25 = vmul.f32 %v835_v16, %v824_v40  ;;  %vm846_vm3 = vcmp.eq.s32.totalorder %v2439_v34, 2 }
 0x10d   : > { %v635_v27 = vadd.s32 %v2383_v24, %v2375_v42  ;;  %v435_v11 = vand.u32 65535, %v2472_v53  ;;  %v436_v37 = vshrl.u32 %v2472_v53, 16  ;;  %v460_v40 = vshrl.u32 %v429_v4, 16 }
 0x10e   : > { %vm1867_vm5 = vcmp.lt.s32.totalorder %v1866_v14, 0  ;;  %v830_v12 = vadd.f32 1.0, %v829_v46  ;;  %v837_v38 = vadd.f32 1.0, %v836_v25  ;;  %v459_v47 = vand.u32 65535, %v429_v4 }
 0x10f   : > { %v650_v21 = vsel %vm1867_vm5, 0, %v1866_v14  ;;  %v440_v39 = vmul.u32 %v438_v9, %v435_v11  ;;  %v439_v62 = vmul.u32 %v437_v45, %v435_v11  ;;  %v441_v8 = vmul.u32 %v437_v45, %v436_v37 }
 0x110   : > { %v651_v6 = vsub.s32 32, %v650_v21  ;;  %v655_v13 = vsub.s32 4294967266, %v650_v21  ;;  %v838_v48 = vmul.f32 %v837_v38, %v822_v26  ;;  %v847_v29 = vxor.u32 2147483648, %v830_v12 }
 0x111   : > { %v652_v35 = vshll.u32 %v643_v57, %v650_v21  ;;  %v443_v42 = vshll.u32 %v440_v39, 16  ;;  %v442_v44 = vmul.u32 %v438_v9, %v436_v37  ;;  %v445_v60 = vshll.u32 %v441_v8, 16 }
 0x112   : > { %v653_v56 = vshrl.u32 %v635_v27, %v651_v6  ;;  %v656_v19 = vadd.s32 127, %v655_v13  ;;  %v844_v24 = vxor.u32 2147483648, %v838_v48  ;;  %v848_v55 = vsel %vm846_vm3, %v847_v29, %v838_v48 }
 0x113   : > { %vm447_vm9 = vc.u32 %v439_v62, %v443_v42  ;;  %v449_v22 = vadd.s32 %v443_v42, %v439_v62  ;;  %v462_v57 = vmul.u32 %v460_v40, %v435_v11  ;;  %vm839_vm7 = vweird.f32 %v2083_v30 }
 0x114   : > { %v654_v15 = vor.u32 %v653_v56, %v652_v35  ;;  %v657_v33 = vshll.u32 %v656_v19, 23  ;;  %v845_v26 = vsel %vm843_vm2, %v830_v12, %v844_v24  ;;  %v448_v54 = vsel %vm447_vm9, 1, %v1963_v1 }
 0x115   : > { %v849_v58 = vsel %vm842_vm4, %v845_v26, %v848_v55  ;;  %v450_v7 = vadd.s32 %v448_v54, %v442_v44  ;;  %vm451_vm8 = vc.u32 %v449_v22, %v445_v60  ;;  %v461_v61 = vmul.u32 %v459_v47, %v435_v11 }
 0x116   : > { %v658_v0 = vor.u32 4788187, %v657_v33  ;;  %v850_v41 = vsel %vm839_vm7, nan, %v849_v58  ;;  %v463_v3 = vmul.u32 %v459_v47, %v436_v37  ;;  %v661_v32 = vcvt.s32.f32 %v654_v15 }
 0x117   : > { %1060 = vmatpush.msra.mxu1 %v850_v41  ;;  %1898 = vmatpush.msra.mxu3 %v850_v41  ;;  %v452_v59 = vsel %vm451_vm8, 1, %v1963_v1  ;;  %v465_v16 = vshll.u32 %v462_v57, 16  ;;  %v444_v14 = vshrl.u32 %v440_v39, 16  ;;  %v464_v46 = vmul.u32 %v460_v40, %v436_v37 }
 0x118   : > { %v659_v52 = vand.u32 2147483647, %v658_v0  ;;  %v454_v4 = vadd.s32 %v452_v59, %v450_v7  ;;  %v467_v25 = vshll.u32 %v463_v3, 16  ;;  %v402_v45 = vshrl.u32 %v1967_v5, %v2097_v43 }
 0x119   : > { %vm469_vm10 = vc.u32 %v461_v61, %v465_v16  ;;  %v471_v34 = vadd.s32 %v465_v16, %v461_v61  ;;  %v423_v12 = vsel %vm421_vm6, %v2443_v31, 2102212464  ;;  %v3075_v21 = vand.u32 2147483647, %v2080_v23 }
 0x11a   : > { %v662_v30 = vmul.f32 %v661_v32, %v659_v52  ;;  %v455_v9 = vadd.s32 %v454_v4, %v444_v14  ;;  %v470_v27 = vsel %vm469_vm10, 1, %v1963_v1  ;;  %vm543_vm13 = vcmp.lt.s32.totalorder %v2080_v23, 0 }
 0x11b   : > { %v472_v38 = vadd.s32 %v470_v27, %v464_v46  ;;  %vm473_vm11 = vc.u32 %v471_v34, %v467_v25  ;;  %vm2500_vm12 = vcmp.le.f32.partialorder %v3075_v21, 0.7853982  ;;  %v446_v6 = vshrl.u32 %v441_v8, 16 }
 0x11c   : > { %v663_v11 = vxor.u32 2147483648, %v662_v30  ;;  %v474_v43 = vsel %vm473_vm11, 1, %v1963_v1  ;;  %v422_v31 = vsel %vm418_vm14, %v402_v45, %v2430_v18  ;;  %v466_v39 = vshrl.u32 %v462_v57, 16 }
 0x11d   : > { %v476_v40 = vadd.s32 %v474_v43, %v472_v38  ;;  %v665_v48 = vsub.s32 4, %v2428_v36  ;;  %v424_v62 = vsel %vm420_vm15, %v2437_v28, %v423_v12  ;;  %v456_v8 = vadd.s32 %v455_v9, %v446_v6 }
 0x11e   : > { %v664_v13 = vsel %vm543_vm13, %v663_v11, %v662_v30  ;;  %v468_v56 = vshrl.u32 %v463_v3, 16  ;;  %v475_v42 = vadd.s32 %v471_v34, %v467_v25  ;;  %v425_v18 = vsel %vm419_vm0, %v422_v31, %v424_v62 }
 0x11f   : > { %v667_v29 = vsel %vm2500_vm12, %v2080_v23, %v664_v13  ;;  %v477_v19 = vadd.s32 %v476_v40, %v466_v39  ;;  %v666_v47 = vsel %vm543_vm13, %v665_v48, %v2428_v36  ;;  %v479_v28 = vmul.u32 %v2472_v53, %v425_v18 }
 0x120   : > { %v669_v35 = vmul.f32 %v667_v29, %v667_v29  ;;  %vm481_vm6 = vc.u32 %v456_v8, %v475_v42  ;;  %v668_v26 = vsel %vm2500_vm12, 0, %v666_v47  ;;  %vm684_vm2 = vweird.f32 %v2080_v23 }
 0x121   : > { %v478_v44 = vadd.s32 %v477_v19, %v468_v56  ;;  %v685_v7 = vadd.s32 3, %v668_v26  ;;  %v480_v21 = vadd.s32 %v475_v42, %v456_v8  ;;  %vm388_vm3 = vcmp.lt.s32.totalorder %v2077_v17, 0 }
 0x122   : > { %v670_v24 = vmul.f32 -0.001358992, %v669_v35  ;;  %v677_v55 = vmul.f32 -0.00019511016, %v669_v35  ;;  %vm2530_vm5 = vcmp.le.f32.partialorder %v386_v49, 0.7853982  ;;  %vm529_vm10 = vweird.f32 %v2077_v17 }
 0x123   : > { %v482_v22 = vadd.s32 1, %v478_v44  ;;  %v686_v59 = vand.u32 3, %v685_v7  ;;  %v1012_v7 = vld [vmem:[%s3058_s4 + $0x10] sm:$0xff]  ;;  %vm1034_vm11 = vcmask 261120  }
 0x124   : > { %v671_v15 = vadd.f32 0.041655596, %v670_v24  ;;  %v678_v33 = vadd.f32 0.008332121, %v677_v55 }
 0x125   : > { %v483_v57 = vsel %vm481_vm6, %v482_v22, %v478_v44  ;;  %vm688_vm14 = vcmp.eq.s32.totalorder %v686_v59, 0  ;;  %vm691_vm15 = vcmp.eq.s32.totalorder %v686_v59, 2  ;;  %vm687_vm1 = vcmp.lt.s32.totalorder %v686_v59, 2 }
 0x126   : > { %v672_v60 = vmul.f32 %v671_v15, %v669_v35  ;;  %v679_v54 = vmul.f32 %v678_v33, %v669_v35  ;;  %v484_v58 = vadd.s32 %v483_v57, %v479_v28  ;;  %v1013_v28 = vld [vmem:[%s3058_s4 + $0x18] sm:$0xff] }
 0x127   : > { %1031 = vperm.xlu2 %1938, %v1013_v28  }
 0x128   : > { %v673_v50 = vadd.f32 -0.4999988, %v672_v60  ;;  %v680_v0 = vadd.f32 -0.16666654, %v679_v54  ;;  %v485_v41 = vadd.s32 536870912, %v484_v58 }
 0x12a   : > { %v674_v61 = vmul.f32 %v673_v50, %v669_v35  ;;  %v681_v3 = vmul.f32 %v680_v0, %v669_v35  ;;  %v486_v36 = vshrl.u32 %v485_v41, 30 }
 0x12c   : > { %v675_v52 = vadd.f32 1.0, %v674_v61  ;;  %v682_v32 = vadd.f32 1.0, %v681_v3  ;;  %v487_v16 = vshll.u32 %v486_v36, 30  ;;  %v510_v19 = vsub.s32 4, %v486_v36 }
 0x12e   : > { %v683_v14 = vmul.f32 %v682_v32, %v667_v29  ;;  %v692_v53 = vxor.u32 2147483648, %v675_v52  ;;  %v488_v4 = vsub.s32 %v484_v58, %v487_v16  ;;  %v511_v44 = vsel %vm388_vm3, %v510_v19, %v486_v36  ;;  %v1006_v16 = vld [vmem:[%s3057_s3] sm:$0xff] }
 0x12f   : > { %v513_v33 = vsel %vm2530_vm5, 0, %v511_v44  ;;  %1026 = vperm.xlu2 %1938, %v1012_v7  }
 0x130   : > { %v689_v46 = vxor.u32 2147483648, %v683_v14  ;;  %vm489_vm0 = vcmp.lt.s32.totalorder %v488_v4, 0  ;;  %v490_v30 = vsub.s32 0, %v488_v4  ;;  %v693_v34 = vsel %vm691_vm15, %v692_v53, %v683_v14  ;;  %v1007_v14 = vld [vmem:[%s3057_s3 + $0x8] sm:$0xff] }
 0x131   : > { %v530_v54 = vadd.s32 3, %v513_v33 }
 0x132   : > { %v690_v25 = vsel %vm688_vm14, %v675_v52, %v689_v46  ;;  %v491_v9 = vsel %vm489_vm0, %v490_v30, %v488_v4  ;;  %v1703_v46 = vld [vmem:[%s3060_s6 + $0x18] sm:$0xff] }
 0x133   : > { %v694_v45 = vsel %vm687_vm1, %v690_v25, %v693_v34  ;;  %v492_v11 = vclz %v491_v9  ;;  %v531_v41 = vand.u32 3, %v530_v54  ;;  %v1009_v30 = vld [vmem:[%s3057_s3 + $0x18] sm:$0xff]  ;;  %v1017_v34 = vpop.permute.xlu1 %1016 }
 0x134   : > { %v695_v27 = vsel %vm684_vm2, nan, %v694_v45 }
 0x135   : > { %1061 = vmatpush.msra.mxu1 %v695_v27  ;;  %1899 = vmatpush.msra.mxu3 %v695_v27  ;;  %v1863_v12 = vadd.s32 4294967294, %v492_v11  ;;  %vm533_vm9 = vcmp.eq.s32.totalorder %v531_v41, 0  ;;  %vm536_vm7 = vcmp.eq.s32.totalorder %v531_v41, 2  ;;  %vm532_vm8 = vcmp.lt.s32.totalorder %v531_v41, 2  ;;  %v1022_v27 = vpop.permute.xlu0 %1021 }
 0x137   : > { %vm1864_vm4 = vcmp.lt.s32.totalorder %v1863_v12, 0 }
 0x138   : > { %v495_v38 = vsel %vm1864_vm4, 0, %v1863_v12 }
 0x139   : > { %v496_v37 = vsub.s32 32, %v495_v38  ;;  %v500_v6 = vsub.s32 4294967266, %v495_v38  ;;  %v497_v43 = vshll.u32 %v488_v4, %v495_v38  ;;  %v1700_v4 = vld [vmem:[%s3060_s6] sm:$0xff] }
 0x13a   : > { %1706 = vperm.xlu2 %1938, %v1700_v4  }
 0x13b   : > { %v498_v13 = vshrl.u32 %v480_v21, %v496_v37  ;;  %v501_v31 = vadd.s32 127, %v500_v6 }
 0x13d   : > { %v499_v39 = vor.u32 %v498_v13, %v497_v43  ;;  %v502_v40 = vshll.u32 %v501_v31, 23 }
 0x13f   : > { %v503_v48 = vor.u32 4788187, %v502_v40  ;;  %v506_v23 = vcvt.s32.f32 %v499_v39 }
 0x141   : > { %v504_v29 = vand.u32 2147483647, %v503_v48 }
 0x142   : > { %1721 = vperm.xlu2 %1938, %v1703_v46  }
 0x143   : > { %v507_v62 = vmul.f32 %v506_v23, %v504_v29 }
 0x145   : > { %v508_v35 = vxor.u32 2147483648, %v507_v62 }
 0x147   : > { %v509_v8 = vsel %vm388_vm3, %v508_v35, %v507_v62 }
 0x148   : > { %v512_v42 = vsel %vm2530_vm5, %v2077_v17, %v509_v8  ;;  %v1008_v17 = vld [vmem:[%s3057_s3 + $0x10] sm:$0xff] }
 0x149   : > { %v514_v24 = vmul.f32 %v512_v42, %v512_v42 }
 0x14b   : > { %v515_v55 = vmul.f32 -0.001358992, %v514_v24  ;;  %v522_v18 = vmul.f32 -0.00019511016, %v514_v24 }
 0x14d   : > { %v516_v47 = vadd.f32 0.041655596, %v515_v55  ;;  %v523_v15 = vadd.f32 0.008332121, %v522_v18 }
 0x14f   : > { %v517_v22 = vmul.f32 %v516_v47, %v514_v24  ;;  %v524_v49 = vmul.f32 %v523_v15, %v514_v24 }
 0x151   : > { %v518_v26 = vadd.f32 -0.4999988, %v517_v22  ;;  %v525_v60 = vadd.f32 -0.16666654, %v524_v49 }
 0x153   : > { %v519_v57 = vmul.f32 %v518_v26, %v514_v24  ;;  %v526_v58 = vmul.f32 %v525_v60, %v514_v24 }
 0x155   : > { %v520_v50 = vadd.f32 1.0, %v519_v57  ;;  %v527_v0 = vadd.f32 1.0, %v526_v58 }
 0x157   : > { %v528_v61 = vmul.f32 %v527_v0, %v512_v42  ;;  %v537_v3 = vxor.u32 2147483648, %v520_v50 }
 0x159   : > { %v534_v36 = vxor.u32 2147483648, %v528_v61  ;;  %v538_v32 = vsel %vm536_vm7, %v537_v3, %v528_v61 }
 0x15b   : > { %v535_v52 = vsel %vm533_vm9, %v520_v50, %v534_v36 }
 0x15c   : > { %v539_v59 = vsel %vm532_vm8, %v535_v52, %v538_v32 }
 0x15d   : > { %v540_v53 = vsel %vm529_vm10, nan, %v539_v59 }
 0x15e   : > { %1062 = vmatpush.msra.mxu1 %v540_v53  ;;  %1900 = vmatpush.msra.mxu3 %v540_v53 }
 0x15f   : > { %1874 = vmatmul.msk.f32.vlgmr.msra.gmra.mxu1 %vm1034_vm11, %v1006_v16  ;;  %1875 = vmatmul.msk.f32.vlgmr.msra.gmra.mxu3 %vm1034_vm11, %v1007_v14 }
 0x167   : > { %1876 = vmatmul.msk.f32.gmra.mxu3 %vm1034_vm11, %v1008_v17 }
 0x16f   : > { %1877 = vmatmul.msk.f32.gmra.mxu3 %vm1034_vm11, %v1009_v30 }
 0x181   : > { %v1032_v9 = vpop.permute.xlu2 %1031 }
 0x189   : > { %v1027_v13 = vpop.permute.xlu2 %1026 }
 0x1dc   : > { %v1064_v25 = vpop.f32.mrf.mxu1 }
 0x1dd   : > { %v2568_v45 = vadd.f32 %v1064_v25, %v1017_v34 }
 0x1df   : > { %v1079_v12 = vand.u32 2139095040, %v2568_v45 }
 0x1e1   : > { %v1080_v37 = vshrl.u32 %v1079_v12, 23 }
 0x1e2   : > { %v1067_v11 = vpop.f32.mrf.mxu3 }
 0x1e3   : > { %v2571_v38 = vadd.f32 %v1067_v11, %v1022_v27  ;;  %v1878_v31 = vadd.s32 4294967169, %v1080_v37 }
 0x1e5   : > { %v1234_v21 = vand.u32 2139095040, %v2571_v38  ;;  %v1086_v29 = vadd.s32 1, %v1878_v31 }
 0x1e7   : > { %v1235_v6 = vshrl.u32 %v1234_v21, 23  ;;  %vm1087_vm12 = vcmp.gt.s32.totalorder %v1086_v29, 0 }
 0x1e8   : > { %v1088_v55 = vsel %vm1087_vm12, %v1086_v29, 0 }
 0x1e9   : > { %v1881_v39 = vadd.s32 4294967169, %v1235_v6  ;;  %v2583_v33 = vand.u32 31, %v1088_v55  ;;  %v2592_v57 = vshrl.u32 %v1088_v55, 5 }
 0x1ea   : > { %v1070_v43 = vpop.f32.mrf.mxu3 }
 0x1eb   : > { %v2574_v40 = vadd.f32 %v1070_v43, %v1027_v13  ;;  %v1241_v23 = vadd.s32 1, %v1881_v39  ;;  %v2595_v58 = vsub.s32 32, %v2583_v33  ;;  %v2602_v0 = vshll.u32 %v1964_v51, %v2583_v33 }
 0x1ec   : > { %v2610_v61 = vshll.u32 %v3068_v63, %v2583_v33 }
 0x1ed   : > { %v1389_v48 = vand.u32 2139095040, %v2574_v40  ;;  %vm1242_vm13 = vcmp.gt.s32.totalorder %v1241_v23, 0 }
 0x1ee   : > { %v1243_v18 = vsel %vm1242_vm13, %v1241_v23, 0 }
 0x1ef   : > { %v1390_v62 = vshrl.u32 %v1389_v48, 23  ;;  %v2585_v22 = vand.u32 31, %v1243_v18  ;;  %v2612_v3 = vshrl.u32 %v1243_v18, 5 }
 0x1f1   : > { %v1884_v56 = vadd.s32 4294967169, %v1390_v62  ;;  %v2598_v50 = vsub.s32 32, %v2585_v22  ;;  %v2618_v32 = vshll.u32 %v1964_v51, %v2585_v22  ;;  %v2628_v4 = vshll.u32 %v3068_v63, %v2585_v22 }
 0x1f2   : > { %v1073_v35 = vpop.f32.mrf.mxu3 }
 0x1f3   : > { %v2577_v8 = vadd.f32 %v1073_v35, %v1032_v9  ;;  %v1396_v19 = vadd.s32 1, %v1884_v56  ;;  %v2624_v53 = vshrl.u32 %v3068_v63, %v2598_v50  ;;  %v1386_v35 = vand.u32 2147483647, %v2574_v40 }
 0x1f5   : > { %v1544_v42 = vand.u32 2139095040, %v2577_v8  ;;  %v1541_v24 = vand.u32 2147483647, %v2577_v8  ;;  %vm1397_vm6 = vcmp.gt.s32.totalorder %v1396_v19, 0 }
 0x1f6   : > { %v1398_v15 = vsel %vm1397_vm6, %v1396_v19, 0  ;;  %vm1266_vm6 = vcmp.lt.s32.totalorder %v2612_v3, 4 }
 0x1f7   : > { %v1545_v44 = vshrl.u32 %v1544_v42, 23  ;;  %v1548_v47 = vand.u32 8388607, %v1541_v24  ;;  %v2587_v49 = vand.u32 31, %v1398_v15  ;;  %v2630_v17 = vshrl.u32 %v1398_v15, 5 }
 0x1f9   : > { %v1887_v28 = vadd.s32 4294967169, %v1545_v44  ;;  %v1549_v26 = vor.u32 8388608, %v1548_v47  ;;  %v2590_v60 = vsub.s32 32, %v2587_v49  ;;  %v1412_v59 = vshll.u32 %v1964_v51, %v2587_v49 }
 0x1fa   : > { %v1415_v46 = vshll.u32 %v3068_v63, %v2587_v49  ;;  %vm1421_vm4 = vcmp.lt.s32.totalorder %v2630_v17, 4  ;;  %vm1418_vm8 = vcmp.lt.s32.totalorder %v2630_v17, 1  ;;  %vm1420_vm10 = vcmp.lt.s32.totalorder %v2630_v17, 3 }
 0x1fb   : > { %v1551_v54 = vadd.s32 1, %v1887_v28  ;;  %v1413_v7 = vshrl.u32 %v3068_v63, %v2590_v60  ;;  %v2606_v41 = vshll.u32 %v1549_v26, 8  ;;  %v1416_v36 = vshrl.u32 %v1966_v2, %v2590_v60 }
 0x1fc   : > { %vm1419_vm12 = vcmp.lt.s32.totalorder %v2630_v17, 2 }
 0x1fd   : > { %vm1552_vm14 = vcmp.gt.s32.totalorder %v1551_v54, 0  ;;  %v2634_v30 = vor.u32 %v1413_v7, %v1412_v59  ;;  %v1590_v34 = vand.u32 65535, %v2606_v41  ;;  %v1591_v9 = vshrl.u32 %v2606_v41, 16 }
 0x1fe   : > { %v1553_v52 = vsel %vm1552_vm14, %v1551_v54, 0  ;;  %v1417_v27 = vor.u32 %v1416_v36, %v1415_v46  ;;  %v1393_v36 = vand.u32 8388607, %v1386_v35 }
 0x1ff   : > { %v1554_v16 = vshrl.u32 %v1553_v52, 5  ;;  %v1555_v14 = vand.u32 31, %v1553_v52 }
 0x201   : > { %v1556_v25 = vsub.s32 32, %v1555_v14  ;;  %v1567_v11 = vshll.u32 %v1964_v51, %v1555_v14  ;;  %v1570_v12 = vshll.u32 %v3068_v63, %v1555_v14  ;;  %vm1576_vm15 = vcmp.lt.s32.totalorder %v1554_v16, 4 }
 0x202   : > { %v1558_v6 = vshll.u32 %v1967_v5, %v1555_v14  ;;  %v1561_v13 = vshll.u32 %v1968_v10, %v1555_v14  ;;  %v1564_v39 = vshll.u32 %v1969_v20, %v1555_v14  ;;  %vm1573_vm0 = vcmp.lt.s32.totalorder %v1554_v16, 1 }
 0x203   : > { %v1568_v21 = vshrl.u32 %v3068_v63, %v1556_v25  ;;  %v1571_v37 = vshrl.u32 %v1966_v2, %v1556_v25  ;;  %v1559_v43 = vshrl.u32 %v1968_v10, %v1556_v25  ;;  %v1562_v31 = vshrl.u32 %v1969_v20, %v1556_v25 }
 0x204   : > { %v1565_v48 = vshrl.u32 %v1964_v51, %v1556_v25  ;;  %v1557_v56 = vshrl.u32 %v1967_v5, %v1556_v25  ;;  %vm1574_vm1 = vcmp.lt.s32.totalorder %v1554_v16, 2  ;;  %vm1575_vm2 = vcmp.lt.s32.totalorder %v1554_v16, 3 }
 0x205   : > { %v1569_v29 = vor.u32 %v1568_v21, %v1567_v11  ;;  %v1572_v23 = vor.u32 %v1571_v37, %v1570_v12  ;;  %v1560_v62 = vor.u32 %v1559_v43, %v1558_v6  ;;  %v1563_v19 = vor.u32 %v1562_v31, %v1561_v13 }
 0x206   : > { %v1566_v42 = vor.u32 %v1565_v48, %v1564_v39  ;;  %v2659_v25 = vshrl.u32 %v1966_v2, %v2598_v50  ;;  %v1427_v21 = vsel %vm1421_vm4, %v2634_v30, 920167782  ;;  %v1431_v37 = vsel %vm1421_vm4, %v1417_v27, 1326507024 }
 0x207   : > { %v1582_v55 = vsel %vm1576_vm15, %v1569_v29, 920167782  ;;  %v1586_v18 = vsel %vm1576_vm15, %v1572_v23, 1326507024  ;;  %v1581_v47 = vsel %vm1573_vm0, %v1560_v62, %v1563_v19  ;;  %v1577_v26 = vsel %vm1573_vm0, %v1557_v56, %v1560_v62 }
 0x208   : > { %v1578_v44 = vsel %vm1576_vm15, %v1566_v42, 2102212464  ;;  %v1583_v15 = vsel %vm1575_vm2, %v1566_v42, %v1582_v55  ;;  %v1585_v28 = vsel %vm1573_vm0, %v1563_v19, %v1566_v42  ;;  %v1587_v7 = vsel %vm1575_vm2, %v1569_v29, %v1586_v18 }
 0x209   : > { %v1584_v54 = vsel %vm1574_vm1, %v1581_v47, %v1583_v15  ;;  %v1579_v52 = vsel %vm1575_vm2, %v1563_v19, %v1578_v44  ;;  %v1588_v59 = vsel %vm1574_vm1, %v1585_v28, %v1587_v7  ;;  %v1394_v48 = vor.u32 8388608, %v1393_v36 }
 0x20a   : > { %v1614_v14 = vand.u32 65535, %v1584_v54  ;;  %v1615_v46 = vshrl.u32 %v1584_v54, 16  ;;  %v1592_v11 = vand.u32 65535, %v1588_v59  ;;  %v1593_v12 = vshrl.u32 %v1588_v59, 16 }
 0x20b   : > { %v2668_v13 = vsel %vm1574_vm1, %v1577_v26, %v1579_v52  ;;  %v1406_v36 = vshll.u32 %v1968_v10, %v2587_v49 }
 0x20c   : > { %v1617_v6 = vmul.u32 %v1615_v46, %v1590_v34  ;;  %v1618_v43 = vmul.u32 %v1614_v14, %v1591_v9  ;;  %v1595_v31 = vmul.u32 %v1593_v12, %v1590_v34  ;;  %v1596_v39 = vmul.u32 %v1592_v11, %v1591_v9 }
 0x20d   : > { %v1594_v29 = vmul.u32 %v1592_v11, %v1590_v34  ;;  %v1616_v23 = vmul.u32 %v1614_v14, %v1590_v34  ;;  %v1619_v62 = vmul.u32 %v1615_v46, %v1591_v9  ;;  %v1597_v19 = vmul.u32 %v1593_v12, %v1591_v9 }
 0x20e   : > { %v1620_v56 = vshll.u32 %v1617_v6, 16  ;;  %v1598_v42 = vshll.u32 %v1595_v31, 16  ;;  %v1621_v55 = vshrl.u32 %v1617_v6, 16  ;;  %v1622_v18 = vshll.u32 %v1618_v43, 16 }
 0x20f   : > { %v1599_v44 = vshrl.u32 %v1595_v31, 16  ;;  %v1623_v47 = vshrl.u32 %v1618_v43, 16  ;;  %v1600_v15 = vshll.u32 %v1596_v39, 16  ;;  %v1403_v34 = vshll.u32 %v1967_v5, %v2587_v49 }
 0x210   : > { %vm1624_vm3 = vc.u32 %v1616_v23, %v1620_v56  ;;  %v1626_v27 = vadd.s32 %v1620_v56, %v1616_v23  ;;  %vm1602_vm5 = vc.u32 %v1594_v29, %v1598_v42  ;;  %v1604_v16 = vadd.s32 %v1598_v42, %v1594_v29 }
 0x211   : > { %v1625_v28 = vsel %vm1624_vm3, 1, %v1963_v1  ;;  %v1603_v26 = vsel %vm1602_vm5, 1, %v1963_v1  ;;  %v1404_v14 = vshrl.u32 %v1968_v10, %v2590_v60  ;;  %v1407_v46 = vshrl.u32 %v1969_v20, %v2590_v60 }
 0x212   : > { %v1627_v54 = vadd.s32 %v1625_v28, %v1619_v62  ;;  %vm1628_vm9 = vc.u32 %v1626_v27, %v1622_v18  ;;  %v1605_v9 = vadd.s32 %v1603_v26, %v1597_v19  ;;  %vm1606_vm7 = vc.u32 %v1604_v16, %v1600_v15 }
 0x213   : > { %v1629_v7 = vsel %vm1628_vm9, 1, %v1963_v1  ;;  %v1607_v52 = vsel %vm1606_vm7, 1, %v1963_v1  ;;  %v1601_v11 = vshrl.u32 %v1596_v39, 16  ;;  %v1409_v6 = vshll.u32 %v1969_v20, %v2587_v49 }
 0x214   : > { %v1631_v59 = vadd.s32 %v1629_v7, %v1627_v54  ;;  %v1609_v12 = vadd.s32 %v1607_v52, %v1605_v9  ;;  %v1410_v43 = vshrl.u32 %v1964_v51, %v2590_v60  ;;  %v2686_v29 = vor.u32 %v1404_v14, %v1403_v34 }
 0x215   : > { %v2688_v23 = vor.u32 %v1407_v46, %v1406_v36  ;;  %v2694_v39 = vshll.u32 %v1394_v48, 8  ;;  %v2696_v19 = vadd.s32 %v1626_v27, %v1622_v18  ;;  %v1262_v27 = vor.u32 %v2659_v25, %v2628_v4 }
 0x216   : > { %v1632_v31 = vadd.s32 %v1631_v59, %v1621_v55  ;;  %v1610_v62 = vadd.s32 %v1609_v12, %v1599_v44  ;;  %v2691_v56 = vor.u32 %v1410_v43, %v1409_v6  ;;  %v1432_v55 = vsel %vm1420_vm10, %v2634_v30, %v1431_v37 }
 0x217   : > { %v1426_v42 = vsel %vm1418_vm8, %v2686_v29, %v2688_v23  ;;  %v2717_v44 = vor.u32 %v2624_v53, %v2618_v32  ;;  %v1435_v16 = vand.u32 65535, %v2694_v39  ;;  %v1436_v53 = vshrl.u32 %v2694_v39, 16 }
 0x218   : > { %v1633_v49 = vadd.s32 %v1632_v31, %v1623_v47  ;;  %v2705_v15 = vadd.s32 %v1610_v62, %v1601_v11  ;;  %v1428_v48 = vsel %vm1420_vm10, %v2691_v56, %v1427_v21  ;;  %v1430_v18 = vsel %vm1418_vm8, %v2688_v23, %v2691_v56 }
 0x219   : > { %v1429_v30 = vsel %vm1419_vm12, %v1426_v42, %v1428_v48  ;;  %v1433_v37 = vsel %vm1419_vm12, %v1430_v18, %v1432_v55  ;;  %v1634_v21 = vmul.u32 %v2606_v41, %v2668_v13  ;;  %v2733_v54 = vshrl.u32 %v3068_v63, %v2595_v58 }
 0x21a   : > { %v1637_v47 = vadd.s32 1, %v1633_v49  ;;  %vm1636_vm13 = vc.u32 %v2705_v15, %v2696_v19  ;;  %v1437_v28 = vand.u32 65535, %v1433_v37  ;;  %v1438_v26 = vshrl.u32 %v1433_v37, 16 }
 0x21b   : > { %v1459_v9 = vand.u32 65535, %v1429_v30  ;;  %v1460_v4 = vshrl.u32 %v1429_v30, 16  ;;  %v2737_v41 = vshrl.u32 %v1966_v2, %v2595_v58  ;;  %v2743_v7 = vsel %vm1266_vm6, %v2717_v44, 920167782 }
 0x21c   : > { %v1638_v32 = vsel %vm1636_vm13, %v1637_v47, %v1633_v49  ;;  %v1440_v25 = vmul.u32 %v1438_v26, %v1435_v16  ;;  %v1441_v13 = vmul.u32 %v1437_v28, %v1436_v53  ;;  %v2747_v59 = vsel %vm1266_vm6, %v1262_v27, 1326507024 }
 0x21d   : > { %v1639_v34 = vadd.s32 %v1638_v32, %v1634_v21  ;;  %v1462_v52 = vmul.u32 %v1460_v4, %v1435_v16  ;;  %v1463_v63 = vmul.u32 %v1459_v9, %v1436_v53  ;;  %v1439_v14 = vmul.u32 %v1437_v28, %v1435_v16 }
 0x21e   : > { %v1443_v46 = vshll.u32 %v1440_v25, 16  ;;  %v1231_v2 = vand.u32 2147483647, %v2571_v38  ;;  %v1442_v12 = vmul.u32 %v1438_v26, %v1436_v53  ;;  %v1461_v6 = vmul.u32 %v1459_v9, %v1435_v16 }
 0x21f   : > { %v1640_v36 = vadd.s32 536870912, %v1639_v34  ;;  %v1465_v43 = vshll.u32 %v1462_v52, 16  ;;  %v1445_v31 = vshll.u32 %v1441_v13, 16  ;;  %v1464_v49 = vmul.u32 %v1460_v4, %v1436_v53 }
 0x220   : > { %vm1447_vm14 = vc.u32 %v1439_v14, %v1443_v46  ;;  %v1449_v62 = vadd.s32 %v1443_v46, %v1439_v14  ;;  %v1467_v48 = vshll.u32 %v1463_v63, 16  ;;  %v1238_v16 = vand.u32 8388607, %v1231_v2 }
 0x221   : > { %v2750_v11 = vshrl.u32 %v1640_v36, 30  ;;  %v1448_v55 = vsel %vm1447_vm14, 1, %v1963_v1  ;;  %vm1469_vm15 = vc.u32 %v1461_v6, %v1465_v43  ;;  %v1471_v30 = vadd.s32 %v1465_v43, %v1461_v6 }
 0x222   : > { %v1450_v18 = vadd.s32 %v1448_v55, %v1442_v12  ;;  %vm1451_vm0 = vc.u32 %v1449_v62, %v1445_v31  ;;  %v1470_v47 = vsel %vm1469_vm15, 1, %v1963_v1  ;;  %v1402_v32 = vshrl.u32 %v1967_v5, %v2590_v60 }
 0x223   : > { %v1642_v42 = vshll.u32 %v2750_v11, 30  ;;  %v1452_v27 = vsel %vm1451_vm0, 1, %v1963_v1  ;;  %v1472_v21 = vadd.s32 %v1470_v47, %v1464_v49  ;;  %v1444_v53 = vshrl.u32 %v1440_v25, 16 }
 0x224   : > { %v1454_v28 = vadd.s32 %v1452_v27, %v1450_v18  ;;  %vm1473_vm1 = vc.u32 %v1471_v30, %v1467_v48  ;;  %v1423_v9 = vsel %vm1421_vm4, %v2691_v56, 2102212464  ;;  %vm1543_vm3 = vcmp.lt.s32.totalorder %v2577_v8, 0 }
 0x225   : > { %v1643_v37 = vsub.s32 %v1639_v34, %v1642_v42  ;;  %v1474_v34 = vsel %vm1473_vm1, 1, %v1963_v1  ;;  %v1446_v4 = vshrl.u32 %v1441_v13, 16  ;;  %v1466_v14 = vshrl.u32 %v1462_v52, 16 }
 0x226   : > { %v1455_v36 = vadd.s32 %v1454_v28, %v1444_v53  ;;  %v1476_v46 = vadd.s32 %v1474_v34, %v1472_v21  ;;  %v1422_v60 = vsel %vm1418_vm8, %v1402_v32, %v2686_v29  ;;  %v1468_v25 = vshrl.u32 %v1463_v63, 16 }
 0x227   : > { %vm1644_vm2 = vcmp.lt.s32.totalorder %v1643_v37, 0  ;;  %v1645_v26 = vsub.s32 0, %v1643_v37  ;;  %v1252_v6 = vshrl.u32 %v1969_v20, %v2598_v50  ;;  %v1251_v62 = vshll.u32 %v1968_v10, %v2585_v22 }
 0x228   : > { %v1456_v31 = vadd.s32 %v1455_v36, %v1446_v4  ;;  %v1477_v56 = vadd.s32 %v1476_v46, %v1466_v14  ;;  %v1424_v13 = vsel %vm1420_vm10, %v2688_v23, %v1423_v9  ;;  %v1249_v52 = vshrl.u32 %v1968_v10, %v2598_v50 }
 0x229   : > { %v1646_v12 = vsel %vm1644_vm2, %v1645_v26, %v1643_v37  ;;  %v1254_v29 = vshll.u32 %v1969_v20, %v2585_v22  ;;  %v1255_v63 = vshrl.u32 %v1964_v51, %v2598_v50  ;;  %v1475_v42 = vadd.s32 %v1471_v30, %v1467_v48 }
 0x22a   : > { %v1647_v43 = vclz %v1646_v12  ;;  %v1478_v55 = vadd.s32 %v1477_v56, %v1468_v25  ;;  %v2781_v18 = vor.u32 %v1252_v6, %v1251_v62  ;;  %v1635_v47 = vadd.s32 %v2696_v19, %v2705_v15 }
 0x22b   : > { %v1665_v27 = vsub.s32 4, %v2750_v11  ;;  %v1248_v23 = vshll.u32 %v1967_v5, %v2585_v22  ;;  %v1256_v21 = vor.u32 %v1255_v63, %v1254_v29  ;;  %v1425_v32 = vsel %vm1419_vm12, %v1422_v60, %v1424_v13 }
 0x22c   : > { %v1888_v49 = vadd.s32 4294967294, %v1647_v43  ;;  %vm1481_vm5 = vc.u32 %v1456_v31, %v1475_v42  ;;  %v1482_v53 = vadd.s32 1, %v1478_v55  ;;  %v1239_v48 = vor.u32 8388608, %v1238_v16 }
 0x22d   : > { %v1250_v30 = vor.u32 %v1249_v52, %v1248_v23  ;;  %vm1263_vm9 = vcmp.lt.s32.totalorder %v2612_v3, 1  ;;  %vm1265_vm7 = vcmp.lt.s32.totalorder %v2612_v3, 3  ;;  %v1666_v17 = vsel %vm1543_vm3, %v1665_v27, %v2750_v11 }
 0x22e   : > { %vm1889_vm4 = vcmp.lt.s32.totalorder %v1888_v49, 0  ;;  %v1275_v22 = vsel %vm1263_vm9, %v2781_v18, %v1256_v21  ;;  %v1479_v19 = vmul.u32 %v2694_v39, %v1425_v32  ;;  %v1483_v15 = vsel %vm1481_vm5, %v1482_v53, %v1478_v55 }
 0x22f   : > { %v1650_v28 = vsel %vm1889_vm4, 0, %v1888_v49  ;;  %v1277_v16 = vsel %vm1265_vm7, %v2717_v44, %v2747_v59  ;;  %vm1264_vm8 = vcmp.lt.s32.totalorder %v2612_v3, 2  ;;  %v1271_v46 = vsel %vm1263_vm9, %v1250_v30, %v2781_v18 }
 0x230   : > { %v1651_v26 = vsub.s32 32, %v1650_v28  ;;  %v1655_v9 = vsub.s32 4294967266, %v1650_v28  ;;  %v1652_v34 = vshll.u32 %v1643_v37, %v1650_v28  ;;  %v1484_v14 = vadd.s32 %v1483_v15, %v1479_v19 }
 0x231   : > { %v1273_v39 = vsel %vm1265_vm7, %v1256_v21, %v2743_v7  ;;  %v1278_v11 = vsel %vm1264_vm8, %v1275_v22, %v1277_v16  ;;  %v2812_v44 = vshll.u32 %v1239_v48, 8  ;;  %v2816_v37 = vor.u32 %v2733_v54, %v2602_v0 }
 0x232   : > { %v1653_v4 = vshrl.u32 %v1635_v47, %v1651_v26  ;;  %v1656_v36 = vadd.s32 127, %v1655_v9  ;;  %v1282_v59 = vand.u32 65535, %v1278_v11  ;;  %vm2820_vm10 = vcmp.le.f32.partialorder %v1541_v24, 0.7853982 }
 0x233   : > { %v1485_v6 = vadd.s32 536870912, %v1484_v14  ;;  %v1283_v7 = vshrl.u32 %v1278_v11, 16  ;;  %v1274_v56 = vsel %vm1264_vm8, %v1271_v46, %v1273_v39  ;;  %v1280_v62 = vand.u32 65535, %v2812_v44 }
 0x234   : > { %v1654_v12 = vor.u32 %v1653_v4, %v1652_v34  ;;  %v1657_v60 = vshll.u32 %v1656_v36, 23  ;;  %v1281_v13 = vshrl.u32 %v2812_v44, 16  ;;  %v1107_v0 = vor.u32 %v2737_v41, %v2610_v61 }
 0x235   : > { %v1668_v54 = vsel %vm2820_vm10, 0, %v1666_v17  ;;  %v1486_v24 = vshrl.u32 %v1485_v6, 30  ;;  %v1247_v52 = vshrl.u32 %v1967_v5, %v2598_v50  ;;  %v1285_v49 = vmul.u32 %v1283_v7, %v1280_v62 }
 0x236   : > { %v1658_v43 = vor.u32 4788187, %v1657_v60  ;;  %v1661_v63 = vcvt.s32.f32 %v1654_v12  ;;  %v2834_v55 = vmul.u32 %v1282_v59, %v1281_v13  ;;  %v2836_v47 = vadd.s32 %v1475_v42, %v1456_v31 }
 0x237   : > { %v1487_v27 = vshll.u32 %v1486_v24, 30  ;;  %v1267_v23 = vsel %vm1263_vm9, %v1247_v52, %v1250_v30  ;;  %v1305_v32 = vshrl.u32 %v1274_v56, 16  ;;  %v1685_v28 = vadd.s32 3, %v1668_v54 }
 0x238   : > { %v1659_v29 = vand.u32 2147483647, %v1658_v43  ;;  %vm1388_vm12 = vcmp.lt.s32.totalorder %v2574_v40, 0  ;;  %v1284_v48 = vmul.u32 %v1282_v59, %v1280_v62  ;;  %v1288_v26 = vshll.u32 %v1285_v49, 16 }
 0x239   : > { %v2841_v9 = vsub.s32 %v1484_v14, %v1487_v27  ;;  %v1268_v50 = vsel %vm1266_vm6, %v1256_v21, 2102212464  ;;  %v1287_v22 = vmul.u32 %v1283_v7, %v1281_v13  ;;  %v1304_v17 = vand.u32 65535, %v1274_v56 }
 0x23a   : > { %v1662_v53 = vmul.f32 %v1661_v63, %v1659_v29  ;;  %v1290_v42 = vshll.u32 %v2834_v55, 16  ;;  %vm1292_vm13 = vc.u32 %v1284_v48, %v1288_v26  ;;  %v1294_v19 = vadd.s32 %v1288_v26, %v1284_v48 }
 0x23b   : > { %vm1489_vm14 = vcmp.lt.s32.totalorder %v2841_v9, 0  ;;  %v1490_v30 = vsub.s32 0, %v2841_v9  ;;  %v1293_v15 = vsel %vm1292_vm13, 1, %v1963_v1  ;;  %v1307_v16 = vmul.u32 %v1305_v32, %v1280_v62 }
 0x23c   : > { %v1663_v31 = vxor.u32 2147483648, %v1662_v53  ;;  %v1269_v21 = vsel %vm1265_vm7, %v2781_v18, %v1268_v50  ;;  %v1295_v4 = vadd.s32 %v1293_v15, %v1287_v22  ;;  %vm1296_vm6 = vc.u32 %v1294_v19, %v1290_v42 }
 0x23d   : > { %v1491_v14 = vsel %vm1489_vm14, %v1490_v30, %v2841_v9  ;;  %v1510_v46 = vsub.s32 4, %v1486_v24  ;;  %v1297_v39 = vsel %vm1296_vm6, 1, %v1963_v1  ;;  %v2863_v12 = vand.u32 3, %v1685_v28 }
 0x23e   : > { %v1664_v34 = vsel %vm1543_vm3, %v1663_v31, %v1662_v53  ;;  %v1492_v60 = vclz %v1491_v14  ;;  %v1299_v59 = vadd.s32 %v1297_v39, %v1295_v4  ;;  %v2867_v18 = vsel %vm1264_vm8, %v1267_v23, %v1269_v21 }
 0x23f   : > { %v2857_v36 = vsel %vm2820_vm10, %v2577_v8, %v1664_v34  ;;  %v1306_v6 = vmul.u32 %v1304_v17, %v1280_v62  ;;  %v1308_v25 = vmul.u32 %v1304_v17, %v1281_v13  ;;  %v1310_v7 = vshll.u32 %v1307_v16, 16 }
 0x240   : > { %v1669_v11 = vmul.f32 %v2857_v36, %v2857_v36  ;;  %v1885_v54 = vadd.s32 4294967294, %v1492_v60  ;;  %v1289_v52 = vshrl.u32 %v1285_v49, 16  ;;  %vm2871_vm15 = vcmp.le.f32.partialorder %v1386_v35, 0.7853982 }
 0x241   : > { %v2877_v63 = vsel %vm1388_vm12, %v1510_v46, %v1486_v24  ;;  %v1309_v3 = vmul.u32 %v1305_v32, %v1281_v13  ;;  %vm1314_vm0 = vc.u32 %v1306_v6, %v1310_v7  ;;  %v1076_v62 = vand.u32 2147483647, %v2568_v45 }
 0x242   : > { %v1670_v43 = vmul.f32 -0.001358992, %v1669_v11  ;;  %v1677_v56 = vmul.f32 -0.00019511016, %v1669_v11  ;;  %vm1886_vm1 = vcmp.lt.s32.totalorder %v1885_v54, 0  ;;  %v1300_v53 = vadd.s32 %v1299_v59, %v1289_v52 }
 0x243   : > { %v1495_v28 = vsel %vm1886_vm1, 0, %v1885_v54  ;;  %v1312_v49 = vshll.u32 %v1308_v25, 16  ;;  %v1315_v48 = vsel %vm1314_vm0, 1, %v1963_v1  ;;  %v1316_v35 = vadd.s32 %v1310_v7, %v1306_v6 }
 0x244   : > { %v1671_v27 = vadd.f32 0.041655596, %v1670_v43  ;;  %v1678_v23 = vadd.f32 0.008332121, %v1677_v56  ;;  %v1496_v22 = vsub.s32 32, %v1495_v28  ;;  %v1291_v17 = vshrl.u32 %v2834_v55, 16 }
 0x245   : > { %v1497_v24 = vshll.u32 %v2841_v9, %v1495_v28  ;;  %v1500_v13 = vsub.s32 4294967266, %v1495_v28  ;;  %v1317_v32 = vadd.s32 %v1315_v48, %v1309_v3  ;;  %vm1318_vm2 = vc.u32 %v1316_v35, %v1312_v49 }
 0x246   : > { %v1672_v26 = vmul.f32 %v1671_v27, %v1669_v11  ;;  %v1679_v50 = vmul.f32 %v1678_v23, %v1669_v11  ;;  %v1498_v19 = vshrl.u32 %v2836_v47, %v1496_v22  ;;  %v1319_v30 = vsel %vm1318_vm2, 1, %v1963_v1 }
 0x247   : > { %vm1688_vm3 = vcmp.eq.s32.totalorder %v2863_v12, 0  ;;  %v1501_v15 = vadd.s32 127, %v1500_v13  ;;  %v2886_v34 = vadd.s32 %v1300_v53, %v1291_v17  ;;  %v1311_v21 = vshrl.u32 %v1307_v16, 16 }
 0x248   : > { %v1673_v31 = vadd.f32 -0.4999988, %v1672_v26  ;;  %v1680_v42 = vadd.f32 -0.16666654, %v1679_v50  ;;  %v1321_v4 = vadd.s32 %v1319_v30, %v1317_v32  ;;  %vm1111_vm4 = vcmp.lt.s32.totalorder %v2592_v57, 4 }
 0x249   : > { %vm1687_vm5 = vcmp.lt.s32.totalorder %v2863_v12, 2  ;;  %vm1691_vm9 = vcmp.eq.s32.totalorder %v2863_v12, 2  ;;  %v1499_v14 = vor.u32 %v1498_v19, %v1497_v24  ;;  %v1502_v46 = vshll.u32 %v1501_v15, 23 }
 0x24a   : > { %v1674_v55 = vmul.f32 %v1673_v31, %v1669_v11  ;;  %v1681_v9 = vmul.f32 %v1680_v42, %v1669_v11  ;;  %v1313_v47 = vshrl.u32 %v1308_v25, 16  ;;  %v2891_v39 = vadd.s32 %v1316_v35, %v1312_v49 }
 0x24b   : > { %v1322_v60 = vadd.s32 %v1321_v4, %v1311_v21  ;;  %v1513_v16 = vsel %vm2871_vm15, 0, %v2877_v63  ;;  %v1324_v7 = vmul.u32 %v2812_v44, %v2867_v18  ;;  %v1503_v11 = vor.u32 4788187, %v1502_v46 }
 0x24c   : > { %v1675_v59 = vadd.f32 1.0, %v1674_v55  ;;  %v1682_v6 = vadd.f32 1.0, %v1681_v9  ;;  %vm1326_vm7 = vc.u32 %v2886_v34, %v2891_v39  ;;  %v1083_v25 = vand.u32 8388607, %v1076_v62 }
 0x24d   : > { %v1323_v43 = vadd.s32 %v1322_v60, %v1313_v47  ;;  %v1506_v52 = vcvt.s32.f32 %v1499_v14  ;;  %v1097_v3 = vshrl.u32 %v1969_v20, %v2595_v58  ;;  %v1504_v27 = vand.u32 2147483647, %v1503_v11 }
 0x24e   : > { %v1683_v56 = vmul.f32 %v1682_v6, %v2857_v36  ;;  %v1692_v54 = vxor.u32 2147483648, %v1675_v59  ;;  %v1093_v44 = vshll.u32 %v1967_v5, %v2583_v33  ;;  %v1094_v18 = vshrl.u32 %v1968_v10, %v2595_v58 }
 0x24f   : > { %v1327_v63 = vadd.s32 1, %v1323_v43  ;;  %v1096_v53 = vshll.u32 %v1968_v10, %v2583_v33  ;;  %v1099_v36 = vshll.u32 %v1969_v20, %v2583_v33  ;;  %v1100_v28 = vshrl.u32 %v1964_v51, %v2595_v58 }
 0x250   : > { %v1689_v23 = vxor.u32 2147483648, %v1683_v56  ;;  %v1693_v49 = vsel %vm1691_vm9, %v1692_v54, %v1683_v56  ;;  %v1507_v48 = vmul.f32 %v1506_v52, %v1504_v27  ;;  %v1084_v26 = vor.u32 8388608, %v1083_v25 }
 0x251   : > { %v1328_v35 = vsel %vm1326_vm7, %v1327_v63, %v1323_v43  ;;  %v2922_v10 = vor.u32 %v1097_v3, %v1096_v53  ;;  %v1101_v17 = vor.u32 %v1100_v28, %v1099_v36  ;;  %v1117_v51 = vsel %vm1111_vm4, %v2816_v37, 920167782 }
 0x252   : > { %v1690_v50 = vsel %vm1688_vm3, %v1675_v59, %v1689_v23  ;;  %v1329_v22 = vadd.s32 %v1328_v35, %v1324_v7  ;;  %vm1684_vm8 = vweird.f32 %v2577_v8  ;;  %v1508_v33 = vxor.u32 2147483648, %v1507_v48 }
 0x253   : > { %v1694_v20 = vsel %vm1687_vm5, %v1690_v50, %v1693_v49  ;;  %v1121_v24 = vsel %vm1111_vm4, %v1107_v0, 1326507024  ;;  %v2935_v31 = vor.u32 %v1094_v18, %v1093_v44  ;;  %v1530_v8 = vadd.s32 3, %v1513_v16 }
 0x254   : > { %v1695_v13 = vsel %vm1684_vm8, nan, %v1694_v20  ;;  %v1330_v32 = vadd.s32 536870912, %v1329_v22  ;;  %v1509_v42 = vsel %vm1388_vm12, %v1508_v33, %v1507_v48  ;;  %vm1108_vm10 = vcmp.lt.s32.totalorder %v2592_v57, 1 }
 0x255   : > { %1748 = vmatpush.msrb.mxu1 %v1695_v13  ;;  %1901 = vmatpush.msra.mxu2 %v1695_v13  ;;  %vm1110_vm13 = vcmp.lt.s32.totalorder %v2592_v57, 3  ;;  %v1512_v61 = vsel %vm2871_vm15, %v2574_v40, %v1509_v42  ;;  %v1120_v0 = vsel %vm1108_vm10, %v2922_v10, %v1101_v17  ;;  %v2949_v12 = vshll.u32 %v1084_v26, 8 }
 0x256   : > { %v2944_v41 = vshrl.u32 %v1330_v32, 30  ;;  %v1514_v19 = vmul.f32 %v1512_v61, %v1512_v61  ;;  %vm1109_vm12 = vcmp.lt.s32.totalorder %v2592_v57, 2  ;;  %v1122_v30 = vsel %vm1110_vm13, %v2816_v37, %v1121_v24 }
 0x257   : > { %v1116_v29 = vsel %vm1108_vm10, %v2935_v31, %v2922_v10  ;;  %v1118_v21 = vsel %vm1110_vm13, %v1101_v17, %v1117_v51  ;;  %v1123_v4 = vsel %vm1109_vm12, %v1120_v0, %v1122_v30  ;;  %v2964_v47 = vand.u32 3, %v1530_v8 }
 0x258   : > { %v1332_v15 = vshll.u32 %v2944_v41, 30  ;;  %v1515_v55 = vmul.f32 -0.001358992, %v1514_v19  ;;  %v1522_v9 = vmul.f32 -0.00019511016, %v1514_v19  ;;  %v1127_v14 = vand.u32 65535, %v1123_v4 }
 0x259   : > { %v1128_v46 = vshrl.u32 %v1123_v4, 16  ;;  %v1125_v60 = vand.u32 65535, %v2949_v12  ;;  %v1119_v16 = vsel %vm1109_vm12, %v1116_v29, %v1118_v21  ;;  %v1126_v7 = vshrl.u32 %v2949_v12, 16 }
 0x25a   : > { %v1333_v37 = vsub.s32 %v1329_v22, %v1332_v15  ;;  %v1516_v59 = vadd.f32 0.041655596, %v1515_v55  ;;  %v1523_v6 = vadd.f32 0.008332121, %v1522_v9  ;;  %v1149_v27 = vand.u32 65535, %v1119_v16 }
 0x25b   : > { %v1130_v43 = vmul.u32 %v1128_v46, %v1125_v60  ;;  %v2970_v54 = vmul.u32 %v1127_v14, %v1126_v7  ;;  %v1150_v63 = vshrl.u32 %v1119_v16, 16  ;;  %vm1536_vm6 = vcmp.eq.s32.totalorder %v2964_v47, 2 }
 0x25c   : > { %vm1334_vm14 = vcmp.lt.s32.totalorder %v1333_v37, 0  ;;  %v1335_v11 = vsub.s32 0, %v1333_v37  ;;  %v1517_v25 = vmul.f32 %v1516_v59, %v1514_v19  ;;  %v1524_v56 = vmul.f32 %v1523_v6, %v1514_v19 }
 0x25d   : > { %v1133_v3 = vshll.u32 %v1130_v43, 16  ;;  %v1129_v53 = vmul.u32 %v1127_v14, %v1125_v60  ;;  %vm1533_vm15 = vcmp.eq.s32.totalorder %v2964_v47, 0  ;;  %v1325_v36 = vadd.s32 %v2891_v39, %v2886_v34 }
 0x25e   : > { %v1336_v52 = vsel %vm1334_vm14, %v1335_v11, %v1333_v37  ;;  %v1518_v44 = vadd.f32 -0.4999988, %v1517_v25  ;;  %v1525_v18 = vadd.f32 -0.16666654, %v1524_v56  ;;  %v1113_v28 = vsel %vm1111_vm4, %v1101_v17, 2102212464 }
 0x25f   : > { %v1337_v23 = vclz %v1336_v52  ;;  %v1132_v49 = vmul.u32 %v1128_v46, %v1126_v7  ;;  %v1135_v48 = vshll.u32 %v2970_v54, 16  ;;  %vm1532_vm0 = vcmp.lt.s32.totalorder %v2964_v47, 2 }
 0x260   : > { %v1519_v35 = vmul.f32 %v1518_v44, %v1514_v19  ;;  %v1526_v26 = vmul.f32 %v1525_v18, %v1514_v19  ;;  %vm1137_vm1 = vc.u32 %v1129_v53, %v1133_v3  ;;  %vm1529_vm2 = vweird.f32 %v2574_v40 }
 0x261   : > { %v1882_v50 = vadd.s32 4294967294, %v1337_v23  ;;  %v1138_v22 = vsel %vm1137_vm1, 1, %v1963_v1  ;;  %v1139_v51 = vadd.s32 %v1133_v3, %v1129_v53  ;;  %v1152_v20 = vmul.u32 %v1150_v63, %v1125_v60 }
 0x262   : > { %v1153_v33 = vmul.u32 %v1149_v27, %v1126_v7  ;;  %v1520_v34 = vadd.f32 1.0, %v1519_v35  ;;  %v1527_v39 = vadd.f32 1.0, %v1526_v26  ;;  %v1140_v17 = vadd.s32 %v1138_v22, %v1132_v49 }
 0x263   : > { %vm1883_vm3 = vcmp.lt.s32.totalorder %v1882_v50, 0  ;;  %vm1141_vm4 = vc.u32 %v1139_v51, %v1135_v48  ;;  %v1151_v13 = vmul.u32 %v1149_v27, %v1125_v60  ;;  %v1155_v32 = vshll.u32 %v1152_v20, 16 }
 0x264   : > { %v1340_v24 = vsel %vm1883_vm3, 0, %v1882_v50  ;;  %v1528_v42 = vmul.f32 %v1527_v39, %v1512_v61  ;;  %v1537_v8 = vxor.u32 2147483648, %v1520_v34  ;;  %v1134_v19 = vshrl.u32 %v1130_v43, 16 }
 0x265   : > { %v1341_v0 = vsub.s32 32, %v1340_v24  ;;  %v1342_v30 = vshll.u32 %v1333_v37, %v1340_v24  ;;  %v1345_v15 = vsub.s32 4294967266, %v1340_v24  ;;  %v1142_v29 = vsel %vm1141_vm4, 1, %v1963_v1 }
 0x266   : > { %v1154_v21 = vmul.u32 %v1150_v63, %v1126_v7  ;;  %v1534_v4 = vxor.u32 2147483648, %v1528_v42  ;;  %v1144_v9 = vadd.s32 %v1142_v29, %v1140_v17  ;;  %v1157_v14 = vshll.u32 %v1153_v33, 16 }
 0x267   : > { %v1343_v55 = vshrl.u32 %v1325_v36, %v1341_v0  ;;  %v1538_v46 = vsel %vm1536_vm6, %v1537_v8, %v1528_v42  ;;  %v1346_v59 = vadd.s32 127, %v1345_v15  ;;  %vm1159_vm5 = vc.u32 %v1151_v13, %v1155_v32 }
 0x268   : > { %v1161_v60 = vadd.s32 %v1155_v32, %v1151_v13  ;;  %v1535_v61 = vsel %vm1533_vm15, %v1520_v34, %v1534_v4  ;;  %v1145_v16 = vadd.s32 %v1144_v9, %v1134_v19  ;;  %v1160_v37 = vsel %vm1159_vm5, 1, %v1963_v1 }
 0x269   : > { %v1344_v6 = vor.u32 %v1343_v55, %v1342_v30  ;;  %v1539_v7 = vsel %vm1532_vm0, %v1535_v61, %v1538_v46  ;;  %v1347_v11 = vshll.u32 %v1346_v59, 23  ;;  %v1162_v43 = vadd.s32 %v1160_v37, %v1154_v21 }
 0x26a   : > { %vm1163_vm9 = vc.u32 %v1161_v60, %v1157_v14  ;;  %v1540_v25 = vsel %vm1529_vm2, nan, %v1539_v7  ;;  %v1092_v56 = vshrl.u32 %v1967_v5, %v2595_v58  ;;  %v1136_v52 = vshrl.u32 %v2970_v54, 16 }
 0x26b   : > { %v1164_v3 = vsel %vm1163_vm9, 1, %v1963_v1  ;;  %1749 = vmatpush.msrb.mxu1 %v1540_v25  ;;  %1902 = vmatpush.msra.mxu2 %v1540_v25  ;;  %v1348_v27 = vor.u32 4788187, %v1347_v11  ;;  %v1156_v63 = vshrl.u32 %v1152_v20, 16  ;;  %v1114_v40 = vsel %vm1110_vm13, %v2922_v10, %v1113_v28 }
 0x26c   : > { %v1166_v44 = vadd.s32 %v1164_v3, %v1162_v43  ;;  %v1112_v47 = vsel %vm1108_vm10, %v1092_v56, %v2935_v31  ;;  %v1146_v18 = vadd.s32 %v1145_v16, %v1136_v52  ;;  %v1351_v5 = vcvt.s32.f32 %v1344_v6 }
 0x26d   : > { %v1349_v23 = vand.u32 2147483647, %v1348_v27  ;;  %v1158_v58 = vshrl.u32 %v1153_v33, 16  ;;  %v1165_v53 = vadd.s32 %v1161_v60, %v1157_v14  ;;  %v1115_v36 = vsel %vm1109_vm12, %v1112_v47, %v1114_v40 }
 0x26e   : > { %v1167_v54 = vadd.s32 %v1166_v44, %v1156_v63  ;;  %vm1233_vm8 = vcmp.lt.s32.totalorder %v2571_v38, 0  ;;  %v1169_v31 = vmul.u32 %v2949_v12, %v1115_v36  ;;  %vm3008_vm10 = vcmp.le.f32.partialorder %v1231_v2, 0.7853982 }
 0x26f   : > { %v1352_v1 = vmul.f32 %v1351_v5, %v1349_v23  ;;  %vm1171_vm7 = vc.u32 %v1146_v18, %v1165_v53  ;;  %v1355_v26 = vsub.s32 4, %v2944_v41  ;;  %v1170_v6 = vadd.s32 %v1165_v53, %v1146_v18 }
 0x270   : > { %v1168_v49 = vadd.s32 %v1167_v54, %v1158_v58  ;;  %vm1374_vm0 = vweird.f32 %v2571_v38  ;;  %vm1078_vm1 = vcmp.lt.s32.totalorder %v2568_v45, 0  ;;  %vm1077_vm2 = vcmp.le.f32.partialorder %v1076_v62, 0.7853982 }
 0x271   : > { %v1353_v48 = vxor.u32 2147483648, %v1352_v1  ;;  %v1356_v33 = vsel %vm1233_vm8, %v1355_v26, %v2944_v41  ;;  %vm1219_vm9 = vweird.f32 %v2568_v45 }
 0x272   : > { %v1172_v35 = vadd.s32 1, %v1168_v49  ;;  %v1358_v24 = vsel %vm3008_vm10, 0, %v1356_v33 }
 0x273   : > { %v1354_v28 = vsel %vm1233_vm8, %v1353_v48, %v1352_v1  ;;  %v1375_v30 = vadd.s32 3, %v1358_v24 }
 0x274   : > { %v1173_v50 = vsel %vm1171_vm7, %v1172_v35, %v1168_v49  ;;  %v1357_v57 = vsel %vm3008_vm10, %v2571_v38, %v1354_v28 }
 0x275   : > { %v1174_v22 = vadd.s32 %v1173_v50, %v1169_v31  ;;  %v1359_v51 = vmul.f32 %v1357_v57, %v1357_v57  ;;  %v1376_v9 = vand.u32 3, %v1375_v30 }
 0x277   : > { %v1175_v20 = vadd.s32 536870912, %v1174_v22  ;;  %v1360_v12 = vmul.f32 -0.001358992, %v1359_v51  ;;  %v1367_v34 = vmul.f32 -0.00019511016, %v1359_v51  ;;  %vm1377_vm12 = vcmp.lt.s32.totalorder %v1376_v9, 2 }
 0x278   : > { %vm1378_vm6 = vcmp.eq.s32.totalorder %v1376_v9, 0  ;;  %vm1381_vm15 = vcmp.eq.s32.totalorder %v1376_v9, 2 }
 0x279   : > { %v1176_v39 = vshrl.u32 %v1175_v20, 30  ;;  %v1361_v2 = vadd.f32 0.041655596, %v1360_v12  ;;  %v1368_v17 = vadd.f32 0.008332121, %v1367_v34 }
 0x27b   : > { %v1177_v13 = vshll.u32 %v1176_v39, 30  ;;  %v1362_v32 = vmul.f32 %v1361_v2, %v1359_v51  ;;  %v1369_v42 = vmul.f32 %v1368_v17, %v1359_v51  ;;  %v1200_v58 = vsub.s32 4, %v1176_v39 }
 0x27d   : > { %v1178_v8 = vsub.s32 %v1174_v22, %v1177_v13  ;;  %v1363_v0 = vadd.f32 -0.4999988, %v1362_v32  ;;  %v1370_v19 = vadd.f32 -0.16666654, %v1369_v42  ;;  %v1201_v49 = vsel %vm1078_vm1, %v1200_v58, %v1176_v39  ;;  %v1696_v13 = vld [vmem:[%s3059_s5] sm:$0xff]  ;;  %v1697_v32 = vld [vmem:[%s3059_s5 + $0x8] sm:$0xff] }
 0x27e   : > { %v1203_v31 = vsel %vm1077_vm2, 0, %v1201_v49 }
 0x27f   : > { %vm1179_vm13 = vcmp.lt.s32.totalorder %v1178_v8, 0  ;;  %v1180_v15 = vsub.s32 0, %v1178_v8  ;;  %v1364_v29 = vmul.f32 %v1363_v0, %v1359_v51  ;;  %v1371_v21 = vmul.f32 %v1370_v19, %v1359_v51  ;;  %v1707_v0 = vpop.permute.xlu2 %1706 }
 0x281   : > { %v1181_v41 = vsel %vm1179_vm13, %v1180_v15, %v1178_v8  ;;  %v1365_v4 = vadd.f32 1.0, %v1364_v29  ;;  %v1372_v55 = vadd.f32 1.0, %v1371_v21  ;;  %v1712_v15 = vpop.permute.xlu0 %1711 }
 0x282   : > { %v1182_v14 = vclz %v1181_v41  ;;  %v1717_v41 = vpop.permute.xlu1 %1716 }
 0x283   : > { %v1373_v46 = vmul.f32 %v1372_v55, %v1357_v57  ;;  %v1382_v59 = vxor.u32 2147483648, %v1365_v4  ;;  %v1220_v57 = vadd.s32 3, %v1203_v31 }
 0x284   : > { %v1879_v60 = vadd.s32 4294967294, %v1182_v14 }
 0x285   : > { %v1379_v61 = vxor.u32 2147483648, %v1373_v46  ;;  %v1383_v7 = vsel %vm1381_vm15, %v1382_v59, %v1373_v46  ;;  %v1221_v33 = vand.u32 3, %v1220_v57 }
 0x286   : > { %vm1880_vm14 = vcmp.lt.s32.totalorder %v1879_v60, 0 }
 0x287   : > { %v1185_v16 = vsel %vm1880_vm14, 0, %v1879_v60  ;;  %v1380_v37 = vsel %vm1378_vm6, %v1365_v4, %v1379_v61  ;;  %vm1223_vm3 = vcmp.eq.s32.totalorder %v1221_v33, 0  ;;  %vm1226_vm4 = vcmp.eq.s32.totalorder %v1221_v33, 2  ;;  %v1722_v9 = vpop.permute.xlu2 %1721 }
 0x288   : > { %v1186_v11 = vsub.s32 32, %v1185_v16  ;;  %v1190_v43 = vsub.s32 4294967266, %v1185_v16  ;;  %v1384_v25 = vsel %vm1377_vm12, %v1380_v37, %v1383_v7  ;;  %v1187_v52 = vshll.u32 %v1178_v8, %v1185_v16  ;;  %v1699_v8 = vld [vmem:[%s3059_s5 + $0x18] sm:$0xff] }
 0x289   : > { %v1385_v56 = vsel %vm1374_vm0, nan, %v1384_v25  ;;  %vm1222_vm5 = vcmp.lt.s32.totalorder %v1221_v33, 2 }
 0x28a   : > { %v1188_v3 = vshrl.u32 %v1170_v6, %v1186_v11  ;;  %v1191_v27 = vadd.s32 127, %v1190_v43  ;;  %1750 = vmatpush.msrb.mxu1 %v1385_v56  ;;  %1903 = vmatpush.msra.mxu2 %v1385_v56 }
 0x28c   : > { %v1189_v63 = vor.u32 %v1188_v3, %v1187_v52  ;;  %v1192_v44 = vshll.u32 %v1191_v27, 23 }
 0x28e   : > { %v1193_v47 = vor.u32 4788187, %v1192_v44  ;;  %v1196_v23 = vcvt.s32.f32 %v1189_v63 }
 0x290   : > { %v1194_v40 = vand.u32 2147483647, %v1193_v47 }
 0x292   : > { %v1197_v18 = vmul.f32 %v1196_v23, %v1194_v40 }
 0x294   : > { %v1198_v5 = vxor.u32 2147483648, %v1197_v18 }
 0x296   : > { %v1199_v38 = vsel %vm1078_vm1, %v1198_v5, %v1197_v18 }
 0x297   : > { %v1202_v54 = vsel %vm1077_vm2, %v2568_v45, %v1199_v38  ;;  %v1698_v45 = vld [vmem:[%s3059_s5 + $0x10] sm:$0xff] }
 0x298   : > { %v1204_v53 = vmul.f32 %v1202_v54, %v1202_v54 }
 0x29a   : > { %v1205_v1 = vmul.f32 -0.001358992, %v1204_v53  ;;  %v1212_v36 = vmul.f32 -0.00019511016, %v1204_v53 }
 0x29c   : > { %v1206_v48 = vadd.f32 0.041655596, %v1205_v1  ;;  %v1213_v35 = vadd.f32 0.008332121, %v1212_v36 }
 0x29e   : > { %v1207_v10 = vmul.f32 %v1206_v48, %v1204_v53  ;;  %v1214_v28 = vmul.f32 %v1213_v35, %v1204_v53 }
 0x2a0   : > { %v1208_v26 = vadd.f32 -0.4999988, %v1207_v10  ;;  %v1215_v50 = vadd.f32 -0.16666654, %v1214_v28 }
 0x2a2   : > { %v1209_v22 = vmul.f32 %v1208_v26, %v1204_v53  ;;  %v1216_v51 = vmul.f32 %v1215_v50, %v1204_v53 }
 0x2a4   : > { %v1210_v20 = vadd.f32 1.0, %v1209_v22  ;;  %v1217_v62 = vadd.f32 1.0, %v1216_v51 }
 0x2a6   : > { %v1218_v12 = vmul.f32 %v1217_v62, %v1202_v54  ;;  %v1227_v34 = vxor.u32 2147483648, %v1210_v20 }
 0x2a8   : > { %v1224_v2 = vxor.u32 2147483648, %v1218_v12  ;;  %v1228_v17 = vsel %vm1226_vm4, %v1227_v34, %v1218_v12 }
 0x2aa   : > { %v1225_v39 = vsel %vm1223_vm3, %v1210_v20, %v1224_v2 }
 0x2ab   : > { %v1229_v24 = vsel %vm1222_vm5, %v1225_v39, %v1228_v17 }
 0x2ac   : > { %v1230_v42 = vsel %vm1219_vm9, nan, %v1229_v24 }
 0x2ad   : > { %1751 = vmatpush.msrb.mxu1 %v1230_v42  ;;  %1904 = vmatpush.msra.mxu2 %v1230_v42 }
 0x2ae   : > { %1890 = vmatmul.msk.f32.vlgmr.msrb.gmra.mxu1 %vm1034_vm11, %v1696_v13  ;;  %1891 = vmatmul.msk.f32.vlgmr.msra.gmra.mxu2 %vm1034_vm11, %v1697_v32 }
 0x2b6   : > { %1892 = vmatmul.msk.f32.gmra.mxu2 %vm1034_vm11, %v1698_v45 }
 0x2be   : > { %1893 = vmatmul.msk.f32.gmra.mxu2 %vm1034_vm11, %v1699_v8 }
 0x32b   : > { %v1753_v19 = vpop.f32.mrf.mxu1 }
 0x32c   : > { %v1754_v30 = vadd.f32 %v1753_v19, %v1707_v0 }
 0x32e   : > { %1765 = vst [vmem:[%s306_s22] sm:$0xff] %v1754_v30 }
 0x331   : > { %v1756_v29 = vpop.f32.mrf.mxu2 }
 0x332   : > { %v1757_v21 = vadd.f32 %v1756_v29, %v1712_v15 }
 0x334   : > { %1766 = vst [vmem:[%s306_s22 + $0x8] sm:$0xff] %v1757_v21 }
 0x339   : > { %v1759_v4 = vpop.f32.mrf.mxu2 }
 0x33a   : > { %v1760_v55 = vadd.f32 %v1759_v4, %v1717_v41 }
 0x33c   : > { %1767 = vst [vmem:[%s306_s22 + $0x10] sm:$0xff] %v1760_v55 }
 0x341   : > { %v1762_v14 = vpop.f32.mrf.mxu2 }
 0x342   : > { %v1763_v46 = vadd.f32 %v1762_v14, %v1722_v9 }
 0x344   : > { %1768 = vst [vmem:[%s306_s22 + $0x18] sm:$0xff] %v1763_v46 }
 0x345 PF: > { %s17_s26 = sadd.s32 1, %s1961_s26   ;;  %s3086_s24 = smov %s1957_s25 }
 0x346   : > { %p14_p5 = scmp.ge.s32.totalorder %s17_s26, 4   ;;  %s3087_s25 = smov %s3089_s27 }
 0x348   :  { %16 = sbr.rel (!%p14_p5) target bundleno = 2 (0x2), region = 78 }

// kernel: _lambda_.9
= control target key start
LH: loop header
LB: loop body
LE: loop exit
PB: predicated region body
PF: predicated region fallthrough
CT: control target
= control target key end

     0   :  { %s2457_s21 = smov 0   ;;  %s2459_s22 = smov 0   ;;  %s3556_s0 = inlined_call_operand.vmem [shape: f32[2,32,128], index: 0, kind: input, shape index: {}]   ;;  %s3557_s1 = inlined_call_operand.vmem [shape: f32[2,32,128], index: 1, kind: input, shape index: {}]   ;;  %s3558_s2 = inlined_call_operand.vmem [shape: f32[2,32,128], index: 2, kind: input, shape index: {}, may-alias: {2,3}]   ;;  %s3559_s3 = inlined_call_operand.vmem [shape: f32[2,32,128], index: 3, kind: input, shape index: {}, may-alias: {2,3}]   ;;  %s3560_s4 = inlined_call_operand.vmem [shape: f32[32,32], index: 4, kind: input, shape index: {}]   ;;  %s3561_s5 = inlined_call_operand.vmem [shape: f32[32,32], index: 5, kind: input, shape index: {}]   ;;  %s3562_s6 = inlined_call_operand.vmem [shape: f32[32,32], index: 6, kind: input, shape index: {}]   ;;  %s3563_s7 = inlined_call_operand.vmem [shape: f32[32,1], index: 7, kind: input, shape index: {}]   ;;  %s3564_s8 = inlined_call_operand.vmem [shape: f32[32,32], index: 8, kind: input, shape index: {}]   ;;  %s3565_s9 = inlined_call_operand.vmem [shape: f32[32,1], index: 9, kind: input, shape index: {}]   ;;  %s3566_s10 = inlined_call_operand.vmem [shape: f32[32,32], index: 10, kind: input, shape index: {}]   ;;  %s3567_s11 = inlined_call_operand.vmem [shape: f32[32,1], index: 11, kind: input, shape index: {}]   ;;  %s3568_s12 = inlined_call_operand.vmem [shape: f32[2,32,128], index: 12, kind: output, shape index: {}]  }
   0x1   :  { %s2461_s23 = smov 0  }
   0x2 LB: > { %s34_s24 = sadd.s32 1, %s2379_s22  ;;  %p2253_p0 = scmp.ge.s32.totalorder %s2383_s23, 1  ;;  %s2383_s23 = sphi %s2461_s23, %s22_s23   ;;  %s2379_s22 = sphi %s2459_s22, %s3592_s22   ;;  %s2375_s21 = sphi %s2457_s21, %s3591_s21  }
   0x3   : > { %p36_p1 = scmp.ge.s32.totalorder %s34_s24, 2  ;;  %p426_p2 = scmp.lt.s32.totalorder %s2383_s23, 3 }
   0x5   : > { %s3594_s24 = smov (%p36_p1, %s34_s24), 0  ;;  %p427_p3 = pnand %p2253_p0, %p426_p2 }
   0x6   : > { %p498_p4 = scmp.lt.s32.totalorder (!%p427_p3), %s2375_s21, 1 }
   0x7   : > { %430 = sbr.rel (%p427_p3) target bundleno = 870 (0x366), region = 68 }
   0xc   : > { %v2385_v0 = vmov 0   ;;  %v541_v1 = vld [vmem:[%s3563_s7 + $0x18] sm:$0xff]  ;;  %s3596_s21 = smov (!%p498_p4, %s2375_s21), 1  ;;  %v539_v2 = vld [vmem:[%s3563_s7 + $0x8] sm:$0xff]  ;;  %v540_v5 = vld [vmem:[%s3563_s7 + $0x10] sm:$0xff]  ;;  %vm550_vm0 = vcmask 261120  }
   0xd   : > { %2358 = vset.pattern.permute.xlu0 %v2385_v0  ;;  %2359 = vset.pattern.permute.xlu1 %v2385_v0  ;;  %s2484_s29 = sshll.u32 %s3596_s21, 5  ;;  %v543_v8 = vld [vmem:[%s3560_s4 + $0x8] sm:$0xff]  ;;  %v544_v9 = vld [vmem:[%s3560_s4 + $0x10] sm:$0xff]  ;;  %v542_v14 = vld [vmem:[%s3560_s4] sm:$0xff] }
   0xe   : > { %609 = vperm.xlu0 %2358, %v541_v1   ;;  %2360 = vset.pattern.permute.xlu2 %v2385_v0  ;;  %s505_s14 = scalar_lea.vmem %s3556_s0, %s2484_s29  ;;  %s2497_s19 = scalar_lea.vmem %s3557_s1, %s2484_s29  ;;  %v538_v15 = vld [vmem:[%s3563_s7] sm:$0xff]  ;;  %v1347_v18 = vld [vmem:[%s3565_s9 + $0x8] sm:$0xff]  ;;  %v545_v23 = vld [vmem:[%s3560_s4 + $0x18] sm:$0xff] }
   0xf   : > { %599 = vperm.xlu1 %2359, %v539_v2   ;;  %v549_v3 = vld [vmem:[%s505_s14 + $0x18] sm:$0xff]  ;;  %v548_v4 = vld [vmem:[%s505_s14 + $0x10] sm:$0xff]  ;;  %v547_v6 = vld [vmem:[%s505_s14 + $0x8] sm:$0xff]  ;;  %s2503_s25 = scalar_lea.vmem %s3558_s2, %s2484_s29  ;;  %s529_s13 = scalar_lea.vmem %s3559_s3, %s2484_s29 }
  0x10   : > { %2315 = vmatpush.msra.mxu1 %v549_v3  ;;  %2316 = vmatpush.msra.mxu2 %v549_v3  ;;  %v546_v7 = vld [vmem:[%s505_s14] sm:$0xff]  ;;  %v623_v10 = vld [vmem:[%s2497_s19 + $0x18] sm:$0xff]  ;;  %v622_v12 = vld [vmem:[%s2497_s19 + $0x10] sm:$0xff]  ;;  %s537_s16 = scalar_lea.vmem %s3568_s12, %s2484_s29 }
  0x11   : > { %575 = vmatpush.msra.mxu0 %v549_v3  ;;  %2317 = vmatpush.msra.mxu3 %v549_v3  ;;  %v676_v11 = vld [vmem:[%s2503_s25 + $0x18] sm:$0xff]  ;;  %v675_v13 = vld [vmem:[%s2503_s25 + $0x10] sm:$0xff]  ;;  %v621_v16 = vld [vmem:[%s2497_s19 + $0x8] sm:$0xff] }
  0x12   : > { %2318 = vmatpush.msra.mxu1 %v548_v4  ;;  %2319 = vmatpush.msra.mxu2 %v548_v4  ;;  %v674_v17 = vld [vmem:[%s2503_s25 + $0x8] sm:$0xff]  ;;  %v620_v19 = vld [vmem:[%s2497_s19] sm:$0xff]  ;;  %v2037_v28 = vld [vmem:[%s3567_s11 + $0x10] sm:$0xff] }
  0x13   : > { %576 = vmatpush.msra.mxu0 %v548_v4  ;;  %2320 = vmatpush.msra.mxu3 %v548_v4  ;;  %v673_v20 = vld [vmem:[%s2503_s25] sm:$0xff]  ;;  %v2036_v25 = vld [vmem:[%s3567_s11 + $0x8] sm:$0xff]  ;;  %v618_v29 = vld [vmem:[%s3561_s5 + $0x10] sm:$0xff] }
  0x14   : > { %2321 = vmatpush.msra.mxu1 %v547_v6  ;;  %2322 = vmatpush.msra.mxu2 %v547_v6  ;;  %v616_v21 = vld [vmem:[%s3561_s5] sm:$0xff]  ;;  %v617_v26 = vld [vmem:[%s3561_s5 + $0x8] sm:$0xff]  ;;  %v671_v30 = vld [vmem:[%s3562_s6 + $0x10] sm:$0xff] }
  0x15   : > { %577 = vmatpush.msra.mxu0 %v547_v6  ;;  %2323 = vmatpush.msra.mxu3 %v547_v6  ;;  %v669_v22 = vld [vmem:[%s3562_s6] sm:$0xff]  ;;  %v670_v27 = vld [vmem:[%s3562_s6 + $0x8] sm:$0xff]  ;;  %v619_v31 = vld [vmem:[%s3561_s5 + $0x18] sm:$0xff] }
  0x16   : > { %604 = vperm.xlu0 %2358, %v540_v5   ;;  %2324 = vmatpush.msra.mxu1 %v546_v7  ;;  %v1346_v24 = vld [vmem:[%s3565_s9] sm:$0xff]  ;;  %v672_v32 = vld [vmem:[%s3562_s6 + $0x18] sm:$0xff] }
  0x17   : > { %2325 = vmatpush.msra.mxu2 %v546_v7  ;;  %2265 = vmatmul.msk.f32.vlgmr.msra.gmra.mxu1 %vm550_vm0, %v543_v8 }
  0x18   : > { %2266 = vmatmul.msk.f32.vlgmr.msra.gmra.mxu2 %vm550_vm0, %v544_v9  ;;  %648 = vmatpush.msrb.mxu1 %v623_v10 }
  0x19   : > { %701 = vmatpush.msrb.mxu2 %v676_v11  ;;  %578 = vmatpush.msra.mxu0 %v546_v7 }
  0x1a   : > { %649 = vmatpush.msrb.mxu1 %v622_v12  ;;  %2264 = vmatmul.msk.f32.vlgmr.msra.gmra.mxu0 %vm550_vm0, %v542_v14 }
  0x1b   : > { %702 = vmatpush.msrb.mxu2 %v675_v13  ;;  %594 = vperm.xlu1 %2359, %v538_v15  }
  0x1c   : > { %650 = vmatpush.msrb.mxu1 %v621_v16  ;;  %2326 = vmatpush.msra.mxu3 %v546_v7 }
  0x1d   : > { %703 = vmatpush.msrb.mxu2 %v674_v17  ;;  %2267 = vmatmul.msk.f32.vlgmr.msra.gmra.mxu3 %vm550_vm0, %v545_v23  ;;  %v2386_v23 = vmov 2102212464  }
  0x1e   : > { %1357 = vperm.xlu0 %2358, %v1347_v18   ;;  %651 = vmatpush.msrb.mxu1 %v620_v19 }
  0x1f   : > { %704 = vmatpush.msrb.mxu2 %v673_v20  ;;  %2268 = vmatmul.msk.f32.vlgmr.msrb.gmra.mxu1 %vm550_vm0, %v616_v21 }
  0x20   : > { %2272 = vmatmul.msk.f32.vlgmr.msrb.gmra.mxu2 %vm550_vm0, %v669_v22 }
  0x23   : > { %1352 = vperm.xlu1 %2359, %v1346_v24  }
  0x26   : > { %2046 = vperm.xlu0 %2358, %v2036_v25  }
  0x27   : > { %2269 = vmatmul.msk.f32.gmra.mxu1 %vm550_vm0, %v617_v26 }
  0x28   : > { %2273 = vmatmul.msk.f32.gmra.mxu2 %vm550_vm0, %v670_v27  ;;  %v3572_v27 = vmov 920167782  }
  0x2b   : > { %2051 = vperm.xlu1 %2359, %v2037_v28  }
  0x2f   : > { %2270 = vmatmul.msk.f32.gmra.mxu1 %vm550_vm0, %v618_v29 }
  0x30   : > { %2274 = vmatmul.msk.f32.gmra.mxu2 %vm550_vm0, %v671_v30 }
  0x37   : > { %2271 = vmatmul.msk.f32.gmra.mxu1 %vm550_vm0, %v619_v31 }
  0x38   : > { %2275 = vmatmul.msk.f32.gmra.mxu2 %vm550_vm0, %v672_v32 }
  0x80   : > { %v610_v41 = vpop.permute.xlu0 %609 }
  0x81   : > { %v600_v33 = vpop.permute.xlu1 %599 }
  0x88   : > { %v605_v52 = vpop.permute.xlu0 %604 }
  0x8d   : > { %v595_v35 = vpop.permute.xlu1 %594 }
  0x94   : > { %v583_v34 = vpop.f32.mrf.mxu1 }
  0x95   : > { %v613_v46 = vadd.f32 %v600_v33, %v583_v34 }
  0x97   : > { %v580_v36 = vpop.f32.mrf.mxu0 }
  0x98   : > { %v612_v38 = vadd.f32 %v595_v35, %v580_v36 }
  0x9b   : > { %v586_v37 = vpop.f32.mrf.mxu2 }
  0x9c   : > { %v653_v39 = vpop.f32.mrf.mxu1  ;;  %v614_v56 = vadd.f32 %v605_v52, %v586_v37  ;;  %v2388_v37 = vmov 1326507024  }
  0x9d   : > { %v665_v40 = vadd.f32 %v653_v39, %v612_v38 }
  0xa0   : > { %v589_v1 = vpop.f32.mrf.mxu3 }
  0xa1   : > { %v615_v7 = vadd.f32 %v610_v41, %v589_v1 }
  0xa3   : > { %v706_v42 = vpop.f32.mrf.mxu2 }
  0xa4   : > { %v2576_v43 = vadd.f32 %v706_v42, %v665_v40  ;;  %v656_v44 = vpop.f32.mrf.mxu1  ;;  %v2389_v40 = vmov 683565275  }
  0xa5   : > { %v666_v49 = vadd.f32 %v656_v44, %v613_v46  ;;  %v2390_v46 = vmov 2475754826  }
  0xa6   : > { %v725_v45 = vand.u32 2139095040, %v2576_v43 }
  0xa8   : > { %v726_v47 = vshrl.u32 %v725_v45, 23 }
  0xaa   : > { %v2276_v48 = vadd.s32 4294967169, %v726_v47 }
  0xab   : > { %v709_v50 = vpop.f32.mrf.mxu2 }
  0xac   : > { %v2579_v51 = vadd.f32 %v709_v50, %v666_v49  ;;  %v659_v53 = vpop.f32.mrf.mxu1  ;;  %v732_v54 = vadd.s32 1, %v2276_v48 }
  0xad   : > { %v667_v58 = vadd.f32 %v659_v53, %v614_v56  ;;  %v2391_v56 = vmov 2131351028  }
  0xae   : > { %v880_v55 = vand.u32 2139095040, %v2579_v51  ;;  %vm733_vm1 = vcmp.gt.s32.totalorder %v732_v54, 0  ;;  %v3569_v4 = vand.u32 2147483647, %v2579_v51 }
  0xaf   : > { %v734_v62 = vsel %vm733_vm1, %v732_v54, 0 }
  0xb0   : > { %v881_v57 = vshrl.u32 %v880_v55, 23  ;;  %v2586_v5 = vand.u32 31, %v734_v62  ;;  %v2593_v14 = vand.u32 8388607, %v3569_v4  ;;  %v2609_v22 = vshrl.u32 %v734_v62, 5 }
  0xb2   : > { %v2279_v59 = vadd.s32 4294967169, %v881_v57  ;;  %v2596_v15 = vsub.s32 32, %v2586_v5  ;;  %v2613_v24 = vshll.u32 %v2386_v23, %v2586_v5 }
  0xb3   : > { %v712_v60 = vpop.f32.mrf.mxu2 }
  0xb4   : > { %v2582_v61 = vadd.f32 %v712_v60, %v667_v58  ;;  %v887_v63 = vadd.s32 1, %v2279_v59  ;;  %v662_v3 = vpop.f32.mrf.mxu1  ;;  %v2618_v28 = vshrl.u32 %v3572_v27, %v2596_v15 }
  0xb5   : > { %v668_v12 = vadd.f32 %v662_v3, %v615_v7 }
  0xb6   : > { %v1035_v2 = vand.u32 2139095040, %v2582_v61  ;;  %vm888_vm2 = vcmp.gt.s32.totalorder %v887_v63, 0  ;;  %v3570_v9 = vand.u32 2147483647, %v2582_v61 }
  0xb7   : > { %v889_v6 = vsel %vm888_vm2, %v887_v63, 0 }
  0xb8   : > { %v1036_v8 = vshrl.u32 %v1035_v2, 23  ;;  %v2589_v10 = vand.u32 31, %v889_v6  ;;  %v2602_v18 = vand.u32 8388607, %v3570_v9  ;;  %v2620_v29 = vshrl.u32 %v889_v6, 5 }
  0xba   : > { %v2282_v11 = vadd.s32 4294967169, %v1036_v8  ;;  %v2605_v19 = vsub.s32 32, %v2589_v10  ;;  %v903_v32 = vshll.u32 %v2386_v23, %v2589_v10  ;;  %v2626_v33 = vshll.u32 %v3572_v27, %v2589_v10 }
  0xbb   : > { %v715_v13 = vpop.f32.mrf.mxu2  ;;  %v1040_v35 = vor.u32 8388608, %v2602_v18  ;;  %v894_v41 = vshll.u32 %v2389_v40, %v2589_v10 }
  0xbc   : > { %v1042_v16 = vadd.s32 1, %v2282_v11  ;;  %v2598_v17 = vadd.f32 %v715_v13, %v668_v12  ;;  %v904_v36 = vshrl.u32 %v3572_v27, %v2605_v19  ;;  %v2635_v38 = vshrl.u32 %v2388_v37, %v2605_v19 }
  0xbd   : > { %v895_v47 = vshrl.u32 %v2390_v46, %v2605_v19 }
  0xbe   : > { %vm1043_vm3 = vcmp.gt.s32.totalorder %v1042_v16, 0  ;;  %v1190_v20 = vand.u32 2139095040, %v2598_v17  ;;  %v3571_v21 = vand.u32 2147483647, %v2598_v17  ;;  %v2655_v63 = vor.u32 %v904_v36, %v903_v32 }
  0xbf   : > { %v1044_v25 = vsel %vm1043_vm3, %v1042_v16, 0  ;;  %v908_v1 = vor.u32 %v2635_v38, %v2626_v33  ;;  %v2664_v8 = vor.u32 %v895_v47, %v894_v41  ;;  %vm912_vm3 = vcmp.lt.s32.totalorder %v2620_v29, 4 }
  0xc0   : > { %v1046_v30 = vand.u32 31, %v1044_v25  ;;  %v1191_v31 = vshrl.u32 %v1190_v20, 23  ;;  %v1194_v34 = vand.u32 8388607, %v3571_v21  ;;  %v2646_v53 = vshrl.u32 %v1044_v25, 5 }
  0xc2   : > { %v1047_v39 = vsub.s32 32, %v1046_v30  ;;  %v1058_v42 = vshll.u32 %v2386_v23, %v1046_v30  ;;  %v2285_v44 = vadd.s32 4294967169, %v1191_v31  ;;  %v1195_v45 = vor.u32 8388608, %v1194_v34 }
  0xc3   : > { %v1061_v49 = vshll.u32 %v3572_v27, %v1046_v30  ;;  %v1049_v55 = vshll.u32 %v2389_v40, %v1046_v30  ;;  %v1052_v62 = vshll.u32 %v2390_v46, %v1046_v30  ;;  %vm1067_vm5 = vcmp.lt.s32.totalorder %v2646_v53, 4 }
  0xc4   : > { %v1059_v48 = vshrl.u32 %v3572_v27, %v1047_v39  ;;  %v1062_v50 = vshrl.u32 %v2388_v37, %v1047_v39  ;;  %v1050_v52 = vshrl.u32 %v2390_v46, %v1047_v39  ;;  %v1197_v54 = vadd.s32 1, %v2285_v44 }
  0xc5   : > { %v1053_v57 = vshrl.u32 %v2391_v56, %v1047_v39  ;;  %v2652_v60 = vshll.u32 %v1195_v45, 8  ;;  %v1056_v2 = vshrl.u32 %v2386_v23, %v1047_v39  ;;  %v2668_v12 = vshrl.u32 %v2389_v40, %v1047_v39 }
  0xc6   : > { %v2650_v58 = vor.u32 %v1059_v48, %v1058_v42  ;;  %v1063_v59 = vor.u32 %v1062_v50, %v1061_v49  ;;  %vm1198_vm4 = vcmp.gt.s32.totalorder %v1197_v54, 0  ;;  %v2660_v6 = vor.u32 %v1050_v52, %v1049_v55 }
  0xc7   : > { %v1199_v3 = vsel %vm1198_vm4, %v1197_v54, 0  ;;  %v2662_v7 = vor.u32 %v1053_v57, %v1052_v62  ;;  %v1055_v13 = vshll.u32 %v2391_v56, %v1046_v30  ;;  %v1236_v25 = vand.u32 65535, %v2652_v60 }
  0xc8   : > { %v1201_v11 = vand.u32 31, %v1199_v3  ;;  %v1073_v16 = vsel %vm1067_vm5, %v2650_v58, 920167782  ;;  %v1077_v20 = vsel %vm1067_vm5, %v1063_v59, 1326507024  ;;  %v1237_v31 = vshrl.u32 %v2652_v60, 16 }
  0xc9   : > { %v1200_v32 = vshrl.u32 %v1199_v3, 5  ;;  %v1057_v36 = vor.u32 %v1056_v2, %v1055_v13  ;;  %vm1064_vm6 = vcmp.lt.s32.totalorder %v2646_v53, 1  ;;  %vm1066_vm7 = vcmp.lt.s32.totalorder %v2646_v53, 3 }
  0xca   : > { %v1202_v34 = vsub.s32 32, %v1201_v11  ;;  %v1213_v39 = vshll.u32 %v2386_v23, %v1201_v11  ;;  %v1216_v30 = vshll.u32 %v3572_v27, %v1201_v11  ;;  %v1072_v41 = vsel %vm1064_vm6, %v2660_v6, %v2662_v7 }
  0xcb   : > { %v1204_v45 = vshll.u32 %v2389_v40, %v1201_v11  ;;  %v1207_v48 = vshll.u32 %v2390_v46, %v1201_v11  ;;  %v1210_v50 = vshll.u32 %v2391_v56, %v1201_v11  ;;  %vm1222_vm8 = vcmp.lt.s32.totalorder %v1200_v32, 4 }
  0xcc   : > { %v1214_v42 = vshrl.u32 %v3572_v27, %v1202_v34  ;;  %v1217_v44 = vshrl.u32 %v2388_v37, %v1202_v34  ;;  %v1205_v47 = vshrl.u32 %v2390_v46, %v1202_v34  ;;  %v1208_v49 = vshrl.u32 %v2391_v56, %v1202_v34 }
  0xcd   : > { %v1211_v52 = vshrl.u32 %v2386_v23, %v1202_v34  ;;  %v1203_v59 = vshrl.u32 %v2389_v40, %v1202_v34  ;;  %vm1219_vm9 = vcmp.lt.s32.totalorder %v1200_v32, 1  ;;  %vm1220_vm10 = vcmp.lt.s32.totalorder %v1200_v32, 2 }
  0xce   : > { %v1215_v54 = vor.u32 %v1214_v42, %v1213_v39  ;;  %v1218_v55 = vor.u32 %v1217_v44, %v1216_v30  ;;  %v1206_v57 = vor.u32 %v1205_v47, %v1204_v45  ;;  %v1209_v62 = vor.u32 %v1208_v49, %v1207_v48 }
  0xcf   : > { %v1212_v2 = vor.u32 %v1211_v52, %v1210_v50  ;;  %vm1221_vm11 = vcmp.lt.s32.totalorder %v1200_v32, 3  ;;  %v1074_v30 = vsel %vm1066_vm7, %v1057_v36, %v1073_v16  ;;  %vm1065_vm12 = vcmp.lt.s32.totalorder %v2646_v53, 2 }
  0xd0   : > { %v1228_v3 = vsel %vm1222_vm8, %v1215_v54, 920167782  ;;  %v1232_v13 = vsel %vm1222_vm8, %v1218_v55, 1326507024  ;;  %v1227_v9 = vsel %vm1219_vm9, %v1206_v57, %v1209_v62  ;;  %v1223_v11 = vsel %vm1219_vm9, %v1203_v59, %v1206_v57 }
  0xd1   : > { %v1224_v4 = vsel %vm1222_vm8, %v1212_v2, 2102212464  ;;  %v1229_v21 = vsel %vm1221_vm11, %v1212_v2, %v1228_v3  ;;  %v1231_v27 = vsel %vm1219_vm9, %v1209_v62, %v1212_v2  ;;  %v1233_v39 = vsel %vm1221_vm11, %v1215_v54, %v1232_v13 }
  0xd2   : > { %v1230_v26 = vsel %vm1220_vm10, %v1227_v9, %v1229_v21  ;;  %v1225_v42 = vsel %vm1221_vm11, %v1209_v62, %v1224_v4  ;;  %v1234_v34 = vsel %vm1220_vm10, %v1231_v27, %v1233_v39  ;;  %v2702_v49 = vsel %vm1067_vm5, %v1057_v36, 2102212464 }
  0xd3   : > { %v1260_v44 = vand.u32 65535, %v1230_v26  ;;  %v1261_v45 = vshrl.u32 %v1230_v26, 16  ;;  %v1238_v47 = vand.u32 65535, %v1234_v34  ;;  %v1239_v48 = vshrl.u32 %v1234_v34, 16 }
  0xd4   : > { %v2706_v9 = vsel %vm1065_vm12, %v1072_v41, %v1074_v30  ;;  %v1076_v4 = vsel %vm1064_vm6, %v2662_v7, %v1057_v36  ;;  %v2712_v21 = vsel %vm1220_vm10, %v1223_v11, %v1225_v42  ;;  %v1078_v16 = vsel %vm1066_vm7, %v2650_v58, %v1077_v20 }
  0xd5   : > { %v1263_v50 = vmul.u32 %v1261_v45, %v1236_v25  ;;  %v1264_v52 = vmul.u32 %v1260_v44, %v1237_v31  ;;  %v1241_v26 = vmul.u32 %v1239_v48, %v1236_v25  ;;  %v1242_v27 = vmul.u32 %v1238_v47, %v1237_v31 }
  0xd6   : > { %v1240_v54 = vmul.u32 %v1238_v47, %v1236_v25  ;;  %v1262_v55 = vmul.u32 %v1260_v44, %v1236_v25  ;;  %v1265_v57 = vmul.u32 %v1261_v45, %v1237_v31  ;;  %v1243_v62 = vmul.u32 %v1239_v48, %v1237_v31 }
  0xd7   : > { %v1266_v59 = vshll.u32 %v1263_v50, 16  ;;  %v1244_v41 = vshll.u32 %v1241_v26, 16  ;;  %v1267_v2 = vshrl.u32 %v1263_v50, 16  ;;  %v1268_v3 = vshll.u32 %v1264_v52, 16 }
  0xd8   : > { %v1079_v32 = vsel %vm1065_vm12, %v1076_v4, %v1078_v16  ;;  %v2721_v36 = vshll.u32 %v1040_v35, 8  ;;  %v1246_v11 = vshll.u32 %v1242_v27, 16  ;;  %v1245_v47 = vshrl.u32 %v1241_v26, 16 }
  0xd9   : > { %vm1270_vm13 = vc.u32 %v1262_v55, %v1266_v59  ;;  %v1272_v13 = vadd.s32 %v1266_v59, %v1262_v55  ;;  %vm1248_vm14 = vc.u32 %v1240_v54, %v1244_v41  ;;  %v1250_v58 = vadd.s32 %v1244_v41, %v1240_v54 }
  0xda   : > { %v1271_v20 = vsel %vm1270_vm13, 1, %v2385_v0  ;;  %v1249_v25 = vsel %vm1248_vm14, 1, %v2385_v0  ;;  %v1083_v39 = vand.u32 65535, %v1079_v32  ;;  %v1081_v34 = vand.u32 65535, %v2721_v36 }
  0xdb   : > { %v1273_v31 = vadd.s32 %v1271_v20, %v1265_v57  ;;  %vm1274_vm15 = vc.u32 %v1272_v13, %v1268_v3  ;;  %v1251_v30 = vadd.s32 %v1249_v25, %v1243_v62  ;;  %vm1252_vm1 = vc.u32 %v1250_v58, %v1246_v11 }
  0xdc   : > { %v1275_v42 = vsel %vm1274_vm15, 1, %v2385_v0  ;;  %v1253_v18 = vsel %vm1252_vm1, 1, %v2385_v0  ;;  %v1082_v44 = vshrl.u32 %v2721_v36, 16  ;;  %v1084_v45 = vshrl.u32 %v1079_v32, 16 }
  0xdd   : > { %v1277_v35 = vadd.s32 %v1275_v42, %v1273_v31  ;;  %v1255_v48 = vadd.s32 %v1253_v18, %v1251_v30  ;;  %v1105_v50 = vand.u32 65535, %v2706_v9  ;;  %v1106_v4 = vshrl.u32 %v2706_v9, 16 }
  0xde   : > { %v1269_v16 = vshrl.u32 %v1264_v52, 16  ;;  %v1086_v55 = vmul.u32 %v1084_v45, %v1081_v34  ;;  %v1087_v57 = vmul.u32 %v1083_v39, %v1082_v44  ;;  %v1247_v59 = vshrl.u32 %v1242_v27, 16 }
  0xdf   : > { %v1278_v54 = vadd.s32 %v1277_v35, %v1267_v2  ;;  %v1256_v62 = vadd.s32 %v1255_v48, %v1245_v47  ;;  %v1280_v41 = vmul.u32 %v2652_v60, %v2712_v21  ;;  %v1108_v11 = vmul.u32 %v1106_v4, %v1081_v34 }
  0xe0   : > { %v1085_v20 = vmul.u32 %v1083_v39, %v1081_v34  ;;  %v1089_v25 = vshll.u32 %v1086_v55, 16  ;;  %v1109_v32 = vmul.u32 %v1105_v50, %v1082_v44  ;;  %v2735_v31 = vadd.s32 %v1272_v13, %v1268_v3 }
  0xe1   : > { %v1279_v58 = vadd.s32 %v1278_v54, %v1269_v16  ;;  %v2733_v26 = vadd.s32 %v1256_v62, %v1247_v59  ;;  %v1088_v30 = vmul.u32 %v1084_v45, %v1082_v44  ;;  %v1111_v9 = vshll.u32 %v1108_v11, 16 }
  0xe2   : > { %v1091_v2 = vshll.u32 %v1087_v57, 16  ;;  %vm1093_vm2 = vc.u32 %v1085_v20, %v1089_v25  ;;  %v1095_v42 = vadd.s32 %v1089_v25, %v1085_v20  ;;  %v1107_v21 = vmul.u32 %v1105_v50, %v1081_v34 }
  0xe3   : > { %v1283_v52 = vadd.s32 1, %v1279_v58  ;;  %vm1282_vm4 = vc.u32 %v2733_v26, %v2735_v31  ;;  %v1094_v60 = vsel %vm1093_vm2, 1, %v2385_v0  ;;  %v1110_v27 = vmul.u32 %v1106_v4, %v1082_v44 }
  0xe4   : > { %v1096_v18 = vadd.s32 %v1094_v60, %v1088_v30  ;;  %vm1097_vm5 = vc.u32 %v1095_v42, %v1091_v2  ;;  %v1113_v3 = vshll.u32 %v1109_v32, 16  ;;  %vm1115_vm8 = vc.u32 %v1107_v21, %v1111_v9 }
  0xe5   : > { %v1284_v39 = vsel %vm1282_vm4, %v1283_v52, %v1279_v58  ;;  %v1098_v35 = vsel %vm1097_vm5, 1, %v2385_v0  ;;  %v1117_v45 = vadd.s32 %v1111_v9, %v1107_v21  ;;  %v1090_v47 = vshrl.u32 %v1086_v55, 16 }
  0xe6   : > { %v1285_v13 = vadd.s32 %v1284_v39, %v1280_v41  ;;  %v1092_v48 = vshrl.u32 %v1087_v57, 16  ;;  %v1100_v16 = vadd.s32 %v1098_v35, %v1096_v18  ;;  %v1116_v54 = vsel %vm1115_vm8, 1, %v2385_v0 }
  0xe7   : > { %v1112_v62 = vshrl.u32 %v1108_v11, 16  ;;  %v1118_v20 = vadd.s32 %v1116_v54, %v1110_v27  ;;  %vm1119_vm9 = vc.u32 %v1117_v45, %v1113_v3  ;;  %v897_v50 = vshll.u32 %v2390_v46, %v2589_v10 }
  0xe8   : > { %v1286_v59 = vadd.s32 536870912, %v1285_v13  ;;  %v1101_v34 = vadd.s32 %v1100_v16, %v1090_v47  ;;  %v1120_v44 = vsel %vm1119_vm9, 1, %v2385_v0  ;;  %v898_v4 = vshrl.u32 %v2391_v56, %v2605_v19 }
  0xe9   : > { %v1122_v55 = vadd.s32 %v1120_v44, %v1118_v20  ;;  %v900_v57 = vshll.u32 %v2391_v56, %v2589_v10  ;;  %v901_v11 = vshrl.u32 %v2386_v23, %v2605_v19  ;;  %v1068_v58 = vsel %vm1064_vm6, %v2668_v12, %v2660_v6 }
  0xea   : > { %v2748_v41 = vshrl.u32 %v1286_v59, 30  ;;  %v1070_v25 = vsel %vm1066_vm7, %v2662_v7, %v2702_v49  ;;  %v1102_v30 = vadd.s32 %v1101_v34, %v1092_v48  ;;  %v2762_v9 = vor.u32 %v898_v4, %v897_v50 }
  0xeb   : > { %v1114_v2 = vshrl.u32 %v1109_v32, 16  ;;  %v1123_v10 = vadd.s32 %v1122_v55, %v1112_v62  ;;  %v2765_v42 = vor.u32 %v901_v11, %v900_v57  ;;  %v2769_v60 = vshrl.u32 %v2388_v37, %v2596_v15 }
  0xec   : > { %v1288_v52 = vshll.u32 %v2748_v41, 30  ;;  %v918_v6 = vsel %vm912_vm3, %v2655_v63, 920167782  ;;  %v922_v7 = vsel %vm912_vm3, %v908_v1, 1326507024  ;;  %v1121_v12 = vadd.s32 %v1117_v45, %v1113_v3 }
  0xed   : > { %v1071_v32 = vsel %vm1065_vm12, %v1068_v58, %v1070_v25  ;;  %v1124_v21 = vadd.s32 %v1123_v10, %v1114_v2  ;;  %vm909_vm6 = vcmp.lt.s32.totalorder %v2620_v29, 1  ;;  %vm911_vm10 = vcmp.lt.s32.totalorder %v2620_v29, 3 }
  0xee   : > { %v1289_v49 = vsub.s32 %v1285_v13, %v1288_v52  ;;  %vm1127_vm7 = vc.u32 %v1102_v30, %v1121_v12  ;;  %v917_v27 = vsel %vm909_vm6, %v2664_v8, %v2762_v9  ;;  %v921_v33 = vsel %vm909_vm6, %v2762_v9, %v2765_v42 }
  0xef   : > { %v1128_v53 = vadd.s32 1, %v1124_v21  ;;  %v919_v1 = vsel %vm911_vm10, %v2765_v42, %v918_v6  ;;  %v1125_v39 = vmul.u32 %v2721_v36, %v1071_v32  ;;  %vm910_vm12 = vcmp.lt.s32.totalorder %v2620_v29, 2 }
  0xf0   : > { %vm1290_vm11 = vcmp.lt.s32.totalorder %v1289_v49, 0  ;;  %v1291_v38 = vsub.s32 0, %v1289_v49  ;;  %v923_v18 = vsel %vm911_vm10, %v2655_v63, %v922_v7  ;;  %v3574_v3 = vor.u32 8388608, %v2593_v14 }
  0xf1   : > { %v3575_v35 = vmov 920167782   ;;  %v1129_v48 = vsel %vm1127_vm7, %v1128_v53, %v1124_v21  ;;  %v924_v16 = vsel %vm910_vm12, %v921_v33, %v923_v18  ;;  %v2811_v36 = vor.u32 %v2618_v28, %v2613_v24 }
  0xf2   : > { %v2801_v13 = vshll.u32 %v3574_v3, 8  ;;  %v2805_v45 = vshll.u32 %v3575_v35, %v2586_v5  ;;  %v1292_v47 = vsel %vm1290_vm11, %v1291_v38, %v1289_v49  ;;  %v1130_v59 = vadd.s32 %v1129_v48, %v1125_v39 }
  0xf3   : > { %v1293_v54 = vclz %v1292_v47  ;;  %v2815_v14 = vsel %vm910_vm12, %v917_v27, %v919_v1  ;;  %vm1189_vm13 = vcmp.lt.s32.totalorder %v2598_v17, 0  ;;  %v893_v62 = vshrl.u32 %v2389_v40, %v2605_v19 }
  0xf4   : > { %v753_v63 = vor.u32 %v2769_v60, %v2805_v45  ;;  %v928_v20 = vand.u32 65535, %v924_v16  ;;  %v1131_v44 = vadd.s32 536870912, %v1130_v59  ;;  %v926_v24 = vand.u32 65535, %v2801_v13 }
  0xf5   : > { %v2286_v34 = vadd.s32 4294967294, %v1293_v54  ;;  %v929_v28 = vshrl.u32 %v924_v16, 16  ;;  %v3576_v50 = vand.u32 2147483647, %v2598_v17  ;;  %v1311_v55 = vsub.s32 4, %v2748_v41 }
  0xf6   : > { %v927_v57 = vshrl.u32 %v2801_v13, 16  ;;  %v951_v11 = vshrl.u32 %v2815_v14, 16  ;;  %v1281_v19 = vadd.s32 %v2735_v31, %v2733_v26  ;;  %v2834_v58 = vshrl.u32 %v1131_v44, 30 }
  0xf7   : > { %vm2825_vm14 = vcmp.le.f32.partialorder %v3576_v50, 0.7853982  ;;  %vm2287_vm15 = vcmp.lt.s32.totalorder %v2286_v34, 0  ;;  %v931_v25 = vmul.u32 %v929_v28, %v926_v24  ;;  %v2836_v2 = vadd.s32 %v1121_v12, %v1102_v30 }
  0xf8   : > { %v1296_v52 = vsel %vm2287_vm15, 0, %v2286_v34  ;;  %v2838_v10 = vmul.u32 %v928_v20, %v927_v57  ;;  %v950_v6 = vand.u32 65535, %v2815_v14  ;;  %v1133_v21 = vshll.u32 %v2834_v58, 30 }
  0xf9   : > { %v1297_v7 = vsub.s32 32, %v1296_v52  ;;  %v1301_v32 = vsub.s32 4294967266, %v1296_v52  ;;  %v2845_v27 = vsel %vm909_vm6, %v893_v62, %v2664_v8  ;;  %v1312_v26 = vsel %vm1189_vm13, %v1311_v55, %v2748_v41 }
  0xfa   : > { %v930_v31 = vmul.u32 %v928_v20, %v926_v24  ;;  %v934_v30 = vshll.u32 %v931_v25, 16  ;;  %v953_v12 = vmul.u32 %v951_v11, %v926_v24  ;;  %v1298_v33 = vshll.u32 %v1289_v49, %v1296_v52 }
  0xfb   : > { %v1299_v38 = vshrl.u32 %v1281_v19, %v1297_v7  ;;  %v1302_v53 = vadd.s32 127, %v1301_v32  ;;  %v1134_v1 = vsub.s32 %v1130_v59, %v1133_v21  ;;  %v936_v39 = vshll.u32 %v2838_v10, 16 }
  0xfc   : > { %vm938_vm1 = vc.u32 %v930_v31, %v934_v30  ;;  %v940_v18 = vadd.s32 %v934_v30, %v930_v31  ;;  %v954_v3 = vmul.u32 %v950_v6, %v927_v57  ;;  %v933_v16 = vmul.u32 %v929_v28, %v927_v57 }
  0xfd   : > { %v1300_v47 = vor.u32 %v1299_v38, %v1298_v33  ;;  %v1303_v48 = vshll.u32 %v1302_v53, 23  ;;  %vm1135_vm2 = vcmp.lt.s32.totalorder %v1134_v1, 0  ;;  %v1136_v8 = vsub.s32 0, %v1134_v1 }
  0xfe   : > { %v939_v54 = vsel %vm938_vm1, 1, %v2385_v0  ;;  %vm942_vm4 = vc.u32 %v940_v18, %v936_v39  ;;  %v956_v41 = vshll.u32 %v953_v12, 16  ;;  %v1314_v49 = vsel %vm2825_vm14, 0, %v1312_v26 }
  0xff   : > { %v1304_v14 = vor.u32 4788187, %v1303_v48  ;;  %v1137_v62 = vsel %vm1135_vm2, %v1136_v8, %v1134_v1  ;;  %v914_v59 = vsel %vm912_vm3, %v2765_v42, 2102212464  ;;  %v941_v34 = vadd.s32 %v939_v54, %v933_v16 }
 0x100   : > { %v1138_v20 = vclz %v1137_v62  ;;  %v943_v44 = vsel %vm942_vm4, 1, %v2385_v0  ;;  %v952_v50 = vmul.u32 %v950_v6, %v926_v24  ;;  %v1307_v28 = vcvt.s32.f32 %v1300_v47 }
 0x101   : > { %v1305_v55 = vand.u32 2147483647, %v1304_v14  ;;  %v935_v19 = vshrl.u32 %v931_v25, 16  ;;  %v958_v52 = vshll.u32 %v954_v3, 16  ;;  %v945_v32 = vadd.s32 %v943_v44, %v941_v34 }
 0x102   : > { %v2283_v7 = vadd.s32 4294967294, %v1138_v20  ;;  %vm960_vm5 = vc.u32 %v952_v50, %v956_v41  ;;  %v962_v21 = vadd.s32 %v956_v41, %v952_v50  ;;  %v1331_v26 = vadd.s32 3, %v1314_v49 }
 0x103   : > { %v1308_v31 = vmul.f32 %v1307_v28, %v1305_v55  ;;  %v915_v30 = vsel %vm911_vm10, %v2762_v9, %v914_v59  ;;  %v955_v42 = vmul.u32 %v951_v11, %v927_v57  ;;  %v946_v33 = vadd.s32 %v945_v32, %v935_v19 }
 0x104   : > { %vm2284_vm3 = vcmp.lt.s32.totalorder %v2283_v7, 0  ;;  %v961_v38 = vsel %vm960_vm5, 1, %v2385_v0  ;;  %vm964_vm8 = vc.u32 %v962_v21, %v958_v52  ;;  %vm757_vm9 = vcmp.lt.s32.totalorder %v2609_v22, 4 }
 0x105   : > { %v1309_v24 = vxor.u32 2147483648, %v1308_v31  ;;  %v1141_v6 = vsel %vm2284_vm3, 0, %v2283_v7  ;;  %v963_v25 = vadd.s32 %v961_v38, %v955_v42  ;;  %v965_v53 = vsel %vm964_vm8, 1, %v2385_v0 }
 0x106   : > { %v1142_v39 = vsub.s32 32, %v1141_v6  ;;  %v1146_v18 = vsub.s32 4294967266, %v1141_v6  ;;  %v1156_v47 = vsub.s32 4, %v2834_v58  ;;  %v937_v48 = vshrl.u32 %v2838_v10, 16 }
 0x107   : > { %v1310_v9 = vsel %vm1189_vm13, %v1309_v24, %v1308_v31  ;;  %v1143_v57 = vshll.u32 %v1134_v1, %v1141_v6  ;;  %v957_v11 = vshrl.u32 %v953_v12, 16  ;;  %v967_v8 = vadd.s32 %v965_v53, %v963_v25 }
 0x108   : > { %v2871_v16 = vsel %vm2825_vm14, %v2598_v17, %v1310_v9  ;;  %v1144_v54 = vshrl.u32 %v2836_v2, %v1142_v39  ;;  %v1147_v41 = vadd.s32 127, %v1146_v18  ;;  %v2874_v14 = vadd.s32 %v946_v33, %v937_v48 }
 0x109   : > { %v1315_v49 = vmul.f32 %v2871_v16, %v2871_v16  ;;  %vm1034_vm6 = vcmp.lt.s32.totalorder %v2582_v61, 0  ;;  %v959_v10 = vshrl.u32 %v954_v3, 16  ;;  %v968_v62 = vadd.s32 %v967_v8, %v957_v11 }
 0x10a   : > { %v1145_v1 = vor.u32 %v1144_v54, %v1143_v57  ;;  %v1148_v12 = vshll.u32 %v1147_v41, 23  ;;  %v916_v4 = vsel %vm910_vm12, %v2845_v27, %v915_v30  ;;  %v2882_v59 = vadd.s32 %v962_v21, %v958_v52 }
 0x10b   : > { %v1316_v20 = vmul.f32 -0.001358992, %v1315_v49  ;;  %v1323_v2 = vmul.f32 -0.00019511016, %v1315_v49  ;;  %v1157_v34 = vsel %vm1034_vm6, %v1156_v47, %v2834_v58  ;;  %v969_v44 = vadd.s32 %v968_v62, %v959_v10 }
 0x10c   : > { %v2887_v50 = vand.u32 3, %v1331_v26  ;;  %v3579_v3 = vand.u32 2147483647, %v2582_v61  ;;  %v1149_v28 = vor.u32 4788187, %v1148_v12  ;;  %vm972_vm10 = vc.u32 %v2874_v14, %v2882_v59 }
 0x10d   : > { %v1317_v29 = vadd.f32 0.041655596, %v1316_v20  ;;  %v1324_v27 = vadd.f32 0.008332121, %v1323_v2  ;;  %v970_v19 = vmul.u32 %v2801_v13, %v916_v4  ;;  %v973_v52 = vadd.s32 1, %v969_v44 }
 0x10e   : > { %vm2891_vm7 = vcmp.le.f32.partialorder %v3579_v3, 0.7853982  ;;  %v1150_v7 = vand.u32 2147483647, %v1149_v28  ;;  %v1152_v58 = vcvt.s32.f32 %v1145_v1  ;;  %v722_v21 = vand.u32 2147483647, %v2576_v43 }
 0x10f   : > { %v1159_v32 = vsel %vm2891_vm7, 0, %v1157_v34  ;;  %v763_v31 = vsel %vm757_vm9, %v2811_v36, 920167782  ;;  %v1318_v26 = vmul.f32 %v1317_v29, %v1315_v49  ;;  %v1325_v30 = vmul.f32 %v1324_v27, %v1315_v49 }
 0x110   : > { %v974_v42 = vsel %vm972_vm10, %v973_v52, %v969_v44  ;;  %v767_v13 = vsel %vm757_vm9, %v753_v63, 1326507024  ;;  %v1153_v33 = vmul.f32 %v1152_v58, %v1150_v7  ;;  %v740_v24 = vshrl.u32 %v2390_v46, %v2596_v15 }
 0x111   : > { %v975_v38 = vadd.s32 %v974_v42, %v970_v19  ;;  %v1319_v6 = vadd.f32 -0.4999988, %v1318_v26  ;;  %v1326_v25 = vadd.f32 -0.16666654, %v1325_v30  ;;  %v1176_v53 = vadd.s32 3, %v1159_v32 }
 0x112   : > { %v743_v39 = vshrl.u32 %v2391_v56, %v2596_v15  ;;  %vm1334_vm11 = vcmp.eq.s32.totalorder %v2887_v50, 0  ;;  %vm1337_vm12 = vcmp.eq.s32.totalorder %v2887_v50, 2  ;;  %v1154_v18 = vxor.u32 2147483648, %v1153_v33 }
 0x113   : > { %v976_v60 = vadd.s32 536870912, %v975_v38  ;;  %v729_v45 = vand.u32 8388607, %v722_v21  ;;  %v739_v63 = vshll.u32 %v2389_v40, %v2586_v5  ;;  %v1320_v47 = vmul.f32 %v1319_v6, %v1315_v49 }
 0x114   : > { %v1327_v48 = vmul.f32 %v1326_v25, %v1315_v49  ;;  %vm1333_vm13 = vcmp.lt.s32.totalorder %v2887_v50, 2  ;;  %v742_v9 = vshll.u32 %v2390_v46, %v2586_v5  ;;  %v746_v57 = vshrl.u32 %v2386_v23, %v2596_v15 }
 0x115   : > { %vm1330_vm14 = vweird.f32 %v2598_v17  ;;  %v1155_v11 = vsel %vm1034_vm6, %v1154_v18, %v1153_v33  ;;  %v2927_v8 = vshrl.u32 %v976_v60, 30  ;;  %v2929_v54 = vor.u32 %v740_v24, %v739_v63 }
 0x116   : > { %v745_v41 = vshll.u32 %v2391_v56, %v2586_v5  ;;  %v1321_v49 = vadd.f32 1.0, %v1320_v47  ;;  %v1328_v10 = vadd.f32 1.0, %v1327_v48  ;;  %v1158_v62 = vsel %vm2891_vm7, %v2582_v61, %v1155_v11 }
 0x117   : > { %v2936_v1 = vor.u32 %v743_v39, %v742_v9  ;;  %v1160_v12 = vmul.f32 %v1158_v62, %v1158_v62  ;;  %v2938_v4 = vand.u32 3, %v1176_v53  ;;  %v978_v20 = vshll.u32 %v2927_v8, 30 }
 0x118   : > { %v730_v2 = vor.u32 8388608, %v729_v45  ;;  %v1329_v34 = vmul.f32 %v1328_v10, %v2871_v16  ;;  %v1338_v44 = vxor.u32 2147483648, %v1321_v49  ;;  %v2942_v3 = vor.u32 %v746_v57, %v745_v41 }
 0x119   : > { %vm754_vm15 = vcmp.lt.s32.totalorder %v2609_v22, 1  ;;  %v1161_v5 = vmul.f32 -0.001358992, %v1160_v12  ;;  %v1168_v28 = vmul.f32 -0.00019511016, %v1160_v12  ;;  %v979_v29 = vsub.s32 %v975_v38, %v978_v20 }
 0x11a   : > { %vm756_vm1 = vcmp.lt.s32.totalorder %v2609_v22, 3  ;;  %v1335_v55 = vxor.u32 2147483648, %v1329_v34  ;;  %vm755_vm2 = vcmp.lt.s32.totalorder %v2609_v22, 2  ;;  %v762_v27 = vsel %vm754_vm15, %v2929_v54, %v2936_v1 }
 0x11b   : > { %v768_v16 = vsel %vm756_vm1, %v2811_v36, %v767_v13  ;;  %v1162_v19 = vadd.f32 0.041655596, %v1161_v5  ;;  %v1169_v52 = vadd.f32 0.008332121, %v1168_v28  ;;  %vm980_vm4 = vcmp.lt.s32.totalorder %v979_v29, 0 }
 0x11c   : > { %v981_v7 = vsub.s32 0, %v979_v29  ;;  %v1336_v58 = vsel %vm1334_vm11, %v1321_v49, %v1335_v55  ;;  %v1339_v32 = vsel %vm1337_vm12, %v1338_v44, %v1329_v34  ;;  %v764_v26 = vsel %vm756_vm1, %v2942_v3, %v763_v31 }
 0x11d   : > { %v766_v30 = vsel %vm754_vm15, %v2936_v1, %v2942_v3  ;;  %v1340_v36 = vsel %vm1333_vm13, %v1336_v58, %v1339_v32  ;;  %v1163_v42 = vmul.f32 %v1162_v19, %v1160_v12  ;;  %v1170_v13 = vmul.f32 %v1169_v52, %v1160_v12 }
 0x11e   : > { %v982_v33 = vsel %vm980_vm4, %v981_v7, %v979_v29  ;;  %v1341_v38 = vsel %vm1330_vm14, nan, %v1340_v36  ;;  %v769_v6 = vsel %vm755_vm2, %v766_v30, %v768_v16  ;;  %v2971_v25 = vshll.u32 %v730_v2, 8 }
 0x11f   : > { %v983_v24 = vclz %v982_v33  ;;  %1394 = vmatpush.msrb.mxu3 %v1341_v38  ;;  %v1164_v31 = vadd.f32 -0.4999988, %v1163_v42  ;;  %v1171_v53 = vadd.f32 -0.16666654, %v1170_v13  ;;  %vm1179_vm5 = vcmp.eq.s32.totalorder %v2938_v4, 0 }
 0x120   : > { %v765_v50 = vsel %vm755_vm2, %v762_v27, %v764_v26  ;;  %vm1178_vm3 = vcmp.lt.s32.totalorder %v2938_v4, 2  ;;  %v773_v17 = vand.u32 65535, %v769_v6  ;;  %v774_v45 = vshrl.u32 %v769_v6, 16 }
 0x121   : > { %v2280_v39 = vadd.s32 4294967294, %v983_v24  ;;  %v1165_v18 = vmul.f32 %v1164_v31, %v1160_v12  ;;  %v1172_v60 = vmul.f32 %v1171_v53, %v1160_v12  ;;  %vm1182_vm8 = vcmp.eq.s32.totalorder %v2938_v4, 2 }
 0x122   : > { %v971_v63 = vadd.s32 %v2882_v59, %v2874_v14  ;;  %v771_v47 = vand.u32 65535, %v2971_v25  ;;  %v772_v11 = vshrl.u32 %v2971_v25, 16  ;;  %v796_v12 = vshrl.u32 %v765_v50, 16 }
 0x123   : > { %vm2281_vm6 = vcmp.lt.s32.totalorder %v2280_v39, 0  ;;  %v1166_v48 = vadd.f32 1.0, %v1165_v18  ;;  %v1173_v9 = vadd.f32 1.0, %v1172_v60  ;;  %v795_v19 = vand.u32 65535, %v765_v50 }
 0x124   : > { %v986_v57 = vsel %vm2281_vm6, 0, %v2280_v39  ;;  %v776_v10 = vmul.u32 %v774_v45, %v771_v47  ;;  %v775_v34 = vmul.u32 %v773_v17, %v771_v47  ;;  %v777_v44 = vmul.u32 %v773_v17, %v772_v11 }
 0x125   : > { %v987_v41 = vsub.s32 32, %v986_v57  ;;  %v991_v49 = vsub.s32 4294967266, %v986_v57  ;;  %v1174_v20 = vmul.f32 %v1173_v9, %v1158_v62  ;;  %v1183_v2 = vxor.u32 2147483648, %v1166_v48 }
 0x126   : > { %v988_v5 = vshll.u32 %v979_v29, %v986_v57  ;;  %v779_v14 = vshll.u32 %v776_v10, 16  ;;  %v778_v16 = vmul.u32 %v774_v45, %v772_v11  ;;  %v781_v32 = vshll.u32 %v777_v44, 16 }
 0x127   : > { %v989_v28 = vshrl.u32 %v971_v63, %v987_v41  ;;  %v992_v55 = vadd.s32 127, %v991_v49  ;;  %v1180_v59 = vxor.u32 2147483648, %v1174_v20  ;;  %v1184_v27 = vsel %vm1182_vm8, %v1183_v2, %v1174_v20 }
 0x128   : > { %vm783_vm7 = vc.u32 %v775_v34, %v779_v14  ;;  %v785_v58 = vadd.s32 %v779_v14, %v775_v34  ;;  %v798_v29 = vmul.u32 %v796_v12, %v771_v47  ;;  %vm1175_vm10 = vweird.f32 %v2582_v61 }
 0x129   : > { %v990_v52 = vor.u32 %v989_v28, %v988_v5  ;;  %v993_v7 = vshll.u32 %v992_v55, 23  ;;  %v1181_v62 = vsel %vm1179_vm5, %v1166_v48, %v1180_v59  ;;  %v784_v26 = vsel %vm783_vm7, 1, %v2385_v0 }
 0x12a   : > { %v1185_v30 = vsel %vm1178_vm3, %v1181_v62, %v1184_v27  ;;  %v786_v42 = vadd.s32 %v784_v26, %v778_v16  ;;  %vm787_vm11 = vc.u32 %v785_v58, %v781_v32  ;;  %v797_v33 = vmul.u32 %v795_v19, %v771_v47 }
 0x12b   : > { %v994_v36 = vor.u32 4788187, %v993_v7  ;;  %v1186_v13 = vsel %vm1175_vm10, nan, %v1185_v30  ;;  %v799_v38 = vmul.u32 %v795_v19, %v772_v11  ;;  %v997_v6 = vcvt.s32.f32 %v990_v52 }
 0x12c   : > { %1395 = vmatpush.msrb.mxu3 %v1186_v13  ;;  %v788_v31 = vsel %vm787_vm11, 1, %v2385_v0  ;;  %v801_v53 = vshll.u32 %v798_v29, 16  ;;  %v780_v39 = vshrl.u32 %v776_v10, 16  ;;  %v800_v18 = vmul.u32 %v796_v12, %v772_v11 }
 0x12d   : > { %v995_v24 = vand.u32 2147483647, %v994_v36  ;;  %v790_v50 = vadd.s32 %v788_v31, %v786_v42  ;;  %v803_v61 = vshll.u32 %v799_v38, 16  ;;  %v738_v17 = vshrl.u32 %v2389_v40, %v2596_v15 }
 0x12e   : > { %vm805_vm12 = vc.u32 %v797_v33, %v801_v53  ;;  %v807_v4 = vadd.s32 %v801_v53, %v797_v33  ;;  %v759_v48 = vsel %vm757_vm9, %v2942_v3, 2102212464  ;;  %v3582_v57 = vand.u32 2147483647, %v2579_v51 }
 0x12f   : > { %v998_v60 = vmul.f32 %v997_v6, %v995_v24  ;;  %v791_v45 = vadd.s32 %v790_v50, %v780_v39  ;;  %v806_v63 = vsel %vm805_vm12, 1, %v2385_v0  ;;  %vm879_vm4 = vcmp.lt.s32.totalorder %v2579_v51, 0 }
 0x130   : > { %v808_v9 = vadd.s32 %v806_v63, %v800_v18  ;;  %vm809_vm13 = vc.u32 %v807_v4, %v803_v61  ;;  %vm2999_vm14 = vcmp.le.f32.partialorder %v3582_v57, 0.7853982  ;;  %v782_v41 = vshrl.u32 %v777_v44, 16 }
 0x131   : > { %v999_v47 = vxor.u32 2147483648, %v998_v60  ;;  %v810_v15 = vsel %vm809_vm13, 1, %v2385_v0  ;;  %v758_v3 = vsel %vm754_vm15, %v738_v17, %v2929_v54  ;;  %v802_v10 = vshrl.u32 %v798_v29, 16 }
 0x132   : > { %v812_v12 = vadd.s32 %v810_v15, %v808_v9  ;;  %v1001_v20 = vsub.s32 4, %v2927_v8  ;;  %v760_v34 = vsel %vm756_vm1, %v2936_v1, %v759_v48  ;;  %v792_v44 = vadd.s32 %v791_v45, %v782_v41 }
 0x133   : > { %v1000_v49 = vsel %vm879_vm4, %v999_v47, %v998_v60  ;;  %v804_v28 = vshrl.u32 %v799_v38, 16  ;;  %v811_v14 = vadd.s32 %v807_v4, %v803_v61  ;;  %v761_v54 = vsel %vm755_vm2, %v758_v3, %v760_v34 }
 0x134   : > { %v1003_v2 = vsel %vm2999_vm14, %v2579_v51, %v1000_v49  ;;  %v813_v55 = vadd.s32 %v812_v12, %v802_v10  ;;  %v1002_v19 = vsel %vm879_vm4, %v1001_v20, %v2927_v8  ;;  %v815_v1 = vmul.u32 %v2971_v25, %v761_v54 }
 0x135   : > { %v1005_v5 = vmul.f32 %v1003_v2, %v1003_v2  ;;  %vm817_vm9 = vc.u32 %v792_v44, %v811_v14  ;;  %v1004_v62 = vsel %vm2999_vm14, 0, %v1002_v19  ;;  %vm1020_vm3 = vweird.f32 %v2579_v51 }
 0x136   : > { %v814_v16 = vadd.s32 %v813_v55, %v804_v28  ;;  %v1021_v42 = vadd.s32 3, %v1004_v62  ;;  %v816_v57 = vadd.s32 %v811_v14, %v792_v44  ;;  %vm724_vm6 = vcmp.lt.s32.totalorder %v2576_v43, 0 }
 0x137   : > { %v1006_v59 = vmul.f32 -0.001358992, %v1005_v5  ;;  %v1013_v27 = vmul.f32 -0.00019511016, %v1005_v5  ;;  %vm723_vm7 = vcmp.le.f32.partialorder %v722_v21, 0.7853982  ;;  %vm865_vm13 = vweird.f32 %v2576_v43 }
 0x138   : > { %v818_v58 = vadd.s32 1, %v814_v16  ;;  %v1022_v31 = vand.u32 3, %v1021_v42 }
 0x139   : > { %v1007_v52 = vadd.f32 0.041655596, %v1006_v59  ;;  %v1014_v7 = vadd.f32 0.008332121, %v1013_v27 }
 0x13a   : > { %v819_v29 = vsel %vm817_vm9, %v818_v58, %v814_v16  ;;  %vm1024_vm15 = vcmp.eq.s32.totalorder %v1022_v31, 0  ;;  %vm1027_vm1 = vcmp.eq.s32.totalorder %v1022_v31, 2  ;;  %vm1023_vm5 = vcmp.lt.s32.totalorder %v1022_v31, 2 }
 0x13b   : > { %v1008_v32 = vmul.f32 %v1007_v52, %v1005_v5  ;;  %v1015_v26 = vmul.f32 %v1014_v7, %v1005_v5  ;;  %v820_v30 = vadd.s32 %v819_v29, %v815_v1 }
 0x13d   : > { %v1009_v22 = vadd.f32 -0.4999988, %v1008_v32  ;;  %v1016_v36 = vadd.f32 -0.16666654, %v1015_v26  ;;  %v821_v13 = vadd.s32 536870912, %v820_v30 }
 0x13f   : > { %v1010_v33 = vmul.f32 %v1009_v22, %v1005_v5  ;;  %v1017_v38 = vmul.f32 %v1016_v36, %v1005_v5  ;;  %v822_v8 = vshrl.u32 %v821_v13, 30  ;;  %v1349_v13 = vld [vmem:[%s3565_s9 + $0x18] sm:$0xff] }
 0x140   : > { %1367 = vperm.xlu2 %2360, %v1349_v13  }
 0x141   : > { %v1011_v24 = vadd.f32 1.0, %v1010_v33  ;;  %v1018_v6 = vadd.f32 1.0, %v1017_v38  ;;  %v823_v53 = vshll.u32 %v822_v8, 30  ;;  %v846_v55 = vsub.s32 4, %v822_v8 }
 0x143   : > { %v1019_v39 = vmul.f32 %v1018_v6, %v1003_v2  ;;  %v1028_v25 = vxor.u32 2147483648, %v1011_v24  ;;  %v824_v50 = vsub.s32 %v820_v30, %v823_v53  ;;  %v847_v54 = vsel %vm724_vm6, %v846_v55, %v822_v8  ;;  %v1342_v6 = vld [vmem:[%s3564_s8] sm:$0xff]  ;;  %v1348_v53 = vld [vmem:[%s3565_s9 + $0x10] sm:$0xff] }
 0x144   : > { %v849_v52 = vsel %vm723_vm7, 0, %v847_v54 }
 0x145   : > { %v1025_v18 = vxor.u32 2147483648, %v1019_v39  ;;  %vm825_vm2 = vcmp.lt.s32.totalorder %v824_v50, 0  ;;  %v826_v60 = vsub.s32 0, %v824_v50  ;;  %v1029_v4 = vsel %vm1027_vm1, %v1028_v25, %v1019_v39  ;;  %v1343_v39 = vld [vmem:[%s3564_s8 + $0x8] sm:$0xff]  ;;  %v1344_v25 = vld [vmem:[%s3564_s8 + $0x10] sm:$0xff] }
 0x146   : > { %v866_v32 = vadd.s32 3, %v849_v52 }
 0x147   : > { %v1026_v61 = vsel %vm1024_vm15, %v1011_v24, %v1025_v18  ;;  %v827_v45 = vsel %vm825_vm2, %v826_v60, %v824_v50  ;;  %v1345_v18 = vld [vmem:[%s3564_s8 + $0x18] sm:$0xff] }
 0x148   : > { %v1030_v17 = vsel %vm1023_vm5, %v1026_v61, %v1029_v4  ;;  %v828_v47 = vclz %v827_v45  ;;  %v867_v22 = vand.u32 3, %v866_v32  ;;  %1362 = vperm.xlu2 %2360, %v1348_v53   ;;  %v1353_v61 = vpop.permute.xlu1 %1352  ;;  %v1358_v45 = vpop.permute.xlu0 %1357 }
 0x149   : > { %v1031_v63 = vsel %vm1020_vm3, nan, %v1030_v17 }
 0x14a   : > { %1396 = vmatpush.msrb.mxu3 %v1031_v63  ;;  %v2277_v48 = vadd.s32 4294967294, %v828_v47  ;;  %vm869_vm10 = vcmp.eq.s32.totalorder %v867_v22, 0  ;;  %vm872_vm11 = vcmp.eq.s32.totalorder %v867_v22, 2  ;;  %vm868_vm12 = vcmp.lt.s32.totalorder %v867_v22, 2 }
 0x14c   : > { %vm2278_vm8 = vcmp.lt.s32.totalorder %v2277_v48, 0 }
 0x14d   : > { %v831_v9 = vsel %vm2278_vm8, 0, %v2277_v48 }
 0x14e   : > { %v832_v11 = vsub.s32 32, %v831_v9  ;;  %v836_v41 = vsub.s32 4294967266, %v831_v9  ;;  %v833_v15 = vshll.u32 %v824_v50, %v831_v9  ;;  %v2038_v50 = vld [vmem:[%s3567_s11 + $0x18] sm:$0xff] }
 0x150   : > { %v834_v49 = vshrl.u32 %v816_v57, %v832_v11  ;;  %v837_v3 = vadd.s32 127, %v836_v41 }
 0x152   : > { %v835_v10 = vor.u32 %v834_v49, %v833_v15  ;;  %v838_v12 = vshll.u32 %v837_v3, 23 }
 0x154   : > { %v839_v20 = vor.u32 4788187, %v838_v12  ;;  %v842_v34 = vcvt.s32.f32 %v835_v10 }
 0x156   : > { %v840_v2 = vand.u32 2147483647, %v839_v20 }
 0x158   : > { %v843_v51 = vmul.f32 %v842_v34, %v840_v2 }
 0x15a   : > { %v844_v5 = vxor.u32 2147483648, %v843_v51 }
 0x15c   : > { %v845_v28 = vsel %vm724_vm6, %v844_v5, %v843_v51 }
 0x15d   : > { %v848_v44 = vsel %vm723_vm7, %v2576_v43, %v845_v28  ;;  %v2035_v43 = vld [vmem:[%s3567_s11] sm:$0xff] }
 0x15e   : > { %v850_v14 = vmul.f32 %v848_v44, %v848_v44  ;;  %2041 = vperm.xlu2 %2360, %v2035_v43  }
 0x160   : > { %v851_v59 = vmul.f32 -0.001358992, %v850_v14  ;;  %v858_v27 = vmul.f32 -0.00019511016, %v850_v14 }
 0x162   : > { %v852_v16 = vadd.f32 0.041655596, %v851_v59  ;;  %v859_v19 = vadd.f32 0.008332121, %v858_v27 }
 0x164   : > { %v853_v7 = vmul.f32 %v852_v16, %v850_v14  ;;  %v860_v58 = vmul.f32 %v859_v19, %v850_v14 }
 0x166   : > { %v854_v1 = vadd.f32 -0.4999988, %v853_v7  ;;  %v861_v62 = vadd.f32 -0.16666654, %v860_v58  ;;  %2056 = vperm.xlu2 %2360, %v2038_v50  }
 0x168   : > { %v855_v26 = vmul.f32 %v854_v1, %v850_v14  ;;  %v862_v29 = vmul.f32 %v861_v62, %v850_v14 }
 0x16a   : > { %v856_v30 = vadd.f32 1.0, %v855_v26  ;;  %v863_v21 = vadd.f32 1.0, %v862_v29 }
 0x16c   : > { %v864_v36 = vmul.f32 %v863_v21, %v848_v44  ;;  %v873_v42 = vxor.u32 2147483648, %v856_v30 }
 0x16e   : > { %v870_v33 = vxor.u32 2147483648, %v864_v36  ;;  %v874_v8 = vsel %vm872_vm11, %v873_v42, %v864_v36 }
 0x170   : > { %v871_v38 = vsel %vm869_vm10, %v856_v30, %v870_v33 }
 0x171   : > { %v875_v24 = vsel %vm868_vm12, %v871_v38, %v874_v8 }
 0x172   : > { %v876_v31 = vsel %vm865_vm13, nan, %v875_v24 }
 0x173   : > { %1397 = vmatpush.msrb.mxu3 %v876_v31 }
 0x174   : > { %2288 = vmatmul.msk.f32.vlgmr.msrb.gmra.mxu3 %vm550_vm0, %v1342_v6 }
 0x17c   : > { %2289 = vmatmul.msk.f32.gmra.mxu3 %vm550_vm0, %v1343_v39 }
 0x184   : > { %2290 = vmatmul.msk.f32.gmra.mxu3 %vm550_vm0, %v1344_v25 }
 0x18c   : > { %2291 = vmatmul.msk.f32.gmra.mxu3 %vm550_vm0, %v1345_v18 }
 0x19a   : > { %v1368_v17 = vpop.permute.xlu2 %1367 }
 0x1a2   : > { %v1363_v41 = vpop.permute.xlu2 %1362 }
 0x1f7   : > { %v1399_v60 = vpop.f32.mrf.mxu3 }
 0x1f8   : > { %v3059_v4 = vadd.f32 %v1399_v60, %v1353_v61 }
 0x1fa   : > { %v1414_v47 = vand.u32 2139095040, %v3059_v4 }
 0x1fc   : > { %v1415_v57 = vshrl.u32 %v1414_v47, 23 }
 0x1fe   : > { %v2292_v49 = vadd.s32 4294967169, %v1415_v57 }
 0x1ff   : > { %v1402_v63 = vpop.f32.mrf.mxu3 }
 0x200   : > { %v3062_v48 = vadd.f32 %v1402_v63, %v1358_v45  ;;  %v1421_v20 = vadd.s32 1, %v2292_v49 }
 0x202   : > { %v1569_v9 = vand.u32 2139095040, %v3062_v48  ;;  %vm1422_vm14 = vcmp.gt.s32.totalorder %v1421_v20, 0 }
 0x203   : > { %v1423_v59 = vsel %vm1422_vm14, %v1421_v20, 0 }
 0x204   : > { %v1570_v11 = vshrl.u32 %v1569_v9, 23  ;;  %v3076_v7 = vand.u32 31, %v1423_v59  ;;  %v3083_v29 = vshrl.u32 %v1423_v59, 5 }
 0x206   : > { %v2295_v3 = vadd.s32 4294967169, %v1570_v11  ;;  %v3086_v30 = vsub.s32 32, %v3076_v7  ;;  %v3099_v13 = vshll.u32 %v2386_v23, %v3076_v7  ;;  %v3103_v33 = vshll.u32 %v3575_v35, %v3076_v7 }
 0x207   : > { %v1405_v15 = vpop.f32.mrf.mxu3 }
 0x208   : > { %v3065_v10 = vadd.f32 %v1405_v15, %v1363_v41  ;;  %v1576_v2 = vadd.s32 1, %v2295_v3 }
 0x20a   : > { %v1724_v12 = vand.u32 2139095040, %v3065_v10  ;;  %vm1577_vm4 = vcmp.gt.s32.totalorder %v1576_v2, 0 }
 0x20b   : > { %v1578_v27 = vsel %vm1577_vm4, %v1576_v2, 0 }
 0x20c   : > { %v1725_v34 = vshrl.u32 %v1724_v12, 23  ;;  %v3078_v58 = vand.u32 31, %v1578_v27  ;;  %v3105_v38 = vshrl.u32 %v1578_v27, 5 }
 0x20e   : > { %v2298_v51 = vadd.s32 4294967169, %v1725_v34  ;;  %v3089_v21 = vsub.s32 32, %v3078_v58  ;;  %v3113_v39 = vshll.u32 %v2386_v23, %v3078_v58  ;;  %v3121_v25 = vshll.u32 %v3575_v35, %v3078_v58 }
 0x20f   : > { %v1408_v5 = vpop.f32.mrf.mxu3 }
 0x210   : > { %v1731_v28 = vadd.s32 1, %v2298_v51  ;;  %v3068_v55 = vadd.f32 %v1408_v5, %v1368_v17  ;;  %v3117_v43 = vshrl.u32 %v3575_v35, %v3089_v21  ;;  %v1721_v51 = vand.u32 2147483647, %v3065_v10 }
 0x212   : > { %vm1732_vm9 = vcmp.gt.s32.totalorder %v1731_v28, 0  ;;  %v1879_v44 = vand.u32 2139095040, %v3068_v55  ;;  %v1876_v14 = vand.u32 2147483647, %v3068_v55 }
 0x213   : > { %v1733_v54 = vsel %vm1732_vm9, %v1731_v28, 0  ;;  %vm1601_vm9 = vcmp.lt.s32.totalorder %v3105_v38, 4 }
 0x214   : > { %v3072_v16 = vand.u32 31, %v1733_v54  ;;  %v1880_v19 = vshrl.u32 %v1879_v44, 23  ;;  %v1883_v52 = vand.u32 8388607, %v1876_v14  ;;  %v3123_v50 = vshrl.u32 %v1733_v54, 5 }
 0x216   : > { %v3081_v1 = vsub.s32 32, %v3072_v16  ;;  %v2301_v62 = vadd.s32 4294967169, %v1880_v19  ;;  %v1884_v32 = vor.u32 8388608, %v1883_v52  ;;  %v1747_v24 = vshll.u32 %v2386_v23, %v3072_v16 }
 0x217   : > { %v1750_v6 = vshll.u32 %v3575_v35, %v3072_v16  ;;  %vm1756_vm8 = vcmp.lt.s32.totalorder %v3123_v50, 4  ;;  %vm1753_vm12 = vcmp.lt.s32.totalorder %v3123_v50, 1  ;;  %vm1755_vm13 = vcmp.lt.s32.totalorder %v3123_v50, 3 }
 0x218   : > { %v1886_v26 = vadd.s32 1, %v2301_v62  ;;  %v1748_v22 = vshrl.u32 %v3575_v35, %v3081_v1  ;;  %v1751_v36 = vshrl.u32 %v2388_v37, %v3081_v1  ;;  %v3095_v42 = vshll.u32 %v1884_v32, 8 }
 0x219   : > { %vm1754_vm14 = vcmp.lt.s32.totalorder %v3123_v50, 2 }
 0x21a   : > { %vm1887_vm15 = vcmp.gt.s32.totalorder %v1886_v26, 0  ;;  %v3125_v18 = vor.u32 %v1748_v22, %v1747_v24  ;;  %v1752_v60 = vor.u32 %v1751_v36, %v1750_v6  ;;  %v1925_v17 = vand.u32 65535, %v3095_v42 }
 0x21b   : > { %v1888_v8 = vsel %vm1887_vm15, %v1886_v26, 0  ;;  %v1926_v47 = vshrl.u32 %v3095_v42, 16  ;;  %v1728_v36 = vand.u32 8388607, %v1721_v51 }
 0x21c   : > { %v1889_v31 = vshrl.u32 %v1888_v8, 5  ;;  %v1890_v53 = vand.u32 31, %v1888_v8 }
 0x21e   : > { %v1891_v61 = vsub.s32 32, %v1890_v53  ;;  %v1902_v45 = vshll.u32 %v2386_v23, %v1890_v53  ;;  %v1905_v63 = vshll.u32 %v3575_v35, %v1890_v53  ;;  %vm1911_vm1 = vcmp.lt.s32.totalorder %v1889_v31, 4 }
 0x21f   : > { %v1893_v11 = vshll.u32 %v2389_v40, %v1890_v53  ;;  %v1896_v15 = vshll.u32 %v2390_v46, %v1890_v53  ;;  %v1899_v3 = vshll.u32 %v2391_v56, %v1890_v53  ;;  %vm1908_vm2 = vcmp.lt.s32.totalorder %v1889_v31, 1 }
 0x220   : > { %v1903_v9 = vshrl.u32 %v3575_v35, %v1891_v61  ;;  %v1906_v57 = vshrl.u32 %v2388_v37, %v1891_v61  ;;  %v1894_v41 = vshrl.u32 %v2390_v46, %v1891_v61  ;;  %v1897_v49 = vshrl.u32 %v2391_v56, %v1891_v61 }
 0x221   : > { %v1900_v12 = vshrl.u32 %v2386_v23, %v1891_v61  ;;  %v1892_v5 = vshrl.u32 %v2389_v40, %v1891_v61  ;;  %vm1909_vm5 = vcmp.lt.s32.totalorder %v1889_v31, 2  ;;  %vm1910_vm3 = vcmp.lt.s32.totalorder %v1889_v31, 3 }
 0x222   : > { %v1904_v20 = vor.u32 %v1903_v9, %v1902_v45  ;;  %v1907_v2 = vor.u32 %v1906_v57, %v1905_v63  ;;  %v1895_v34 = vor.u32 %v1894_v41, %v1893_v11  ;;  %v1898_v28 = vor.u32 %v1897_v49, %v1896_v15 }
 0x223   : > { %v1901_v44 = vor.u32 %v1900_v12, %v1899_v3  ;;  %v3150_v61 = vshrl.u32 %v2388_v37, %v3089_v21  ;;  %v1762_v9 = vsel %vm1756_vm8, %v3125_v18, 920167782  ;;  %v1766_v57 = vsel %vm1756_vm8, %v1752_v60, 1326507024 }
 0x224   : > { %v1917_v59 = vsel %vm1911_vm1, %v1904_v20, 920167782  ;;  %v1921_v27 = vsel %vm1911_vm1, %v1907_v2, 1326507024  ;;  %v1916_v19 = vsel %vm1908_vm2, %v1895_v34, %v1898_v28  ;;  %v1912_v32 = vsel %vm1908_vm2, %v1892_v5, %v1895_v34 }
 0x225   : > { %v1913_v54 = vsel %vm1911_vm1, %v1901_v44, 2102212464  ;;  %v1918_v52 = vsel %vm1910_vm3, %v1901_v44, %v1917_v59  ;;  %v1920_v62 = vsel %vm1908_vm2, %v1898_v28, %v1901_v44  ;;  %v1922_v22 = vsel %vm1910_vm3, %v1904_v20, %v1921_v27 }
 0x226   : > { %v1919_v26 = vsel %vm1909_vm5, %v1916_v19, %v1918_v52  ;;  %v1914_v8 = vsel %vm1910_vm3, %v1898_v28, %v1913_v54  ;;  %v1923_v24 = vsel %vm1909_vm5, %v1920_v62, %v1922_v22  ;;  %v1729_v12 = vor.u32 8388608, %v1728_v36 }
 0x227   : > { %v1949_v6 = vand.u32 65535, %v1919_v26  ;;  %v1950_v53 = vshrl.u32 %v1919_v26, 16  ;;  %v1927_v45 = vand.u32 65535, %v1923_v24  ;;  %v1928_v63 = vshrl.u32 %v1923_v24, 16 }
 0x228   : > { %v3159_v15 = vsel %vm1909_vm5, %v1912_v32, %v1914_v8  ;;  %v1741_v36 = vshll.u32 %v2390_v46, %v3072_v16 }
 0x229   : > { %v1952_v11 = vmul.u32 %v1950_v53, %v1925_v17  ;;  %v1953_v41 = vmul.u32 %v1949_v6, %v1926_v47  ;;  %v1930_v49 = vmul.u32 %v1928_v63, %v1925_v17  ;;  %v1931_v3 = vmul.u32 %v1927_v45, %v1926_v47 }
 0x22a   : > { %v1929_v20 = vmul.u32 %v1927_v45, %v1925_v17  ;;  %v1951_v2 = vmul.u32 %v1949_v6, %v1925_v17  ;;  %v1954_v34 = vmul.u32 %v1950_v53, %v1926_v47  ;;  %v1932_v28 = vmul.u32 %v1928_v63, %v1926_v47 }
 0x22b   : > { %v1955_v5 = vshll.u32 %v1952_v11, 16  ;;  %v1933_v44 = vshll.u32 %v1930_v49, 16  ;;  %v1956_v59 = vshrl.u32 %v1952_v11, 16  ;;  %v1957_v27 = vshll.u32 %v1953_v41, 16 }
 0x22c   : > { %v1934_v54 = vshrl.u32 %v1930_v49, 16  ;;  %v1958_v19 = vshrl.u32 %v1953_v41, 16  ;;  %v1935_v52 = vshll.u32 %v1931_v3, 16  ;;  %v1738_v17 = vshll.u32 %v2389_v40, %v3072_v16 }
 0x22d   : > { %vm1959_vm6 = vc.u32 %v1951_v2, %v1955_v5  ;;  %v1961_v60 = vadd.s32 %v1955_v5, %v1951_v2  ;;  %vm1937_vm7 = vc.u32 %v1929_v20, %v1933_v44  ;;  %v1939_v31 = vadd.s32 %v1933_v44, %v1929_v20 }
 0x22e   : > { %v1960_v62 = vsel %vm1959_vm6, 1, %v2385_v0  ;;  %v1938_v32 = vsel %vm1937_vm7, 1, %v2385_v0  ;;  %v1739_v6 = vshrl.u32 %v2390_v46, %v3081_v1  ;;  %v1742_v53 = vshrl.u32 %v2391_v56, %v3081_v1 }
 0x22f   : > { %v1962_v26 = vadd.s32 %v1960_v62, %v1954_v34  ;;  %vm1963_vm10 = vc.u32 %v1961_v60, %v1957_v27  ;;  %v1940_v47 = vadd.s32 %v1938_v32, %v1932_v28  ;;  %vm1941_vm11 = vc.u32 %v1939_v31, %v1935_v52 }
 0x230   : > { %v1964_v22 = vsel %vm1963_vm10, 1, %v2385_v0  ;;  %v1942_v8 = vsel %vm1941_vm11, 1, %v2385_v0  ;;  %v1936_v45 = vshrl.u32 %v1931_v3, 16  ;;  %v1744_v11 = vshll.u32 %v2391_v56, %v3072_v16 }
 0x231   : > { %v1966_v24 = vadd.s32 %v1964_v22, %v1962_v26  ;;  %v1944_v63 = vadd.s32 %v1942_v8, %v1940_v47  ;;  %v1745_v41 = vshrl.u32 %v2386_v23, %v3081_v1  ;;  %v3177_v20 = vor.u32 %v1739_v6, %v1738_v17 }
 0x232   : > { %v3179_v2 = vor.u32 %v1742_v53, %v1741_v36  ;;  %v3185_v3 = vshll.u32 %v1729_v12, 8  ;;  %v3187_v28 = vadd.s32 %v1961_v60, %v1957_v27  ;;  %v1597_v60 = vor.u32 %v3150_v61, %v3121_v25 }
 0x233   : > { %v1967_v49 = vadd.s32 %v1966_v24, %v1956_v59  ;;  %v1945_v34 = vadd.s32 %v1944_v63, %v1934_v54  ;;  %v3182_v5 = vor.u32 %v1745_v41, %v1744_v11  ;;  %v1767_v59 = vsel %vm1755_vm13, %v3125_v18, %v1766_v57 }
 0x234   : > { %v1761_v44 = vsel %vm1753_vm12, %v3177_v20, %v3179_v2  ;;  %v3208_v54 = vor.u32 %v3117_v43, %v3113_v39  ;;  %v1770_v31 = vand.u32 65535, %v3185_v3  ;;  %v1771_v43 = vshrl.u32 %v3185_v3, 16 }
 0x235   : > { %v1968_v16 = vadd.s32 %v1967_v49, %v1958_v19  ;;  %v3196_v52 = vadd.s32 %v1945_v34, %v1936_v45  ;;  %v1763_v12 = vsel %vm1755_vm13, %v3182_v5, %v1762_v9  ;;  %v1765_v27 = vsel %vm1753_vm12, %v3179_v2, %v3182_v5 }
 0x236   : > { %v1764_v18 = vsel %vm1754_vm14, %v1761_v44, %v1763_v12  ;;  %v1768_v57 = vsel %vm1754_vm14, %v1765_v27, %v1767_v59  ;;  %v1969_v9 = vmul.u32 %v3095_v42, %v3159_v15  ;;  %v3224_v26 = vshrl.u32 %v3575_v35, %v3086_v30 }
 0x237   : > { %v1972_v19 = vadd.s32 1, %v1968_v16  ;;  %vm1971_vm4 = vc.u32 %v3196_v52, %v3187_v28  ;;  %v1772_v62 = vand.u32 65535, %v1768_v57  ;;  %v1773_v32 = vshrl.u32 %v1768_v57, 16 }
 0x238   : > { %v1794_v47 = vand.u32 65535, %v1764_v18  ;;  %v1795_v25 = vshrl.u32 %v1764_v18, 16  ;;  %v3228_v42 = vshrl.u32 %v2388_v37, %v3086_v30  ;;  %v3234_v22 = vsel %vm1601_vm9, %v3208_v54, 920167782 }
 0x239   : > { %v1973_v39 = vsel %vm1971_vm4, %v1972_v19, %v1968_v16  ;;  %v1775_v61 = vmul.u32 %v1773_v32, %v1770_v31  ;;  %v1776_v15 = vmul.u32 %v1772_v62, %v1771_v43  ;;  %v3238_v24 = vsel %vm1601_vm9, %v1597_v60, 1326507024 }
 0x23a   : > { %v1974_v17 = vadd.s32 %v1973_v39, %v1969_v9  ;;  %v1797_v8 = vmul.u32 %v1795_v25, %v1770_v31  ;;  %v1798_v35 = vmul.u32 %v1794_v47, %v1771_v43  ;;  %v1774_v6 = vmul.u32 %v1772_v62, %v1770_v31 }
 0x23b   : > { %v1778_v53 = vshll.u32 %v1775_v61, 16  ;;  %v1566_v37 = vand.u32 2147483647, %v3062_v48  ;;  %v1777_v63 = vmul.u32 %v1773_v32, %v1771_v43  ;;  %v1796_v11 = vmul.u32 %v1794_v47, %v1770_v31 }
 0x23c   : > { %v1975_v36 = vadd.s32 536870912, %v1974_v17  ;;  %v1800_v41 = vshll.u32 %v1797_v8, 16  ;;  %v1780_v49 = vshll.u32 %v1776_v15, 16  ;;  %v1799_v16 = vmul.u32 %v1795_v25, %v1771_v43 }
 0x23d   : > { %vm1782_vm15 = vc.u32 %v1774_v6, %v1778_v53  ;;  %v1784_v34 = vadd.s32 %v1778_v53, %v1774_v6  ;;  %v1802_v12 = vshll.u32 %v1798_v35, 16  ;;  %v1573_v31 = vand.u32 8388607, %v1566_v37 }
 0x23e   : > { %v3241_v45 = vshrl.u32 %v1975_v36, 30  ;;  %v1783_v59 = vsel %vm1782_vm15, 1, %v2385_v0  ;;  %vm1804_vm1 = vc.u32 %v1796_v11, %v1800_v41  ;;  %v1806_v18 = vadd.s32 %v1800_v41, %v1796_v11 }
 0x23f   : > { %v1785_v27 = vadd.s32 %v1783_v59, %v1777_v63  ;;  %vm1786_vm2 = vc.u32 %v1784_v34, %v1780_v49  ;;  %v1805_v19 = vsel %vm1804_vm1, 1, %v2385_v0  ;;  %v1737_v39 = vshrl.u32 %v2389_v40, %v3081_v1 }
 0x240   : > { %v1977_v44 = vshll.u32 %v3241_v45, 30  ;;  %v1787_v60 = vsel %vm1786_vm2, 1, %v2385_v0  ;;  %v1807_v9 = vadd.s32 %v1805_v19, %v1799_v16  ;;  %v1779_v43 = vshrl.u32 %v1775_v61, 16 }
 0x241   : > { %v1789_v62 = vadd.s32 %v1787_v60, %v1785_v27  ;;  %vm1808_vm5 = vc.u32 %v1806_v18, %v1802_v12  ;;  %v1758_v47 = vsel %vm1756_vm8, %v3182_v5, 2102212464  ;;  %vm1878_vm6 = vcmp.lt.s32.totalorder %v3068_v55, 0 }
 0x242   : > { %v1978_v57 = vsub.s32 %v1974_v17, %v1977_v44  ;;  %v1809_v17 = vsel %vm1808_vm5, 1, %v2385_v0  ;;  %v1781_v25 = vshrl.u32 %v1776_v15, 16  ;;  %v1801_v6 = vshrl.u32 %v1797_v8, 16 }
 0x243   : > { %v1790_v36 = vadd.s32 %v1789_v62, %v1779_v43  ;;  %v1811_v53 = vadd.s32 %v1809_v17, %v1807_v9  ;;  %v1757_v1 = vsel %vm1753_vm12, %v1737_v39, %v3177_v20  ;;  %v1803_v61 = vshrl.u32 %v1798_v35, 16 }
 0x244   : > { %vm1979_vm3 = vcmp.lt.s32.totalorder %v1978_v57, 0  ;;  %v1980_v32 = vsub.s32 0, %v1978_v57  ;;  %v1587_v11 = vshrl.u32 %v2391_v56, %v3089_v21  ;;  %v1586_v34 = vshll.u32 %v2390_v46, %v3078_v58 }
 0x245   : > { %v3261_v49 = vadd.s32 %v1790_v36, %v1781_v25  ;;  %v1812_v5 = vadd.s32 %v1811_v53, %v1801_v6  ;;  %v1759_v15 = vsel %vm1755_vm13, %v3179_v2, %v1758_v47  ;;  %v1584_v8 = vshrl.u32 %v2390_v46, %v3089_v21 }
 0x246   : > { %v1981_v63 = vsel %vm1979_vm3, %v1980_v32, %v1978_v57  ;;  %v1589_v20 = vshll.u32 %v2391_v56, %v3078_v58  ;;  %v1590_v35 = vshrl.u32 %v2386_v23, %v3089_v21  ;;  %v3274_v44 = vadd.s32 %v1806_v18, %v1802_v12 }
 0x247   : > { %v1982_v41 = vclz %v1981_v63  ;;  %v1813_v59 = vadd.s32 %v1812_v5, %v1803_v61  ;;  %v3276_v27 = vor.u32 %v1587_v11, %v1586_v34  ;;  %v1970_v19 = vadd.s32 %v3187_v28, %v3196_v52 }
 0x248   : > { %v2000_v2 = vsub.s32 4, %v3241_v45  ;;  %v1583_v60 = vshll.u32 %v2389_v40, %v3078_v58  ;;  %v1591_v9 = vor.u32 %v1590_v35, %v1589_v20  ;;  %v1760_v39 = vsel %vm1754_vm14, %v1757_v1, %v1759_v15 }
 0x249   : > { %v2302_v16 = vadd.s32 4294967294, %v1982_v41  ;;  %vm1816_vm7 = vc.u32 %v3261_v49, %v3274_v44  ;;  %v1817_v12 = vadd.s32 1, %v1813_v59  ;;  %v1574_v43 = vor.u32 8388608, %v1573_v31 }
 0x24a   : > { %v3287_v62 = vor.u32 %v1584_v8, %v1583_v60  ;;  %vm1598_vm10 = vcmp.lt.s32.totalorder %v3105_v38, 1  ;;  %vm1600_vm11 = vcmp.lt.s32.totalorder %v3105_v38, 3  ;;  %v2001_v50 = vsel %vm1878_vm6, %v2000_v2, %v3241_v45 }
 0x24b   : > { %vm2303_vm8 = vcmp.lt.s32.totalorder %v2302_v16, 0  ;;  %v1610_v58 = vsel %vm1598_vm10, %v3276_v27, %v1591_v9  ;;  %v1814_v32 = vmul.u32 %v3185_v3, %v1760_v39  ;;  %v1818_v47 = vsel %vm1816_vm7, %v1817_v12, %v1813_v59 }
 0x24c   : > { %v1985_v18 = vsel %vm2303_vm8, 0, %v2302_v16  ;;  %v1612_v31 = vsel %vm1600_vm11, %v3208_v54, %v3238_v24  ;;  %vm1599_vm12 = vcmp.lt.s32.totalorder %v3105_v38, 2  ;;  %v1606_v53 = vsel %vm1598_vm10, %v3287_v62, %v3276_v27 }
 0x24d   : > { %v1986_v28 = vsub.s32 32, %v1985_v18  ;;  %v1990_v52 = vsub.s32 4294967266, %v1985_v18  ;;  %v1987_v17 = vshll.u32 %v1978_v57, %v1985_v18  ;;  %v1819_v6 = vadd.s32 %v1818_v47, %v1814_v32 }
 0x24e   : > { %v1608_v3 = vsel %vm1600_vm11, %v1591_v9, %v3234_v22  ;;  %v1613_v45 = vsel %vm1599_vm12, %v1610_v58, %v1612_v31  ;;  %v3312_v24 = vshll.u32 %v1574_v43, 8  ;;  %v1442_v1 = vor.u32 %v3228_v42, %v3103_v33 }
 0x24f   : > { %v1988_v25 = vshrl.u32 %v1970_v19, %v1986_v28  ;;  %v1991_v36 = vadd.s32 127, %v1990_v52  ;;  %v1617_v57 = vand.u32 65535, %v1613_v45  ;;  %vm3318_vm13 = vcmp.le.f32.partialorder %v1876_v14, 0.7853982 }
 0x250   : > { %v1820_v11 = vadd.s32 536870912, %v1819_v6  ;;  %v1618_v41 = vshrl.u32 %v1613_v45, 16  ;;  %v1609_v5 = vsel %vm1599_vm12, %v1606_v53, %v1608_v3  ;;  %v1615_v34 = vand.u32 65535, %v3312_v24 }
 0x251   : > { %v1989_v63 = vor.u32 %v1988_v25, %v1987_v17  ;;  %v1992_v54 = vshll.u32 %v1991_v36, 23  ;;  %v1616_v15 = vshrl.u32 %v3312_v24, 16  ;;  %v3328_v8 = vor.u32 %v3224_v26, %v3099_v13 }
 0x252   : > { %vm1446_vm14 = vcmp.lt.s32.totalorder %v3083_v29, 4  ;;  %v2003_v14 = vsel %vm3318_vm13, 0, %v2001_v50  ;;  %v3333_v33 = vshrl.u32 %v1820_v11, 30  ;;  %v1620_v35 = vmul.u32 %v1618_v41, %v1615_v34 }
 0x253   : > { %v1993_v22 = vor.u32 4788187, %v1992_v54  ;;  %v1996_v20 = vcvt.s32.f32 %v1989_v63  ;;  %v3335_v16 = vmul.u32 %v1617_v57, %v1616_v15  ;;  %v3339_v59 = vsel %vm1446_vm14, %v1442_v1, 1326507024 }
 0x254   : > { %v1822_v19 = vshll.u32 %v3333_v33, 30  ;;  %v1582_v13 = vshrl.u32 %v2389_v40, %v3089_v21  ;;  %v1640_v26 = vshrl.u32 %v1609_v5, 16  ;;  %v2020_v60 = vadd.s32 3, %v2003_v14 }
 0x255   : > { %v1994_v42 = vand.u32 2147483647, %v1993_v22  ;;  %v1619_v39 = vmul.u32 %v1617_v57, %v1615_v34  ;;  %v1623_v12 = vshll.u32 %v1620_v35, 16  ;;  %v1603_v43 = vsel %vm1601_vm9, %v1591_v9, 2102212464 }
 0x256   : > { %v3344_v18 = vsub.s32 %v1819_v6, %v1822_v19  ;;  %v1622_v28 = vmul.u32 %v1618_v41, %v1616_v15  ;;  %v1639_v52 = vand.u32 65535, %v1609_v5  ;;  %v1625_v50 = vshll.u32 %v3335_v16, 16 }
 0x257   : > { %v1997_v2 = vmul.f32 %v1996_v20, %v1994_v42  ;;  %vm1627_vm4 = vc.u32 %v1619_v39, %v1623_v12  ;;  %v1629_v32 = vadd.s32 %v1623_v12, %v1619_v39  ;;  %v1642_v31 = vmul.u32 %v1640_v26, %v1615_v34 }
 0x258   : > { %vm1824_vm15 = vcmp.lt.s32.totalorder %v3344_v18, 0  ;;  %v1825_v21 = vsub.s32 0, %v3344_v18  ;;  %v1628_v47 = vsel %vm1627_vm4, 1, %v2385_v0  ;;  %v1815_v9 = vadd.s32 %v3274_v44, %v3261_v49 }
 0x259   : > { %v1998_v58 = vxor.u32 2147483648, %v1997_v2  ;;  %v1630_v25 = vadd.s32 %v1628_v47, %v1622_v28  ;;  %vm1631_vm9 = vc.u32 %v1629_v32, %v1625_v50  ;;  %v1602_v53 = vsel %vm1598_vm10, %v1582_v13, %v3287_v62 }
 0x25a   : > { %v1826_v6 = vsel %vm1824_vm15, %v1825_v21, %v3344_v18  ;;  %v1632_v3 = vsel %vm1631_vm9, 1, %v2385_v0  ;;  %v1604_v49 = vsel %vm1600_vm11, %v3276_v27, %v1603_v43  ;;  %v3371_v54 = vand.u32 3, %v2020_v60 }
 0x25b   : > { %v1999_v17 = vsel %vm1878_vm6, %v1998_v58, %v1997_v2  ;;  %v1827_v63 = vclz %v1826_v6  ;;  %v1634_v44 = vadd.s32 %v1632_v3, %v1630_v25  ;;  %v1641_v57 = vmul.u32 %v1639_v52, %v1615_v34 }
 0x25c   : > { %v3359_v36 = vsel %vm3318_vm13, %v3068_v55, %v1999_v17  ;;  %v1643_v1 = vmul.u32 %v1639_v52, %v1616_v15  ;;  %v1645_v61 = vshll.u32 %v1642_v31, 16  ;;  %v1624_v62 = vshrl.u32 %v1620_v35, 16 }
 0x25d   : > { %v2004_v45 = vmul.f32 %v3359_v36, %v3359_v36  ;;  %v2299_v22 = vadd.s32 4294967294, %v1827_v63  ;;  %v1845_v5 = vsub.s32 4, %v3333_v33  ;;  %v3376_v14 = vsel %vm1599_vm12, %v1602_v53, %v1604_v49 }
 0x25e   : > { %v1644_v42 = vmul.u32 %v1640_v26, %v1616_v15  ;;  %vm1649_vm1 = vc.u32 %v1641_v57, %v1645_v61  ;;  %vm1723_vm2 = vcmp.lt.s32.totalorder %v3065_v10, 0  ;;  %v1635_v34 = vadd.s32 %v1634_v44, %v1624_v62 }
 0x25f   : > { %v2005_v11 = vmul.f32 -0.001358992, %v2004_v45  ;;  %v2012_v41 = vmul.f32 -0.00019511016, %v2004_v45  ;;  %vm2300_vm5 = vcmp.lt.s32.totalorder %v2299_v22, 0  ;;  %v1647_v13 = vshll.u32 %v1643_v1, 16 }
 0x260   : > { %v1830_v19 = vsel %vm2300_vm5, 0, %v2299_v22  ;;  %v1650_v2 = vsel %vm1649_vm1, 1, %v2385_v0  ;;  %v1651_v60 = vadd.s32 %v1645_v61, %v1641_v57  ;;  %v1626_v38 = vshrl.u32 %v3335_v16, 16 }
 0x261   : > { %v2006_v20 = vadd.f32 0.041655596, %v2005_v11  ;;  %v2013_v27 = vadd.f32 0.008332121, %v2012_v41  ;;  %v1831_v12 = vsub.s32 32, %v1830_v19  ;;  %v1835_v43 = vsub.s32 4294967266, %v1830_v19 }
 0x262   : > { %v1646_v28 = vshrl.u32 %v1642_v31, 16  ;;  %v1652_v15 = vadd.s32 %v1650_v2, %v1644_v42  ;;  %vm1653_vm3 = vc.u32 %v1651_v60, %v1647_v13  ;;  %vm2023_vm6 = vcmp.eq.s32.totalorder %v3371_v54, 0 }
 0x263   : > { %v2007_v35 = vmul.f32 %v2006_v20, %v2004_v45  ;;  %v2014_v39 = vmul.f32 %v2013_v27, %v2004_v45  ;;  %v1833_v58 = vshrl.u32 %v1815_v9, %v1831_v12  ;;  %v1654_v50 = vsel %vm1653_vm3, 1, %v2385_v0 }
 0x264   : > { %v1832_v32 = vshll.u32 %v3344_v18, %v1830_v19  ;;  %v1836_v21 = vadd.s32 127, %v1835_v43  ;;  %v3384_v47 = vadd.s32 %v1635_v34, %v1626_v38  ;;  %v1656_v17 = vadd.s32 %v1654_v50, %v1652_v15 }
 0x265   : > { %v2008_v26 = vadd.f32 -0.4999988, %v2007_v35  ;;  %v2015_v52 = vadd.f32 -0.16666654, %v2014_v39  ;;  %vm2022_vm8 = vcmp.lt.s32.totalorder %v3371_v54, 2  ;;  %v1648_v31 = vshrl.u32 %v1643_v1, 16 }
 0x266   : > { %vm3389_vm7 = vcmp.le.f32.partialorder %v1721_v51, 0.7853982  ;;  %v1411_v9 = vand.u32 2147483647, %v3059_v4  ;;  %vm2019_vm10 = vweird.f32 %v3068_v55  ;;  %v1834_v18 = vor.u32 %v1833_v58, %v1832_v32 }
 0x267   : > { %v2009_v25 = vmul.f32 %v2008_v26, %v2004_v45  ;;  %v2016_v6 = vmul.f32 %v2015_v52, %v2004_v45  ;;  %v1837_v53 = vshll.u32 %v1836_v21, 23  ;;  %v3395_v3 = vadd.s32 %v1651_v60, %v1647_v13 }
 0x268   : > { %v1657_v63 = vadd.s32 %v1656_v17, %v1646_v28  ;;  %vm2026_vm11 = vcmp.eq.s32.totalorder %v3371_v54, 2  ;;  %v1659_v51 = vmul.u32 %v3312_v24, %v3376_v14  ;;  %v1846_v57 = vsel %vm1723_vm2, %v1845_v5, %v3333_v33 }
 0x269   : > { %v2010_v49 = vadd.f32 1.0, %v2009_v25  ;;  %v2017_v45 = vadd.f32 1.0, %v2016_v6  ;;  %v1838_v44 = vor.u32 4788187, %v1837_v53  ;;  %vm1661_vm12 = vc.u32 %v3384_v47, %v3395_v3 }
 0x26a   : > { %v1658_v1 = vadd.s32 %v1657_v63, %v1648_v31  ;;  %v1418_v41 = vand.u32 8388607, %v1411_v9  ;;  %v1432_v22 = vshrl.u32 %v2391_v56, %v3086_v30  ;;  %v1841_v24 = vcvt.s32.f32 %v1834_v18 }
 0x26b   : > { %v2018_v61 = vmul.f32 %v2017_v45, %v3359_v36  ;;  %v2027_v11 = vxor.u32 2147483648, %v2010_v49  ;;  %v1839_v62 = vand.u32 2147483647, %v1838_v44  ;;  %v1431_v42 = vshll.u32 %v2390_v46, %v3076_v7 }
 0x26c   : > { %v1662_v14 = vadd.s32 1, %v1658_v1  ;;  %v1429_v5 = vshrl.u32 %v2390_v46, %v3086_v30  ;;  %v1434_v36 = vshll.u32 %v2391_v56, %v3076_v7  ;;  %v1435_v20 = vshrl.u32 %v2386_v23, %v3086_v30 }
 0x26d   : > { %v2024_v33 = vxor.u32 2147483648, %v2018_v61  ;;  %v1842_v27 = vmul.f32 %v1841_v24, %v1839_v62  ;;  %v1428_v19 = vshll.u32 %v2389_v40, %v3076_v7  ;;  %v3420_v13 = vor.u32 %v1432_v22, %v1431_v42 }
 0x26e   : > { %v1663_v34 = vsel %vm1661_vm12, %v1662_v14, %v1658_v1  ;;  %v2028_v60 = vsel %vm2026_vm11, %v2027_v11, %v2018_v61  ;;  %v3426_v35 = vor.u32 %v1435_v20, %v1434_v36  ;;  %v1848_v39 = vsel %vm3389_vm7, 0, %v1846_v57 }
 0x26f   : > { %v2025_v2 = vsel %vm2023_vm6, %v2010_v49, %v2024_v33  ;;  %v1664_v46 = vadd.s32 %v1663_v34, %v1659_v51  ;;  %v1843_v23 = vxor.u32 2147483648, %v1842_v27  ;;  %v1419_v12 = vor.u32 8388608, %v1418_v41 }
 0x270   : > { %v2029_v56 = vsel %vm2022_vm8, %v2025_v2, %v2028_v60  ;;  %v3434_v43 = vor.u32 %v1429_v5, %v1428_v19  ;;  %vm1443_vm13 = vcmp.lt.s32.totalorder %v3083_v29, 1  ;;  %v1452_v28 = vsel %vm1446_vm14, %v3328_v8, 920167782 }
 0x271   : > { %v2030_v7 = vsel %vm2019_vm10, nan, %v2029_v56  ;;  %v1665_v38 = vadd.s32 536870912, %v1664_v46  ;;  %v1844_v54 = vsel %vm1723_vm2, %v1843_v23, %v1842_v27  ;;  %vm1445_vm4 = vcmp.lt.s32.totalorder %v3083_v29, 3 }
 0x272   : > { %2083 = vmatpush.msrb.mxu0 %v2030_v7  ;;  %v1455_v55 = vsel %vm1443_vm13, %v3420_v13, %v3426_v35  ;;  %v1847_v15 = vsel %vm3389_vm7, %v3065_v10, %v1844_v54  ;;  %vm1444_vm15 = vcmp.lt.s32.totalorder %v3083_v29, 2  ;;  %v1457_v52 = vsel %vm1445_vm4, %v3328_v8, %v3339_v59 }
 0x273   : > { %v3450_v26 = vshrl.u32 %v1665_v38, 30  ;;  %v1849_v58 = vmul.f32 %v1847_v15, %v1847_v15  ;;  %v1865_v50 = vadd.s32 3, %v1848_v39  ;;  %v1458_v32 = vsel %vm1444_vm15, %v1455_v55, %v1457_v52 }
 0x274   : > { %v3459_v21 = vshll.u32 %v1419_v12, 8  ;;  %v1451_v25 = vsel %vm1443_vm13, %v3434_v43, %v3420_v13  ;;  %v1453_v6 = vsel %vm1445_vm4, %v3426_v35, %v1452_v28  ;;  %v1463_v16 = vshrl.u32 %v1458_v32, 16 }
 0x275   : > { %v1667_v17 = vshll.u32 %v3450_v26, 30  ;;  %v1850_v8 = vmul.f32 -0.001358992, %v1849_v58  ;;  %v1857_v59 = vmul.f32 -0.00019511016, %v1849_v58  ;;  %v1462_v53 = vand.u32 65535, %v1458_v32 }
 0x276   : > { %v1460_v18 = vand.u32 65535, %v3459_v21  ;;  %v1866_v45 = vand.u32 3, %v1865_v50  ;;  %v1454_v51 = vsel %vm1444_vm15, %v1451_v25, %v1453_v6  ;;  %v1461_v57 = vshrl.u32 %v3459_v21, 16 }
 0x277   : > { %v1668_v31 = vsub.s32 %v1664_v46, %v1667_v17  ;;  %v1851_v63 = vadd.f32 0.041655596, %v1850_v8  ;;  %v1858_v49 = vadd.f32 0.008332121, %v1857_v59  ;;  %v1485_v24 = vshrl.u32 %v1454_v51, 16 }
 0x278   : > { %v1465_v1 = vmul.u32 %v1463_v16, %v1460_v18  ;;  %v3473_v22 = vmul.u32 %v1462_v53, %v1461_v57  ;;  %v1464_v5 = vmul.u32 %v1462_v53, %v1460_v18  ;;  %vm1868_vm1 = vcmp.eq.s32.totalorder %v1866_v45, 0 }
 0x279   : > { %vm1669_vm9 = vcmp.lt.s32.totalorder %v1668_v31, 0  ;;  %v1670_v44 = vsub.s32 0, %v1668_v31  ;;  %v1852_v61 = vmul.f32 %v1851_v63, %v1849_v58  ;;  %v1859_v11 = vmul.f32 %v1858_v49, %v1849_v58 }
 0x27a   : > { %v1468_v62 = vshll.u32 %v1465_v1, 16  ;;  %vm1871_vm2 = vcmp.eq.s32.totalorder %v1866_v45, 2  ;;  %v1467_v36 = vmul.u32 %v1463_v16, %v1461_v57  ;;  %v1484_v20 = vand.u32 65535, %v1454_v51 }
 0x27b   : > { %v1671_v41 = vsel %vm1669_vm9, %v1670_v44, %v1668_v31  ;;  %v1853_v14 = vadd.f32 -0.4999988, %v1852_v61  ;;  %v1860_v42 = vadd.f32 -0.16666654, %v1859_v11  ;;  %vm1867_vm5 = vcmp.lt.s32.totalorder %v1866_v45, 2 }
 0x27c   : > { %v1672_v33 = vclz %v1671_v41  ;;  %vm1472_vm3 = vc.u32 %v1464_v5, %v1468_v62  ;;  %vm1864_vm6 = vweird.f32 %v3065_v10  ;;  %v1470_v2 = vshll.u32 %v3473_v22, 16 }
 0x27d   : > { %v1854_v27 = vmul.f32 %v1853_v14, %v1849_v58  ;;  %v1861_v34 = vmul.f32 %v1860_v42, %v1849_v58  ;;  %v1473_v60 = vsel %vm1472_vm3, 1, %v2385_v0  ;;  %v1474_v46 = vadd.s32 %v1468_v62, %v1464_v5 }
 0x27e   : > { %v2296_v19 = vadd.s32 4294967294, %v1672_v33  ;;  %v1487_v56 = vmul.u32 %v1485_v24, %v1460_v18  ;;  %v1475_v12 = vadd.s32 %v1473_v60, %v1467_v36  ;;  %v1660_v7 = vadd.s32 %v3395_v3, %v3384_v47 }
 0x27f   : > { %v1855_v23 = vadd.f32 1.0, %v1854_v27  ;;  %v1862_v39 = vadd.f32 1.0, %v1861_v34  ;;  %v1469_v28 = vshrl.u32 %v1465_v1, 16  ;;  %vm1476_vm7 = vc.u32 %v1474_v46, %v1470_v2 }
 0x280   : > { %vm2297_vm8 = vcmp.lt.s32.totalorder %v2296_v19, 0  ;;  %v1488_v58 = vmul.u32 %v1484_v20, %v1461_v57  ;;  %v1477_v32 = vsel %vm1476_vm7, 1, %v2385_v0  ;;  %v1486_v17 = vmul.u32 %v1484_v20, %v1460_v18 }
 0x281   : > { %v1675_v38 = vsel %vm2297_vm8, 0, %v2296_v19  ;;  %v1863_v54 = vmul.f32 %v1862_v39, %v1847_v15  ;;  %v1872_v55 = vxor.u32 2147483648, %v1855_v23  ;;  %v1490_v25 = vshll.u32 %v1487_v56, 16 }
 0x282   : > { %v1676_v52 = vsub.s32 32, %v1675_v38  ;;  %v1680_v50 = vsub.s32 4294967266, %v1675_v38  ;;  %v1677_v16 = vshll.u32 %v1668_v31, %v1675_v38  ;;  %v1479_v59 = vadd.s32 %v1477_v32, %v1475_v12 }
 0x283   : > { %v1869_v6 = vxor.u32 2147483648, %v1863_v54  ;;  %v1873_v53 = vsel %vm1871_vm2, %v1872_v55, %v1863_v54  ;;  %v1489_v47 = vmul.u32 %v1485_v24, %v1461_v57  ;;  %vm1494_vm10 = vc.u32 %v1486_v17, %v1490_v25 }
 0x284   : > { %v1678_v8 = vshrl.u32 %v1660_v7, %v1676_v52  ;;  %v1681_v63 = vadd.s32 127, %v1680_v50  ;;  %v1492_v49 = vshll.u32 %v1488_v58, 16  ;;  %v1495_v51 = vsel %vm1494_vm10, 1, %v2385_v0 }
 0x285   : > { %v1870_v3 = vsel %vm1868_vm1, %v1855_v23, %v1869_v6  ;;  %v1496_v18 = vadd.s32 %v1490_v25, %v1486_v17  ;;  %v1497_v61 = vadd.s32 %v1495_v51, %v1489_v47  ;;  %v1480_v11 = vadd.s32 %v1479_v59, %v1469_v28 }
 0x286   : > { %v1679_v15 = vor.u32 %v1678_v8, %v1677_v16  ;;  %v1874_v44 = vsel %vm1867_vm5, %v1870_v3, %v1873_v53  ;;  %v1682_v1 = vshll.u32 %v1681_v63, 23  ;;  %v1448_v57 = vsel %vm1446_vm14, %v3426_v35, 2102212464 }
 0x287   : > { %v1875_v31 = vsel %vm1864_vm6, nan, %v1874_v44  ;;  %vm1498_vm11 = vc.u32 %v1496_v18, %v1492_v49  ;;  %v1427_v62 = vshrl.u32 %v2389_v40, %v3086_v30  ;;  %v1471_v45 = vshrl.u32 %v3473_v22, 16 }
 0x288   : > { %2084 = vmatpush.msrb.mxu0 %v1875_v31  ;;  %v1683_v41 = vor.u32 4788187, %v1682_v1  ;;  %v1499_v24 = vsel %vm1498_vm11, 1, %v2385_v0  ;;  %v1686_v42 = vcvt.s32.f32 %v1679_v15  ;;  %v1491_v33 = vshrl.u32 %v1487_v56, 16 }
 0x289   : > { %v1501_v10 = vadd.s32 %v1499_v24, %v1497_v61  ;;  %v1447_v5 = vsel %vm1443_vm13, %v1427_v62, %v3434_v43  ;;  %v1449_v35 = vsel %vm1445_vm4, %v3420_v13, %v1448_v57  ;;  %v1481_v36 = vadd.s32 %v1480_v11, %v1471_v45 }
 0x28a   : > { %v1684_v14 = vand.u32 2147483647, %v1683_v41  ;;  %v1493_v27 = vshrl.u32 %v1488_v58, 16  ;;  %v1500_v30 = vadd.s32 %v1496_v18, %v1492_v49  ;;  %v1450_v0 = vsel %vm1444_vm15, %v1447_v5, %v1449_v35 }
 0x28b   : > { %v1502_v40 = vadd.s32 %v1501_v10, %v1491_v33  ;;  %vm1568_vm14 = vcmp.lt.s32.totalorder %v3062_v48, 0  ;;  %vm3505_vm13 = vcmp.le.f32.partialorder %v1566_v37, 0.7853982  ;;  %v1690_v2 = vsub.s32 4, %v3450_v26 }
 0x28c   : > { %v1687_v20 = vmul.f32 %v1686_v42, %v1684_v14  ;;  %vm1506_vm12 = vc.u32 %v1481_v36, %v1500_v30  ;;  %v1504_v29 = vmul.u32 %v3459_v21, %v1450_v0  ;;  %vm1709_vm5 = vweird.f32 %v3062_v48 }
 0x28d   : > { %v1503_v34 = vadd.s32 %v1502_v40, %v1493_v27  ;;  %v1691_v37 = vsel %vm1568_vm14, %v1690_v2, %v3450_v26  ;;  %v1505_v11 = vadd.s32 %v1500_v30, %v1481_v36  ;;  %vm1413_vm3 = vcmp.lt.s32.totalorder %v3059_v4, 0 }
 0x28e   : > { %v1688_v22 = vxor.u32 2147483648, %v1687_v20  ;;  %v1693_v55 = vsel %vm3505_vm13, 0, %v1691_v37  ;;  %vm1412_vm6 = vcmp.le.f32.partialorder %v1411_v9, 0.7853982  ;;  %vm1554_vm11 = vweird.f32 %v3059_v4 }
 0x28f   : > { %v1507_v19 = vadd.s32 1, %v1503_v34  ;;  %v1710_v21 = vadd.s32 3, %v1693_v55 }
 0x290   : > { %v1689_v13 = vsel %vm1568_vm14, %v1688_v22, %v1687_v20 }
 0x291   : > { %v1692_v60 = vsel %vm3505_vm13, %v3062_v48, %v1689_v13  ;;  %v1508_v56 = vsel %vm1506_vm12, %v1507_v19, %v1503_v34  ;;  %v1711_v53 = vand.u32 3, %v1710_v21 }
 0x292   : > { %v1694_v46 = vmul.f32 %v1692_v60, %v1692_v60  ;;  %v1509_v23 = vadd.s32 %v1508_v56, %v1504_v29 }
 0x293   : > { %vm1713_vm15 = vcmp.eq.s32.totalorder %v1711_v53, 0  ;;  %vm1716_vm9 = vcmp.eq.s32.totalorder %v1711_v53, 2  ;;  %vm1712_vm1 = vcmp.lt.s32.totalorder %v1711_v53, 2 }
 0x294   : > { %v1695_v39 = vmul.f32 -0.001358992, %v1694_v46  ;;  %v1702_v12 = vmul.f32 -0.00019511016, %v1694_v46  ;;  %v1510_v7 = vadd.s32 536870912, %v1509_v23 }
 0x296   : > { %v1696_v38 = vadd.f32 0.041655596, %v1695_v39  ;;  %v1703_v28 = vadd.f32 0.008332121, %v1702_v12  ;;  %v1511_v54 = vshrl.u32 %v1510_v7, 30 }
 0x298   : > { %v1697_v52 = vmul.f32 %v1696_v38, %v1694_v46  ;;  %v1704_v58 = vmul.f32 %v1703_v28, %v1694_v46  ;;  %v1512_v50 = vshll.u32 %v1511_v54, 30  ;;  %v1535_v36 = vsub.s32 4, %v1511_v54 }
 0x29a   : > { %v1698_v32 = vadd.f32 -0.4999988, %v1697_v52  ;;  %v1705_v17 = vadd.f32 -0.16666654, %v1704_v58  ;;  %v1513_v25 = vsub.s32 %v1509_v23, %v1512_v50  ;;  %v1536_v0 = vsel %vm1413_vm3, %v1535_v36, %v1511_v54  ;;  %v2031_v52 = vld [vmem:[%s3566_s10] sm:$0xff]  ;;  %v2032_v50 = vld [vmem:[%s3566_s10 + $0x8] sm:$0xff] }
 0x29b   : > { %v1538_v13 = vsel %vm1412_vm6, 0, %v1536_v0 }
 0x29c   : > { %v1699_v6 = vmul.f32 %v1698_v32, %v1694_v46  ;;  %v1706_v16 = vmul.f32 %v1705_v17, %v1694_v46  ;;  %vm1514_vm4 = vcmp.lt.s32.totalorder %v1513_v25, 0  ;;  %v1515_v8 = vsub.s32 0, %v1513_v25  ;;  %v2034_v32 = vld [vmem:[%s3566_s10 + $0x18] sm:$0xff]  ;;  %v2042_v17 = vpop.permute.xlu2 %2041 }
 0x29d   : > { %v1555_v46 = vadd.s32 3, %v1538_v13 }
 0x29e   : > { %v1700_v59 = vadd.f32 1.0, %v1699_v6  ;;  %v1707_v26 = vadd.f32 1.0, %v1706_v16  ;;  %v1516_v63 = vsel %vm1514_vm4, %v1515_v8, %v1513_v25  ;;  %v2047_v8 = vpop.permute.xlu0 %2046 }
 0x29f   : > { %v1517_v15 = vclz %v1516_v63  ;;  %v1556_v12 = vand.u32 3, %v1555_v46 }
 0x2a0   : > { %v1708_v47 = vmul.f32 %v1707_v26, %v1692_v60  ;;  %v1717_v3 = vxor.u32 2147483648, %v1700_v59  ;;  %v2101_v26 = vld [vmem:[%s529_s13 + $0x8] sm:$0xff] }
 0x2a1   : > { %v2293_v51 = vadd.s32 4294967294, %v1517_v15  ;;  %vm1558_vm8 = vcmp.eq.s32.totalorder %v1556_v12, 0  ;;  %vm1561_vm7 = vcmp.eq.s32.totalorder %v1556_v12, 2  ;;  %vm1557_vm10 = vcmp.lt.s32.totalorder %v1556_v12, 2  ;;  %v2102_v15 = vld [vmem:[%s529_s13 + $0x10] sm:$0xff] }
 0x2a2   : > { %v1714_v49 = vxor.u32 2147483648, %v1708_v47  ;;  %v1718_v1 = vsel %vm1716_vm9, %v1717_v3, %v1708_v47  ;;  %v2052_v47 = vpop.permute.xlu1 %2051 }
 0x2a3   : > { %vm2294_vm2 = vcmp.lt.s32.totalorder %v2293_v51, 0 }
 0x2a4   : > { %v1715_v44 = vsel %vm1713_vm15, %v1700_v59, %v1714_v49  ;;  %v1520_v61 = vsel %vm2294_vm2, 0, %v2293_v51 }
 0x2a5   : > { %v1719_v18 = vsel %vm1712_vm1, %v1715_v44, %v1718_v1  ;;  %v1521_v41 = vsub.s32 32, %v1520_v61  ;;  %v1525_v57 = vsub.s32 4294967266, %v1520_v61  ;;  %v1522_v62 = vshll.u32 %v1513_v25, %v1520_v61  ;;  %v2100_v25 = vld [vmem:[%s529_s13] sm:$0xff]  ;;  %v2057_v44 = vpop.permute.xlu2 %2056 }
 0x2a6   : > { %v1720_v31 = vsel %vm1709_vm5, nan, %v1719_v18  ;;  %v2103_v18 = vld [vmem:[%s529_s13 + $0x18] sm:$0xff] }
 0x2a7   : > { %2085 = vmatpush.msrb.mxu0 %v1720_v31  ;;  %v1523_v45 = vshrl.u32 %v1505_v11, %v1521_v41  ;;  %v1526_v24 = vadd.s32 127, %v1525_v57 }
 0x2a9   : > { %v1524_v14 = vor.u32 %v1523_v45, %v1522_v62  ;;  %v1527_v42 = vshll.u32 %v1526_v24, 23 }
 0x2ab   : > { %v1528_v33 = vor.u32 4788187, %v1527_v42  ;;  %v1531_v5 = vcvt.s32.f32 %v1524_v14 }
 0x2ad   : > { %v1529_v10 = vand.u32 2147483647, %v1528_v33 }
 0x2af   : > { %v1532_v35 = vmul.f32 %v1531_v5, %v1529_v10 }
 0x2b1   : > { %v1533_v20 = vxor.u32 2147483648, %v1532_v35 }
 0x2b3   : > { %v1534_v48 = vsel %vm1413_vm3, %v1533_v20, %v1532_v35 }
 0x2b4   : > { %v1537_v27 = vsel %vm1412_vm6, %v3059_v4, %v1534_v48  ;;  %v2033_v4 = vld [vmem:[%s3566_s10 + $0x10] sm:$0xff] }
 0x2b5   : > { %v1539_v40 = vmul.f32 %v1537_v27, %v1537_v27 }
 0x2b7   : > { %v1540_v30 = vmul.f32 -0.001358992, %v1539_v40  ;;  %v1547_v22 = vmul.f32 -0.00019511016, %v1539_v40 }
 0x2b9   : > { %v1541_v34 = vadd.f32 0.041655596, %v1540_v30  ;;  %v1548_v43 = vadd.f32 0.008332121, %v1547_v22 }
 0x2bb   : > { %v1542_v19 = vmul.f32 %v1541_v34, %v1539_v40  ;;  %v1549_v2 = vmul.f32 %v1548_v43, %v1539_v40 }
 0x2bd   : > { %v1543_v60 = vadd.f32 -0.4999988, %v1542_v19  ;;  %v1550_v29 = vadd.f32 -0.16666654, %v1549_v2 }
 0x2bf   : > { %v1544_v56 = vmul.f32 %v1543_v60, %v1539_v40  ;;  %v1551_v23 = vmul.f32 %v1550_v29, %v1539_v40 }
 0x2c1   : > { %v1545_v39 = vadd.f32 1.0, %v1544_v56  ;;  %v1552_v9 = vadd.f32 1.0, %v1551_v23 }
 0x2c3   : > { %v1553_v37 = vmul.f32 %v1552_v9, %v1537_v27  ;;  %v1562_v7 = vxor.u32 2147483648, %v1545_v39 }
 0x2c5   : > { %v1559_v38 = vxor.u32 2147483648, %v1553_v37  ;;  %v1563_v54 = vsel %vm1561_vm7, %v1562_v7, %v1553_v37 }
 0x2c7   : > { %v1560_v28 = vsel %vm1558_vm8, %v1545_v39, %v1559_v38 }
 0x2c8   : > { %v1564_v55 = vsel %vm1557_vm10, %v1560_v28, %v1563_v54 }
 0x2c9   : > { %v1565_v58 = vsel %vm1554_vm11, nan, %v1564_v55 }
 0x2ca   : > { %2086 = vmatpush.msrb.mxu0 %v1565_v58 }
 0x2cb   : > { %2304 = vmatmul.msk.f32.vlgmr.msrb.gmra.mxu0 %vm550_vm0, %v2031_v52 }
 0x2d3   : > { %2305 = vmatmul.msk.f32.gmra.mxu0 %vm550_vm0, %v2032_v50 }
 0x2db   : > { %2306 = vmatmul.msk.f32.gmra.mxu0 %vm550_vm0, %v2033_v4 }
 0x2e3   : > { %2307 = vmatmul.msk.f32.gmra.mxu0 %vm550_vm0, %v2034_v32 }
 0x348   : > { %v2088_v21 = vpop.f32.mrf.mxu0 }
 0x349   : > { %v2089_v6 = vadd.f32 %v2088_v21, %v2042_v17 }
 0x34b   : > { %v2104_v16 = vadd.f32 %v2100_v25, %v2089_v6 }
 0x34d   : > { %2108 = vst [vmem:[%s537_s16] sm:$0xff] %v2104_v16 }
 0x350   : > { %v2091_v59 = vpop.f32.mrf.mxu0 }
 0x351   : > { %v2092_v53 = vadd.f32 %v2091_v59, %v2047_v8 }
 0x353   : > { %v2105_v63 = vadd.f32 %v2101_v26, %v2092_v53 }
 0x355   : > { %2109 = vst [vmem:[%s537_s16 + $0x8] sm:$0xff] %v2105_v63 }
 0x358   : > { %v2094_v3 = vpop.f32.mrf.mxu0 }
 0x359   : > { %v2095_v49 = vadd.f32 %v2094_v3, %v2052_v47 }
 0x35b   : > { %v2106_v51 = vadd.f32 %v2102_v15, %v2095_v49 }
 0x35d   : > { %2110 = vst [vmem:[%s537_s16 + $0x10] sm:$0xff] %v2106_v51 }
 0x360   : > { %v2097_v1 = vpop.f32.mrf.mxu0 }
 0x361   : > { %v2098_v61 = vadd.f32 %v2097_v1, %v2057_v44 }
 0x363   : > { %v2107_v31 = vadd.f32 %v2103_v18, %v2098_v61 }
 0x365   : > { %2111 = vst [vmem:[%s537_s16 + $0x18] sm:$0xff] %v2107_v31 }
 0x366 PF: > { %s22_s23 = sadd.s32 1, %s2383_s23   ;;  %s3591_s21 = smov %s2379_s22 }
 0x367   : > { %p19_p5 = scmp.ge.s32.totalorder %s22_s23, 4   ;;  %s3592_s22 = smov %s3594_s24 }
 0x369   :  { %21 = sbr.rel (!%p19_p5) target bundleno = 2 (0x2), region = 107 }

// kernel: _lambda_.10
= control target key start
LH: loop header
LB: loop body
LE: loop exit
PB: predicated region body
PF: predicated region fallthrough
CT: control target
= control target key end

     0   :  { %s2272_s13 = smov 0   ;;  %s2274_s14 = smov 0   ;;  %s3337_s0 = inlined_call_operand.vmem [shape: f32[2,32,128], index: 0, kind: input, shape index: {}, may-alias: {0,2}]   ;;  %s3338_s1 = inlined_call_operand.vmem [shape: f32[2,32,128], index: 1, kind: input, shape index: {}]   ;;  %s3339_s2 = inlined_call_operand.vmem [shape: f32[2,32,128], index: 2, kind: input, shape index: {}, may-alias: {0,2}]   ;;  %s3340_s3 = inlined_call_operand.vmem [shape: f32[32,32], index: 3, kind: input, shape index: {}]   ;;  %s3341_s4 = inlined_call_operand.vmem [shape: f32[32,32], index: 4, kind: input, shape index: {}]   ;;  %s3342_s5 = inlined_call_operand.vmem [shape: f32[32,1], index: 5, kind: input, shape index: {}]   ;;  %s3343_s6 = inlined_call_operand.vmem [shape: f32[32,32], index: 6, kind: input, shape index: {}]   ;;  %s3344_s7 = inlined_call_operand.vmem [shape: f32[32,1], index: 7, kind: input, shape index: {}]   ;;  %s3345_s8 = inlined_call_operand.vmem [shape: f32[32,32], index: 8, kind: input, shape index: {}]   ;;  %s3346_s9 = inlined_call_operand.vmem [shape: f32[32,1], index: 9, kind: input, shape index: {}]   ;;  %s3347_s10 = inlined_call_operand.vmem [shape: f32[2,32,128], index: 10, kind: output, shape index: {}]  }
   0x1   :  { %s2276_s15 = smov 0  }
   0x2 LB: > { %s32_s16 = sadd.s32 1, %s2204_s14  ;;  %p2097_p0 = scmp.ge.s32.totalorder %s2208_s15, 1  ;;  %s2208_s15 = sphi %s2276_s15, %s20_s15   ;;  %s2204_s14 = sphi %s2274_s14, %s3374_s14   ;;  %s2200_s13 = sphi %s2272_s13, %s3373_s13  }
   0x3   : > { %p34_p1 = scmp.ge.s32.totalorder %s32_s16, 2  ;;  %p361_p2 = scmp.lt.s32.totalorder %s2208_s15, 3 }
   0x5   : > { %s3376_s16 = smov (%p34_p1, %s32_s16), 0  ;;  %p362_p3 = pnand %p2097_p0, %p361_p2 }
   0x6   : > { %p421_p4 = scmp.lt.s32.totalorder (!%p362_p3), %s2200_s13, 1 }
   0x7   : > { %365 = sbr.rel (%p362_p3) target bundleno = 861 (0x35d), region = 60 }
   0xc   : > { %v454_v0 = vld [vmem:[%s3342_s5 + $0x8] sm:$0xff]  ;;  %v2210_v1 = vmov 0   ;;  %v456_v2 = vld [vmem:[%s3342_s5 + $0x18] sm:$0xff]  ;;  %s3378_s13 = smov (!%p421_p4, %s2200_s13), 1  ;;  %v453_v7 = vld [vmem:[%s3342_s5] sm:$0xff]  ;;  %vm465_vm0 = vcmask 261120  }
   0xd   : > { %2184 = vset.pattern.permute.xlu1 %v2210_v1  ;;  %2183 = vset.pattern.permute.xlu0 %v2210_v1  ;;  %s2299_s21 = sshll.u32 %s3378_s13, 5  ;;  %v455_v8 = vld [vmem:[%s3342_s5 + $0x10] sm:$0xff]  ;;  %v457_v13 = vld [vmem:[%s3340_s3] sm:$0xff]  ;;  %v1209_v15 = vld [vmem:[%s3344_s7 + $0x8] sm:$0xff] }
   0xe   : > { %514 = vperm.xlu1 %2184, %v454_v0   ;;  %524 = vperm.xlu0 %2183, %v456_v2   ;;  %s428_s24 = scalar_lea.vmem %s3337_s0, %s2299_s21  ;;  %s436_s27 = scalar_lea.vmem %s3338_s1, %s2299_s21  ;;  %v531_v14 = vld [vmem:[%s3341_s4] sm:$0xff]  ;;  %v458_v17 = vld [vmem:[%s3340_s3 + $0x8] sm:$0xff]  ;;  %v1899_v20 = vld [vmem:[%s3346_s9 + $0x10] sm:$0xff]  ;;  %v3348_v2 = vmov 1326507024  }
   0xf   : > { %2185 = vset.pattern.permute.xlu2 %v2210_v1  ;;  %v464_v3 = vld [vmem:[%s428_s24 + $0x18] sm:$0xff]  ;;  %v463_v4 = vld [vmem:[%s428_s24 + $0x10] sm:$0xff]  ;;  %v462_v9 = vld [vmem:[%s428_s24 + $0x8] sm:$0xff]  ;;  %s444_s17 = scalar_lea.vmem %s3339_s2, %s2299_s21  ;;  %s452_s20 = scalar_lea.vmem %s3347_s10, %s2299_s21 }
  0x10   : > { %v538_v5 = vld [vmem:[%s436_s27 + $0x18] sm:$0xff]  ;;  %490 = vmatpush.msra.mxu0 %v464_v3  ;;  %v537_v6 = vld [vmem:[%s436_s27 + $0x10] sm:$0xff]  ;;  %v536_v10 = vld [vmem:[%s436_s27 + $0x8] sm:$0xff] }
  0x11   : > { %563 = vmatpush.msra.mxu1 %v538_v5  ;;  %v461_v11 = vld [vmem:[%s428_s24] sm:$0xff]  ;;  %v532_v18 = vld [vmem:[%s3341_s4 + $0x8] sm:$0xff]  ;;  %v459_v21 = vld [vmem:[%s3340_s3 + $0x10] sm:$0xff] }
  0x12   : > { %491 = vmatpush.msra.mxu0 %v463_v4  ;;  %v535_v12 = vld [vmem:[%s436_s27] sm:$0xff]  ;;  %v1898_v19 = vld [vmem:[%s3346_s9 + $0x8] sm:$0xff]  ;;  %v533_v22 = vld [vmem:[%s3341_s4 + $0x10] sm:$0xff] }
  0x13   : > { %564 = vmatpush.msra.mxu1 %v537_v6  ;;  %v1208_v16 = vld [vmem:[%s3344_s7] sm:$0xff]  ;;  %v460_v23 = vld [vmem:[%s3340_s3 + $0x18] sm:$0xff] }
  0x14   : > { %492 = vmatpush.msra.mxu0 %v462_v9  ;;  %v534_v24 = vld [vmem:[%s3341_s4 + $0x18] sm:$0xff]  ;;  %v3350_v9 = vmov 920167782  }
  0x15   : > { %565 = vmatpush.msra.mxu1 %v536_v10 }
  0x16   : > { %509 = vperm.xlu1 %2184, %v453_v7   ;;  %519 = vperm.xlu0 %2183, %v455_v8  }
  0x17   : > { %493 = vmatpush.msra.mxu0 %v461_v11  ;;  %566 = vmatpush.msra.mxu1 %v535_v12 }
  0x18   : > { %2106 = vmatmul.msk.f32.vlgmr.msra.gmra.mxu0 %vm465_vm0, %v457_v13  ;;  %2110 = vmatmul.msk.f32.vlgmr.msra.gmra.mxu1 %vm465_vm0, %v531_v14 }
  0x1e   : > { %1219 = vperm.xlu0 %2183, %v1209_v15   ;;  %1214 = vperm.xlu1 %2184, %v1208_v16   ;;  %v2213_v16 = vmov 2102212464  }
  0x20   : > { %2107 = vmatmul.msk.f32.gmra.mxu0 %vm465_vm0, %v458_v17  ;;  %2111 = vmatmul.msk.f32.gmra.mxu1 %vm465_vm0, %v532_v18 }
  0x26   : > { %1908 = vperm.xlu0 %2183, %v1898_v19   ;;  %1913 = vperm.xlu1 %2184, %v1899_v20  }
  0x28   : > { %2108 = vmatmul.msk.f32.gmra.mxu0 %vm465_vm0, %v459_v21  ;;  %2112 = vmatmul.msk.f32.gmra.mxu1 %vm465_vm0, %v533_v22 }
  0x30   : > { %2109 = vmatmul.msk.f32.gmra.mxu0 %vm465_vm0, %v460_v23  ;;  %2113 = vmatmul.msk.f32.gmra.mxu1 %vm465_vm0, %v534_v24 }
  0x80   : > { %v515_v25 = vpop.permute.xlu1 %514  ;;  %v525_v32 = vpop.permute.xlu0 %524 }
  0x88   : > { %v510_v26 = vpop.permute.xlu1 %509  ;;  %v520_v44 = vpop.permute.xlu0 %519 }
  0x95   : > { %v495_v27 = vpop.f32.mrf.mxu0  ;;  %v568_v28 = vpop.f32.mrf.mxu1 }
  0x96   : > { %v527_v29 = vadd.f32 %v510_v26, %v495_v27 }
  0x98   : > { %v2359_v30 = vadd.f32 %v568_v28, %v527_v29 }
  0x9a   : > { %v587_v31 = vand.u32 2139095040, %v2359_v30 }
  0x9c   : > { %v588_v33 = vshrl.u32 %v587_v31, 23 }
  0x9d   : > { %v498_v34 = vpop.f32.mrf.mxu0  ;;  %v571_v35 = vpop.f32.mrf.mxu1 }
  0x9e   : > { %v2114_v36 = vadd.s32 4294967169, %v588_v33  ;;  %v528_v37 = vadd.f32 %v515_v25, %v498_v34 }
  0xa0   : > { %v2362_v38 = vadd.f32 %v571_v35, %v528_v37  ;;  %v594_v39 = vadd.s32 1, %v2114_v36  ;;  %v3353_v37 = vmov 2475754826  }
  0xa2   : > { %v742_v40 = vand.u32 2139095040, %v2362_v38  ;;  %vm595_vm1 = vcmp.gt.s32.totalorder %v594_v39, 0  ;;  %v3352_v62 = vand.u32 2147483647, %v2362_v38 }
  0xa3   : > { %v596_v47 = vsel %vm595_vm1, %v594_v39, 0 }
  0xa4   : > { %v743_v41 = vshrl.u32 %v742_v40, 23  ;;  %v2367_v50 = vand.u32 31, %v596_v47  ;;  %v2388_v8 = vshrl.u32 %v596_v47, 5  ;;  %v2396_v12 = vand.u32 8388607, %v3352_v62 }
  0xa5   : > { %v501_v42 = vpop.f32.mrf.mxu0  ;;  %v574_v43 = vpop.f32.mrf.mxu1 }
  0xa6   : > { %v2117_v45 = vadd.s32 4294967169, %v743_v41  ;;  %v529_v46 = vadd.f32 %v520_v44, %v501_v42  ;;  %v2376_v60 = vsub.s32 32, %v2367_v50  ;;  %v610_v17 = vshll.u32 %v2213_v16, %v2367_v50 }
  0xa7   : > { %v2410_v25 = vshll.u32 %v3350_v9, %v2367_v50  ;;  %v747_v28 = vor.u32 8388608, %v2396_v12 }
  0xa8   : > { %v749_v48 = vadd.s32 1, %v2117_v45  ;;  %v2365_v49 = vadd.f32 %v574_v43, %v529_v46  ;;  %v611_v10 = vshrl.u32 %v3350_v9, %v2376_v60  ;;  %v2414_v26 = vshrl.u32 %v3348_v2, %v2376_v60 }
  0xaa   : > { %vm750_vm2 = vcmp.gt.s32.totalorder %v749_v48, 0  ;;  %v897_v51 = vand.u32 2139095040, %v2365_v49  ;;  %v3355_v52 = vand.u32 2147483647, %v2365_v49  ;;  %v2419_v29 = vor.u32 %v611_v10, %v610_v17 }
  0xab   : > { %v751_v53 = vsel %vm750_vm2, %v749_v48, 0 }
  0xac   : > { %v2371_v54 = vand.u32 31, %v751_v53  ;;  %v898_v55 = vshrl.u32 %v897_v51, 23  ;;  %v901_v59 = vand.u32 8388607, %v3355_v52  ;;  %v2398_v13 = vshrl.u32 %v751_v53, 5 }
  0xad   : > { %v504_v56 = vpop.f32.mrf.mxu0  ;;  %v577_v57 = vpop.f32.mrf.mxu1  ;;  %v2216_v51 = vmov 2131351028  }
  0xae   : > { %v530_v58 = vadd.f32 %v525_v32, %v504_v56  ;;  %v2379_v61 = vsub.s32 32, %v2371_v54  ;;  %v2120_v63 = vadd.s32 4294967169, %v898_v55  ;;  %v902_v7 = vor.u32 8388608, %v901_v59 }
  0xaf   : > { %v768_v11 = vshll.u32 %v3350_v9, %v2371_v54  ;;  %v765_v27 = vshll.u32 %v2213_v16, %v2371_v54  ;;  %vm774_vm4 = vcmp.lt.s32.totalorder %v2398_v13, 4  ;;  %v2214_v32 = vmov 683565275  }
  0xb0   : > { %v2382_v0 = vadd.f32 %v577_v57, %v530_v58  ;;  %v769_v3 = vshrl.u32 %v3348_v2, %v2379_v61  ;;  %v904_v4 = vadd.s32 1, %v2120_v63  ;;  %v766_v18 = vshrl.u32 %v3350_v9, %v2379_v61 }
  0xb1   : > { %v2406_v24 = vshll.u32 %v902_v7, 8  ;;  %v2426_v33 = vshll.u32 %v2214_v32, %v2371_v54  ;;  %v2434_v39 = vshrl.u32 %v3353_v37, %v2379_v61  ;;  %v2459_v55 = vshll.u32 %v3353_v37, %v2371_v54 }
  0xb2   : > { %v1052_v5 = vand.u32 2139095040, %v2382_v0  ;;  %v1049_v6 = vand.u32 2147483647, %v2382_v0  ;;  %vm905_vm3 = vcmp.gt.s32.totalorder %v904_v4, 0  ;;  %v770_v19 = vor.u32 %v769_v3, %v768_v11 }
  0xb3   : > { %v906_v20 = vsel %vm905_vm3, %v904_v4, 0  ;;  %v2428_v34 = vor.u32 %v766_v18, %v765_v27  ;;  %v2445_v43 = vand.u32 65535, %v2406_v24  ;;  %v2452_v46 = vshrl.u32 %v2406_v24, 16 }
  0xb4   : > { %v1053_v14 = vshrl.u32 %v1052_v5, 23  ;;  %v1056_v15 = vand.u32 8388607, %v1049_v6  ;;  %v908_v21 = vand.u32 31, %v906_v20  ;;  %v2430_v35 = vshrl.u32 %v906_v20, 5 }
  0xb5   : > { %v2438_v40 = vsel %vm774_vm4, %v770_v19, 1326507024 }
  0xb6   : > { %v2123_v22 = vadd.s32 4294967169, %v1053_v14  ;;  %v1057_v23 = vor.u32 8388608, %v1056_v15  ;;  %v2422_v31 = vsub.s32 32, %v908_v21  ;;  %v920_v47 = vshll.u32 %v2213_v16, %v908_v21 }
  0xb7   : > { %v923_v56 = vshll.u32 %v3350_v9, %v908_v21  ;;  %vm929_vm6 = vcmp.lt.s32.totalorder %v2430_v35, 4  ;;  %v911_v58 = vshll.u32 %v2214_v32, %v908_v21  ;;  %v914_v4 = vshll.u32 %v3353_v37, %v908_v21 }
  0xb8   : > { %v1059_v36 = vadd.s32 1, %v2123_v22  ;;  %v921_v41 = vshrl.u32 %v3350_v9, %v2422_v31  ;;  %v2442_v42 = vshll.u32 %v1057_v23, 8  ;;  %v924_v44 = vshrl.u32 %v3348_v2, %v2422_v31 }
  0xb9   : > { %v912_v45 = vshrl.u32 %v3353_v37, %v2422_v31  ;;  %v915_v53 = vshrl.u32 %v2216_v51, %v2422_v31  ;;  %v917_v18 = vshll.u32 %v2216_v51, %v908_v21  ;;  %vm926_vm11 = vcmp.lt.s32.totalorder %v2430_v35, 1 }
  0xba   : > { %vm1060_vm5 = vcmp.gt.s32.totalorder %v1059_v36, 0  ;;  %v2464_v59 = vor.u32 %v921_v41, %v920_v47  ;;  %v1098_v63 = vand.u32 65535, %v2442_v42  ;;  %v1099_v3 = vshrl.u32 %v2442_v42, 16 }
  0xbb   : > { %v1061_v48 = vsel %vm1060_vm5, %v1059_v36, 0  ;;  %v925_v5 = vor.u32 %v924_v44, %v923_v56  ;;  %v2471_v11 = vor.u32 %v912_v45, %v911_v58  ;;  %v2475_v17 = vor.u32 %v915_v53, %v914_v4 }
  0xbc   : > { %v1063_v57 = vand.u32 31, %v1061_v48  ;;  %v2469_v7 = vshrl.u32 %v1061_v48, 5  ;;  %v935_v21 = vsel %vm929_vm6, %v2464_v59, 920167782  ;;  %v918_v58 = vshrl.u32 %v2213_v16, %v2422_v31 }
  0xbd   : > { %vm927_vm12 = vcmp.lt.s32.totalorder %v2430_v35, 2  ;;  %vm928_vm13 = vcmp.lt.s32.totalorder %v2430_v35, 3 }
  0xbe   : > { %v1064_v10 = vsub.s32 32, %v1063_v57  ;;  %v1075_v14 = vshll.u32 %v2213_v16, %v1063_v57  ;;  %v1078_v15 = vshll.u32 %v3350_v9, %v1063_v57  ;;  %v1066_v22 = vshll.u32 %v2214_v32, %v1063_v57 }
  0xbf   : > { %v1069_v27 = vshll.u32 %v3353_v37, %v1063_v57  ;;  %v1072_v41 = vshll.u32 %v2216_v51, %v1063_v57  ;;  %vm1084_vm7 = vcmp.lt.s32.totalorder %v2469_v7, 4  ;;  %vm1081_vm8 = vcmp.lt.s32.totalorder %v2469_v7, 1 }
  0xc0   : > { %v1076_v19 = vshrl.u32 %v3350_v9, %v1064_v10  ;;  %v1079_v20 = vshrl.u32 %v3348_v2, %v1064_v10  ;;  %v1067_v23 = vshrl.u32 %v3353_v37, %v1064_v10  ;;  %v1070_v36 = vshrl.u32 %v2216_v51, %v1064_v10 }
  0xc1   : > { %v1073_v44 = vshrl.u32 %v2213_v16, %v1064_v10  ;;  %vm1083_vm9 = vcmp.lt.s32.totalorder %v2469_v7, 3  ;;  %vm1082_vm10 = vcmp.lt.s32.totalorder %v2469_v7, 2  ;;  %v2517_v2 = vor.u32 %v918_v58, %v917_v18 }
  0xc2   : > { %v1077_v45 = vor.u32 %v1076_v19, %v1075_v14  ;;  %v1080_v47 = vor.u32 %v1079_v20, %v1078_v15  ;;  %v1068_v48 = vor.u32 %v1067_v23, %v1066_v22  ;;  %v1071_v53 = vor.u32 %v1070_v36, %v1069_v27 }
  0xc3   : > { %v1074_v56 = vor.u32 %v1073_v44, %v1072_v41  ;;  %v939_v20 = vsel %vm929_vm6, %v925_v5, 1326507024 }
  0xc4   : > { %v1090_v4 = vsel %vm1084_vm7, %v1077_v45, 920167782  ;;  %v1094_v57 = vsel %vm1084_vm7, %v1080_v47, 1326507024  ;;  %v1089_v14 = vsel %vm1081_vm8, %v1068_v48, %v1071_v53  ;;  %v1065_v47 = vshrl.u32 %v2214_v32, %v1064_v10 }
  0xc5   : > { %v1091_v15 = vsel %vm1083_vm9, %v1074_v56, %v1090_v4  ;;  %v1093_v19 = vsel %vm1081_vm8, %v1071_v53, %v1074_v56  ;;  %v1095_v23 = vsel %vm1083_vm9, %v1077_v45, %v1094_v57  ;;  %v1086_v27 = vsel %vm1084_vm7, %v1074_v56, 2102212464 }
  0xc6   : > { %v1092_v22 = vsel %vm1082_vm10, %v1089_v14, %v1091_v15  ;;  %v1096_v36 = vsel %vm1082_vm10, %v1093_v19, %v1095_v23  ;;  %v1085_v45 = vsel %vm1081_vm8, %v1065_v47, %v1068_v48  ;;  %v1087_v56 = vsel %vm1083_vm9, %v1071_v53, %v1086_v27 }
  0xc7   : > { %v1122_v41 = vand.u32 65535, %v1092_v22  ;;  %v1123_v44 = vshrl.u32 %v1092_v22, 16  ;;  %v1100_v4 = vand.u32 65535, %v1096_v36  ;;  %v1101_v5 = vshrl.u32 %v1096_v36, 16 }
  0xc8   : > { %v934_v48 = vsel %vm926_vm11, %v2471_v11, %v2475_v17 }
  0xc9   : > { %v1125_v14 = vmul.u32 %v1123_v44, %v1098_v63  ;;  %v1126_v15 = vmul.u32 %v1122_v41, %v1099_v3  ;;  %v1103_v57 = vmul.u32 %v1101_v5, %v1098_v63  ;;  %v1104_v19 = vmul.u32 %v1100_v4, %v1099_v3 }
  0xca   : > { %v1102_v22 = vmul.u32 %v1100_v4, %v1098_v63  ;;  %v1124_v10 = vmul.u32 %v1122_v41, %v1098_v63  ;;  %v1127_v23 = vmul.u32 %v1123_v44, %v1099_v3  ;;  %v1105_v18 = vmul.u32 %v1101_v5, %v1099_v3 }
  0xcb   : > { %v1128_v36 = vshll.u32 %v1125_v14, 16  ;;  %v1106_v58 = vshll.u32 %v1103_v57, 16  ;;  %v1129_v9 = vshrl.u32 %v1125_v14, 16  ;;  %v1130_v62 = vshll.u32 %v1126_v15, 16 }
  0xcc   : > { %v1108_v37 = vshll.u32 %v1104_v19, 16  ;;  %v936_v63 = vsel %vm928_vm13, %v2517_v2, %v935_v21  ;;  %v1107_v3 = vshrl.u32 %v1103_v57, 16  ;;  %v938_v21 = vsel %vm926_vm11, %v2475_v17, %v2517_v2 }
  0xcd   : > { %vm1132_vm14 = vc.u32 %v1124_v10, %v1128_v36  ;;  %v1134_v52 = vadd.s32 %v1128_v36, %v1124_v10  ;;  %vm1110_vm15 = vc.u32 %v1102_v22, %v1106_v58  ;;  %v1112_v53 = vadd.s32 %v1106_v58, %v1102_v22 }
  0xce   : > { %v1133_v27 = vsel %vm1132_vm14, 1, %v2210_v1  ;;  %v1111_v41 = vsel %vm1110_vm15, 1, %v2210_v1  ;;  %v937_v5 = vsel %vm927_vm12, %v934_v48, %v936_v63  ;;  %v940_v57 = vsel %vm928_vm13, %v2464_v59, %v939_v20 }
  0xcf   : > { %v1135_v44 = vadd.s32 %v1133_v27, %v1127_v23  ;;  %vm1136_vm1 = vc.u32 %v1134_v52, %v1130_v62  ;;  %v1113_v47 = vadd.s32 %v1111_v41, %v1105_v18  ;;  %vm1114_vm2 = vc.u32 %v1112_v53, %v1108_v37 }
  0xd0   : > { %v1137_v4 = vsel %vm1136_vm1, 1, %v2210_v1  ;;  %v1115_v14 = vsel %vm1114_vm2, 1, %v2210_v1  ;;  %v941_v37 = vsel %vm927_vm12, %v938_v21, %v940_v57  ;;  %v967_v23 = vand.u32 65535, %v937_v5 }
  0xd1   : > { %v1139_v22 = vadd.s32 %v1137_v4, %v1135_v44  ;;  %v1117_v10 = vadd.s32 %v1115_v14, %v1113_v47  ;;  %v968_v36 = vshrl.u32 %v937_v5, 16  ;;  %v1131_v18 = vshrl.u32 %v1126_v15, 16 }
  0xd2   : > { %v945_v48 = vand.u32 65535, %v941_v37  ;;  %v946_v53 = vshrl.u32 %v941_v37, 16  ;;  %v1088_v27 = vsel %vm1082_vm10, %v1085_v45, %v1087_v56  ;;  %v1109_v63 = vshrl.u32 %v1104_v19, 16 }
  0xd3   : > { %v1140_v58 = vadd.s32 %v1139_v22, %v1129_v9  ;;  %v1118_v41 = vadd.s32 %v1117_v10, %v1107_v3  ;;  %v970_v44 = vmul.u32 %v968_v36, %v2445_v43  ;;  %v760_v47 = vshrl.u32 %v2216_v51, %v2379_v61 }
  0xd4   : > { %v948_v59 = vmul.u32 %v946_v53, %v2445_v43  ;;  %v949_v20 = vmul.u32 %v945_v48, %v2452_v46  ;;  %v2556_v9 = vadd.s32 %v1134_v52, %v1130_v62  ;;  %v971_v15 = vmul.u32 %v967_v23, %v2452_v46 }
  0xd5   : > { %v1141_v4 = vadd.s32 %v1140_v58, %v1131_v18  ;;  %v2554_v5 = vadd.s32 %v1118_v41, %v1109_v63  ;;  %v973_v7 = vshll.u32 %v970_v44, 16  ;;  %v1142_v45 = vmul.u32 %v2442_v42, %v1088_v27 }
  0xd6   : > { %v947_v19 = vmul.u32 %v945_v48, %v2445_v43  ;;  %v951_v3 = vshll.u32 %v948_v59, 16  ;;  %v950_v14 = vmul.u32 %v946_v53, %v2452_v46  ;;  %v969_v22 = vmul.u32 %v967_v23, %v2445_v43 }
  0xd7   : > { %v1145_v56 = vadd.s32 1, %v1141_v4  ;;  %vm1144_vm3 = vc.u32 %v2554_v5, %v2556_v9  ;;  %v972_v21 = vmul.u32 %v968_v36, %v2452_v46  ;;  %v953_v62 = vshll.u32 %v949_v20, 16 }
  0xd8   : > { %vm955_vm5 = vc.u32 %v947_v19, %v951_v3  ;;  %v957_v57 = vadd.s32 %v951_v3, %v947_v19  ;;  %v975_v37 = vshll.u32 %v971_v15, 16  ;;  %vm977_vm7 = vc.u32 %v969_v22, %v973_v7 }
  0xd9   : > { %v1146_v52 = vsel %vm1144_vm3, %v1145_v56, %v1141_v4  ;;  %v956_v42 = vsel %vm955_vm5, 1, %v2210_v1  ;;  %v978_v58 = vsel %vm977_vm7, 1, %v2210_v1  ;;  %v979_v48 = vadd.s32 %v973_v7, %v969_v22 }
  0xda   : > { %v1147_v10 = vadd.s32 %v1146_v52, %v1142_v45  ;;  %v958_v18 = vadd.s32 %v956_v42, %v950_v14  ;;  %vm959_vm8 = vc.u32 %v957_v57, %v953_v62  ;;  %v910_v43 = vshrl.u32 %v2214_v32, %v2422_v31 }
  0xdb   : > { %v960_v46 = vsel %vm959_vm8, 1, %v2210_v1  ;;  %v980_v23 = vadd.s32 %v978_v58, %v972_v21  ;;  %v931_v36 = vsel %vm929_vm6, %v2517_v2, 2102212464  ;;  %v952_v53 = vshrl.u32 %v948_v59, 16 }
  0xdc   : > { %v1148_v27 = vadd.s32 536870912, %v1147_v10  ;;  %v962_v63 = vadd.s32 %v960_v46, %v958_v18  ;;  %vm981_vm9 = vc.u32 %v979_v48, %v975_v37  ;;  %v954_v4 = vshrl.u32 %v949_v20, 16 }
  0xdd   : > { %v982_v45 = vsel %vm981_vm9, 1, %v2210_v1  ;;  %v763_v7 = vshrl.u32 %v2213_v16, %v2379_v61  ;;  %v974_v31 = vshrl.u32 %v970_v44, 16  ;;  %v762_v3 = vshll.u32 %v2216_v51, %v2371_v54 }
  0xde   : > { %v2574_v41 = vshrl.u32 %v1148_v27, 30  ;;  %v963_v56 = vadd.s32 %v962_v63, %v952_v53  ;;  %v984_v19 = vadd.s32 %v982_v45, %v980_v23  ;;  %v930_v2 = vsel %vm926_vm11, %v910_v43, %v2471_v11 }
  0xdf   : > { %v932_v59 = vsel %vm928_vm13, %v2475_v17, %v931_v36  ;;  %v976_v20 = vshrl.u32 %v971_v15, 16  ;;  %v2591_v44 = vor.u32 %v760_v47, %v2459_v55  ;;  %v2593_v52 = vor.u32 %v763_v7, %v762_v3 }
  0xe0   : > { %v1150_v14 = vshll.u32 %v2574_v41, 30  ;;  %v2588_v22 = vadd.s32 %v963_v56, %v954_v4  ;;  %v985_v21 = vadd.s32 %v984_v19, %v974_v31  ;;  %v615_v54 = vor.u32 %v2414_v26, %v2410_v25 }
  0xe1   : > { %v2597_v57 = vadd.s32 %v979_v48, %v975_v37  ;;  %vm773_vm6 = vcmp.lt.s32.totalorder %v2398_v13, 3  ;;  %v933_v11 = vsel %vm927_vm12, %v930_v2, %v932_v59  ;;  %v758_v15 = vor.u32 %v2434_v39, %v2426_v33 }
  0xe2   : > { %v1151_v62 = vsub.s32 %v1147_v10, %v1150_v14  ;;  %v986_v17 = vadd.s32 %v985_v21, %v976_v20  ;;  %v785_v55 = vsel %vm773_vm6, %v2428_v34, %v2438_v40  ;;  %vm771_vm13 = vcmp.lt.s32.totalorder %v2398_v13, 1 }
  0xe3   : > { %vm989_vm11 = vc.u32 %v2588_v22, %v2597_v57  ;;  %v780_v25 = vsel %vm774_vm4, %v2428_v34, 920167782  ;;  %vm772_vm12 = vcmp.lt.s32.totalorder %v2398_v13, 2  ;;  %v783_v33 = vsel %vm771_vm13, %v2591_v44, %v2593_v52 }
  0xe4   : > { %vm1152_vm10 = vcmp.lt.s32.totalorder %v1151_v62, 0  ;;  %v1153_v47 = vsub.s32 0, %v1151_v62  ;;  %v990_v26 = vadd.s32 1, %v986_v17  ;;  %v987_v39 = vmul.u32 %v2406_v24, %v933_v11 }
  0xe5   : > { %v786_v40 = vsel %vm772_vm12, %v783_v33, %v785_v55  ;;  %v2624_v10 = vshll.u32 %v747_v28, 8  ;;  %vm619_vm14 = vcmp.lt.s32.totalorder %v2388_v8, 4  ;;  %v779_v58 = vsel %vm771_vm13, %v758_v15, %v2591_v44 }
  0xe6   : > { %v1154_v35 = vsel %vm1152_vm10, %v1153_v47, %v1151_v62  ;;  %v991_v42 = vsel %vm989_vm11, %v990_v26, %v986_v17  ;;  %v791_v37 = vshrl.u32 %v786_v40, 16  ;;  %v781_v24 = vsel %vm773_vm6, %v2593_v52, %v780_v25 }
  0xe7   : > { %v1155_v34 = vclz %v1154_v35  ;;  %v992_v18 = vadd.s32 %v991_v42, %v987_v39  ;;  %v790_v48 = vand.u32 65535, %v786_v40  ;;  %v2636_v12 = vsel %vm619_vm14, %v2419_v29, 920167782 }
  0xe8   : > { %v2640_v28 = vsel %vm619_vm14, %v615_v54, 1326507024  ;;  %v788_v43 = vand.u32 65535, %v2624_v10  ;;  %vm1051_vm15 = vcmp.lt.s32.totalorder %v2382_v0, 0  ;;  %v755_v23 = vshrl.u32 %v2214_v32, %v2379_v61 }
  0xe9   : > { %v2124_v27 = vadd.s32 4294967294, %v1155_v34  ;;  %v993_v46 = vadd.s32 536870912, %v992_v18  ;;  %v789_v36 = vshrl.u32 %v2624_v10, 16  ;;  %vm2649_vm1 = vcmp.le.f32.partialorder %v1049_v6, 0.7853982 }
  0xea   : > { %v1143_v63 = vadd.s32 %v2556_v9, %v2554_v5  ;;  %v782_v4 = vsel %vm772_vm12, %v779_v58, %v781_v24  ;;  %v793_v45 = vmul.u32 %v791_v37, %v788_v43  ;;  %v1173_v56 = vsub.s32 4, %v2574_v41 }
  0xeb   : > { %vm2125_vm2 = vcmp.lt.s32.totalorder %v2124_v27, 0  ;;  %v2658_v61 = vshrl.u32 %v993_v46, 30  ;;  %v2660_v31 = vmul.u32 %v790_v48, %v789_v36  ;;  %v792_v3 = vmul.u32 %v790_v48, %v788_v43 }
  0xec   : > { %v1158_v7 = vsel %vm2125_vm2, 0, %v2124_v27  ;;  %v796_v14 = vshll.u32 %v793_v45, 16  ;;  %v795_v59 = vmul.u32 %v791_v37, %v789_v36  ;;  %v812_v5 = vand.u32 65535, %v782_v4 }
  0xed   : > { %v1159_v19 = vsub.s32 32, %v1158_v7  ;;  %v1163_v6 = vsub.s32 4294967266, %v1158_v7  ;;  %v995_v2 = vshll.u32 %v2658_v61, 30  ;;  %v813_v9 = vshrl.u32 %v782_v4, 16 }
  0xee   : > { %v1160_v20 = vshll.u32 %v1151_v62, %v1158_v7  ;;  %vm800_vm3 = vc.u32 %v792_v3, %v796_v14  ;;  %v798_v17 = vshll.u32 %v2660_v31, 16  ;;  %v802_v47 = vadd.s32 %v796_v14, %v792_v3 }
  0xef   : > { %v1161_v21 = vshrl.u32 %v1143_v63, %v1159_v19  ;;  %v1164_v54 = vadd.s32 127, %v1163_v6  ;;  %v2663_v11 = vsub.s32 %v992_v18, %v995_v2  ;;  %v801_v55 = vsel %vm800_vm3, 1, %v2210_v1 }
  0xf0   : > { %v1174_v33 = vsel %vm1051_vm15, %v1173_v56, %v2574_v41  ;;  %v803_v35 = vadd.s32 %v801_v55, %v795_v59  ;;  %v775_v39 = vsel %vm771_vm13, %v755_v23, %v758_v15  ;;  %vm804_vm7 = vc.u32 %v802_v47, %v798_v17 }
  0xf1   : > { %v1162_v25 = vor.u32 %v1161_v21, %v1160_v20  ;;  %v1165_v26 = vshll.u32 %v1164_v54, 23  ;;  %vm997_vm5 = vcmp.lt.s32.totalorder %v2663_v11, 0  ;;  %v998_v62 = vsub.s32 0, %v2663_v11 }
  0xf2   : > { %v776_v34 = vsel %vm774_vm4, %v2593_v52, 2102212464  ;;  %v805_v42 = vsel %vm804_vm7, 1, %v2210_v1  ;;  %v815_v37 = vmul.u32 %v813_v9, %v788_v43  ;;  %v1176_v41 = vsel %vm2649_vm1, 0, %v1174_v33 }
  0xf3   : > { %v1166_v40 = vor.u32 4788187, %v1165_v26  ;;  %v999_v18 = vsel %vm997_vm5, %v998_v62, %v2663_v11  ;;  %v807_v58 = vadd.s32 %v805_v42, %v803_v35  ;;  %v816_v24 = vmul.u32 %v812_v5, %v789_v36 }
  0xf4   : > { %v1169_v27 = vcvt.s32.f32 %v1162_v25  ;;  %v1000_v46 = vclz %v999_v18  ;;  %v818_v15 = vshll.u32 %v815_v37, 16  ;;  %v988_v23 = vadd.s32 %v2597_v57, %v2588_v22 }
  0xf5   : > { %v1167_v48 = vand.u32 2147483647, %v1166_v40  ;;  %v777_v52 = vsel %vm773_vm6, %v2591_v44, %v776_v34  ;;  %v797_v63 = vshrl.u32 %v793_v45, 16  ;;  %v814_v4 = vmul.u32 %v812_v5, %v788_v43 }
  0xf6   : > { %v1193_v56 = vadd.s32 3, %v1176_v41  ;;  %vm896_vm4 = vcmp.lt.s32.totalorder %v2365_v49, 0  ;;  %v2121_v19 = vadd.s32 4294967294, %v1000_v46  ;;  %v817_v6 = vmul.u32 %v813_v9, %v789_v36 }
  0xf7   : > { %v1170_v7 = vmul.f32 %v1169_v27, %v1167_v48  ;;  %v808_v3 = vadd.s32 %v807_v58, %v797_v63  ;;  %v820_v14 = vshll.u32 %v816_v24, 16  ;;  %vm822_vm8 = vc.u32 %v814_v4, %v818_v15 }
  0xf8   : > { %v824_v2 = vadd.s32 %v818_v15, %v814_v4  ;;  %vm2122_vm9 = vcmp.lt.s32.totalorder %v2121_v19, 0  ;;  %v778_v22 = vsel %vm772_vm12, %v775_v39, %v777_v52  ;;  %v823_v57 = vsel %vm822_vm8, 1, %v2210_v1 }
  0xf9   : > { %v1171_v59 = vxor.u32 2147483648, %v1170_v7  ;;  %v1003_v44 = vsel %vm2122_vm9, 0, %v2121_v19  ;;  %v799_v43 = vshrl.u32 %v2660_v31, 16  ;;  %v825_v45 = vadd.s32 %v823_v57, %v817_v6 }
  0xfa   : > { %vm826_vm6 = vc.u32 %v824_v2, %v820_v14  ;;  %v1004_v36 = vsub.s32 32, %v1003_v44  ;;  %v1008_v9 = vsub.s32 4294967266, %v1003_v44  ;;  %v1018_v20 = vsub.s32 4, %v2658_v61 }
  0xfb   : > { %v1172_v5 = vsel %vm1051_vm15, %v1171_v59, %v1170_v7  ;;  %v3358_v13 = vand.u32 2147483647, %v2365_v49  ;;  %v1005_v31 = vshll.u32 %v2663_v11, %v1003_v44  ;;  %v2706_v17 = vadd.s32 %v808_v3, %v799_v43 }
  0xfc   : > { %v2697_v21 = vsel %vm2649_vm1, %v2382_v0, %v1172_v5  ;;  %v827_v55 = vsel %vm826_vm6, 1, %v2210_v1  ;;  %v1006_v25 = vshrl.u32 %v988_v23, %v1004_v36  ;;  %v1009_v26 = vadd.s32 127, %v1008_v9 }
  0xfd   : > { %vm2701_vm10 = vcmp.le.f32.partialorder %v3358_v13, 0.7853982  ;;  %v1177_v47 = vmul.f32 %v2697_v21, %v2697_v21  ;;  %v829_v53 = vadd.s32 %v827_v55, %v825_v45  ;;  %v2711_v33 = vand.u32 3, %v1193_v56 }
  0xfe   : > { %v819_v35 = vshrl.u32 %v815_v37, 16  ;;  %v2713_v62 = vadd.s32 %v824_v2, %v820_v14  ;;  %v584_v39 = vand.u32 2147483647, %v2359_v30  ;;  %v1007_v11 = vor.u32 %v1006_v25, %v1005_v31 }
  0xff   : > { %v1178_v40 = vmul.f32 -0.001358992, %v1177_v47  ;;  %v1185_v34 = vmul.f32 -0.00019511016, %v1177_v47  ;;  %v1010_v42 = vshll.u32 %v1009_v26, 23  ;;  %v1019_v41 = vsel %vm896_vm4, %v1018_v20, %v2658_v61 }
 0x100   : > { %v821_v18 = vshrl.u32 %v816_v24, 16  ;;  %v830_v58 = vadd.s32 %v829_v53, %v819_v35  ;;  %v832_v48 = vmul.u32 %v2624_v10, %v778_v22  ;;  %vm834_vm11 = vc.u32 %v2706_v17, %v2713_v62 }
 0x101   : > { %v1179_v27 = vadd.f32 0.041655596, %v1178_v40  ;;  %v1186_v46 = vadd.f32 0.008332121, %v1185_v34  ;;  %v1011_v15 = vor.u32 4788187, %v1010_v42  ;;  %v605_v61 = vshrl.u32 %v2216_v51, %v2376_v60 }
 0x102   : > { %v831_v37 = vadd.s32 %v830_v58, %v821_v18  ;;  %v591_v23 = vand.u32 8388607, %v584_v39  ;;  %v3361_v52 = vmov 2475754826   ;;  %v1014_v10 = vcvt.s32.f32 %v1007_v11 }
 0x103   : > { %v604_v63 = vshll.u32 %v3361_v52, %v2367_v50  ;;  %v1180_v24 = vmul.f32 %v1179_v27, %v1177_v47  ;;  %v1187_v4 = vmul.f32 %v1186_v46, %v1177_v47  ;;  %v1012_v7 = vand.u32 2147483647, %v1011_v15 }
 0x104   : > { %v835_v56 = vadd.s32 1, %v831_v37  ;;  %v607_v6 = vshll.u32 %v2216_v51, %v2367_v50  ;;  %v608_v3 = vshrl.u32 %v2213_v16, %v2376_v60  ;;  %v1021_v22 = vsel %vm2701_vm10, 0, %v1019_v41 }
 0x105   : > { %v2728_v19 = vor.u32 %v605_v61, %v604_v63  ;;  %v1181_v14 = vadd.f32 -0.4999988, %v1180_v24  ;;  %v1188_v2 = vadd.f32 -0.16666654, %v1187_v4  ;;  %v1015_v59 = vmul.f32 %v1014_v10, %v1012_v7 }
 0x106   : > { %v836_v57 = vsel %vm834_vm11, %v835_v56, %v831_v37  ;;  %v602_v44 = vshrl.u32 %v3361_v52, %v2376_v60  ;;  %v2741_v43 = vor.u32 %v608_v3, %v607_v6  ;;  %vm616_vm13 = vcmp.lt.s32.totalorder %v2388_v8, 1 }
 0x107   : > { %v1182_v45 = vmul.f32 %v1181_v14, %v1177_v47  ;;  %v1189_v5 = vmul.f32 %v1188_v2, %v1177_v47  ;;  %v1016_v36 = vxor.u32 2147483648, %v1015_v59  ;;  %v837_v9 = vadd.s32 %v836_v57, %v832_v48 }
 0x108   : > { %vm1192_vm12 = vweird.f32 %v2382_v0  ;;  %v592_v20 = vor.u32 8388608, %v591_v23  ;;  %v601_v13 = vshll.u32 %v2214_v32, %v2367_v50  ;;  %vm618_vm15 = vcmp.lt.s32.totalorder %v2388_v8, 3 }
 0x109   : > { %v628_v31 = vsel %vm616_vm13, %v2728_v19, %v2741_v43  ;;  %v1183_v55 = vadd.f32 1.0, %v1182_v45  ;;  %v1190_v25 = vadd.f32 1.0, %v1189_v5  ;;  %v1017_v47 = vsel %vm896_vm4, %v1016_v36, %v1015_v59 }
 0x10a   : > { %v838_v26 = vadd.s32 536870912, %v837_v9  ;;  %v1020_v53 = vsel %vm2701_vm10, %v2365_v49, %v1017_v47  ;;  %v2757_v35 = vor.u32 %v602_v44, %v601_v13  ;;  %vm617_vm1 = vcmp.lt.s32.totalorder %v2388_v8, 2 }
 0x10b   : > { %v630_v50 = vsel %vm618_vm15, %v2419_v29, %v2640_v28  ;;  %v1191_v40 = vmul.f32 %v1190_v25, %v2697_v21  ;;  %v1200_v34 = vxor.u32 2147483648, %v1183_v55  ;;  %v1022_v11 = vmul.f32 %v1020_v53, %v1020_v53 }
 0x10c   : > { %v2765_v42 = vshrl.u32 %v838_v26, 30  ;;  %vm1195_vm2 = vcmp.lt.s32.totalorder %v2711_v33, 2  ;;  %vm1196_vm3 = vcmp.eq.s32.totalorder %v2711_v33, 0  ;;  %vm1199_vm5 = vcmp.eq.s32.totalorder %v2711_v33, 2 }
 0x10d   : > { %v631_v54 = vsel %vm617_vm1, %v628_v31, %v630_v50  ;;  %v1197_v41 = vxor.u32 2147483648, %v1191_v40  ;;  %v1023_v18 = vmul.f32 -0.001358992, %v1022_v11  ;;  %v1030_v58 = vmul.f32 -0.00019511016, %v1022_v11 }
 0x10e   : > { %v2772_v48 = vshll.u32 %v592_v20, 8  ;;  %v1038_v29 = vadd.s32 3, %v1021_v22  ;;  %v840_v28 = vshll.u32 %v2765_v42, 30  ;;  %v624_v21 = vsel %vm616_vm13, %v2757_v35, %v2728_v19 }
 0x10f   : > { %v626_v27 = vsel %vm618_vm15, %v2741_v43, %v2636_v12  ;;  %v1198_v46 = vsel %vm1196_vm3, %v1183_v55, %v1197_v41  ;;  %v1201_v15 = vsel %vm1199_vm5, %v1200_v34, %v1191_v40  ;;  %v1024_v37 = vadd.f32 0.041655596, %v1023_v18 }
 0x110   : > { %v1031_v23 = vadd.f32 0.008332121, %v1030_v58  ;;  %v1202_v63 = vsel %vm1195_vm2, %v1198_v46, %v1201_v15  ;;  %v2785_v61 = vsub.s32 %v837_v9, %v840_v28  ;;  %v635_v24 = vand.u32 65535, %v631_v54 }
 0x111   : > { %v636_v4 = vshrl.u32 %v631_v54, 16  ;;  %v1203_v7 = vsel %vm1192_vm12, nan, %v1202_v63  ;;  %v1025_v10 = vmul.f32 %v1024_v37, %v1022_v11  ;;  %v633_v6 = vand.u32 65535, %v2772_v48 }
 0x112   : > { %v1032_v56 = vmul.f32 %v1031_v23, %v1022_v11  ;;  %1256 = vmatpush.msra.mxu2 %v1203_v7  ;;  %v1039_v12 = vand.u32 3, %v1038_v29  ;;  %vm842_vm7 = vcmp.lt.s32.totalorder %v2785_v61, 0  ;;  %v843_v3 = vsub.s32 0, %v2785_v61 }
 0x113   : > { %v634_v33 = vshrl.u32 %v2772_v48, 16  ;;  %v1026_v14 = vadd.f32 -0.4999988, %v1025_v10  ;;  %v627_v59 = vsel %vm617_vm1, %v624_v21, %v626_v27  ;;  %v638_v22 = vmul.u32 %v636_v4, %v633_v6 }
 0x114   : > { %v1033_v2 = vadd.f32 -0.16666654, %v1032_v56  ;;  %v844_v0 = vsel %vm842_vm7, %v843_v3, %v2785_v61  ;;  %vm1037_vm4 = vweird.f32 %v2365_v49  ;;  %vm1040_vm8 = vcmp.lt.s32.totalorder %v1039_v12, 2 }
 0x115   : > { %v2796_v57 = vmul.u32 %v635_v24, %v634_v33  ;;  %v1027_v44 = vmul.f32 %v1026_v14, %v1022_v11  ;;  %v845_v5 = vclz %v844_v0  ;;  %v641_v36 = vshll.u32 %v638_v22, 16 }
 0x116   : > { %v1034_v45 = vmul.f32 %v1033_v2, %v1022_v11  ;;  %vm1041_vm9 = vcmp.eq.s32.totalorder %v1039_v12, 0  ;;  %v637_v9 = vmul.u32 %v635_v24, %v633_v6  ;;  %v658_v20 = vshrl.u32 %v627_v59, 16 }
 0x117   : > { %v1028_v13 = vadd.f32 1.0, %v1027_v44  ;;  %v2118_v55 = vadd.s32 4294967294, %v845_v5  ;;  %v657_v25 = vand.u32 65535, %v627_v59  ;;  %v640_v47 = vmul.u32 %v636_v4, %v634_v33 }
 0x118   : > { %v1035_v31 = vadd.f32 1.0, %v1034_v45  ;;  %v643_v26 = vshll.u32 %v2796_v57, 16  ;;  %vm645_vm6 = vc.u32 %v637_v9, %v641_v36  ;;  %v647_v50 = vadd.s32 %v641_v36, %v637_v9 }
 0x119   : > { %v1045_v34 = vxor.u32 2147483648, %v1028_v13  ;;  %vm2119_vm10 = vcmp.lt.s32.totalorder %v2118_v55, 0  ;;  %v646_v11 = vsel %vm645_vm6, 1, %v2210_v1  ;;  %v660_v18 = vmul.u32 %v658_v20, %v633_v6 }
 0x11a   : > { %v1036_v40 = vmul.f32 %v1035_v31, %v1020_v53  ;;  %v848_v54 = vsel %vm2119_vm10, 0, %v2118_v55  ;;  %v648_v41 = vadd.s32 %v646_v11, %v640_v47  ;;  %vm649_vm11 = vc.u32 %v647_v50, %v643_v26 }
 0x11b   : > { %vm1044_vm12 = vcmp.eq.s32.totalorder %v1039_v12, 2  ;;  %v833_v29 = vadd.s32 %v2713_v62, %v2706_v17  ;;  %v849_v28 = vsub.s32 32, %v848_v54  ;;  %v853_v27 = vsub.s32 4294967266, %v848_v54 }
 0x11c   : > { %v1042_v58 = vxor.u32 2147483648, %v1036_v40  ;;  %v1046_v21 = vsel %vm1044_vm12, %v1045_v34, %v1036_v40  ;;  %v650_v46 = vsel %vm649_vm11, 1, %v2210_v1  ;;  %v661_v15 = vmul.u32 %v657_v25, %v634_v33 }
 0x11d   : > { %v851_v37 = vshrl.u32 %v833_v29, %v849_v28  ;;  %v652_v23 = vadd.s32 %v650_v46, %v648_v41  ;;  %v663_v63 = vshll.u32 %v660_v18, 16  ;;  %v850_v4 = vshll.u32 %v2785_v61, %v848_v54 }
 0x11e   : > { %v1043_v53 = vsel %vm1041_vm9, %v1028_v13, %v1042_v58  ;;  %v854_v7 = vadd.s32 127, %v853_v27  ;;  %v659_v10 = vmul.u32 %v657_v25, %v633_v6  ;;  %v642_v62 = vshrl.u32 %v638_v22, 16 }
 0x11f   : > { %v1047_v24 = vsel %vm1040_vm8, %v1043_v53, %v1046_v21  ;;  %v662_v56 = vmul.u32 %v658_v20, %v634_v33  ;;  %v665_v3 = vshll.u32 %v661_v15, 16  ;;  %v852_v14 = vor.u32 %v851_v37, %v850_v4 }
 0x120   : > { %v1048_v17 = vsel %vm1037_vm4, nan, %v1047_v24  ;;  %v855_v2 = vshll.u32 %v854_v7, 23  ;;  %vm667_vm2 = vc.u32 %v659_v10, %v663_v63  ;;  %v669_v59 = vadd.s32 %v663_v63, %v659_v10 }
 0x121   : > { %1257 = vmatpush.msra.mxu2 %v1048_v17  ;;  %v653_v0 = vadd.s32 %v652_v23, %v642_v62  ;;  %v668_v44 = vsel %vm667_vm2, 1, %v2210_v1  ;;  %v621_v61 = vsel %vm619_vm14, %v2741_v43, 2102212464  ;;  %v600_v49 = vshrl.u32 %v2214_v32, %v2376_v60 }
 0x122   : > { %v856_v12 = vor.u32 4788187, %v855_v2  ;;  %v670_v6 = vadd.s32 %v668_v44, %v662_v56  ;;  %vm671_vm3 = vc.u32 %v669_v59, %v665_v3  ;;  %v644_v33 = vshrl.u32 %v2796_v57, 16 }
 0x123   : > { %v672_v22 = vsel %vm671_vm3, 1, %v2210_v1  ;;  %v859_v5 = vcvt.s32.f32 %v852_v14  ;;  %v664_v36 = vshrl.u32 %v660_v18, 16  ;;  %v620_v20 = vsel %vm616_vm13, %v600_v49, %v2757_v35 }
 0x124   : > { %v857_v45 = vand.u32 2147483647, %v856_v12  ;;  %v674_v9 = vadd.s32 %v672_v22, %v670_v6  ;;  %v622_v43 = vsel %vm618_vm15, %v2728_v19, %v621_v61  ;;  %v654_v13 = vadd.s32 %v653_v0, %v644_v33 }
 0x125   : > { %v666_v55 = vshrl.u32 %v661_v15, 16  ;;  %v673_v25 = vadd.s32 %v669_v59, %v665_v3  ;;  %v623_v47 = vsel %vm617_vm1, %v620_v20, %v622_v43  ;;  %vm741_vm14 = vcmp.lt.s32.totalorder %v2362_v38, 0 }
 0x126   : > { %v860_v31 = vmul.f32 %v859_v5, %v857_v45  ;;  %v675_v60 = vadd.s32 %v674_v9, %v664_v36  ;;  %v3362_v50 = vand.u32 2147483647, %v2362_v38  ;;  %v863_v34 = vsub.s32 4, %v2765_v42 }
 0x127   : > { %vm679_vm5 = vc.u32 %v654_v13, %v673_v25  ;;  %v677_v8 = vmul.u32 %v2772_v48, %v623_v47  ;;  %vm882_vm9 = vweird.f32 %v2362_v38  ;;  %v678_v45 = vadd.s32 %v673_v25, %v654_v13 }
 0x128   : > { %v861_v57 = vxor.u32 2147483648, %v860_v31  ;;  %v676_v26 = vadd.s32 %v675_v60, %v666_v55  ;;  %vm2828_vm13 = vcmp.le.f32.partialorder %v3362_v50, 0.7853982  ;;  %v864_v28 = vsel %vm741_vm14, %v863_v34, %v2765_v42 }
 0x129   : > { %v866_v53 = vsel %vm2828_vm13, 0, %v864_v28  ;;  %vm586_vm6 = vcmp.lt.s32.totalorder %v2359_v30, 0  ;;  %vm585_vm10 = vcmp.le.f32.partialorder %v584_v39, 0.7853982  ;;  %vm727_vm3 = vweird.f32 %v2359_v30 }
 0x12a   : > { %v862_v19 = vsel %vm741_vm14, %v861_v57, %v860_v31  ;;  %v680_v40 = vadd.s32 1, %v676_v26  ;;  %v883_v48 = vadd.s32 3, %v866_v53 }
 0x12b   : > { %v865_v11 = vsel %vm2828_vm13, %v2362_v38, %v862_v19 }
 0x12c   : > { %v867_v54 = vmul.f32 %v865_v11, %v865_v11  ;;  %v681_v41 = vsel %vm679_vm5, %v680_v40, %v676_v26  ;;  %v884_v3 = vand.u32 3, %v883_v48 }
 0x12d   : > { %v682_v18 = vadd.s32 %v681_v41, %v677_v8 }
 0x12e   : > { %v868_v58 = vmul.f32 -0.001358992, %v867_v54  ;;  %v875_v29 = vmul.f32 -0.00019511016, %v867_v54  ;;  %vm886_vm1 = vcmp.eq.s32.totalorder %v884_v3, 0  ;;  %vm889_vm7 = vcmp.eq.s32.totalorder %v884_v3, 2 }
 0x12f   : > { %v683_v21 = vadd.s32 536870912, %v682_v18  ;;  %vm885_vm4 = vcmp.lt.s32.totalorder %v884_v3, 2  ;;  %v1207_v3 = vld [vmem:[%s3343_s6 + $0x18] sm:$0xff] }
 0x130   : > { %v869_v27 = vadd.f32 0.041655596, %v868_v58  ;;  %v876_v46 = vadd.f32 0.008332121, %v875_v29 }
 0x131   : > { %v684_v15 = vshrl.u32 %v683_v21, 30 }
 0x132   : > { %v870_v37 = vmul.f32 %v869_v27, %v867_v54  ;;  %v877_v23 = vmul.f32 %v876_v46, %v867_v54 }
 0x133   : > { %v685_v63 = vshll.u32 %v684_v15, 30  ;;  %v708_v13 = vsub.s32 4, %v684_v15 }
 0x134   : > { %v871_v24 = vadd.f32 -0.4999988, %v870_v37  ;;  %v878_v4 = vadd.f32 -0.16666654, %v877_v23 }
 0x135   : > { %v686_v7 = vsub.s32 %v682_v18, %v685_v63  ;;  %v709_v34 = vsel %vm586_vm6, %v708_v13, %v684_v15  ;;  %v1211_v63 = vld [vmem:[%s3344_s7 + $0x18] sm:$0xff] }
 0x136   : > { %v872_v10 = vmul.f32 %v871_v24, %v867_v54  ;;  %v879_v17 = vmul.f32 %v878_v4, %v867_v54  ;;  %v711_v54 = vsel %vm585_vm10, 0, %v709_v34  ;;  %1229 = vperm.xlu2 %2185, %v1211_v63  }
 0x137   : > { %vm687_vm15 = vcmp.lt.s32.totalorder %v686_v7, 0  ;;  %v688_v62 = vsub.s32 0, %v686_v7  ;;  %v728_v28 = vadd.s32 3, %v711_v54 }
 0x138   : > { %v873_v56 = vadd.f32 1.0, %v872_v10  ;;  %v880_v42 = vadd.f32 1.0, %v879_v17  ;;  %v1210_v17 = vld [vmem:[%s3344_s7 + $0x10] sm:$0xff] }
 0x139   : > { %v689_v14 = vsel %vm687_vm15, %v688_v62, %v686_v7  ;;  %v729_v53 = vand.u32 3, %v728_v28  ;;  %v1205_v62 = vld [vmem:[%s3343_s6 + $0x8] sm:$0xff] }
 0x13a   : > { %v881_v2 = vmul.f32 %v880_v42, %v865_v11  ;;  %v890_v59 = vxor.u32 2147483648, %v873_v56  ;;  %v690_v0 = vclz %v689_v14  ;;  %v1900_v42 = vld [vmem:[%s3346_s9 + $0x18] sm:$0xff]  ;;  %v1215_v14 = vpop.permute.xlu1 %1214 }
 0x13b   : > { %vm731_vm11 = vcmp.eq.s32.totalorder %v729_v53, 0  ;;  %vm734_vm12 = vcmp.eq.s32.totalorder %v729_v53, 2  ;;  %vm730_vm2 = vcmp.lt.s32.totalorder %v729_v53, 2 }
 0x13c   : > { %v887_v44 = vxor.u32 2147483648, %v881_v2  ;;  %v2115_v12 = vadd.s32 4294967294, %v690_v0  ;;  %v891_v6 = vsel %vm889_vm7, %v890_v59, %v881_v2 }
 0x13e   : > { %v888_v61 = vsel %vm886_vm1, %v873_v56, %v887_v44  ;;  %vm2116_vm8 = vcmp.lt.s32.totalorder %v2115_v12, 0  ;;  %1224 = vperm.xlu2 %2185, %v1210_v17   ;;  %v1206_v56 = vld [vmem:[%s3343_s6 + $0x10] sm:$0xff] }
 0x13f   : > { %v892_v49 = vsel %vm885_vm4, %v888_v61, %v891_v6  ;;  %v693_v33 = vsel %vm2116_vm8, 0, %v2115_v12  ;;  %v1220_v12 = vpop.permute.xlu0 %1219 }
 0x140   : > { %v893_v22 = vsel %vm882_vm9, nan, %v892_v49  ;;  %v694_v5 = vsub.s32 32, %v693_v33  ;;  %v698_v36 = vsub.s32 4294967266, %v693_v33  ;;  %v695_v9 = vshll.u32 %v686_v7, %v693_v33  ;;  %v1204_v7 = vld [vmem:[%s3343_s6] sm:$0xff] }
 0x141   : > { %1258 = vmatpush.msra.mxu2 %v893_v22 }
 0x142   : > { %v696_v20 = vshrl.u32 %v678_v45, %v694_v5  ;;  %v699_v43 = vadd.s32 127, %v698_v36 }
 0x144   : > { %v697_v31 = vor.u32 %v696_v20, %v695_v9  ;;  %v700_v55 = vshll.u32 %v699_v43, 23 }
 0x146   : > { %v701_v60 = vor.u32 4788187, %v700_v55  ;;  %v704_v47 = vcvt.s32.f32 %v697_v31 }
 0x148   : > { %v702_v57 = vand.u32 2147483647, %v701_v60 }
 0x14a   : > { %v705_v26 = vmul.f32 %v704_v47, %v702_v57 }
 0x14c   : > { %v706_v50 = vxor.u32 2147483648, %v705_v26 }
 0x14e   : > { %v707_v38 = vsel %vm586_vm6, %v706_v50, %v705_v26 }
 0x14f   : > { %v710_v25 = vsel %vm585_vm10, %v2359_v30, %v707_v38  ;;  %v1897_v30 = vld [vmem:[%s3346_s9] sm:$0xff] }
 0x150   : > { %v712_v35 = vmul.f32 %v710_v25, %v710_v25  ;;  %1903 = vperm.xlu2 %2185, %v1897_v30  }
 0x152   : > { %v713_v19 = vmul.f32 -0.001358992, %v712_v35  ;;  %v720_v40 = vmul.f32 -0.00019511016, %v712_v35 }
 0x154   : > { %v714_v11 = vadd.f32 0.041655596, %v713_v19  ;;  %v721_v8 = vadd.f32 0.008332121, %v720_v40 }
 0x156   : > { %v715_v41 = vmul.f32 %v714_v11, %v712_v35  ;;  %v722_v18 = vmul.f32 %v721_v8, %v712_v35 }
 0x158   : > { %v716_v58 = vadd.f32 -0.4999988, %v715_v41  ;;  %v723_v29 = vadd.f32 -0.16666654, %v722_v18  ;;  %1918 = vperm.xlu2 %2185, %v1900_v42  }
 0x15a   : > { %v717_v21 = vmul.f32 %v716_v58, %v712_v35  ;;  %v724_v27 = vmul.f32 %v723_v29, %v712_v35  ;;  %v3365_v29 = vmov 920167782  }
 0x15c   : > { %v718_v46 = vadd.f32 1.0, %v717_v21  ;;  %v725_v39 = vadd.f32 1.0, %v724_v27 }
 0x15e   : > { %v726_v37 = vmul.f32 %v725_v39, %v710_v25  ;;  %v735_v23 = vxor.u32 2147483648, %v718_v46 }
 0x160   : > { %v732_v15 = vxor.u32 2147483648, %v726_v37  ;;  %v736_v4 = vsel %vm734_vm12, %v735_v23, %v726_v37  ;;  %v3366_v37 = vmov 1326507024  }
 0x162   : > { %v733_v24 = vsel %vm731_vm11, %v718_v46, %v732_v15 }
 0x163   : > { %v737_v48 = vsel %vm730_vm2, %v733_v24, %v736_v4 }
 0x164   : > { %v738_v10 = vsel %vm727_vm3, nan, %v737_v48 }
 0x165   : > { %1259 = vmatpush.msra.mxu2 %v738_v10 }
 0x166   : > { %2126 = vmatmul.msk.f32.vlgmr.msra.gmra.mxu2 %vm465_vm0, %v1204_v7 }
 0x16e   : > { %2127 = vmatmul.msk.f32.gmra.mxu2 %vm465_vm0, %v1205_v62 }
 0x176   : > { %2128 = vmatmul.msk.f32.gmra.mxu2 %vm465_vm0, %v1206_v56 }
 0x17e   : > { %2129 = vmatmul.msk.f32.gmra.mxu2 %vm465_vm0, %v1207_v3 }
 0x190   : > { %v1230_v44 = vpop.permute.xlu2 %1229 }
 0x198   : > { %v1225_v45 = vpop.permute.xlu2 %1224 }
 0x1e9   : > { %v1261_v2 = vpop.f32.mrf.mxu2 }
 0x1ea   : > { %v2874_v59 = vadd.f32 %v1261_v2, %v1215_v14 }
 0x1ec   : > { %v1276_v0 = vand.u32 2139095040, %v2874_v59 }
 0x1ee   : > { %v1277_v6 = vshrl.u32 %v1276_v0, 23 }
 0x1f0   : > { %v2130_v33 = vadd.s32 4294967169, %v1277_v6 }
 0x1f1   : > { %v1264_v61 = vpop.f32.mrf.mxu2 }
 0x1f2   : > { %v2877_v49 = vadd.f32 %v1264_v61, %v1220_v12  ;;  %v1283_v36 = vadd.s32 1, %v2130_v33 }
 0x1f4   : > { %v1431_v22 = vand.u32 2139095040, %v2877_v49  ;;  %vm1284_vm14 = vcmp.gt.s32.totalorder %v1283_v36, 0 }
 0x1f5   : > { %v1285_v57 = vsel %vm1284_vm14, %v1283_v36, 0 }
 0x1f6   : > { %v1432_v9 = vshrl.u32 %v1431_v22, 23  ;;  %v2885_v13 = vand.u32 31, %v1285_v57  ;;  %v2905_v39 = vshrl.u32 %v1285_v57, 5 }
 0x1f8   : > { %v2133_v31 = vadd.s32 4294967169, %v1432_v9  ;;  %v2892_v11 = vsub.s32 32, %v2885_v13  ;;  %v1299_v53 = vshll.u32 %v2213_v16, %v2885_v13  ;;  %v2913_v15 = vshll.u32 %v3365_v29, %v2885_v13 }
 0x1f9   : > { %v1267_v5 = vpop.f32.mrf.mxu2 }
 0x1fa   : > { %v2880_v20 = vadd.f32 %v1267_v5, %v1225_v45  ;;  %v1438_v26 = vadd.s32 1, %v2133_v31  ;;  %v1300_v28 = vshrl.u32 %v3365_v29, %v2892_v11  ;;  %v2917_v24 = vshrl.u32 %v3366_v37, %v2892_v11 }
 0x1fc   : > { %v1586_v43 = vand.u32 2139095040, %v2880_v20  ;;  %vm1439_vm13 = vcmp.gt.s32.totalorder %v1438_v26, 0  ;;  %v2921_v7 = vor.u32 %v1300_v28, %v1299_v53  ;;  %v1583_v53 = vand.u32 2147483647, %v2880_v20 }
 0x1fd   : > { %v1440_v8 = vsel %vm1439_vm13, %v1438_v26, 0 }
 0x1fe   : > { %v1587_v55 = vshrl.u32 %v1586_v43, 23  ;;  %v2901_v21 = vand.u32 31, %v1440_v8  ;;  %v2923_v10 = vshrl.u32 %v1440_v8, 5 }
 0x200   : > { %v2136_v60 = vadd.s32 4294967169, %v1587_v55  ;;  %v2926_v17 = vsub.s32 32, %v2901_v21  ;;  %vm1463_vm13 = vcmp.lt.s32.totalorder %v2923_v10, 4 }
 0x201   : > { %v1270_v47 = vpop.f32.mrf.mxu2 }
 0x202   : > { %v1593_v50 = vadd.s32 1, %v2136_v60  ;;  %v2883_v38 = vadd.f32 %v1270_v47, %v1230_v44 }
 0x204   : > { %vm1594_vm5 = vcmp.gt.s32.totalorder %v1593_v50, 0  ;;  %v1741_v25 = vand.u32 2139095040, %v2883_v38  ;;  %v1738_v19 = vand.u32 2147483647, %v2883_v38 }
 0x205   : > { %v1595_v35 = vsel %vm1594_vm5, %v1593_v50, 0 }
 0x206   : > { %v2889_v40 = vand.u32 31, %v1595_v35  ;;  %v1742_v34 = vshrl.u32 %v1741_v25, 23  ;;  %v1745_v18 = vand.u32 8388607, %v1738_v19  ;;  %v2930_v30 = vshrl.u32 %v1595_v35, 5 }
 0x208   : > { %v2895_v54 = vsub.s32 32, %v2889_v40  ;;  %v2139_v41 = vadd.s32 4294967169, %v1742_v34  ;;  %v1746_v46 = vor.u32 8388608, %v1745_v18  ;;  %v1609_v4 = vshll.u32 %v2213_v16, %v2889_v40 }
 0x209   : > { %v1612_v62 = vshll.u32 %v3365_v29, %v2889_v40  ;;  %vm1618_vm9 = vcmp.lt.s32.totalorder %v2930_v30, 4  ;;  %vm1615_vm2 = vcmp.lt.s32.totalorder %v2930_v30, 1  ;;  %vm1617_vm3 = vcmp.lt.s32.totalorder %v2930_v30, 3 }
 0x20a   : > { %v1748_v58 = vadd.s32 1, %v2139_v41  ;;  %v1610_v27 = vshrl.u32 %v3365_v29, %v2895_v54  ;;  %v1613_v23 = vshrl.u32 %v3366_v37, %v2895_v54  ;;  %v2934_v3 = vshll.u32 %v1746_v46, 8 }
 0x20b   : > { %vm1616_vm14 = vcmp.lt.s32.totalorder %v2930_v30, 2  ;;  %v1446_v30 = vshrl.u32 %v3361_v52, %v2926_v17 }
 0x20c   : > { %vm1749_vm15 = vcmp.gt.s32.totalorder %v1748_v58, 0  ;;  %v2932_v56 = vor.u32 %v1610_v27, %v1609_v4  ;;  %v1614_v14 = vor.u32 %v1613_v23, %v1612_v62  ;;  %v1787_v55 = vand.u32 65535, %v2934_v3 }
 0x20d   : > { %v1750_v63 = vsel %vm1749_vm15, %v1748_v58, 0  ;;  %v1788_v58 = vshrl.u32 %v2934_v3, 16  ;;  %v2957_v62 = vshll.u32 %v2213_v16, %v2901_v21 }
 0x20e   : > { %v1752_v48 = vand.u32 31, %v1750_v63  ;;  %v1751_v2 = vshrl.u32 %v1750_v63, 5 }
 0x210   : > { %v1753_v42 = vsub.s32 32, %v1752_v48  ;;  %v1764_v0 = vshll.u32 %v2213_v16, %v1752_v48  ;;  %v1767_v44 = vshll.u32 %v3365_v29, %v1752_v48  ;;  %v1755_v6 = vshll.u32 %v2214_v32, %v1752_v48 }
 0x211   : > { %v1758_v22 = vshll.u32 %v3361_v52, %v1752_v48  ;;  %v1761_v5 = vshll.u32 %v2216_v51, %v1752_v48  ;;  %vm1773_vm1 = vcmp.lt.s32.totalorder %v1751_v2, 4  ;;  %vm1770_vm7 = vcmp.lt.s32.totalorder %v1751_v2, 1 }
 0x212   : > { %v1765_v12 = vshrl.u32 %v3365_v29, %v1753_v42  ;;  %v1768_v61 = vshrl.u32 %v3366_v37, %v1753_v42  ;;  %v1756_v33 = vshrl.u32 %v3361_v52, %v1753_v42  ;;  %v1759_v45 = vshrl.u32 %v2216_v51, %v1753_v42 }
 0x213   : > { %v1762_v36 = vshrl.u32 %v2213_v16, %v1753_v42  ;;  %vm1771_vm4 = vcmp.lt.s32.totalorder %v1751_v2, 2  ;;  %vm1772_vm8 = vcmp.lt.s32.totalorder %v1751_v2, 3  ;;  %v1754_v8 = vshrl.u32 %v2214_v32, %v1753_v42 }
 0x214   : > { %v1766_v9 = vor.u32 %v1765_v12, %v1764_v0  ;;  %v1769_v43 = vor.u32 %v1768_v61, %v1767_v44  ;;  %v1757_v31 = vor.u32 %v1756_v33, %v1755_v6  ;;  %v1760_v60 = vor.u32 %v1759_v45, %v1758_v22 }
 0x215   : > { %v1763_v57 = vor.u32 %v1762_v36, %v1761_v5  ;;  %v1624_v44 = vsel %vm1618_vm9, %v2932_v56, 920167782  ;;  %v1628_v12 = vsel %vm1618_vm9, %v1614_v14, 1326507024  ;;  %v1590_v5 = vand.u32 8388607, %v1583_v53 }
 0x216   : > { %v1779_v47 = vsel %vm1773_vm1, %v1766_v9, 920167782  ;;  %v1783_v26 = vsel %vm1773_vm1, %v1769_v43, 1326507024  ;;  %v1778_v25 = vsel %vm1770_vm7, %v1757_v31, %v1760_v60  ;;  %v1774_v23 = vsel %vm1770_vm7, %v1754_v8, %v1757_v31 }
 0x217   : > { %v1775_v50 = vsel %vm1773_vm1, %v1763_v57, 2102212464  ;;  %v1780_v35 = vsel %vm1772_vm8, %v1763_v57, %v1779_v47  ;;  %v1782_v34 = vsel %vm1770_vm7, %v1760_v60, %v1763_v57  ;;  %v1784_v18 = vsel %vm1772_vm8, %v1766_v9, %v1783_v26 }
 0x218   : > { %v1781_v41 = vsel %vm1771_vm4, %v1778_v25, %v1780_v35  ;;  %v1785_v28 = vsel %vm1771_vm4, %v1782_v34, %v1784_v18  ;;  %v1776_v63 = vsel %vm1772_vm8, %v1760_v60, %v1775_v50  ;;  %v1591_v8 = vor.u32 8388608, %v1590_v5 }
 0x219   : > { %v1811_v27 = vand.u32 65535, %v1781_v41  ;;  %v1812_v46 = vshrl.u32 %v1781_v41, 16  ;;  %v1789_v4 = vand.u32 65535, %v1785_v28  ;;  %v1790_v48 = vshrl.u32 %v1785_v28, 16 }
 0x21a   : > { %v1777_v33 = vsel %vm1771_vm4, %v1774_v23, %v1776_v63  ;;  %v1601_v28 = vshrl.u32 %v3361_v52, %v2895_v54  ;;  %v1603_v23 = vshll.u32 %v3361_v52, %v2889_v40  ;;  %v1604_v63 = vshrl.u32 %v2216_v51, %v2895_v54 }
 0x21b   : > { %v1814_v42 = vmul.u32 %v1812_v46, %v1787_v55  ;;  %v1815_v0 = vmul.u32 %v1811_v27, %v1788_v58  ;;  %v1792_v61 = vmul.u32 %v1790_v48, %v1787_v55  ;;  %v1793_v6 = vmul.u32 %v1789_v4, %v1788_v58 }
 0x21c   : > { %v1813_v22 = vmul.u32 %v1811_v27, %v1787_v55  ;;  %v1791_v36 = vmul.u32 %v1789_v4, %v1787_v55  ;;  %v1794_v9 = vmul.u32 %v1790_v48, %v1788_v58  ;;  %v1816_v31 = vmul.u32 %v1812_v46, %v1788_v58 }
 0x21d   : > { %v1817_v45 = vshll.u32 %v1814_v42, 16  ;;  %v1795_v43 = vshll.u32 %v1792_v61, 16  ;;  %v1818_v60 = vshrl.u32 %v1814_v42, 16  ;;  %v1819_v57 = vshll.u32 %v1815_v0, 16 }
 0x21e   : > { %v1797_v26 = vshll.u32 %v1793_v6, 16  ;;  %v1820_v25 = vshrl.u32 %v1815_v0, 16  ;;  %v1600_v58 = vshll.u32 %v2214_v32, %v2889_v40  ;;  %v1796_v27 = vshrl.u32 %v1792_v61, 16 }
 0x21f   : > { %vm1821_vm6 = vc.u32 %v1813_v22, %v1817_v45  ;;  %v1823_v47 = vadd.s32 %v1817_v45, %v1813_v22  ;;  %vm1799_vm10 = vc.u32 %v1791_v36, %v1795_v43  ;;  %v1801_v14 = vadd.s32 %v1795_v43, %v1791_v36 }
 0x220   : > { %v1822_v50 = vsel %vm1821_vm6, 1, %v2210_v1  ;;  %v1800_v2 = vsel %vm1799_vm10, 1, %v2210_v1  ;;  %v1602_v48 = vor.u32 %v1601_v28, %v1600_v58  ;;  %v1606_v42 = vshll.u32 %v2216_v51, %v2889_v40 }
 0x221   : > { %v1824_v35 = vadd.s32 %v1822_v50, %v1816_v31  ;;  %vm1825_vm11 = vc.u32 %v1823_v47, %v1819_v57  ;;  %v1802_v34 = vadd.s32 %v1800_v2, %v1794_v9  ;;  %vm1803_vm12 = vc.u32 %v1801_v14, %v1797_v26 }
 0x222   : > { %v1826_v55 = vsel %vm1825_vm11, 1, %v2210_v1  ;;  %v1804_v41 = vsel %vm1803_vm12, 1, %v2210_v1  ;;  %v1607_v0 = vshrl.u32 %v2213_v16, %v2895_v54  ;;  %v1798_v22 = vshrl.u32 %v1793_v6, 16 }
 0x223   : > { %v1828_v18 = vadd.s32 %v1826_v55, %v1824_v35  ;;  %v1806_v46 = vadd.s32 %v1804_v41, %v1802_v34  ;;  %v1605_v5 = vor.u32 %v1604_v63, %v1603_v23  ;;  %v2986_v9 = vshll.u32 %v1591_v8, 8 }
 0x224   : > { %v1608_v36 = vor.u32 %v1607_v0, %v1606_v42  ;;  %v2990_v31 = vadd.s32 %v1823_v47, %v1819_v57  ;;  %v1629_v6 = vsel %vm1617_vm3, %v2932_v56, %v1628_v12  ;;  %v1455_v57 = vshrl.u32 %v3365_v29, %v2926_v17 }
 0x225   : > { %v1829_v4 = vadd.s32 %v1828_v18, %v1818_v60  ;;  %v1807_v45 = vadd.s32 %v1806_v46, %v1796_v27  ;;  %v1623_v40 = vsel %vm1615_vm2, %v1602_v48, %v1605_v5  ;;  %v1831_v47 = vmul.u32 %v2934_v3, %v1777_v33 }
 0x226   : > { %v1625_v26 = vsel %vm1617_vm3, %v1608_v36, %v1624_v44  ;;  %v1627_v14 = vsel %vm1615_vm2, %v1605_v5, %v1608_v36  ;;  %v3011_v12 = vshrl.u32 %v3366_v37, %v2926_v17  ;;  %v1632_v2 = vand.u32 65535, %v2986_v9 }
 0x227   : > { %v1830_v61 = vadd.s32 %v1829_v4, %v1820_v25  ;;  %v2988_v43 = vadd.s32 %v1807_v45, %v1798_v22  ;;  %v1626_v56 = vsel %vm1616_vm14, %v1623_v40, %v1625_v26  ;;  %v1630_v44 = vsel %vm1616_vm14, %v1627_v14, %v1629_v6 }
 0x228   : > { %v1633_v35 = vshrl.u32 %v2986_v9, 16  ;;  %v1634_v3 = vand.u32 65535, %v1630_v44  ;;  %v1635_v33 = vshrl.u32 %v1630_v44, 16  ;;  %v3019_v34 = vshll.u32 %v3365_v29, %v2901_v21 }
 0x229   : > { %v1834_v60 = vadd.s32 1, %v1830_v61  ;;  %vm1833_vm5 = vc.u32 %v2988_v43, %v2990_v31  ;;  %v1599_v55 = vshrl.u32 %v2214_v32, %v2895_v54  ;;  %v1656_v37 = vand.u32 65535, %v1626_v56 }
 0x22a   : > { %v1657_v8 = vshrl.u32 %v1626_v56, 16  ;;  %v3024_v41 = vor.u32 %v1455_v57, %v2957_v62  ;;  %v1637_v58 = vmul.u32 %v1635_v33, %v1632_v2  ;;  %v1638_v28 = vmul.u32 %v1634_v3, %v1633_v35 }
 0x22b   : > { %v1835_v50 = vsel %vm1833_vm5, %v1834_v60, %v1830_v61  ;;  %v1459_v27 = vor.u32 %v3011_v12, %v3019_v34  ;;  %v1619_v29 = vsel %vm1615_vm2, %v1599_v55, %v1602_v48  ;;  %v1428_v23 = vand.u32 2147483647, %v2877_v49 }
 0x22c   : > { %v1836_v25 = vadd.s32 %v1835_v50, %v1831_v47  ;;  %v1659_v46 = vmul.u32 %v1657_v8, %v1632_v2  ;;  %v1620_v62 = vsel %vm1618_vm9, %v1608_v36, 2102212464  ;;  %v1636_v63 = vmul.u32 %v1634_v3, %v1632_v2 }
 0x22d   : > { %v1640_v4 = vshll.u32 %v1637_v58, 16  ;;  %v1639_v42 = vmul.u32 %v1635_v33, %v1633_v35  ;;  %v1658_v0 = vmul.u32 %v1656_v37, %v1632_v2  ;;  %v1660_v22 = vmul.u32 %v1656_v37, %v1633_v35 }
 0x22e   : > { %v1837_v18 = vadd.s32 536870912, %v1836_v25  ;;  %v1662_v45 = vshll.u32 %v1659_v46, 16  ;;  %v1642_v40 = vshll.u32 %v1638_v28, 16  ;;  %v1621_v48 = vsel %vm1617_vm3, %v1605_v5, %v1620_v62 }
 0x22f   : > { %vm1644_vm15 = vc.u32 %v1636_v63, %v1640_v4  ;;  %v1646_v6 = vadd.s32 %v1640_v4, %v1636_v63  ;;  %v1641_v60 = vshrl.u32 %v1637_v58, 16  ;;  %v1661_v57 = vmul.u32 %v1657_v8, %v1633_v35 }
 0x230   : > { %v3032_v54 = vshrl.u32 %v1837_v18, 30  ;;  %v1645_v26 = vsel %vm1644_vm15, 1, %v2210_v1  ;;  %vm1666_vm1 = vc.u32 %v1658_v0, %v1662_v45  ;;  %v1664_v56 = vshll.u32 %v1660_v22, 16 }
 0x231   : > { %v1647_v36 = vadd.s32 %v1645_v26, %v1639_v42  ;;  %vm1648_vm7 = vc.u32 %v1646_v6, %v1642_v40  ;;  %v1667_v12 = vsel %vm1666_vm1, 1, %v2210_v1  ;;  %v1668_v50 = vadd.s32 %v1662_v45, %v1658_v0 }
 0x232   : > { %v1839_v61 = vshll.u32 %v3032_v54, 30  ;;  %v1649_v47 = vsel %vm1648_vm7, 1, %v2210_v1  ;;  %v1669_v2 = vadd.s32 %v1667_v12, %v1661_v57  ;;  %v1622_v3 = vsel %vm1616_vm14, %v1619_v29, %v1621_v48 }
 0x233   : > { %v1651_v5 = vadd.s32 %v1649_v47, %v1647_v36  ;;  %vm1670_vm8 = vc.u32 %v1668_v50, %v1664_v56  ;;  %v1435_v35 = vand.u32 8388607, %v1428_v23  ;;  %v1643_v34 = vshrl.u32 %v1638_v28, 16 }
 0x234   : > { %v3040_v14 = vsub.s32 %v1836_v25, %v1839_v61  ;;  %v1469_v25 = vsel %vm1463_vm13, %v3024_v41, 920167782  ;;  %v1671_v37 = vsel %vm1670_vm8, 1, %v2210_v1  ;;  %v1663_v18 = vshrl.u32 %v1659_v46, 16 }
 0x235   : > { %v1652_v55 = vadd.s32 %v1651_v5, %v1641_v60  ;;  %v1673_v58 = vadd.s32 %v1671_v37, %v1669_v2  ;;  %v1449_v62 = vshrl.u32 %v2216_v51, %v2926_v17  ;;  %v1448_v29 = vshll.u32 %v3361_v52, %v2901_v21 }
 0x236   : > { %vm1841_vm4 = vcmp.lt.s32.totalorder %v3040_v14, 0  ;;  %v1842_v44 = vsub.s32 0, %v3040_v14  ;;  %v1451_v63 = vshll.u32 %v2216_v51, %v2901_v21  ;;  %v1452_v28 = vshrl.u32 %v2213_v16, %v2926_v17 }
 0x237   : > { %vm1740_vm9 = vcmp.lt.s32.totalorder %v2883_v38, 0  ;;  %v1653_v46 = vadd.s32 %v1652_v55, %v1643_v34  ;;  %v1665_v42 = vshrl.u32 %v1660_v22, 16  ;;  %v1674_v0 = vadd.s32 %v1673_v58, %v1663_v18 }
 0x238   : > { %v1843_v33 = vsel %vm1841_vm4, %v1842_v44, %v3040_v14  ;;  %v1473_v45 = vsel %vm1463_vm13, %v1459_v27, 1326507024  ;;  %v1445_v61 = vshll.u32 %v2214_v32, %v2901_v21  ;;  %v1450_v40 = vor.u32 %v1449_v62, %v1448_v29 }
 0x239   : > { %v1844_v8 = vclz %v1843_v33  ;;  %v1453_v6 = vor.u32 %v1452_v28, %v1451_v63  ;;  %v1672_v48 = vadd.s32 %v1668_v50, %v1664_v56  ;;  %v1675_v60 = vadd.s32 %v1674_v0, %v1665_v42 }
 0x23a   : > { %v1436_v26 = vor.u32 8388608, %v1435_v35  ;;  %v1832_v36 = vadd.s32 %v2990_v31, %v2988_v43  ;;  %v1676_v47 = vmul.u32 %v2986_v9, %v1622_v3  ;;  %v1447_v22 = vor.u32 %v1446_v30, %v1445_v61 }
 0x23b   : > { %v2140_v4 = vadd.s32 4294967294, %v1844_v8  ;;  %vm1678_vm10 = vc.u32 %v1653_v46, %v1672_v48  ;;  %vm1460_vm11 = vcmp.lt.s32.totalorder %v2923_v10, 1  ;;  %vm1308_vm12 = vcmp.lt.s32.totalorder %v2905_v39, 4 }
 0x23c   : > { %v1862_v21 = vsub.s32 4, %v3032_v54  ;;  %v1679_v27 = vadd.s32 1, %v1675_v60  ;;  %vm1461_vm2 = vcmp.lt.s32.totalorder %v2923_v10, 2  ;;  %v1472_v56 = vsel %vm1460_vm11, %v1450_v40, %v1453_v6 }
 0x23d   : > { %vm2141_vm6 = vcmp.lt.s32.totalorder %v2140_v4, 0  ;;  %vm1462_vm3 = vcmp.lt.s32.totalorder %v2923_v10, 3  ;;  %v1468_v5 = vsel %vm1460_vm11, %v1447_v22, %v1450_v40  ;;  %v3093_v37 = vshll.u32 %v1436_v26, 8 }
 0x23e   : > { %v1847_v57 = vsel %vm2141_vm6, 0, %v2140_v4  ;;  %v1680_v50 = vsel %vm1678_vm10, %v1679_v27, %v1675_v60  ;;  %v1470_v2 = vsel %vm1462_vm3, %v1453_v6, %v1469_v25  ;;  %v1474_v3 = vsel %vm1462_vm3, %v3024_v41, %v1473_v45 }
 0x23f   : > { %v1848_v12 = vsub.s32 32, %v1847_v57  ;;  %v1852_v44 = vsub.s32 4294967266, %v1847_v57  ;;  %v1849_v43 = vshll.u32 %v3040_v14, %v1847_v57  ;;  %v1681_v34 = vadd.s32 %v1680_v50, %v1676_v47 }
 0x240   : > { %v1475_v14 = vsel %vm1461_vm2, %v1472_v56, %v1474_v3  ;;  %v1863_v55 = vsel %vm1740_vm9, %v1862_v21, %v3032_v54  ;;  %v1304_v25 = vor.u32 %v2917_v24, %v2913_v15  ;;  %v1471_v41 = vsel %vm1461_vm2, %v1468_v5, %v1470_v2 }
 0x241   : > { %v1850_v31 = vshrl.u32 %v1832_v36, %v1848_v12  ;;  %v1853_v9 = vadd.s32 127, %v1852_v44  ;;  %v1479_v8 = vand.u32 65535, %v1475_v14  ;;  %v1480_v18 = vshrl.u32 %v1475_v14, 16 }
 0x242   : > { %v1682_v62 = vadd.s32 536870912, %v1681_v34  ;;  %vm3101_vm14 = vcmp.le.f32.partialorder %v1738_v19, 0.7853982  ;;  %v1444_v54 = vshrl.u32 %v2214_v32, %v2926_v17  ;;  %v1477_v29 = vand.u32 65535, %v3093_v37 }
 0x243   : > { %v1851_v35 = vor.u32 %v1850_v31, %v1849_v43  ;;  %v1854_v33 = vshll.u32 %v1853_v9, 23  ;;  %v1478_v63 = vshrl.u32 %v3093_v37, 16  ;;  %v1865_v24 = vsel %vm3101_vm14, 0, %v1863_v55 }
 0x244   : > { %v3111_v4 = vshrl.u32 %v1682_v62, 30  ;;  %v1465_v19 = vsel %vm1463_vm13, %v1453_v6, 2102212464  ;;  %v1482_v42 = vmul.u32 %v1480_v18, %v1477_v29  ;;  %v1502_v45 = vshrl.u32 %v1471_v41, 16 }
 0x245   : > { %v1855_v58 = vor.u32 4788187, %v1854_v33  ;;  %v1858_v15 = vcvt.s32.f32 %v1851_v35  ;;  %v3115_v0 = vmul.u32 %v1479_v8, %v1478_v63  ;;  %v3119_v17 = vsel %vm1308_vm12, %v1304_v25, 1326507024 }
 0x246   : > { %v1677_v60 = vadd.s32 %v1672_v48, %v1653_v46  ;;  %v1684_v26 = vshll.u32 %v3111_v4, 30  ;;  %v1882_v36 = vadd.s32 3, %v1865_v24  ;;  %v1464_v57 = vsel %vm1460_vm11, %v1444_v54, %v1447_v22 }
 0x247   : > { %v1856_v28 = vand.u32 2147483647, %v1855_v58  ;;  %v1481_v47 = vmul.u32 %v1479_v8, %v1477_v29  ;;  %v1485_v12 = vshll.u32 %v1482_v42, 16  ;;  %v1466_v21 = vsel %vm1462_vm3, %v1450_v40, %v1465_v19 }
 0x248   : > { %v3124_v6 = vsub.s32 %v1681_v34, %v1684_v26  ;;  %v1501_v27 = vand.u32 65535, %v1471_v41  ;;  %v1487_v56 = vshll.u32 %v3115_v0, 16  ;;  %v3129_v46 = vmul.u32 %v1502_v45, %v1477_v29 }
 0x249   : > { %v1859_v61 = vmul.f32 %v1858_v15, %v1856_v28  ;;  %vm1489_vm5 = vc.u32 %v1481_v47, %v1485_v12  ;;  %v1491_v43 = vadd.s32 %v1485_v12, %v1481_v47  ;;  %v1484_v31 = vmul.u32 %v1480_v18, %v1478_v63 }
 0x24a   : > { %vm1686_vm13 = vcmp.lt.s32.totalorder %v3124_v6, 0  ;;  %v1687_v22 = vsub.s32 0, %v3124_v6  ;;  %v3140_v40 = vand.u32 3, %v1882_v36  ;;  %v1490_v50 = vsel %vm1489_vm5, 1, %v2210_v1 }
 0x24b   : > { %v1860_v44 = vxor.u32 2147483648, %v1859_v61  ;;  %vm1493_vm15 = vc.u32 %v1491_v43, %v1487_v56  ;;  %v1492_v3 = vadd.s32 %v1490_v50, %v1484_v31  ;;  %v1505_v35 = vmul.u32 %v1501_v27, %v1478_v63 }
 0x24c   : > { %v1688_v2 = vsel %vm1686_vm13, %v1687_v22, %v3124_v6  ;;  %v3148_v34 = vsel %vm1461_vm2, %v1464_v57, %v1466_v21  ;;  %v1494_v14 = vsel %vm1493_vm15, 1, %v2210_v1  ;;  %v1507_v55 = vshll.u32 %v3129_v46, 16 }
 0x24d   : > { %v1861_v48 = vsel %vm1740_vm9, %v1860_v44, %v1859_v61  ;;  %v1689_v33 = vclz %v1688_v2  ;;  %v1503_v25 = vmul.u32 %v1501_v27, %v1477_v29  ;;  %v1273_v58 = vand.u32 2147483647, %v2874_v59 }
 0x24e   : > { %v3138_v9 = vsel %vm3101_vm14, %v2883_v38, %v1861_v48  ;;  %v1486_v41 = vshrl.u32 %v1482_v42, 16  ;;  %v1496_v30 = vadd.s32 %v1494_v14, %v1492_v3  ;;  %v1506_v54 = vmul.u32 %v1502_v45, %v1478_v63 }
 0x24f   : > { %v1866_v5 = vmul.f32 %v3138_v9, %v3138_v9  ;;  %v2137_v62 = vadd.s32 4294967294, %v1689_v33  ;;  %vm1585_vm1 = vcmp.lt.s32.totalorder %v2880_v20, 0  ;;  %v1509_v10 = vshll.u32 %v1505_v35, 16 }
 0x250   : > { %vm1511_vm7 = vc.u32 %v1503_v25, %v1507_v55  ;;  %v1497_v24 = vadd.s32 %v1496_v30, %v1486_v41  ;;  %v1513_v61 = vadd.s32 %v1507_v55, %v1503_v25  ;;  %v1707_v42 = vsub.s32 4, %v3111_v4 }
 0x251   : > { %v1867_v8 = vmul.f32 -0.001358992, %v1866_v5  ;;  %v1874_v18 = vmul.f32 -0.00019511016, %v1866_v5  ;;  %vm2138_vm4 = vcmp.lt.s32.totalorder %v2137_v62, 0  ;;  %v1512_v19 = vsel %vm1511_vm7, 1, %v2210_v1 }
 0x252   : > { %v1692_v29 = vsel %vm2138_vm4, 0, %v2137_v62  ;;  %v1514_v57 = vadd.s32 %v1512_v19, %v1506_v54  ;;  %v1488_v63 = vshrl.u32 %v3115_v0, 16  ;;  %vm1515_vm8 = vc.u32 %v1513_v61, %v1509_v10 }
 0x253   : > { %v1868_v28 = vadd.f32 0.041655596, %v1867_v8  ;;  %v1875_v15 = vadd.f32 0.008332121, %v1874_v18  ;;  %v1693_v47 = vsub.s32 32, %v1692_v29  ;;  %v1697_v12 = vsub.s32 4294967266, %v1692_v29 }
 0x254   : > { %v1694_v21 = vshll.u32 %v3124_v6, %v1692_v29  ;;  %vm1885_vm9 = vcmp.eq.s32.totalorder %v3140_v40, 0  ;;  %v3159_v43 = vadd.s32 %v1497_v24, %v1488_v63  ;;  %v1516_v48 = vsel %vm1515_vm8, 1, %v2210_v1 }
 0x255   : > { %v1869_v26 = vmul.f32 %v1868_v28, %v1866_v5  ;;  %v1876_v36 = vmul.f32 %v1875_v15, %v1866_v5  ;;  %v1695_v27 = vshrl.u32 %v1677_v60, %v1693_v47  ;;  %v1698_v56 = vadd.s32 127, %v1697_v12 }
 0x256   : > { %vm1884_vm6 = vcmp.lt.s32.totalorder %v3140_v40, 2  ;;  %v1508_v50 = vshrl.u32 %v3129_v46, 16  ;;  %v1518_v0 = vadd.s32 %v1516_v48, %v1514_v57  ;;  %vm1881_vm10 = vweird.f32 %v2883_v38 }
 0x257   : > { %v1870_v45 = vadd.f32 -0.4999988, %v1869_v26  ;;  %v1877_v44 = vadd.f32 -0.16666654, %v1876_v36  ;;  %vm1888_vm11 = vcmp.eq.s32.totalorder %v3140_v40, 2  ;;  %v1696_v6 = vor.u32 %v1695_v27, %v1694_v21 }
 0x258   : > { %v1699_v2 = vshll.u32 %v1698_v56, 23  ;;  %v3166_v3 = vadd.s32 %v1513_v61, %v1509_v10  ;;  %v1510_v14 = vshrl.u32 %v1505_v35, 16  ;;  %v1519_v55 = vadd.s32 %v1518_v0, %v1508_v50 }
 0x259   : > { %v1871_v22 = vmul.f32 %v1870_v45, %v1866_v5  ;;  %v1878_v31 = vmul.f32 %v1877_v44, %v1866_v5  ;;  %v1708_v5 = vsel %vm1585_vm1, %v1707_v42, %v3111_v4  ;;  %v1521_v46 = vmul.u32 %v3093_v37, %v3148_v34 }
 0x25a   : > { %v1700_v8 = vor.u32 4788187, %v1699_v2  ;;  %vm1523_vm2 = vc.u32 %v3159_v43, %v3166_v3  ;;  %v1520_v62 = vadd.s32 %v1519_v55, %v1510_v14  ;;  %v1280_v41 = vand.u32 8388607, %v1273_v58 }
 0x25b   : > { %v1872_v60 = vadd.f32 1.0, %v1871_v22  ;;  %v1879_v33 = vadd.f32 1.0, %v1878_v31  ;;  %v1703_v30 = vcvt.s32.f32 %v1696_v6  ;;  %v1290_v54 = vshll.u32 %v2214_v32, %v2885_v13 }
 0x25c   : > { %v1701_v35 = vand.u32 2147483647, %v1700_v8  ;;  %v1294_v4 = vshrl.u32 %v2216_v51, %v2892_v11  ;;  %v1524_v37 = vadd.s32 1, %v1520_v62  ;;  %v1291_v34 = vshrl.u32 %v3361_v52, %v2892_v11 }
 0x25d   : > { %v1880_v18 = vmul.f32 %v1879_v33, %v3138_v9  ;;  %v1889_v25 = vxor.u32 2147483648, %v1872_v60  ;;  %v1293_v9 = vshll.u32 %v3361_v52, %v2885_v13  ;;  %v1296_v24 = vshll.u32 %v2216_v51, %v2885_v13 }
 0x25e   : > { %v1704_v10 = vmul.f32 %v1703_v30, %v1701_v35  ;;  %v1297_v19 = vshrl.u32 %v2213_v16, %v2892_v11  ;;  %v1525_v26 = vsel %vm1523_vm2, %v1524_v37, %v1520_v62  ;;  %vm1307_vm3 = vcmp.lt.s32.totalorder %v2905_v39, 3 }
 0x25f   : > { %v1886_v28 = vxor.u32 2147483648, %v1880_v18  ;;  %v1890_v15 = vsel %vm1888_vm11, %v1889_v25, %v1880_v18  ;;  %v3197_v36 = vor.u32 %v1294_v4, %v1293_v9  ;;  %v1526_v57 = vadd.s32 %v1525_v26, %v1521_v46 }
 0x260   : > { %v1705_v29 = vxor.u32 2147483648, %v1704_v10  ;;  %v3202_v51 = vor.u32 %v1297_v19, %v1296_v24  ;;  %v1281_v13 = vor.u32 8388608, %v1280_v41  ;;  %v3206_v47 = vor.u32 %v1291_v34, %v1290_v54 }
 0x261   : > { %v1887_v61 = vsel %vm1885_vm9, %v1872_v60, %v1886_v28  ;;  %v1319_v12 = vsel %vm1307_vm3, %v2921_v7, %v3119_v17  ;;  %vm3214_vm14 = vcmp.le.f32.partialorder %v1583_v53, 0.7853982  ;;  %v1527_v38 = vadd.s32 536870912, %v1526_v57 }
 0x262   : > { %v1891_v52 = vsel %vm1884_vm6, %v1887_v61, %v1890_v15  ;;  %v1706_v42 = vsel %vm1585_vm1, %v1705_v29, %v1704_v10  ;;  %vm1305_vm5 = vcmp.lt.s32.totalorder %v2905_v39, 1  ;;  %v1314_v63 = vsel %vm1308_vm12, %v2921_v7, 920167782 }
 0x263   : > { %v1892_v16 = vsel %vm1881_vm10, nan, %v1891_v52  ;;  %v1709_v17 = vsel %vm3214_vm14, %v2880_v20, %v1706_v42  ;;  %vm1306_vm13 = vcmp.lt.s32.totalorder %v2905_v39, 2  ;;  %v1317_v53 = vsel %vm1305_vm5, %v3197_v36, %v3202_v51 }
 0x264   : > { %1945 = vmatpush.msra.mxu3 %v1892_v16  ;;  %v1710_v45 = vsel %vm3214_vm14, 0, %v1708_v5  ;;  %v1711_v44 = vmul.f32 %v1709_v17, %v1709_v17  ;;  %v3234_v21 = vshrl.u32 %v1527_v38, 30  ;;  %v1320_v7 = vsel %vm1306_vm13, %v1317_v53, %v1319_v12 }
 0x265   : > { %v1313_v27 = vsel %vm1305_vm5, %v3206_v47, %v3197_v36  ;;  %v3242_v56 = vshll.u32 %v1281_v13, 8  ;;  %v1324_v48 = vand.u32 65535, %v1320_v7  ;;  %v1325_v22 = vshrl.u32 %v1320_v7, 16 }
 0x266   : > { %v1712_v31 = vmul.f32 -0.001358992, %v1711_v44  ;;  %v1719_v50 = vmul.f32 -0.00019511016, %v1711_v44  ;;  %v1529_v0 = vshll.u32 %v3234_v21, 30  ;;  %v1315_v6 = vsel %vm1307_vm3, %v3202_v51, %v1314_v63 }
 0x267   : > { %v1727_v2 = vadd.s32 3, %v1710_v45  ;;  %v1322_v60 = vand.u32 65535, %v3242_v56  ;;  %v1323_v33 = vshrl.u32 %v3242_v56, 16  ;;  %v1316_v5 = vsel %vm1306_vm13, %v1313_v27, %v1315_v6 }
 0x268   : > { %v1713_v14 = vadd.f32 0.041655596, %v1712_v31  ;;  %v1720_v55 = vadd.f32 0.008332121, %v1719_v50  ;;  %v1530_v8 = vsub.s32 %v1526_v57, %v1529_v0  ;;  %v1347_v34 = vshrl.u32 %v1316_v5, 16 }
 0x269   : > { %v3252_v46 = vmul.u32 %v1325_v22, %v1322_v60  ;;  %v3254_v18 = vmul.u32 %v1324_v48, %v1323_v33  ;;  %v1728_v35 = vand.u32 3, %v1727_v2  ;;  %v1326_v30 = vmul.u32 %v1324_v48, %v1322_v60 }
 0x26a   : > { %v1714_v25 = vmul.f32 %v1713_v14, %v1711_v44  ;;  %v1721_v62 = vmul.f32 %v1720_v55, %v1711_v44  ;;  %vm1531_vm15 = vcmp.lt.s32.totalorder %v1530_v8, 0  ;;  %v1532_v41 = vsub.s32 0, %v1530_v8 }
 0x26b   : > { %v1330_v54 = vshll.u32 %v3252_v46, 16  ;;  %v1329_v15 = vmul.u32 %v1325_v22, %v1323_v33  ;;  %v1332_v10 = vshll.u32 %v3254_v18, 16  ;;  %vm1726_vm7 = vweird.f32 %v2880_v20 }
 0x26c   : > { %v1715_v4 = vadd.f32 -0.4999988, %v1714_v25  ;;  %v1722_v28 = vadd.f32 -0.16666654, %v1721_v62  ;;  %v1533_v37 = vsel %vm1531_vm15, %v1532_v41, %v1530_v8  ;;  %v1346_v29 = vand.u32 65535, %v1316_v5 }
 0x26d   : > { %v1534_v9 = vclz %v1533_v37  ;;  %vm1334_vm1 = vc.u32 %v1326_v30, %v1330_v54  ;;  %v1336_v26 = vadd.s32 %v1330_v54, %v1326_v30  ;;  %vm1729_vm8 = vcmp.lt.s32.totalorder %v1728_v35, 2 }
 0x26e   : > { %v1716_v24 = vmul.f32 %v1715_v4, %v1711_v44  ;;  %v1723_v19 = vmul.f32 %v1722_v28, %v1711_v44  ;;  %v1335_v61 = vsel %vm1334_vm1, 1, %v2210_v1  ;;  %v1349_v40 = vmul.u32 %v1347_v34, %v1322_v60 }
 0x26f   : > { %v2134_v52 = vadd.s32 4294967294, %v1534_v9  ;;  %v1337_v13 = vadd.s32 %v1335_v61, %v1329_v15  ;;  %vm1338_vm4 = vc.u32 %v1336_v26, %v1332_v10  ;;  %vm1730_vm6 = vcmp.eq.s32.totalorder %v1728_v35, 0 }
 0x270   : > { %v1717_v57 = vadd.f32 1.0, %v1716_v24  ;;  %v1724_v16 = vadd.f32 1.0, %v1723_v19  ;;  %v1339_v12 = vsel %vm1338_vm4, 1, %v2210_v1  ;;  %vm1733_vm10 = vcmp.eq.s32.totalorder %v1728_v35, 2 }
 0x271   : > { %vm2135_vm9 = vcmp.lt.s32.totalorder %v2134_v52, 0  ;;  %v1522_v53 = vadd.s32 %v3166_v3, %v3159_v43  ;;  %v1341_v27 = vadd.s32 %v1339_v12, %v1337_v13  ;;  %v1348_v48 = vmul.u32 %v1346_v29, %v1322_v60 }
 0x272   : > { %v1725_v42 = vmul.f32 %v1724_v16, %v1709_v17  ;;  %v1734_v38 = vxor.u32 2147483648, %v1717_v57  ;;  %v1537_v63 = vsel %vm2135_vm9, 0, %v2134_v52  ;;  %v1350_v22 = vmul.u32 %v1346_v29, %v1323_v33 }
 0x273   : > { %v1538_v45 = vsub.s32 32, %v1537_v63  ;;  %v1542_v44 = vsub.s32 4294967266, %v1537_v63  ;;  %v1539_v31 = vshll.u32 %v1530_v8, %v1537_v63  ;;  %v1352_v6 = vshll.u32 %v1349_v40, 16 }
 0x274   : > { %v1731_v7 = vxor.u32 2147483648, %v1725_v42  ;;  %v1735_v14 = vsel %vm1733_vm10, %v1734_v38, %v1725_v42  ;;  %v1331_v17 = vshrl.u32 %v3252_v46, 16  ;;  %v1351_v55 = vmul.u32 %v1347_v34, %v1323_v33 }
 0x275   : > { %v1540_v50 = vshrl.u32 %v1522_v53, %v1538_v45  ;;  %v1543_v0 = vadd.s32 127, %v1542_v44  ;;  %vm1356_vm11 = vc.u32 %v1348_v48, %v1352_v6  ;;  %v1354_v3 = vshll.u32 %v1350_v22, 16 }
 0x276   : > { %v1732_v2 = vsel %vm1730_vm6, %v1717_v57, %v1731_v7  ;;  %v1357_v60 = vsel %vm1356_vm11, 1, %v2210_v1  ;;  %v1358_v8 = vadd.s32 %v1352_v6, %v1348_v48  ;;  %v1342_v30 = vadd.s32 %v1341_v27, %v1331_v17 }
 0x277   : > { %v1736_v5 = vsel %vm1729_vm8, %v1732_v2, %v1735_v14  ;;  %v1541_v25 = vor.u32 %v1540_v50, %v1539_v31  ;;  %v1544_v62 = vshll.u32 %v1543_v0, 23  ;;  %v1359_v54 = vadd.s32 %v1357_v60, %v1351_v55 }
 0x278   : > { %v1737_v43 = vsel %vm1726_vm7, nan, %v1736_v5  ;;  %v1289_v46 = vshrl.u32 %v2214_v32, %v2892_v11  ;;  %v1310_v33 = vsel %vm1308_vm12, %v3202_v51, 2102212464  ;;  %vm1360_vm2 = vc.u32 %v1358_v8, %v1354_v3 }
 0x279   : > { %1946 = vmatpush.msra.mxu3 %v1737_v43  ;;  %v1545_v41 = vor.u32 4788187, %v1544_v62  ;;  %v1548_v4 = vcvt.s32.f32 %v1541_v25  ;;  %v1333_v20 = vshrl.u32 %v3254_v18, 16  ;;  %v1361_v28 = vsel %vm1360_vm2, 1, %v2210_v1 }
 0x27a   : > { %v1353_v37 = vshrl.u32 %v1349_v40, 16  ;;  %v1363_v34 = vadd.s32 %v1361_v28, %v1359_v54  ;;  %v1309_v15 = vsel %vm1305_vm5, %v1289_v46, %v3206_v47  ;;  %v1311_v32 = vsel %vm1307_vm3, %v3197_v36, %v1310_v33 }
 0x27b   : > { %v1546_v35 = vand.u32 2147483647, %v1545_v41  ;;  %v1343_v11 = vadd.s32 %v1342_v30, %v1333_v20  ;;  %v1355_v51 = vshrl.u32 %v1350_v22, 16  ;;  %v1362_v19 = vadd.s32 %v1358_v8, %v1354_v3 }
 0x27c   : > { %v1364_v10 = vadd.s32 %v1363_v34, %v1353_v37  ;;  %vm1430_vm12 = vcmp.lt.s32.totalorder %v2877_v49, 0  ;;  %v1312_v1 = vsel %vm1306_vm13, %v1309_v15, %v1311_v32  ;;  %vm3286_vm14 = vcmp.le.f32.partialorder %v1428_v23, 0.7853982 }
 0x27d   : > { %v1549_v9 = vmul.f32 %v1548_v4, %v1546_v35  ;;  %vm1368_vm5 = vc.u32 %v1343_v11, %v1362_v19  ;;  %v1552_v36 = vsub.s32 4, %v3234_v21  ;;  %v1366_v39 = vmul.u32 %v3242_v56, %v1312_v1 }
 0x27e   : > { %v1365_v18 = vadd.s32 %v1364_v10, %v1355_v51  ;;  %vm1571_vm7 = vweird.f32 %v2877_v49  ;;  %v1367_v30 = vadd.s32 %v1362_v19, %v1343_v11  ;;  %vm1275_vm8 = vcmp.lt.s32.totalorder %v2874_v59, 0 }
 0x27f   : > { %v1550_v24 = vxor.u32 2147483648, %v1549_v9  ;;  %v1553_v23 = vsel %vm1430_vm12, %v1552_v36, %v3234_v21  ;;  %vm1274_vm9 = vcmp.le.f32.partialorder %v1273_v58, 0.7853982  ;;  %vm1416_vm2 = vweird.f32 %v2874_v59 }
 0x280   : > { %v1369_v52 = vadd.s32 1, %v1365_v18  ;;  %v1555_v63 = vsel %vm3286_vm14, 0, %v1553_v23 }
 0x281   : > { %v1551_v47 = vsel %vm1430_vm12, %v1550_v24, %v1549_v9  ;;  %v1572_v22 = vadd.s32 3, %v1555_v63 }
 0x282   : > { %v1554_v26 = vsel %vm3286_vm14, %v2877_v49, %v1551_v47  ;;  %v1370_v57 = vsel %vm1368_vm5, %v1369_v52, %v1365_v18 }
 0x283   : > { %v1556_v29 = vmul.f32 %v1554_v26, %v1554_v26  ;;  %v1371_v12 = vadd.s32 %v1370_v57, %v1366_v39  ;;  %v1573_v2 = vand.u32 3, %v1572_v22 }
 0x285   : > { %v1557_v16 = vmul.f32 -0.001358992, %v1556_v29  ;;  %v1564_v13 = vmul.f32 -0.00019511016, %v1556_v29  ;;  %v1372_v38 = vadd.s32 536870912, %v1371_v12  ;;  %vm1575_vm13 = vcmp.eq.s32.totalorder %v1573_v2, 0 }
 0x286   : > { %vm1578_vm15 = vcmp.eq.s32.totalorder %v1573_v2, 2  ;;  %vm1574_vm1 = vcmp.lt.s32.totalorder %v1573_v2, 2 }
 0x287   : > { %v1558_v40 = vadd.f32 0.041655596, %v1557_v16  ;;  %v1565_v42 = vadd.f32 0.008332121, %v1564_v13  ;;  %v1373_v44 = vshrl.u32 %v1372_v38, 30 }
 0x289   : > { %v1559_v53 = vmul.f32 %v1558_v40, %v1556_v29  ;;  %v1566_v45 = vmul.f32 %v1565_v42, %v1556_v29  ;;  %v1374_v48 = vshll.u32 %v1373_v44, 30  ;;  %v1397_v51 = vsub.s32 4, %v1373_v44 }
 0x28b   : > { %v1560_v7 = vadd.f32 -0.4999988, %v1559_v53  ;;  %v1567_v27 = vadd.f32 -0.16666654, %v1566_v45  ;;  %v1375_v50 = vsub.s32 %v1371_v12, %v1374_v48  ;;  %v1398_v1 = vsel %vm1275_vm8, %v1397_v51, %v1373_v44  ;;  %v1893_v45 = vld [vmem:[%s3345_s8] sm:$0xff]  ;;  %v1904_v48 = vpop.permute.xlu2 %1903 }
 0x28c   : > { %v1400_v47 = vsel %vm1274_vm9, 0, %v1398_v1 }
 0x28d   : > { %v1561_v56 = vmul.f32 %v1560_v7, %v1556_v29  ;;  %v1568_v31 = vmul.f32 %v1567_v27, %v1556_v29  ;;  %vm1376_vm3 = vcmp.lt.s32.totalorder %v1375_v50, 0  ;;  %v1377_v21 = vsub.s32 0, %v1375_v50  ;;  %v1894_v7 = vld [vmem:[%s3345_s8 + $0x8] sm:$0xff]  ;;  %v1896_v27 = vld [vmem:[%s3345_s8 + $0x18] sm:$0xff] }
 0x28e   : > { %v1417_v39 = vadd.s32 3, %v1400_v47 }
 0x28f   : > { %v1562_v0 = vadd.f32 1.0, %v1561_v56  ;;  %v1569_v6 = vadd.f32 1.0, %v1568_v31  ;;  %v1378_v55 = vsel %vm1376_vm3, %v1377_v21, %v1375_v50  ;;  %v1962_v56 = vld [vmem:[%s444_s17] sm:$0xff]  ;;  %v1963_v21 = vld [vmem:[%s444_s17 + $0x8] sm:$0xff] }
 0x290   : > { %v1379_v5 = vclz %v1378_v55  ;;  %v1418_v12 = vand.u32 3, %v1417_v39 }
 0x291   : > { %v1570_v14 = vmul.f32 %v1569_v6, %v1554_v26  ;;  %v1579_v17 = vxor.u32 2147483648, %v1562_v0 }
 0x292   : > { %v2131_v62 = vadd.s32 4294967294, %v1379_v5  ;;  %vm1420_vm6 = vcmp.eq.s32.totalorder %v1418_v12, 0  ;;  %vm1423_vm10 = vcmp.eq.s32.totalorder %v1418_v12, 2  ;;  %vm1419_vm11 = vcmp.lt.s32.totalorder %v1418_v12, 2  ;;  %v1964_v5 = vld [vmem:[%s444_s17 + $0x10] sm:$0xff] }
 0x293   : > { %v1576_v25 = vxor.u32 2147483648, %v1570_v14  ;;  %v1580_v3 = vsel %vm1578_vm15, %v1579_v17, %v1570_v14  ;;  %v1914_v17 = vpop.permute.xlu1 %1913 }
 0x294   : > { %vm2132_vm4 = vcmp.lt.s32.totalorder %v2131_v62, 0 }
 0x295   : > { %v1577_v43 = vsel %vm1575_vm13, %v1562_v0, %v1576_v25  ;;  %v1382_v41 = vsel %vm2132_vm4, 0, %v2131_v62  ;;  %v1909_v0 = vpop.permute.xlu0 %1908 }
 0x296   : > { %v1581_v60 = vsel %vm1574_vm1, %v1577_v43, %v1580_v3  ;;  %v1383_v54 = vsub.s32 32, %v1382_v41  ;;  %v1387_v46 = vsub.s32 4294967266, %v1382_v41  ;;  %v1384_v33 = vshll.u32 %v1375_v50, %v1382_v41  ;;  %v1919_v43 = vpop.permute.xlu2 %1918 }
 0x297   : > { %v1582_v8 = vsel %vm1571_vm7, nan, %v1581_v60  ;;  %v1965_v60 = vld [vmem:[%s444_s17 + $0x18] sm:$0xff] }
 0x298   : > { %1947 = vmatpush.msra.mxu3 %v1582_v8  ;;  %v1385_v35 = vshrl.u32 %v1367_v30, %v1383_v54  ;;  %v1388_v4 = vadd.s32 127, %v1387_v46 }
 0x29a   : > { %v1386_v20 = vor.u32 %v1385_v35, %v1384_v33  ;;  %v1389_v28 = vshll.u32 %v1388_v4, 23 }
 0x29c   : > { %v1390_v37 = vor.u32 4788187, %v1389_v28  ;;  %v1393_v9 = vcvt.s32.f32 %v1386_v20 }
 0x29e   : > { %v1391_v34 = vand.u32 2147483647, %v1390_v37 }
 0x2a0   : > { %v1394_v15 = vmul.f32 %v1393_v9, %v1391_v34 }
 0x2a2   : > { %v1395_v32 = vxor.u32 2147483648, %v1394_v15 }
 0x2a4   : > { %v1396_v49 = vsel %vm1275_vm8, %v1395_v32, %v1394_v15 }
 0x2a5   : > { %v1399_v11 = vsel %vm1274_vm9, %v2874_v59, %v1396_v49  ;;  %v1895_v59 = vld [vmem:[%s3345_s8 + $0x10] sm:$0xff] }
 0x2a6   : > { %v1401_v10 = vmul.f32 %v1399_v11, %v1399_v11 }
 0x2a8   : > { %v1402_v24 = vmul.f32 -0.001358992, %v1401_v10  ;;  %v1409_v19 = vmul.f32 -0.00019511016, %v1401_v10 }
 0x2aa   : > { %v1403_v18 = vadd.f32 0.041655596, %v1402_v24  ;;  %v1410_v61 = vadd.f32 0.008332121, %v1409_v19 }
 0x2ac   : > { %v1404_v36 = vmul.f32 %v1403_v18, %v1401_v10  ;;  %v1411_v26 = vmul.f32 %v1410_v61, %v1401_v10 }
 0x2ae   : > { %v1405_v52 = vadd.f32 -0.4999988, %v1404_v36  ;;  %v1412_v29 = vadd.f32 -0.16666654, %v1411_v26 }
 0x2b0   : > { %v1406_v57 = vmul.f32 %v1405_v52, %v1401_v10  ;;  %v1413_v16 = vmul.f32 %v1412_v29, %v1401_v10 }
 0x2b2   : > { %v1407_v13 = vadd.f32 1.0, %v1406_v57  ;;  %v1414_v58 = vadd.f32 1.0, %v1413_v16 }
 0x2b4   : > { %v1415_v23 = vmul.f32 %v1414_v58, %v1399_v11  ;;  %v1424_v40 = vxor.u32 2147483648, %v1407_v13 }
 0x2b6   : > { %v1421_v42 = vxor.u32 2147483648, %v1415_v23  ;;  %v1425_v63 = vsel %vm1423_vm10, %v1424_v40, %v1415_v23 }
 0x2b8   : > { %v1422_v38 = vsel %vm1420_vm6, %v1407_v13, %v1421_v42 }
 0x2b9   : > { %v1426_v53 = vsel %vm1419_vm11, %v1422_v38, %v1425_v63 }
 0x2ba   : > { %v1427_v44 = vsel %vm1416_vm2, nan, %v1426_v53 }
 0x2bb   : > { %1948 = vmatpush.msra.mxu3 %v1427_v44 }
 0x2bc   : > { %2142 = vmatmul.msk.f32.vlgmr.msra.gmra.mxu3 %vm465_vm0, %v1893_v45 }
 0x2c4   : > { %2143 = vmatmul.msk.f32.gmra.mxu3 %vm465_vm0, %v1894_v7 }
 0x2cc   : > { %2144 = vmatmul.msk.f32.gmra.mxu3 %vm465_vm0, %v1895_v59 }
 0x2d4   : > { %2145 = vmatmul.msk.f32.gmra.mxu3 %vm465_vm0, %v1896_v27 }
 0x33f   : > { %v1950_v22 = vpop.f32.mrf.mxu3 }
 0x340   : > { %v1951_v31 = vadd.f32 %v1950_v22, %v1904_v48 }
 0x342   : > { %v1966_v50 = vadd.f32 %v1962_v56, %v1951_v31 }
 0x344   : > { %1970 = vst [vmem:[%s452_s20] sm:$0xff] %v1966_v50 }
 0x347   : > { %v1953_v6 = vpop.f32.mrf.mxu3 }
 0x348   : > { %v1954_v2 = vadd.f32 %v1953_v6, %v1909_v0 }
 0x34a   : > { %v1967_v14 = vadd.f32 %v1963_v21, %v1954_v2 }
 0x34c   : > { %1971 = vst [vmem:[%s452_s20 + $0x8] sm:$0xff] %v1967_v14 }
 0x34f   : > { %v1956_v55 = vpop.f32.mrf.mxu3 }
 0x350   : > { %v1957_v25 = vadd.f32 %v1956_v55, %v1914_v17 }
 0x352   : > { %v1968_v62 = vadd.f32 %v1964_v5, %v1957_v25 }
 0x354   : > { %1972 = vst [vmem:[%s452_s20 + $0x10] sm:$0xff] %v1968_v62 }
 0x357   : > { %v1959_v3 = vpop.f32.mrf.mxu3 }
 0x358   : > { %v1960_v8 = vadd.f32 %v1959_v3, %v1919_v43 }
 0x35a   : > { %v1969_v41 = vadd.f32 %v1965_v60, %v1960_v8 }
 0x35c   : > { %1973 = vst [vmem:[%s452_s20 + $0x18] sm:$0xff] %v1969_v41 }
 0x35d PF: > { %s20_s15 = sadd.s32 1, %s2208_s15   ;;  %s3373_s13 = smov %s2204_s14 }
 0x35e   : > { %p17_p5 = scmp.ge.s32.totalorder %s20_s15, 4   ;;  %s3374_s14 = smov %s3376_s16 }
 0x360   :  { %19 = sbr.rel (!%p17_p5) target bundleno = 2 (0x2), region = 96 }

// kernel: _lambda_.13
= control target key start
LH: loop header
LB: loop body
LE: loop exit
PB: predicated region body
PF: predicated region fallthrough
CT: control target
= control target key end

     0   :  { %s1960_s24 = smov 0   ;;  %s1962_s25 = smov 0   ;;  %s3012_s0 = inlined_call_operand.vmem [shape: f32[2,32,128], index: 0, kind: input, shape index: {}]   ;;  %s3013_s1 = inlined_call_operand.vmem [shape: f32[32,32], index: 1, kind: input, shape index: {}]   ;;  %s3014_s2 = inlined_call_operand.vmem [shape: f32[32,1], index: 2, kind: input, shape index: {}]   ;;  %s3015_s3 = inlined_call_operand.vmem [shape: f32[32,32], index: 3, kind: input, shape index: {}]   ;;  %s3016_s4 = inlined_call_operand.vmem [shape: f32[32,1], index: 4, kind: input, shape index: {}]   ;;  %s3017_s5 = inlined_call_operand.vmem [shape: f32[3,32], index: 5, kind: input, shape index: {}]   ;;  %s3018_s6 = inlined_call_operand.vmem [shape: f32[3,1], index: 6, kind: input, shape index: {}]   ;;  %s3019_s7 = inlined_call_operand.vmem [shape: f32[2,3,128], index: 7, kind: output, shape index: {}]  }
   0x1   :  { %s1964_s26 = smov 0  }
   0x2 LB: > { %s29_s27 = sadd.s32 1, %s1907_s25  ;;  %p1807_p0 = scmp.ge.s32.totalorder %s1911_s26, 1  ;;  %s1911_s26 = sphi %s1964_s26, %s17_s26   ;;  %s1907_s25 = sphi %s1962_s25, %s3055_s25   ;;  %s1903_s24 = sphi %s1960_s24, %s3054_s24  }
   0x3   : > { %p31_p1 = scmp.ge.s32.totalorder %s29_s27, 2  ;;  %p256_p2 = scmp.lt.s32.totalorder %s1911_s26, 3 }
   0x5   : > { %s3057_s27 = smov (%p31_p1, %s29_s27), 0  ;;  %p257_p3 = pnand %p1807_p0, %p256_p2 }
   0x6   : > { %p293_p4 = scmp.lt.s32.totalorder (!%p257_p3), %s1903_s24, 1 }
   0x7   : > { %260 = sbr.rel (%p257_p3) target bundleno = 816 (0x330), region = 48 }
   0xc   : > { %v309_v0 = vld [vmem:[%s3014_s2 + $0x8] sm:$0xff]  ;;  %v1913_v1 = vmov 0   ;;  %v311_v2 = vld [vmem:[%s3014_s2 + $0x18] sm:$0xff]  ;;  %s3059_s24 = smov (!%p293_p4, %s1903_s24), 1  ;;  %v308_v5 = vld [vmem:[%s3014_s2] sm:$0xff]  ;;  %vm320_vm0 = vcmask 261120  }
   0xd   : > { %1887 = vset.pattern.permute.xlu1 %v1913_v1  ;;  %1886 = vset.pattern.permute.xlu0 %v1913_v1  ;;  %s1846_s9 = sshll.u32 %s3059_s24, 5  ;;  %v310_v6 = vld [vmem:[%s3014_s2 + $0x10] sm:$0xff]  ;;  %v312_v9 = vld [vmem:[%s3013_s1] sm:$0xff]  ;;  %v313_v10 = vld [vmem:[%s3013_s1 + $0x8] sm:$0xff]  ;;  %v1914_v47 = vmov 2102212464  }
   0xe   : > { %369 = vperm.xlu1 %1887, %v309_v0   ;;  %379 = vperm.xlu0 %1886, %v311_v2   ;;  %s300_s12 = scalar_lea.vmem %s3012_s0, %s1846_s9  ;;  %v1011_v11 = vld [vmem:[%s3016_s4 + $0x8] sm:$0xff]  ;;  %v1010_v12 = vld [vmem:[%s3016_s4] sm:$0xff]  ;;  %v314_v13 = vld [vmem:[%s3013_s1 + $0x10] sm:$0xff]  ;;  %v3020_v49 = vmov 1326507024   ;;  %s1810_s30 = sshll.u32 %s3059_s24, 2 }
   0xf   : > { %1888 = vset.pattern.permute.xlu2 %v1913_v1  ;;  %v319_v3 = vld [vmem:[%s300_s12 + $0x18] sm:$0xff]  ;;  %v318_v4 = vld [vmem:[%s300_s12 + $0x10] sm:$0xff]  ;;  %v317_v7 = vld [vmem:[%s300_s12 + $0x8] sm:$0xff]  ;;  %v3022_v56 = vmov 920167782   ;;  %s307_s10 = scalar_lea.vmem %s3019_s7, %s1810_s30 }
  0x10   : > { %345 = vmatpush.msra.mxu0 %v319_v3  ;;  %1847 = vmatpush.msra.mxu3 %v319_v3  ;;  %v316_v8 = vld [vmem:[%s300_s12] sm:$0xff]  ;;  %v315_v14 = vld [vmem:[%s3013_s1 + $0x18] sm:$0xff] }
  0x12   : > { %346 = vmatpush.msra.mxu0 %v318_v4  ;;  %1848 = vmatpush.msra.mxu3 %v318_v4 }
  0x14   : > { %347 = vmatpush.msra.mxu0 %v317_v7  ;;  %1849 = vmatpush.msra.mxu3 %v317_v7 }
  0x16   : > { %364 = vperm.xlu1 %1887, %v308_v5   ;;  %374 = vperm.xlu0 %1886, %v310_v6  }
  0x17   : > { %348 = vmatpush.msra.mxu0 %v316_v8  ;;  %1850 = vmatpush.msra.mxu3 %v316_v8 }
  0x18   : > { %1811 = vmatmul.msk.f32.vlgmr.msra.gmra.mxu0 %vm320_vm0, %v312_v9  ;;  %1812 = vmatmul.msk.f32.vlgmr.msra.gmra.mxu3 %vm320_vm0, %v313_v10 }
  0x1e   : > { %1021 = vperm.xlu0 %1886, %v1011_v11   ;;  %1016 = vperm.xlu1 %1887, %v1010_v12  }
  0x20   : > { %1813 = vmatmul.msk.f32.gmra.mxu3 %vm320_vm0, %v314_v13 }
  0x28   : > { %1814 = vmatmul.msk.f32.gmra.mxu3 %vm320_vm0, %v315_v14  ;;  %v1917_v14 = vmov 683565275  }
  0x80   : > { %v370_v15 = vpop.permute.xlu1 %369  ;;  %v380_v20 = vpop.permute.xlu0 %379 }
  0x88   : > { %v365_v16 = vpop.permute.xlu1 %364  ;;  %v375_v31 = vpop.permute.xlu0 %374 }
  0x95   : > { %v350_v17 = vpop.f32.mrf.mxu0 }
  0x96   : > { %v2021_v18 = vadd.f32 %v365_v16, %v350_v17 }
  0x98   : > { %v389_v19 = vand.u32 2139095040, %v2021_v18 }
  0x9a   : > { %v390_v21 = vshrl.u32 %v389_v19, 23 }
  0x9b   : > { %v353_v22 = vpop.f32.mrf.mxu3 }
  0x9c   : > { %v1815_v23 = vadd.s32 4294967169, %v390_v21  ;;  %v2024_v24 = vadd.f32 %v370_v15, %v353_v22 }
  0x9e   : > { %v396_v25 = vadd.s32 1, %v1815_v23  ;;  %v544_v26 = vand.u32 2139095040, %v2024_v24  ;;  %v3024_v40 = vand.u32 2147483647, %v2024_v24 }
  0xa0   : > { %v545_v27 = vshrl.u32 %v544_v26, 23  ;;  %vm397_vm1 = vcmp.gt.s32.totalorder %v396_v25, 0  ;;  %v2052_v51 = vand.u32 8388607, %v3024_v40 }
  0xa1   : > { %v398_v30 = vsel %vm397_vm1, %v396_v25, 0 }
  0xa2   : > { %v1818_v28 = vadd.s32 4294967169, %v545_v27  ;;  %v2029_v34 = vand.u32 31, %v398_v30  ;;  %v2076_v8 = vshrl.u32 %v398_v30, 5  ;;  %v549_v11 = vor.u32 8388608, %v2052_v51 }
  0xa3   : > { %v356_v29 = vpop.f32.mrf.mxu3 }
  0xa4   : > { %v551_v32 = vadd.s32 1, %v1818_v28  ;;  %v2027_v33 = vadd.f32 %v375_v31, %v356_v29  ;;  %v2039_v42 = vsub.s32 32, %v2029_v34  ;;  %v412_v48 = vshll.u32 %v1914_v47, %v2029_v34 }
  0xa5   : > { %v2060_v58 = vshll.u32 %v3022_v56, %v2029_v34 }
  0xa6   : > { %vm552_vm2 = vcmp.gt.s32.totalorder %v551_v32, 0  ;;  %v699_v35 = vand.u32 2139095040, %v2027_v33  ;;  %v3027_v36 = vand.u32 2147483647, %v2027_v33  ;;  %v413_v57 = vshrl.u32 %v3022_v56, %v2039_v42 }
  0xa7   : > { %v553_v37 = vsel %vm552_vm2, %v551_v32, 0  ;;  %v2064_v59 = vshrl.u32 %v3020_v49, %v2039_v42  ;;  %v1919_v32 = vmov 2131351028  }
  0xa8   : > { %v2033_v38 = vand.u32 31, %v553_v37  ;;  %v700_v39 = vshrl.u32 %v699_v35, 23  ;;  %v703_v41 = vand.u32 8388607, %v3027_v36  ;;  %v2068_v61 = vshrl.u32 %v553_v37, 5 }
  0xa9   : > { %v2078_v9 = vor.u32 %v413_v57, %v412_v48 }
  0xaa   : > { %v2042_v43 = vsub.s32 32, %v2033_v38  ;;  %v1821_v45 = vadd.s32 4294967169, %v700_v39  ;;  %v704_v55 = vor.u32 8388608, %v703_v41  ;;  %v570_v60 = vshll.u32 %v3022_v56, %v2033_v38 }
  0xab   : > { %v359_v44 = vpop.f32.mrf.mxu3  ;;  %v567_v10 = vshll.u32 %v1914_v47, %v2033_v38  ;;  %vm576_vm4 = vcmp.lt.s32.totalorder %v2068_v61, 4  ;;  %v2090_v15 = vshll.u32 %v1917_v14, %v2033_v38 }
  0xac   : > { %v2044_v46 = vadd.f32 %v380_v20, %v359_v44  ;;  %v571_v50 = vshrl.u32 %v3020_v49, %v2042_v43  ;;  %v706_v52 = vadd.s32 1, %v1821_v45  ;;  %v568_v0 = vshrl.u32 %v3022_v56, %v2042_v43 }
  0xad   : > { %v2074_v7 = vshll.u32 %v704_v55, 8  ;;  %v3025_v20 = vmov 2475754826   ;;  %v557_v51 = vshrl.u32 %v1917_v14, %v2042_v43 }
  0xae   : > { %v854_v53 = vand.u32 2139095040, %v2044_v46  ;;  %v851_v54 = vand.u32 2147483647, %v2044_v46  ;;  %vm707_vm3 = vcmp.gt.s32.totalorder %v706_v52, 0  ;;  %v572_v2 = vor.u32 %v571_v50, %v570_v60 }
  0xaf   : > { %v708_v3 = vsel %vm707_vm3, %v706_v52, 0  ;;  %v2092_v16 = vor.u32 %v568_v0, %v567_v10  ;;  %v2098_v21 = vshrl.u32 %v3025_v20, %v2042_v43  ;;  %v2109_v26 = vand.u32 65535, %v2074_v7 }
  0xb0   : > { %v855_v62 = vshrl.u32 %v854_v53, 23  ;;  %v858_v63 = vand.u32 8388607, %v851_v54  ;;  %v710_v4 = vand.u32 31, %v708_v3  ;;  %v2094_v17 = vshrl.u32 %v708_v3, 5 }
  0xb1   : > { %v2102_v22 = vsel %vm576_vm4, %v572_v2, 1326507024  ;;  %v2116_v29 = vshrl.u32 %v2074_v7, 16  ;;  %v2123_v37 = vshll.u32 %v3025_v20, %v2033_v38  ;;  %vm421_vm3 = vcmp.lt.s32.totalorder %v2076_v8, 4 }
  0xb2   : > { %v1824_v5 = vadd.s32 4294967169, %v855_v62  ;;  %v859_v6 = vor.u32 8388608, %v858_v63  ;;  %v2086_v13 = vsub.s32 32, %v710_v4  ;;  %v722_v30 = vshll.u32 %v1914_v47, %v710_v4 }
  0xb3   : > { %v725_v39 = vshll.u32 %v3022_v56, %v710_v4  ;;  %vm731_vm6 = vcmp.lt.s32.totalorder %v2094_v17, 4  ;;  %v713_v44 = vshll.u32 %v1917_v14, %v710_v4  ;;  %v716_v52 = vshll.u32 %v3025_v20, %v710_v4 }
  0xb4   : > { %v861_v19 = vadd.s32 1, %v1824_v5  ;;  %v723_v23 = vshrl.u32 %v3022_v56, %v2086_v13  ;;  %v2106_v25 = vshll.u32 %v859_v6, 8  ;;  %v726_v27 = vshrl.u32 %v3020_v49, %v2086_v13 }
  0xb5   : > { %v714_v28 = vshrl.u32 %v3025_v20, %v2086_v13  ;;  %v717_v35 = vshrl.u32 %v1919_v32, %v2086_v13  ;;  %v719_v2 = vshll.u32 %v1919_v32, %v710_v4  ;;  %vm728_vm11 = vcmp.lt.s32.totalorder %v2094_v17, 1 }
  0xb6   : > { %vm862_vm5 = vcmp.gt.s32.totalorder %v861_v19, 0  ;;  %v2128_v45 = vor.u32 %v723_v23, %v722_v30  ;;  %v900_v48 = vand.u32 65535, %v2106_v25  ;;  %v901_v50 = vshrl.u32 %v2106_v25, 16 }
  0xb7   : > { %v863_v31 = vsel %vm862_vm5, %v861_v19, 0  ;;  %v727_v53 = vor.u32 %v726_v27, %v725_v39  ;;  %v2135_v60 = vor.u32 %v714_v28, %v713_v44  ;;  %v2139_v0 = vor.u32 %v717_v35, %v716_v52 }
  0xb8   : > { %v865_v41 = vand.u32 31, %v863_v31  ;;  %v2133_v55 = vshrl.u32 %v863_v31, 5  ;;  %v737_v4 = vsel %vm731_vm6, %v2128_v45, 920167782  ;;  %v720_v52 = vshrl.u32 %v1914_v47, %v2086_v13 }
  0xb9   : > { %vm729_vm12 = vcmp.lt.s32.totalorder %v2094_v17, 2  ;;  %vm730_vm13 = vcmp.lt.s32.totalorder %v2094_v17, 3  ;;  %v582_v17 = vsel %vm576_vm4, %v2092_v16, 920167782 }
  0xba   : > { %v866_v57 = vsub.s32 32, %v865_v41  ;;  %v877_v62 = vshll.u32 %v1914_v47, %v865_v41  ;;  %v880_v63 = vshll.u32 %v3022_v56, %v865_v41  ;;  %v868_v6 = vshll.u32 %v1917_v14, %v865_v41 }
  0xbb   : > { %v871_v19 = vshll.u32 %v3025_v20, %v865_v41  ;;  %v874_v27 = vshll.u32 %v1919_v32, %v865_v41  ;;  %vm886_vm7 = vcmp.lt.s32.totalorder %v2133_v55, 4  ;;  %vm883_vm8 = vcmp.lt.s32.totalorder %v2133_v55, 1 }
  0xbc   : > { %v878_v3 = vshrl.u32 %v3022_v56, %v866_v57  ;;  %v881_v5 = vshrl.u32 %v3020_v49, %v866_v57  ;;  %v869_v10 = vshrl.u32 %v3025_v20, %v866_v57  ;;  %v872_v23 = vshrl.u32 %v1919_v32, %v866_v57 }
  0xbd   : > { %v875_v28 = vshrl.u32 %v1914_v47, %v866_v57  ;;  %vm885_vm9 = vcmp.lt.s32.totalorder %v2133_v55, 3  ;;  %vm884_vm10 = vcmp.lt.s32.totalorder %v2133_v55, 2  ;;  %v2181_v56 = vor.u32 %v720_v52, %v719_v2 }
  0xbe   : > { %v879_v30 = vor.u32 %v878_v3, %v877_v62  ;;  %v882_v31 = vor.u32 %v881_v5, %v880_v63  ;;  %v870_v35 = vor.u32 %v869_v10, %v868_v6  ;;  %v873_v39 = vor.u32 %v872_v23, %v871_v19 }
  0xbf   : > { %v876_v44 = vor.u32 %v875_v28, %v874_v27  ;;  %v741_v5 = vsel %vm731_vm6, %v727_v53, 1326507024  ;;  %v867_v28 = vshrl.u32 %v1917_v14, %v866_v57 }
  0xc0   : > { %v892_v49 = vsel %vm886_vm7, %v879_v30, 920167782  ;;  %v896_v41 = vsel %vm886_vm7, %v882_v31, 1326507024  ;;  %v891_v62 = vsel %vm883_vm8, %v870_v35, %v873_v39 }
  0xc1   : > { %v893_v63 = vsel %vm885_vm9, %v876_v44, %v892_v49  ;;  %v895_v3 = vsel %vm883_vm8, %v873_v39, %v876_v44  ;;  %v897_v10 = vsel %vm885_vm9, %v879_v30, %v896_v41  ;;  %v888_v19 = vsel %vm886_vm7, %v876_v44, 2102212464 }
  0xc2   : > { %v894_v6 = vsel %vm884_vm10, %v891_v62, %v893_v63  ;;  %v898_v49 = vsel %vm884_vm10, %v895_v3, %v897_v10  ;;  %v887_v30 = vsel %vm883_vm8, %v867_v28, %v870_v35  ;;  %v889_v44 = vsel %vm885_vm9, %v873_v39, %v888_v19 }
  0xc3   : > { %v924_v23 = vand.u32 65535, %v894_v6  ;;  %v925_v27 = vshrl.u32 %v894_v6, 16  ;;  %v902_v31 = vand.u32 65535, %v898_v49  ;;  %v903_v53 = vshrl.u32 %v898_v49, 16 }
  0xc4   : > { %v736_v35 = vsel %vm728_vm11, %v2135_v60, %v2139_v0 }
  0xc5   : > { %v927_v62 = vmul.u32 %v925_v27, %v900_v48  ;;  %v928_v63 = vmul.u32 %v924_v23, %v901_v50  ;;  %v905_v41 = vmul.u32 %v903_v53, %v900_v48  ;;  %v906_v3 = vmul.u32 %v902_v31, %v901_v50 }
  0xc6   : > { %v904_v6 = vmul.u32 %v902_v31, %v900_v48  ;;  %v926_v57 = vmul.u32 %v924_v23, %v900_v48  ;;  %v929_v10 = vmul.u32 %v925_v27, %v901_v50  ;;  %v907_v2 = vmul.u32 %v903_v53, %v901_v50 }
  0xc7   : > { %v930_v49 = vshll.u32 %v927_v62, 16  ;;  %v908_v52 = vshll.u32 %v905_v41, 16  ;;  %v931_v40 = vshrl.u32 %v927_v62, 16  ;;  %v932_v20 = vshll.u32 %v928_v63, 16 }
  0xc8   : > { %v910_v36 = vshll.u32 %v906_v3, 16  ;;  %v738_v48 = vsel %vm730_vm13, %v2181_v56, %v737_v4  ;;  %v909_v50 = vshrl.u32 %v905_v41, 16  ;;  %v740_v4 = vsel %vm728_vm11, %v2139_v0, %v2181_v56 }
  0xc9   : > { %vm934_vm14 = vc.u32 %v926_v57, %v930_v49  ;;  %v936_v12 = vadd.s32 %v930_v49, %v926_v57  ;;  %vm912_vm15 = vc.u32 %v904_v6, %v908_v52  ;;  %v914_v39 = vadd.s32 %v908_v52, %v904_v6 }
  0xca   : > { %v935_v19 = vsel %vm934_vm14, 1, %v1913_v1  ;;  %v913_v23 = vsel %vm912_vm15, 1, %v1913_v1  ;;  %v739_v53 = vsel %vm729_vm12, %v736_v35, %v738_v48  ;;  %v742_v41 = vsel %vm730_vm13, %v2128_v45, %v741_v5 }
  0xcb   : > { %v937_v27 = vadd.s32 %v935_v19, %v929_v10  ;;  %vm938_vm1 = vc.u32 %v936_v12, %v932_v20  ;;  %v915_v28 = vadd.s32 %v913_v23, %v907_v2  ;;  %vm916_vm2 = vc.u32 %v914_v39, %v910_v36 }
  0xcc   : > { %v939_v31 = vsel %vm938_vm1, 1, %v1913_v1  ;;  %v917_v62 = vsel %vm916_vm2, 1, %v1913_v1  ;;  %v743_v36 = vsel %vm729_vm12, %v740_v4, %v742_v41  ;;  %v769_v10 = vand.u32 65535, %v739_v53 }
  0xcd   : > { %v941_v6 = vadd.s32 %v939_v31, %v937_v27  ;;  %v919_v57 = vadd.s32 %v917_v62, %v915_v28  ;;  %v770_v49 = vshrl.u32 %v739_v53, 16  ;;  %v933_v2 = vshrl.u32 %v928_v63, 16 }
  0xce   : > { %v747_v35 = vand.u32 65535, %v743_v36  ;;  %v748_v39 = vshrl.u32 %v743_v36, 16  ;;  %v890_v19 = vsel %vm884_vm10, %v887_v30, %v889_v44  ;;  %v911_v48 = vshrl.u32 %v906_v3, 16 }
  0xcf   : > { %v942_v52 = vadd.s32 %v941_v6, %v931_v40  ;;  %v920_v23 = vadd.s32 %v919_v57, %v909_v50  ;;  %v772_v27 = vmul.u32 %v770_v49, %v2109_v26  ;;  %v562_v28 = vshrl.u32 %v1919_v32, %v2042_v43 }
  0xd0   : > { %v750_v45 = vmul.u32 %v748_v39, %v2109_v26  ;;  %v751_v5 = vmul.u32 %v747_v35, %v2116_v29  ;;  %v2220_v40 = vadd.s32 %v936_v12, %v932_v20  ;;  %v773_v63 = vmul.u32 %v769_v10, %v2116_v29 }
  0xd1   : > { %v943_v31 = vadd.s32 %v942_v52, %v933_v2  ;;  %v2218_v53 = vadd.s32 %v920_v23, %v911_v48  ;;  %v775_v55 = vshll.u32 %v772_v27, 16  ;;  %v944_v30 = vmul.u32 %v2106_v25, %v890_v19 }
  0xd2   : > { %v749_v3 = vmul.u32 %v747_v35, %v2109_v26  ;;  %v753_v50 = vshll.u32 %v750_v45, 16  ;;  %v752_v62 = vmul.u32 %v748_v39, %v2116_v29  ;;  %v771_v6 = vmul.u32 %v769_v10, %v2109_v26 }
  0xd3   : > { %v947_v44 = vadd.s32 1, %v943_v31  ;;  %vm946_vm5 = vc.u32 %v2218_v53, %v2220_v40  ;;  %v774_v12 = vmul.u32 %v770_v49, %v2116_v29  ;;  %v755_v4 = vshll.u32 %v751_v5, 16 }
  0xd4   : > { %vm757_vm7 = vc.u32 %v749_v3, %v753_v50  ;;  %v759_v41 = vadd.s32 %v753_v50, %v749_v3  ;;  %v777_v36 = vshll.u32 %v773_v63, 16  ;;  %vm779_vm8 = vc.u32 %v771_v6, %v775_v55 }
  0xd5   : > { %v948_v20 = vsel %vm946_vm5, %v947_v44, %v943_v31  ;;  %v758_v25 = vsel %vm757_vm7, 1, %v1913_v1  ;;  %v780_v52 = vsel %vm779_vm8, 1, %v1913_v1  ;;  %v781_v35 = vadd.s32 %v775_v55, %v771_v6 }
  0xd6   : > { %v949_v57 = vadd.s32 %v948_v20, %v944_v30  ;;  %v760_v2 = vadd.s32 %v758_v25, %v752_v62  ;;  %vm761_vm9 = vc.u32 %v759_v41, %v755_v4  ;;  %v712_v26 = vshrl.u32 %v1917_v14, %v2086_v13 }
  0xd7   : > { %v762_v29 = vsel %vm761_vm9, 1, %v1913_v1  ;;  %v782_v10 = vadd.s32 %v780_v52, %v774_v12  ;;  %v733_v49 = vsel %vm731_vm6, %v2181_v56, 2102212464  ;;  %v754_v39 = vshrl.u32 %v750_v45, 16 }
  0xd8   : > { %v950_v19 = vadd.s32 536870912, %v949_v57  ;;  %v764_v48 = vadd.s32 %v762_v29, %v760_v2  ;;  %vm783_vm10 = vc.u32 %v781_v35, %v777_v36  ;;  %v756_v31 = vshrl.u32 %v751_v5, 16 }
  0xd9   : > { %v784_v30 = vsel %vm783_vm10, 1, %v1913_v1  ;;  %v565_v55 = vshrl.u32 %v1914_v47, %v2042_v43  ;;  %v776_v3 = vshrl.u32 %v772_v27, 16  ;;  %v564_v50 = vshll.u32 %v1919_v32, %v2033_v38 }
  0xda   : > { %v951_v23 = vshrl.u32 %v950_v19, 30  ;;  %v765_v44 = vadd.s32 %v764_v48, %v754_v39  ;;  %v786_v13 = vadd.s32 %v784_v30, %v782_v10  ;;  %v732_v56 = vsel %vm728_vm11, %v712_v26, %v2135_v60 }
  0xdb   : > { %v734_v45 = vsel %vm730_vm13, %v2139_v0, %v733_v49  ;;  %v778_v5 = vshrl.u32 %v773_v63, 16  ;;  %v2253_v20 = vor.u32 %v562_v28, %v2123_v37  ;;  %v566_v27 = vor.u32 %v565_v55, %v564_v50 }
  0xdc   : > { %v952_v62 = vshll.u32 %v951_v23, 30  ;;  %v2250_v6 = vadd.s32 %v765_v44, %v756_v31  ;;  %v787_v12 = vadd.s32 %v786_v13, %v776_v3  ;;  %v2258_v38 = vsel %vm421_vm3, %v2078_v9, 920167782 }
  0xdd   : > { %v2260_v41 = vadd.s32 %v781_v35, %v777_v36  ;;  %vm575_vm6 = vcmp.lt.s32.totalorder %v2068_v61, 3  ;;  %v735_v60 = vsel %vm729_vm12, %v732_v56, %v734_v45  ;;  %v560_v63 = vor.u32 %v2098_v21, %v2090_v15 }
  0xde   : > { %v953_v4 = vsub.s32 %v949_v57, %v952_v62  ;;  %v788_v0 = vadd.s32 %v787_v12, %v778_v5  ;;  %v587_v37 = vsel %vm575_vm6, %v2092_v16, %v2102_v22  ;;  %vm573_vm14 = vcmp.lt.s32.totalorder %v2068_v61, 1 }
  0xdf   : > { %vm791_vm13 = vc.u32 %v2250_v6, %v2260_v41  ;;  %vm574_vm12 = vcmp.lt.s32.totalorder %v2068_v61, 2  ;;  %v585_v15 = vsel %vm573_vm14, %v2253_v20, %v566_v27  ;;  %v789_v22 = vmul.u32 %v2074_v7, %v735_v60 }
  0xe0   : > { %vm954_vm11 = vcmp.lt.s32.totalorder %v953_v4, 0  ;;  %v955_v28 = vsub.s32 0, %v953_v4  ;;  %v792_v57 = vadd.s32 1, %v788_v0  ;;  %v588_v25 = vsel %vm574_vm12, %v585_v15, %v587_v37 }
  0xe1   : > { %v2286_v36 = vshll.u32 %v549_v11, 8  ;;  %v975_v52 = vsub.s32 4, %v951_v23  ;;  %v593_v35 = vshrl.u32 %v588_v25, 16  ;;  %v581_v26 = vsel %vm573_vm14, %v560_v63, %v2253_v20 }
  0xe2   : > { %v956_v21 = vsel %vm954_vm11, %v955_v28, %v953_v4  ;;  %v793_v16 = vsel %vm791_vm13, %v792_v57, %v788_v0  ;;  %v583_v29 = vsel %vm575_vm6, %v566_v27, %v582_v17  ;;  %v592_v7 = vand.u32 65535, %v588_v25 }
  0xe3   : > { %v957_v2 = vclz %v956_v21  ;;  %v794_v19 = vadd.s32 %v793_v16, %v789_v22  ;;  %vm853_vm15 = vcmp.lt.s32.totalorder %v2044_v46, 0  ;;  %v590_v11 = vand.u32 65535, %v2286_v36 }
  0xe4   : > { %vm2299_vm1 = vcmp.le.f32.partialorder %v851_v54, 0.7853982  ;;  %v945_v39 = vadd.s32 %v2220_v40, %v2218_v53  ;;  %v591_v31 = vshrl.u32 %v2286_v36, 16  ;;  %v976_v30 = vsel %vm853_vm15, %v975_v52, %v951_v23 }
  0xe5   : > { %v1825_v10 = vadd.s32 4294967294, %v957_v2  ;;  %v795_v48 = vadd.s32 536870912, %v794_v19  ;;  %v584_v43 = vsel %vm574_vm12, %v581_v26, %v583_v29  ;;  %v595_v55 = vmul.u32 %v593_v35, %v590_v11 }
  0xe6   : > { %v578_v54 = vsel %vm576_vm4, %v566_v27, 2102212464  ;;  %v596_v13 = vmul.u32 %v592_v7, %v591_v31  ;;  %v594_v40 = vmul.u32 %v592_v7, %v590_v11  ;;  %v597_v45 = vmul.u32 %v593_v35, %v591_v31 }
  0xe7   : > { %vm1826_vm2 = vcmp.lt.s32.totalorder %v1825_v10, 0  ;;  %v2310_v3 = vshrl.u32 %v795_v48, 30  ;;  %v598_v62 = vshll.u32 %v595_v55, 16  ;;  %v614_v5 = vand.u32 65535, %v584_v43 }
  0xe8   : > { %v960_v44 = vsel %vm1826_vm2, 0, %v1825_v10  ;;  %v615_v23 = vshrl.u32 %v584_v43, 16  ;;  %v600_v28 = vshll.u32 %v596_v13, 16  ;;  %v577_v21 = vsel %vm573_vm14, %v557_v51, %v560_v63 }
  0xe9   : > { %v961_v50 = vsub.s32 32, %v960_v44  ;;  %v965_v53 = vsub.s32 4294967266, %v960_v44  ;;  %v797_v56 = vshll.u32 %v2310_v3, 30  ;;  %v962_v12 = vshll.u32 %v953_v4, %v960_v44 }
  0xea   : > { %vm602_vm5 = vc.u32 %v594_v40, %v598_v62  ;;  %v604_v27 = vadd.s32 %v598_v62, %v594_v40  ;;  %v978_v25 = vsel %vm2299_vm1, 0, %v976_v30  ;;  %v579_v52 = vsel %vm575_vm6, %v2253_v20, %v578_v54 }
  0xeb   : > { %v963_v60 = vshrl.u32 %v945_v39, %v961_v50  ;;  %v966_v0 = vadd.s32 127, %v965_v53  ;;  %v2315_v37 = vsub.s32 %v794_v19, %v797_v56  ;;  %v603_v17 = vsel %vm602_vm5, 1, %v1913_v1 }
  0xec   : > { %v605_v22 = vadd.s32 %v603_v17, %v597_v45  ;;  %vm606_vm7 = vc.u32 %v604_v27, %v600_v28  ;;  %v617_v35 = vmul.u32 %v615_v23, %v590_v11  ;;  %v599_v63 = vshrl.u32 %v595_v55, 16 }
  0xed   : > { %v964_v57 = vor.u32 %v963_v60, %v962_v12  ;;  %v967_v15 = vshll.u32 %v966_v0, 23  ;;  %vm799_vm4 = vcmp.lt.s32.totalorder %v2315_v37, 0  ;;  %v800_v4 = vsub.s32 0, %v2315_v37 }
  0xee   : > { %v607_v16 = vsel %vm606_vm7, 1, %v1913_v1  ;;  %v618_v29 = vmul.u32 %v614_v5, %v591_v31  ;;  %v620_v39 = vshll.u32 %v617_v35, 16  ;;  %v3033_v48 = vor.u32 %v2064_v59, %v2060_v58 }
  0xef   : > { %v968_v2 = vor.u32 4788187, %v967_v15  ;;  %v801_v19 = vsel %vm799_vm4, %v800_v4, %v2315_v37  ;;  %v609_v26 = vadd.s32 %v607_v16, %v605_v22  ;;  %v971_v10 = vcvt.s32.f32 %v964_v57 }
  0xf0   : > { %v802_v51 = vclz %v801_v19  ;;  %v2334_v30 = vsel %vm421_vm3, %v3033_v48, 1326507024  ;;  %v995_v20 = vadd.s32 3, %v978_v25  ;;  %v790_v43 = vadd.s32 %v2260_v41, %v2250_v6 }
  0xf1   : > { %v969_v7 = vand.u32 2147483647, %v968_v2  ;;  %v616_v44 = vmul.u32 %v614_v5, %v590_v11  ;;  %vm698_vm8 = vcmp.lt.s32.totalorder %v2027_v33, 0  ;;  %v2341_v50 = vsel %vm574_vm12, %v577_v21, %v579_v52 }
  0xf2   : > { %v1822_v55 = vadd.s32 4294967294, %v802_v51  ;;  %v610_v53 = vadd.s32 %v609_v26, %v599_v63  ;;  %v619_v40 = vmul.u32 %v615_v23, %v591_v31  ;;  %v622_v58 = vshll.u32 %v618_v29, 16 }
  0xf3   : > { %v972_v54 = vmul.f32 %v971_v10, %v969_v7  ;;  %vm624_vm9 = vc.u32 %v616_v44, %v620_v39  ;;  %v626_v59 = vadd.s32 %v620_v39, %v616_v44  ;;  %v601_v56 = vshrl.u32 %v596_v13, 16 }
  0xf4   : > { %vm1823_vm10 = vcmp.lt.s32.totalorder %v1822_v55, 0  ;;  %v625_v45 = vsel %vm624_vm9, 1, %v1913_v1  ;;  %v820_v41 = vsub.s32 4, %v2310_v3  ;;  %v386_v0 = vand.u32 2147483647, %v2021_v18 }
  0xf5   : > { %v973_v62 = vxor.u32 2147483648, %v972_v54  ;;  %v805_v6 = vsel %vm1823_vm10, 0, %v1822_v55  ;;  %v627_v11 = vadd.s32 %v625_v45, %v619_v40  ;;  %vm628_vm6 = vc.u32 %v626_v59, %v622_v58 }
  0xf6   : > { %v806_v5 = vsub.s32 32, %v805_v6  ;;  %v810_v12 = vsub.s32 4294967266, %v805_v6  ;;  %v2347_v60 = vadd.s32 %v610_v53, %v601_v56  ;;  %v807_v13 = vshll.u32 %v2315_v37, %v805_v6 }
  0xf7   : > { %v974_v61 = vsel %vm853_vm15, %v973_v62, %v972_v54  ;;  %v629_v23 = vsel %vm628_vm6, 1, %v1913_v1  ;;  %v2359_v15 = vand.u32 3, %v995_v20  ;;  %v621_v21 = vshrl.u32 %v617_v35, 16 }
  0xf8   : > { %v2352_v31 = vsel %vm2299_vm1, %v2044_v46, %v974_v61  ;;  %v808_v17 = vshrl.u32 %v790_v43, %v806_v5  ;;  %v811_v27 = vadd.s32 127, %v810_v12  ;;  %v631_v57 = vadd.s32 %v629_v23, %v627_v11 }
  0xf9   : > { %v979_v28 = vmul.f32 %v2352_v31, %v2352_v31  ;;  %v2361_v22 = vadd.s32 %v626_v59, %v622_v58  ;;  %v634_v49 = vmul.u32 %v2286_v36, %v2341_v50  ;;  %v3034_v4 = vand.u32 2147483647, %v2027_v33 }
  0xfa   : > { %v809_v52 = vor.u32 %v808_v17, %v807_v13  ;;  %v812_v16 = vshll.u32 %v811_v27, 23  ;;  %v821_v19 = vsel %vm698_vm8, %v820_v41, %v2310_v3  ;;  %v623_v35 = vshrl.u32 %v618_v29, 16 }
  0xfb   : > { %v980_v25 = vmul.f32 -0.001358992, %v979_v28  ;;  %v987_v37 = vmul.f32 -0.00019511016, %v979_v28  ;;  %vm2367_vm11 = vcmp.le.f32.partialorder %v3034_v4, 0.7853982  ;;  %v632_v63 = vadd.s32 %v631_v57, %v621_v21 }
  0xfc   : > { %v393_v26 = vand.u32 8388607, %v386_v0  ;;  %v813_v10 = vor.u32 4788187, %v812_v16  ;;  %vm636_vm13 = vc.u32 %v2347_v60, %v2361_v22  ;;  %v816_v51 = vcvt.s32.f32 %v809_v52 }
  0xfd   : > { %v981_v36 = vadd.f32 0.041655596, %v980_v25  ;;  %v988_v7 = vadd.f32 0.008332121, %v987_v37  ;;  %v633_v39 = vadd.s32 %v632_v63, %v623_v35  ;;  %v3037_v48 = vmov 2475754826  }
  0xfe   : > { %v406_v20 = vshll.u32 %v3037_v48, %v2029_v34  ;;  %v407_v43 = vshrl.u32 %v1919_v32, %v2039_v42  ;;  %v814_v44 = vand.u32 2147483647, %v813_v10  ;;  %v409_v54 = vshll.u32 %v1919_v32, %v2029_v34 }
  0xff   : > { %v982_v3 = vmul.f32 %v981_v36, %v979_v28  ;;  %v989_v29 = vmul.f32 %v988_v7, %v979_v28  ;;  %v637_v55 = vadd.s32 1, %v633_v39  ;;  %v403_v50 = vshll.u32 %v1917_v14, %v2029_v34 }
 0x100   : > { %v404_v53 = vshrl.u32 %v3037_v48, %v2039_v42  ;;  %v410_v40 = vshrl.u32 %v1914_v47, %v2039_v42  ;;  %v817_v62 = vmul.f32 %v816_v51, %v814_v44  ;;  %v2390_v56 = vor.u32 %v407_v43, %v406_v20 }
 0x101   : > { %v983_v58 = vadd.f32 -0.4999988, %v982_v3  ;;  %v990_v59 = vadd.f32 -0.16666654, %v989_v29  ;;  %vm998_vm14 = vcmp.eq.s32.totalorder %v2359_v15, 0  ;;  %v638_v45 = vsel %vm636_vm13, %v637_v55, %v633_v39 }
 0x102   : > { %v2396_v6 = vor.u32 %v410_v40, %v409_v54  ;;  %vm418_vm12 = vcmp.lt.s32.totalorder %v2076_v8, 1  ;;  %vm420_vm15 = vcmp.lt.s32.totalorder %v2076_v8, 3  ;;  %vm997_vm1 = vcmp.lt.s32.totalorder %v2359_v15, 2 }
 0x103   : > { %v984_v34 = vmul.f32 %v983_v58, %v979_v28  ;;  %v991_v41 = vmul.f32 %v990_v59, %v979_v28  ;;  %v818_v11 = vxor.u32 2147483648, %v817_v62  ;;  %v639_v61 = vadd.s32 %v638_v45, %v634_v49 }
 0x104   : > { %vm994_vm2 = vweird.f32 %v2044_v46  ;;  %vm1001_vm5 = vcmp.eq.s32.totalorder %v2359_v15, 2  ;;  %v823_v5 = vsel %vm2367_vm11, 0, %v821_v19  ;;  %v394_v12 = vor.u32 8388608, %v393_v26 }
 0x105   : > { %v2405_v13 = vor.u32 %v404_v53, %v403_v50  ;;  %v985_v23 = vadd.f32 1.0, %v984_v34  ;;  %v992_v17 = vadd.f32 1.0, %v991_v41  ;;  %v819_v27 = vsel %vm698_vm8, %v818_v11, %v817_v62 }
 0x106   : > { %v640_v28 = vadd.s32 536870912, %v639_v61  ;;  %v822_v57 = vsel %vm2367_vm11, %v2027_v33, %v819_v27  ;;  %vm419_vm4 = vcmp.lt.s32.totalorder %v2076_v8, 2  ;;  %v430_v21 = vsel %vm418_vm12, %v2390_v56, %v2396_v6 }
 0x107   : > { %v432_v49 = vsel %vm420_vm15, %v2078_v9, %v2334_v30  ;;  %v993_v25 = vmul.f32 %v992_v17, %v2352_v31  ;;  %v1002_v37 = vxor.u32 2147483648, %v985_v23  ;;  %v824_v4 = vmul.f32 %v822_v57, %v822_v57 }
 0x108   : > { %v2422_v52 = vshrl.u32 %v640_v28, 30  ;;  %v840_v2 = vadd.s32 3, %v823_v5  ;;  %v426_v16 = vsel %vm418_vm12, %v2405_v13, %v2390_v56  ;;  %v428_v19 = vsel %vm420_vm15, %v2396_v6, %v2258_v38 }
 0x109   : > { %v2432_v35 = vshll.u32 %v394_v12, 8  ;;  %v999_v9 = vxor.u32 2147483648, %v993_v25  ;;  %v825_v30 = vmul.f32 -0.001358992, %v824_v4  ;;  %v832_v31 = vmul.f32 -0.00019511016, %v824_v4 }
 0x10a   : > { %v433_v63 = vsel %vm419_vm4, %v430_v21, %v432_v49  ;;  %v1003_v26 = vsel %vm1001_vm5, %v1002_v37, %v993_v25  ;;  %v642_v36 = vshll.u32 %v2422_v52, 30  ;;  %v841_v3 = vand.u32 3, %v840_v2 }
 0x10b   : > { %v435_v7 = vand.u32 65535, %v2432_v35  ;;  %v2441_v10 = vshrl.u32 %v2432_v35, 16  ;;  %v1000_v38 = vsel %vm998_vm14, %v985_v23, %v999_v9  ;;  %v826_v51 = vadd.f32 0.041655596, %v825_v30 }
 0x10c   : > { %v833_v39 = vadd.f32 0.008332121, %v832_v31  ;;  %v437_v20 = vand.u32 65535, %v433_v63  ;;  %v1004_v43 = vsel %vm997_vm1, %v1000_v38, %v1003_v26  ;;  %v2447_v29 = vsub.s32 %v639_v61, %v642_v36 }
 0x10d   : > { %v438_v44 = vshrl.u32 %v433_v63, 16  ;;  %v1005_v54 = vsel %vm994_vm2, nan, %v1004_v43  ;;  %v827_v55 = vmul.f32 %v826_v51, %v824_v4  ;;  %v429_v40 = vsel %vm419_vm4, %v426_v16, %v428_v19 }
 0x10e   : > { %v834_v50 = vmul.f32 %v833_v39, %v824_v4  ;;  %1058 = vmatpush.msrb.mxu0 %v1005_v54  ;;  %1851 = vmatpush.msra.mxu1 %v1005_v54  ;;  %vm644_vm7 = vcmp.lt.s32.totalorder %v2447_v29, 0  ;;  %v645_v53 = vsub.s32 0, %v2447_v29  ;;  %v2456_v62 = vmul.u32 %v437_v20, %v2441_v10 }
 0x10f   : > { %v828_v15 = vadd.f32 -0.4999988, %v827_v55  ;;  %v440_v59 = vmul.u32 %v438_v44, %v435_v7  ;;  %vm843_vm8 = vcmp.eq.s32.totalorder %v841_v3, 0  ;;  %v439_v45 = vmul.u32 %v437_v20, %v435_v7 }
 0x110   : > { %v835_v58 = vadd.f32 -0.16666654, %v834_v50  ;;  %v646_v46 = vsel %vm644_vm7, %v645_v53, %v2447_v29  ;;  %vm842_vm9 = vcmp.lt.s32.totalorder %v841_v3, 2  ;;  %vm839_vm10 = vweird.f32 %v2027_v33 }
 0x111   : > { %v829_v34 = vmul.f32 %v828_v15, %v824_v4  ;;  %v647_v11 = vclz %v646_v46  ;;  %v443_v61 = vshll.u32 %v440_v59, 16  ;;  %vm846_vm6 = vcmp.eq.s32.totalorder %v841_v3, 2 }
 0x112   : > { %v836_v41 = vmul.f32 %v835_v58, %v824_v4  ;;  %v442_v5 = vmul.u32 %v438_v44, %v2441_v10  ;;  %v459_v12 = vand.u32 65535, %v429_v40  ;;  %v460_v23 = vshrl.u32 %v429_v40, 16 }
 0x113   : > { %v830_v17 = vadd.f32 1.0, %v829_v34  ;;  %v1819_v28 = vadd.s32 4294967294, %v647_v11  ;;  %v445_v21 = vshll.u32 %v2456_v62, 16  ;;  %v635_v49 = vadd.s32 %v2361_v22, %v2347_v60 }
 0x114   : > { %v837_v27 = vadd.f32 1.0, %v836_v41  ;;  %v444_v25 = vshrl.u32 %v440_v59, 16  ;;  %vm447_vm11 = vc.u32 %v439_v45, %v443_v61  ;;  %v449_v37 = vadd.s32 %v443_v61, %v439_v45 }
 0x115   : > { %v847_v2 = vxor.u32 2147483648, %v830_v17  ;;  %vm1820_vm13 = vcmp.lt.s32.totalorder %v1819_v28, 0  ;;  %v448_v16 = vsel %vm447_vm11, 1, %v1913_v1  ;;  %v462_v30 = vmul.u32 %v460_v23, %v435_v7 }
 0x116   : > { %v838_v4 = vmul.f32 %v837_v27, %v822_v57  ;;  %v650_v19 = vsel %vm1820_vm13, 0, %v1819_v28  ;;  %v450_v9 = vadd.s32 %v448_v16, %v442_v5  ;;  %vm451_vm14 = vc.u32 %v449_v37, %v445_v21 }
 0x117   : > { %v651_v26 = vsub.s32 32, %v650_v19  ;;  %v461_v36 = vmul.u32 %v459_v12, %v435_v7  ;;  %v652_v38 = vshll.u32 %v2447_v29, %v650_v19  ;;  %v655_v60 = vsub.s32 4294967266, %v650_v19 }
 0x118   : > { %v844_v31 = vxor.u32 2147483648, %v838_v4  ;;  %v848_v63 = vsel %vm846_vm6, %v847_v2, %v838_v4  ;;  %v452_v22 = vsel %vm451_vm14, 1, %v1913_v1  ;;  %v463_v57 = vmul.u32 %v459_v12, %v2441_v10 }
 0x119   : > { %v653_v39 = vshrl.u32 %v635_v49, %v651_v26  ;;  %v454_v20 = vadd.s32 %v452_v22, %v450_v9  ;;  %v465_v43 = vshll.u32 %v462_v30, 16  ;;  %v656_v54 = vadd.s32 127, %v655_v60 }
 0x11a   : > { %v845_v51 = vsel %vm843_vm8, %v830_v17, %v844_v31  ;;  %v464_v55 = vmul.u32 %v460_v23, %v2441_v10  ;;  %v467_v50 = vshll.u32 %v463_v57, 16  ;;  %v402_v29 = vshrl.u32 %v1917_v14, %v2039_v42 }
 0x11b   : > { %v849_v44 = vsel %vm842_vm9, %v845_v51, %v848_v63  ;;  %v654_v53 = vor.u32 %v653_v39, %v652_v38  ;;  %v657_v40 = vshll.u32 %v656_v54, 23  ;;  %vm469_vm1 = vc.u32 %v461_v36, %v465_v43 }
 0x11c   : > { %v850_v7 = vsel %vm839_vm10, nan, %v849_v44  ;;  %v471_v15 = vadd.s32 %v465_v43, %v461_v36  ;;  %v423_v3 = vsel %vm421_vm3, %v2396_v6, 2102212464  ;;  %v446_v58 = vshrl.u32 %v2456_v62, 16 }
 0x11d   : > { %1059 = vmatpush.msrb.mxu0 %v850_v7  ;;  %1852 = vmatpush.msra.mxu1 %v850_v7  ;;  %v455_v10 = vadd.s32 %v454_v20, %v444_v25  ;;  %v470_v59 = vsel %vm469_vm1, 1, %v1913_v1  ;;  %v658_v33 = vor.u32 4788187, %v657_v40  ;;  %v466_v46 = vshrl.u32 %v462_v30, 16 }
 0x11e   : > { %v472_v45 = vadd.s32 %v470_v59, %v464_v55  ;;  %vm473_vm2 = vc.u32 %v471_v15, %v467_v50  ;;  %v661_v41 = vcvt.s32.f32 %v654_v53  ;;  %v468_v11 = vshrl.u32 %v463_v57, 16 }
 0x11f   : > { %v474_v42 = vsel %vm473_vm2, 1, %v1913_v1  ;;  %v659_v34 = vand.u32 2147483647, %v658_v33  ;;  %v422_v5 = vsel %vm418_vm12, %v402_v29, %v2405_v13  ;;  %v424_v6 = vsel %vm420_vm15, %v2390_v56, %v423_v3 }
 0x120   : > { %v476_v61 = vadd.s32 %v474_v42, %v472_v45  ;;  %v456_v62 = vadd.s32 %v455_v10, %v446_v58  ;;  %v475_v12 = vadd.s32 %v471_v15, %v467_v50  ;;  %v425_v28 = vsel %vm419_vm4, %v422_v5, %v424_v6 }
 0x121   : > { %v662_v23 = vmul.f32 %v661_v41, %v659_v34  ;;  %vm543_vm3 = vcmp.lt.s32.totalorder %v2024_v24, 0  ;;  %v3038_v49 = vand.u32 2147483647, %v2024_v24  ;;  %v665_v37 = vsub.s32 4, %v2422_v52 }
 0x122   : > { %v477_v17 = vadd.s32 %v476_v61, %v466_v46  ;;  %vm481_vm5 = vc.u32 %v456_v62, %v475_v12  ;;  %v479_v8 = vmul.u32 %v2432_v35, %v425_v28  ;;  %vm684_vm10 = vweird.f32 %v2024_v24 }
 0x123   : > { %v663_v27 = vxor.u32 2147483648, %v662_v23  ;;  %vm2493_vm7 = vcmp.le.f32.partialorder %v3038_v49, 0.7853982  ;;  %v666_v31 = vsel %vm543_vm3, %v665_v37, %v2422_v52  ;;  %v480_v42 = vadd.s32 %v475_v12, %v456_v62 }
 0x124   : > { %v478_v21 = vadd.s32 %v477_v17, %v468_v11  ;;  %v668_v60 = vsel %vm2493_vm7, 0, %v666_v31  ;;  %vm388_vm6 = vcmp.lt.s32.totalorder %v2021_v18, 0  ;;  %vm2509_vm11 = vcmp.le.f32.partialorder %v386_v0, 0.7853982 }
 0x125   : > { %v664_v25 = vsel %vm543_vm3, %v663_v27, %v662_v23  ;;  %v685_v35 = vadd.s32 3, %v668_v60  ;;  %vm529_vm2 = vweird.f32 %v2021_v18 }
 0x126   : > { %v482_v56 = vadd.s32 1, %v478_v21  ;;  %v667_v4 = vsel %vm2493_vm7, %v2024_v24, %v664_v25 }
 0x127   : > { %v669_v2 = vmul.f32 %v667_v4, %v667_v4  ;;  %v686_v7 = vand.u32 3, %v685_v35 }
 0x128   : > { %v483_v16 = vsel %vm481_vm5, %v482_v56, %v478_v21 }
 0x129   : > { %v484_v19 = vadd.s32 %v483_v16, %v479_v8  ;;  %v670_v9 = vmul.f32 -0.001358992, %v669_v2  ;;  %v677_v30 = vmul.f32 -0.00019511016, %v669_v2  ;;  %vm688_vm15 = vcmp.eq.s32.totalorder %v686_v7, 0 }
 0x12a   : > { %vm691_vm4 = vcmp.eq.s32.totalorder %v686_v7, 2  ;;  %vm687_vm8 = vcmp.lt.s32.totalorder %v686_v7, 2  ;;  %v1009_v7 = vld [vmem:[%s3015_s3 + $0x18] sm:$0xff] }
 0x12b   : > { %v485_v63 = vadd.s32 536870912, %v484_v19  ;;  %v671_v26 = vadd.f32 0.041655596, %v670_v9  ;;  %v678_v36 = vadd.f32 0.008332121, %v677_v30  ;;  %v1013_v9 = vld [vmem:[%s3016_s4 + $0x18] sm:$0xff] }
 0x12c   : > { %1031 = vperm.xlu2 %1888, %v1013_v9  }
 0x12d   : > { %v486_v38 = vshrl.u32 %v485_v63, 30  ;;  %v672_v22 = vmul.f32 %v671_v26, %v669_v2  ;;  %v679_v57 = vmul.f32 %v678_v36, %v669_v2 }
 0x12f   : > { %v487_v51 = vshll.u32 %v486_v38, 30  ;;  %v673_v39 = vadd.f32 -0.4999988, %v672_v22  ;;  %v680_v20 = vadd.f32 -0.16666654, %v679_v57  ;;  %v510_v12 = vsub.s32 4, %v486_v38 }
 0x131   : > { %v488_v43 = vsub.s32 %v484_v19, %v487_v51  ;;  %v674_v44 = vmul.f32 %v673_v39, %v669_v2  ;;  %v681_v54 = vmul.f32 %v680_v20, %v669_v2 }
 0x133   : > { %vm489_vm12 = vcmp.lt.s32.totalorder %v488_v43, 0  ;;  %v490_v55 = vsub.s32 0, %v488_v43  ;;  %v675_v50 = vadd.f32 1.0, %v674_v44  ;;  %v682_v52 = vadd.f32 1.0, %v681_v54  ;;  %v1006_v54 = vld [vmem:[%s3015_s3] sm:$0xff] }
 0x135   : > { %v491_v29 = vsel %vm489_vm12, %v490_v55, %v488_v43  ;;  %v683_v53 = vmul.f32 %v682_v52, %v667_v4  ;;  %v692_v40 = vxor.u32 2147483648, %v675_v50  ;;  %v511_v4 = vsel %vm388_vm6, %v510_v12, %v486_v38  ;;  %v1012_v38 = vld [vmem:[%s3016_s4 + $0x10] sm:$0xff]  ;;  %v1007_v55 = vld [vmem:[%s3015_s3 + $0x8] sm:$0xff]  ;;  %v1696_v52 = vld [vmem:[%s3018_s6] sm:$0x7] }
 0x136   : > { %v492_v15 = vclz %v491_v29  ;;  %v513_v16 = vsel %vm2509_vm11, 0, %v511_v4  ;;  %1026 = vperm.xlu2 %1888, %v1012_v38  }
 0x137   : > { %v689_v3 = vxor.u32 2147483648, %v683_v53  ;;  %v693_v59 = vsel %vm691_vm4, %v692_v40, %v683_v53  ;;  %v530_v63 = vadd.s32 3, %v513_v16  ;;  %v1022_v53 = vpop.permute.xlu0 %1021  ;;  %v1017_v40 = vpop.permute.xlu1 %1016  ;;  %v3043_v16 = vmov 920167782  }
 0x138   : > { %v1816_v58 = vadd.s32 4294967294, %v492_v15 }
 0x139   : > { %v690_v10 = vsel %vm688_vm15, %v675_v50, %v689_v3  ;;  %v531_v57 = vand.u32 3, %v530_v63 }
 0x13a   : > { %vm1817_vm9 = vcmp.lt.s32.totalorder %v1816_v58, 0  ;;  %v694_v33 = vsel %vm687_vm8, %v690_v10, %v693_v59 }
 0x13b   : > { %v495_v46 = vsel %vm1817_vm9, 0, %v1816_v58  ;;  %v695_v45 = vsel %vm684_vm10, nan, %v694_v33  ;;  %vm533_vm13 = vcmp.eq.s32.totalorder %v531_v57, 0  ;;  %vm536_vm14 = vcmp.eq.s32.totalorder %v531_v57, 2 }
 0x13c   : > { %v496_v34 = vsub.s32 32, %v495_v46  ;;  %v500_v41 = vsub.s32 4294967266, %v495_v46  ;;  %1060 = vmatpush.msrb.mxu0 %v695_v45  ;;  %1853 = vmatpush.msra.mxu1 %v695_v45  ;;  %v497_v11 = vshll.u32 %v488_v43, %v495_v46  ;;  %vm532_vm1 = vcmp.lt.s32.totalorder %v531_v57, 2 }
 0x13e   : > { %v498_v61 = vshrl.u32 %v480_v42, %v496_v34  ;;  %v501_v5 = vadd.s32 127, %v500_v41  ;;  %1699 = vperm.xlu2 %1888, %v1696_v52  }
 0x140   : > { %v499_v6 = vor.u32 %v498_v61, %v497_v11  ;;  %v502_v23 = vshll.u32 %v501_v5, 23 }
 0x142   : > { %v503_v17 = vor.u32 4788187, %v502_v23  ;;  %v506_v28 = vcvt.s32.f32 %v499_v6 }
 0x144   : > { %v504_v27 = vand.u32 2147483647, %v503_v17 }
 0x146   : > { %v507_v21 = vmul.f32 %v506_v28, %v504_v27 }
 0x148   : > { %v508_v49 = vxor.u32 2147483648, %v507_v21 }
 0x14a   : > { %v509_v62 = vsel %vm388_vm6, %v508_v49, %v507_v21 }
 0x14b   : > { %v512_v13 = vsel %vm2509_vm11, %v2021_v18, %v509_v62  ;;  %v1008_v18 = vld [vmem:[%s3015_s3 + $0x10] sm:$0xff] }
 0x14c   : > { %v514_v25 = vmul.f32 %v512_v13, %v512_v13 }
 0x14e   : > { %v515_v56 = vmul.f32 -0.001358992, %v514_v25  ;;  %v522_v37 = vmul.f32 -0.00019511016, %v514_v25 }
 0x150   : > { %v516_v8 = vadd.f32 0.041655596, %v515_v56  ;;  %v523_v2 = vadd.f32 0.008332121, %v522_v37 }
 0x152   : > { %v517_v19 = vmul.f32 %v516_v8, %v514_v25  ;;  %v524_v0 = vmul.f32 %v523_v2, %v514_v25 }
 0x154   : > { %v518_v30 = vadd.f32 -0.4999988, %v517_v19  ;;  %v525_v31 = vadd.f32 -0.16666654, %v524_v0 }
 0x156   : > { %v519_v26 = vmul.f32 %v518_v30, %v514_v25  ;;  %v526_v36 = vmul.f32 %v525_v31, %v514_v25 }
 0x158   : > { %v520_v60 = vadd.f32 1.0, %v519_v26  ;;  %v527_v22 = vadd.f32 1.0, %v526_v36 }
 0x15a   : > { %v528_v51 = vmul.f32 %v527_v22, %v512_v13  ;;  %v537_v39 = vxor.u32 2147483648, %v520_v60 }
 0x15c   : > { %v534_v20 = vxor.u32 2147483648, %v528_v51  ;;  %v538_v43 = vsel %vm536_vm14, %v537_v39, %v528_v51  ;;  %v3044_v39 = vmov 1326507024  }
 0x15e   : > { %v535_v35 = vsel %vm533_vm13, %v520_v60, %v534_v20 }
 0x15f   : > { %v539_v44 = vsel %vm532_vm1, %v535_v35, %v538_v43 }
 0x160   : > { %v540_v50 = vsel %vm529_vm2, nan, %v539_v44 }
 0x161   : > { %1061 = vmatpush.msrb.mxu0 %v540_v50  ;;  %1854 = vmatpush.msra.mxu1 %v540_v50 }
 0x162   : > { %1827 = vmatmul.msk.f32.vlgmr.msrb.gmra.mxu0 %vm320_vm0, %v1006_v54  ;;  %1828 = vmatmul.msk.f32.vlgmr.msra.gmra.mxu1 %vm320_vm0, %v1007_v55 }
 0x16a   : > { %1829 = vmatmul.msk.f32.gmra.mxu1 %vm320_vm0, %v1008_v18 }
 0x172   : > { %1830 = vmatmul.msk.f32.gmra.mxu1 %vm320_vm0, %v1009_v7 }
 0x186   : > { %v1032_v29 = vpop.permute.xlu2 %1031 }
 0x190   : > { %v1027_v41 = vpop.permute.xlu2 %1026 }
 0x1df   : > { %v1063_v15 = vpop.f32.mrf.mxu0  ;;  %v1066_v3 = vpop.f32.mrf.mxu1 }
 0x1e0   : > { %v2544_v58 = vadd.f32 %v1063_v15, %v1017_v40  ;;  %v2546_v10 = vadd.f32 %v1066_v3, %v1022_v53 }
 0x1e2   : > { %v1078_v59 = vand.u32 2139095040, %v2544_v58  ;;  %v1233_v33 = vand.u32 2139095040, %v2546_v10  ;;  %v3028_v21 = vand.u32 2147483647, %v2546_v10 }
 0x1e4   : > { %v1079_v46 = vshrl.u32 %v1078_v59, 23  ;;  %v1234_v45 = vshrl.u32 %v1233_v33, 23  ;;  %v2563_v25 = vand.u32 8388607, %v3028_v21 }
 0x1e6   : > { %v1831_v42 = vadd.s32 4294967169, %v1079_v46  ;;  %v1834_v34 = vadd.s32 4294967169, %v1234_v45  ;;  %v1238_v9 = vor.u32 8388608, %v2563_v25 }
 0x1e7   : > { %v1069_v11 = vpop.f32.mrf.mxu1 }
 0x1e8   : > { %v1240_v61 = vadd.s32 1, %v1834_v34  ;;  %v2550_v5 = vadd.f32 %v1069_v11, %v1027_v41  ;;  %v1085_v6 = vadd.s32 1, %v1831_v42 }
 0x1ea   : > { %vm1241_vm3 = vcmp.gt.s32.totalorder %v1240_v61, 0  ;;  %v1388_v23 = vand.u32 2139095040, %v2550_v5  ;;  %vm1086_vm5 = vcmp.gt.s32.totalorder %v1085_v6, 0  ;;  %v3029_v26 = vand.u32 2147483647, %v2550_v5 }
 0x1eb   : > { %v1242_v17 = vsel %vm1241_vm3, %v1240_v61, 0  ;;  %v1087_v24 = vsel %vm1086_vm5, %v1085_v6, 0 }
 0x1ec   : > { %v2553_v27 = vand.u32 31, %v1242_v17  ;;  %v1389_v28 = vshrl.u32 %v1388_v23, 23  ;;  %v2566_v4 = vand.u32 31, %v1087_v24  ;;  %v2572_v30 = vshrl.u32 %v1242_v17, 5 }
 0x1ed   : > { %v2575_v36 = vshrl.u32 %v1087_v24, 5  ;;  %v2608_v18 = vand.u32 8388607, %v3029_v26 }
 0x1ee   : > { %v1837_v62 = vadd.s32 4294967169, %v1389_v28  ;;  %v2559_v13 = vsub.s32 32, %v2553_v27  ;;  %v2578_v60 = vsub.s32 32, %v2566_v4  ;;  %v1256_v22 = vshll.u32 %v1914_v47, %v2553_v27 }
 0x1ef   : > { %v1072_v49 = vpop.f32.mrf.mxu1  ;;  %v2586_v57 = vshll.u32 %v1914_v47, %v2566_v4  ;;  %v2590_v51 = vshll.u32 %v3043_v16, %v2553_v27  ;;  %vm1265_vm12 = vcmp.lt.s32.totalorder %v2572_v30, 4  ;;  %v1393_v42 = vor.u32 8388608, %v2608_v18 }
 0x1f0   : > { %v2556_v12 = vadd.f32 %v1072_v49, %v1032_v29  ;;  %v1395_v56 = vadd.s32 1, %v1837_v62  ;;  %v1257_v19 = vshrl.u32 %v3043_v16, %v2559_v13  ;;  %v2594_v20 = vshrl.u32 %v3044_v39, %v2559_v13 }
 0x1f1   : > { %v2612_v7 = vshrl.u32 %v3043_v16, %v2578_v60  ;;  %v2620_v40 = vshrl.u32 %v3044_v39, %v2578_v60 }
 0x1f2   : > { %v1543_v37 = vand.u32 2139095040, %v2556_v12  ;;  %v3030_v8 = vand.u32 2147483647, %v2556_v12  ;;  %vm1396_vm7 = vcmp.gt.s32.totalorder %v1395_v56, 0  ;;  %v2598_v43 = vor.u32 %v1257_v19, %v1256_v22 }
 0x1f3   : > { %v1397_v0 = vsel %vm1396_vm7, %v1395_v56, 0  ;;  %v1261_v15 = vor.u32 %v2594_v20, %v2590_v51 }
 0x1f4   : > { %v1544_v2 = vshrl.u32 %v1543_v37, 23  ;;  %v1399_v31 = vand.u32 31, %v1397_v0  ;;  %v1547_v38 = vand.u32 8388607, %v3030_v8  ;;  %v2600_v44 = vshrl.u32 %v1397_v0, 5 }
 0x1f5   : > { %v2629_v33 = vsel %vm1265_vm12, %v2598_v43, 920167782 }
 0x1f6   : > { %v1840_v63 = vadd.s32 4294967169, %v1544_v2  ;;  %v2596_v35 = vsub.s32 32, %v1399_v31  ;;  %v1548_v55 = vor.u32 8388608, %v1547_v38  ;;  %v1411_v50 = vshll.u32 %v1914_v47, %v1399_v31 }
 0x1f7   : > { %v1414_v46 = vshll.u32 %v3043_v16, %v1399_v31  ;;  %vm1420_vm4 = vcmp.lt.s32.totalorder %v2600_v44, 4  ;;  %v1402_v34 = vshll.u32 %v1917_v14, %v1399_v31  ;;  %v1405_v41 = vshll.u32 %v3037_v48, %v1399_v31 }
 0x1f8   : > { %v1550_v54 = vadd.s32 1, %v1840_v63  ;;  %v1412_v52 = vshrl.u32 %v3043_v16, %v2596_v35  ;;  %v1415_v29 = vshrl.u32 %v3044_v39, %v2596_v35  ;;  %v2616_v53 = vshll.u32 %v1548_v55, 8 }
 0x1f9   : > { %v1408_v11 = vshll.u32 %v1919_v32, %v1399_v31  ;;  %vm1417_vm11 = vcmp.lt.s32.totalorder %v2600_v44, 1  ;;  %vm1418_vm13 = vcmp.lt.s32.totalorder %v2600_v44, 2  ;;  %vm1419_vm14 = vcmp.lt.s32.totalorder %v2600_v44, 3 }
 0x1fa   : > { %vm1551_vm15 = vcmp.gt.s32.totalorder %v1550_v54, 0  ;;  %v2624_v3 = vor.u32 %v1412_v52, %v1411_v50  ;;  %v1416_v61 = vor.u32 %v1415_v29, %v1414_v46  ;;  %v1589_v17 = vand.u32 65535, %v2616_v53 }
 0x1fb   : > { %v1552_v59 = vsel %vm1551_vm15, %v1550_v54, 0  ;;  %v1590_v62 = vshrl.u32 %v2616_v53, 16  ;;  %v1403_v50 = vshrl.u32 %v3037_v48, %v2596_v35 }
 0x1fc   : > { %v1554_v45 = vand.u32 31, %v1552_v59  ;;  %v1553_v6 = vshrl.u32 %v1552_v59, 5  ;;  %v2641_v28 = vsel %vm1420_vm4, %v2624_v3, 920167782 }
 0x1fe   : > { %v1555_v23 = vsub.s32 32, %v1554_v45  ;;  %v1566_v49 = vshll.u32 %v1914_v47, %v1554_v45  ;;  %v1569_v24 = vshll.u32 %v3043_v16, %v1554_v45  ;;  %v1557_v2 = vshll.u32 %v1917_v14, %v1554_v45 }
 0x1ff   : > { %v1560_v0 = vshll.u32 %v3037_v48, %v1554_v45  ;;  %v1563_v63 = vshll.u32 %v1919_v32, %v1554_v45  ;;  %vm1575_vm8 = vcmp.lt.s32.totalorder %v1553_v6, 4  ;;  %vm1572_vm9 = vcmp.lt.s32.totalorder %v1553_v6, 1 }
 0x200   : > { %v1567_v56 = vshrl.u32 %v3043_v16, %v1555_v23  ;;  %v1570_v37 = vshrl.u32 %v3044_v39, %v1555_v23  ;;  %v1558_v19 = vshrl.u32 %v3037_v48, %v1555_v23  ;;  %v1561_v31 = vshrl.u32 %v1919_v32, %v1555_v23 }
 0x201   : > { %v1564_v22 = vshrl.u32 %v1914_v47, %v1555_v23  ;;  %vm1573_vm10 = vcmp.lt.s32.totalorder %v1553_v6, 2  ;;  %vm1574_vm6 = vcmp.lt.s32.totalorder %v1553_v6, 3 }
 0x202   : > { %v1568_v38 = vor.u32 %v1567_v56, %v1566_v49  ;;  %v1571_v54 = vor.u32 %v1570_v37, %v1569_v24  ;;  %v1559_v55 = vor.u32 %v1558_v19, %v1557_v2  ;;  %v1562_v39 = vor.u32 %v1561_v31, %v1560_v0 }
 0x203   : > { %v1565_v52 = vor.u32 %v1564_v22, %v1563_v63  ;;  %v1556_v49 = vshrl.u32 %v1917_v14, %v1555_v23  ;;  %v1406_v37 = vshrl.u32 %v1919_v32, %v2596_v35  ;;  %v1409_v31 = vshrl.u32 %v1914_v47, %v2596_v35 }
 0x204   : > { %v1581_v29 = vsel %vm1575_vm8, %v1568_v38, 920167782  ;;  %v1585_v59 = vsel %vm1575_vm8, %v1571_v54, 1326507024  ;;  %v1580_v21 = vsel %vm1572_vm9, %v1559_v55, %v1562_v39 }
 0x205   : > { %v1577_v46 = vsel %vm1575_vm8, %v1565_v52, 2102212464  ;;  %v1582_v45 = vsel %vm1574_vm6, %v1565_v52, %v1581_v29  ;;  %v1584_v26 = vsel %vm1572_vm9, %v1562_v39, %v1565_v52  ;;  %v1586_v56 = vsel %vm1574_vm6, %v1568_v38, %v1585_v59 }
 0x206   : > { %v1583_v24 = vsel %vm1573_vm10, %v1580_v21, %v1582_v45  ;;  %v1587_v2 = vsel %vm1573_vm10, %v1584_v26, %v1586_v56  ;;  %v1576_v63 = vsel %vm1572_vm9, %v1556_v49, %v1559_v55  ;;  %v1578_v22 = vsel %vm1574_vm6, %v1562_v39, %v1577_v46 }
 0x207   : > { %v1613_v19 = vand.u32 65535, %v1583_v24  ;;  %v1614_v0 = vshrl.u32 %v1583_v24, 16  ;;  %v1591_v54 = vand.u32 65535, %v1587_v2  ;;  %v1592_v52 = vshrl.u32 %v1587_v2, 16 }
 0x208   : > { %v1430_v21 = vsel %vm1420_vm4, %v1416_v61, 1326507024  ;;  %v2669_v29 = vor.u32 %v1403_v50, %v1402_v34  ;;  %v2671_v45 = vor.u32 %v1406_v37, %v1405_v41  ;;  %v1579_v55 = vsel %vm1573_vm10, %v1576_v63, %v1578_v22 }
 0x209   : > { %v1616_v23 = vmul.u32 %v1614_v0, %v1589_v17  ;;  %v1617_v38 = vmul.u32 %v1613_v19, %v1590_v62  ;;  %v1594_v26 = vmul.u32 %v1592_v52, %v1589_v17  ;;  %v1595_v59 = vmul.u32 %v1591_v54, %v1590_v62 }
 0x20a   : > { %v1615_v39 = vmul.u32 %v1613_v19, %v1589_v17  ;;  %v1410_v49 = vor.u32 %v1409_v31, %v1408_v11  ;;  %v1593_v24 = vmul.u32 %v1591_v54, %v1589_v17  ;;  %v1618_v2 = vmul.u32 %v1614_v0, %v1590_v62 }
 0x20b   : > { %v1619_v46 = vshll.u32 %v1616_v23, 16  ;;  %v1597_v56 = vshll.u32 %v1594_v26, 16  ;;  %v1596_v61 = vmul.u32 %v1592_v52, %v1590_v62  ;;  %v1621_v8 = vshll.u32 %v1617_v38, 16 }
 0x20c   : > { %v1599_v50 = vshll.u32 %v1595_v59, 16  ;;  %v1620_v63 = vshrl.u32 %v1616_v23, 16  ;;  %v1622_v17 = vshrl.u32 %v1617_v38, 16  ;;  %v1425_v22 = vsel %vm1417_vm11, %v2669_v29, %v2671_v45 }
 0x20d   : > { %vm1623_vm1 = vc.u32 %v1615_v39, %v1619_v46  ;;  %v1625_v34 = vadd.s32 %v1619_v46, %v1615_v39  ;;  %vm1601_vm2 = vc.u32 %v1593_v24, %v1597_v56  ;;  %v1603_v41 = vadd.s32 %v1597_v56, %v1593_v24 }
 0x20e   : > { %v1624_v37 = vsel %vm1623_vm1, 1, %v1913_v1  ;;  %v1602_v6 = vsel %vm1601_vm2, 1, %v1913_v1  ;;  %v1427_v54 = vsel %vm1419_vm14, %v1410_v49, %v2641_v28  ;;  %v1598_v52 = vshrl.u32 %v1594_v26, 16 }
 0x20f   : > { %v1626_v19 = vadd.s32 %v1624_v37, %v1618_v2  ;;  %vm1627_vm3 = vc.u32 %v1625_v34, %v1621_v8  ;;  %v1604_v11 = vadd.s32 %v1602_v6, %v1596_v61  ;;  %vm1605_vm5 = vc.u32 %v1603_v41, %v1599_v50 }
 0x210   : > { %v1628_v0 = vsel %vm1627_vm3, 1, %v1913_v1  ;;  %v1606_v62 = vsel %vm1605_vm5, 1, %v1913_v1  ;;  %v1429_v38 = vsel %vm1417_vm11, %v2671_v45, %v1410_v49  ;;  %v1431_v39 = vsel %vm1419_vm14, %v2624_v3, %v1430_v21 }
 0x211   : > { %v1630_v31 = vadd.s32 %v1628_v0, %v1626_v19  ;;  %v1608_v23 = vadd.s32 %v1606_v62, %v1604_v11  ;;  %v1428_v24 = vsel %vm1418_vm13, %v1425_v22, %v1427_v54  ;;  %v1432_v56 = vsel %vm1418_vm13, %v1429_v38, %v1431_v39 }
 0x212   : > { %v2699_v28 = vshll.u32 %v1393_v42, 8  ;;  %v1600_v26 = vshrl.u32 %v1595_v59, 16  ;;  %v1436_v61 = vand.u32 65535, %v1432_v56  ;;  %v1437_v50 = vshrl.u32 %v1432_v56, 16 }
 0x213   : > { %v1631_v46 = vadd.s32 %v1630_v31, %v1620_v63  ;;  %v1609_v2 = vadd.s32 %v1608_v23, %v1598_v52  ;;  %v1401_v37 = vshrl.u32 %v1917_v14, %v2596_v35  ;;  %v2707_v63 = vadd.s32 %v1625_v34, %v1621_v8 }
 0x214   : > { %v1434_v3 = vand.u32 65535, %v2699_v28  ;;  %v1435_v21 = vshrl.u32 %v2699_v28, 16  ;;  %v1458_v19 = vand.u32 65535, %v1428_v24  ;;  %v1459_v18 = vshrl.u32 %v1428_v24, 16 }
 0x215   : > { %v1632_v41 = vadd.s32 %v1631_v46, %v1622_v17  ;;  %v2705_v6 = vadd.s32 %v1609_v2, %v1600_v26  ;;  %v1633_v42 = vmul.u32 %v2616_v53, %v1579_v55  ;;  %v1422_v35 = vsel %vm1420_vm4, %v1410_v49, 2102212464 }
 0x216   : > { %v1439_v11 = vmul.u32 %v1437_v50, %v1434_v3  ;;  %v1440_v0 = vmul.u32 %v1436_v61, %v1435_v21  ;;  %v1247_v17 = vshll.u32 %v1917_v14, %v2553_v27  ;;  %v1248_v8 = vshrl.u32 %v3037_v48, %v2559_v13 }
 0x217   : > { %v1636_v59 = vadd.s32 1, %v1632_v41  ;;  %vm1635_vm7 = vc.u32 %v2705_v6, %v2707_v63  ;;  %v1438_v62 = vmul.u32 %v1436_v61, %v1434_v3  ;;  %v1250_v53 = vshll.u32 %v3037_v48, %v2553_v27 }
 0x218   : > { %v1442_v31 = vshll.u32 %v1439_v11, 16  ;;  %v1441_v22 = vmul.u32 %v1437_v50, %v1435_v21  ;;  %v1461_v54 = vmul.u32 %v1459_v18, %v1434_v3  ;;  %v1462_v52 = vmul.u32 %v1458_v19, %v1435_v21 }
 0x219   : > { %v1637_v34 = vsel %vm1635_vm7, %v1636_v59, %v1632_v41  ;;  %v1444_v23 = vshll.u32 %v1440_v0, 16  ;;  %v1460_v49 = vmul.u32 %v1458_v19, %v1434_v3  ;;  %v1443_v46 = vshrl.u32 %v1439_v11, 16 }
 0x21a   : > { %v1638_v55 = vadd.s32 %v1637_v34, %v1633_v42  ;;  %vm1446_vm15 = vc.u32 %v1438_v62, %v1442_v31  ;;  %v1448_v38 = vadd.s32 %v1442_v31, %v1438_v62  ;;  %v1464_v56 = vshll.u32 %v1461_v54, 16 }
 0x21b   : > { %v1447_v24 = vsel %vm1446_vm15, 1, %v1913_v1  ;;  %v1463_v2 = vmul.u32 %v1459_v18, %v1435_v21  ;;  %v1466_v61 = vshll.u32 %v1462_v52, 16  ;;  %v1445_v59 = vshrl.u32 %v1440_v0, 16 }
 0x21c   : > { %v1639_v39 = vadd.s32 536870912, %v1638_v55  ;;  %v1449_v26 = vadd.s32 %v1447_v24, %v1441_v22  ;;  %vm1450_vm4 = vc.u32 %v1448_v38, %v1444_v23  ;;  %vm1468_vm8 = vc.u32 %v1460_v49, %v1464_v56 }
 0x21d   : > { %v1451_v42 = vsel %vm1450_vm4, 1, %v1913_v1  ;;  %v1470_v50 = vadd.s32 %v1464_v56, %v1460_v49  ;;  %v1469_v62 = vsel %vm1468_vm8, 1, %v1913_v1  ;;  %v1251_v3 = vshrl.u32 %v1919_v32, %v2559_v13 }
 0x21e   : > { %v2721_v41 = vshrl.u32 %v1639_v39, 30  ;;  %v1453_v34 = vadd.s32 %v1451_v42, %v1449_v26  ;;  %v1471_v11 = vadd.s32 %v1469_v62, %v1463_v2  ;;  %v2728_v31 = vor.u32 %v1248_v8, %v1247_v17 }
 0x21f   : > { %vm1472_vm9 = vc.u32 %v1470_v50, %v1466_v61  ;;  %v1465_v18 = vshrl.u32 %v1461_v54, 16  ;;  %v1253_v23 = vshll.u32 %v1919_v32, %v2553_v27  ;;  %v2733_v49 = vor.u32 %v1251_v3, %v1250_v53 }
 0x220   : > { %v1641_v19 = vshll.u32 %v2721_v41, 30  ;;  %v1454_v21 = vadd.s32 %v1453_v34, %v1443_v46  ;;  %v1473_v22 = vsel %vm1472_vm9, 1, %v1913_v1  ;;  %v1254_v39 = vshrl.u32 %v1914_v47, %v2559_v13 }
 0x221   : > { %v1475_v38 = vadd.s32 %v1473_v22, %v1471_v11  ;;  %v1421_v24 = vsel %vm1417_vm11, %v1401_v37, %v2669_v29  ;;  %v1423_v17 = vsel %vm1419_vm14, %v2671_v45, %v1422_v35  ;;  %v1467_v54 = vshrl.u32 %v1462_v52, 16 }
 0x222   : > { %v1642_v0 = vsub.s32 %v1638_v55, %v1641_v19  ;;  %v2743_v8 = vadd.s32 %v1454_v21, %v1445_v59  ;;  %v2745_v46 = vor.u32 %v1254_v39, %v1253_v23  ;;  %v2749_v53 = vor.u32 %v2612_v7, %v2586_v57 }
 0x223   : > { %v1476_v55 = vadd.s32 %v1475_v38, %v1465_v18  ;;  %v1275_v29 = vsel %vm1265_vm12, %v1261_v15, 1326507024  ;;  %v2756_v37 = vadd.s32 %v1470_v50, %v1466_v61  ;;  %vm1262_vm6 = vcmp.lt.s32.totalorder %v2572_v30, 1 }
 0x224   : > { %vm1643_vm10 = vcmp.lt.s32.totalorder %v1642_v0, 0  ;;  %v1644_v27 = vsub.s32 0, %v1642_v0  ;;  %vm1264_vm11 = vcmp.lt.s32.totalorder %v2572_v30, 3  ;;  %v1270_v57 = vsel %vm1262_vm6, %v2728_v31, %v2733_v49 }
 0x225   : > { %v1477_v35 = vadd.s32 %v1476_v55, %v1467_v54  ;;  %v1424_v51 = vsel %vm1418_vm13, %v1421_v24, %v1423_v17  ;;  %vm1480_vm14 = vc.u32 %v2743_v8, %v2756_v37  ;;  %v1272_v20 = vsel %vm1264_vm11, %v2745_v46, %v2629_v33 }
 0x226   : > { %v1645_v45 = vsel %vm1643_vm10, %v1644_v27, %v1642_v0  ;;  %v2774_v15 = vshll.u32 %v3043_v16, %v2566_v4  ;;  %vm1263_vm1 = vcmp.lt.s32.totalorder %v2572_v30, 2  ;;  %v1274_v44 = vsel %vm1262_vm6, %v2733_v49, %v2745_v46 }
 0x227   : > { %v1646_v7 = vclz %v1645_v45  ;;  %v1481_v52 = vadd.s32 1, %v1477_v35  ;;  %vm1110_vm13 = vcmp.lt.s32.totalorder %v2575_v36, 4  ;;  %v1273_v26 = vsel %vm1263_vm1, %v1270_v57, %v1272_v20 }
 0x228   : > { %v1276_v33 = vsel %vm1264_vm11, %v2598_v43, %v1275_v29  ;;  %v1478_v16 = vmul.u32 %v2699_v28, %v1424_v51  ;;  %v2792_v42 = vshll.u32 %v1238_v9, 8  ;;  %v1106_v50 = vor.u32 %v2620_v40, %v2774_v15 }
 0x229   : > { %v1841_v56 = vadd.s32 4294967294, %v1646_v7  ;;  %v1482_v2 = vsel %vm1480_vm14, %v1481_v52, %v1477_v35  ;;  %v1277_v61 = vsel %vm1263_vm1, %v1274_v44, %v1276_v33  ;;  %v2799_v59 = vsel %vm1110_vm13, %v2749_v53, 920167782 }
 0x22a   : > { %vm1542_vm2 = vcmp.lt.s32.totalorder %v2556_v12, 0  ;;  %v1664_v28 = vsub.s32 4, %v2721_v41  ;;  %v1483_v34 = vadd.s32 %v1482_v2, %v1478_v16  ;;  %v1304_v62 = vshrl.u32 %v1273_v26, 16 }
 0x22b   : > { %vm1842_vm3 = vcmp.lt.s32.totalorder %v1841_v56, 0  ;;  %v1634_v25 = vadd.s32 %v2707_v63, %v2705_v6  ;;  %v1281_v19 = vand.u32 65535, %v1277_v61  ;;  %v1279_v21 = vand.u32 65535, %v2792_v42 }
 0x22c   : > { %v1649_v43 = vsel %vm1842_vm3, 0, %v1841_v56  ;;  %v1484_v11 = vadd.s32 536870912, %v1483_v34  ;;  %v1282_v18 = vshrl.u32 %v1277_v61, 16  ;;  %v1303_v22 = vand.u32 65535, %v1273_v26 }
 0x22d   : > { %v1650_v9 = vsub.s32 32, %v1649_v43  ;;  %v1654_v3 = vsub.s32 4294967266, %v1649_v43  ;;  %v1651_v23 = vshll.u32 %v1642_v0, %v1649_v43  ;;  %v1280_v24 = vshrl.u32 %v2792_v42, 16 }
 0x22e   : > { %v1665_v17 = vsel %vm1542_vm2, %v1664_v28, %v2721_v41  ;;  %v2810_v54 = vshrl.u32 %v1484_v11, 30  ;;  %v1284_v6 = vmul.u32 %v1282_v18, %v1279_v21  ;;  %v2812_v63 = vmul.u32 %v1304_v62, %v1279_v21 }
 0x22f   : > { %v1652_v38 = vshrl.u32 %v1634_v25, %v1650_v9  ;;  %v1655_v39 = vadd.s32 127, %v1654_v3  ;;  %v3045_v27 = vand.u32 2147483647, %v2556_v12  ;;  %v1285_v45 = vmul.u32 %v1281_v19, %v1280_v24 }
 0x230   : > { %v1486_v35 = vshll.u32 %v2810_v54, 30  ;;  %v1246_v57 = vshrl.u32 %v1917_v14, %v2559_v13  ;;  %v1283_v41 = vmul.u32 %v1281_v19, %v1279_v21  ;;  %v1287_v7 = vshll.u32 %v1284_v6, 16 }
 0x231   : > { %vm2816_vm5 = vcmp.le.f32.partialorder %v3045_v27, 0.7853982  ;;  %v1653_v0 = vor.u32 %v1652_v38, %v1651_v23  ;;  %v1656_v29 = vshll.u32 %v1655_v39, 23  ;;  %v1286_v52 = vmul.u32 %v1282_v18, %v1280_v24 }
 0x232   : > { %v1667_v20 = vsel %vm2816_vm5, 0, %v1665_v17  ;;  %v1305_v44 = vmul.u32 %v1303_v22, %v1279_v21  ;;  %v2825_v56 = vsub.s32 %v1483_v34, %v1486_v35  ;;  %vm1291_vm7 = vc.u32 %v1283_v41, %v1287_v7 }
 0x233   : > { %v1657_v51 = vor.u32 4788187, %v1656_v29  ;;  %v1293_v26 = vadd.s32 %v1287_v7, %v1283_v41  ;;  %v1309_v33 = vshll.u32 %v2812_v63, 16  ;;  %v1660_v2 = vcvt.s32.f32 %v1653_v0 }
 0x234   : > { %v1289_v61 = vshll.u32 %v1285_v45, 16  ;;  %v1292_v43 = vsel %vm1291_vm7, 1, %v1913_v1  ;;  %vm1488_vm15 = vcmp.lt.s32.totalorder %v2825_v56, 0  ;;  %v1489_v13 = vsub.s32 0, %v2825_v56 }
 0x235   : > { %v1658_v16 = vand.u32 2147483647, %v1657_v51  ;;  %v1294_v28 = vadd.s32 %v1292_v43, %v1286_v52  ;;  %v1307_v25 = vmul.u32 %v1303_v22, %v1280_v24  ;;  %v1267_v34 = vsel %vm1265_vm12, %v2745_v46, 2102212464 }
 0x236   : > { %v1288_v3 = vshrl.u32 %v1284_v6, 16  ;;  %vm1295_vm4 = vc.u32 %v1293_v26, %v1289_v61  ;;  %v1490_v19 = vsel %vm1488_vm15, %v1489_v13, %v2825_v56  ;;  %v1308_v21 = vmul.u32 %v1304_v62, %v1280_v24 }
 0x237   : > { %v1661_v9 = vmul.f32 %v1660_v2, %v1658_v16  ;;  %v1296_v11 = vsel %vm1295_vm4, 1, %v1913_v1  ;;  %vm1313_vm8 = vc.u32 %v1305_v44, %v1309_v33  ;;  %v1491_v23 = vclz %v1490_v19 }
 0x238   : > { %v1298_v38 = vadd.s32 %v1296_v11, %v1294_v28  ;;  %v1314_v39 = vsel %vm1313_vm8, 1, %v1913_v1  ;;  %v1266_v22 = vsel %vm1262_vm6, %v1246_v57, %v2728_v31  ;;  %v1268_v46 = vsel %vm1264_vm11, %v2733_v49, %v1267_v34 }
 0x239   : > { %v1662_v18 = vxor.u32 2147483648, %v1661_v9  ;;  %v1311_v17 = vshll.u32 %v1307_v25, 16  ;;  %v1315_v6 = vadd.s32 %v1309_v33, %v1305_v44  ;;  %vm1387_vm12 = vcmp.lt.s32.totalorder %v2550_v5, 0 }
 0x23a   : > { %v1838_v62 = vadd.s32 4294967294, %v1491_v23  ;;  %v1299_v24 = vadd.s32 %v1298_v38, %v1288_v3  ;;  %v1316_v0 = vadd.s32 %v1314_v39, %v1308_v21  ;;  %v1684_v35 = vadd.s32 3, %v1667_v20 }
 0x23b   : > { %v1663_v27 = vsel %vm1542_vm2, %v1662_v18, %v1661_v9  ;;  %v1479_v31 = vadd.s32 %v2756_v37, %v2743_v8  ;;  %vm1317_vm9 = vc.u32 %v1315_v6, %v1311_v17  ;;  %v1290_v57 = vshrl.u32 %v1285_v45, 16 }
 0x23c   : > { %v1666_v29 = vsel %vm2816_vm5, %v2556_v12, %v1663_v27  ;;  %vm1839_vm10 = vcmp.lt.s32.totalorder %v1838_v62, 0  ;;  %v1318_v41 = vsel %vm1317_vm9, 1, %v1913_v1  ;;  %v1269_v51 = vsel %vm1263_vm1, %v1266_v22, %v1268_v46 }
 0x23d   : > { %v1668_v49 = vmul.f32 %v1666_v29, %v1666_v29  ;;  %v1494_v7 = vsel %vm1839_vm10, 0, %v1838_v62  ;;  %v1310_v52 = vshrl.u32 %v2812_v63, 16  ;;  %v1320_v44 = vadd.s32 %v1318_v41, %v1316_v0 }
 0x23e   : > { %v1495_v33 = vsub.s32 32, %v1494_v7  ;;  %v2855_v20 = vadd.s32 %v1299_v24, %v1290_v57  ;;  %v1499_v16 = vsub.s32 4294967266, %v1494_v7  ;;  %v1509_v8 = vsub.s32 4, %v2810_v54 }
 0x23f   : > { %v1669_v26 = vmul.f32 -0.001358992, %v1668_v49  ;;  %v1676_v55 = vmul.f32 -0.00019511016, %v1668_v49  ;;  %v1312_v37 = vshrl.u32 %v1307_v25, 16  ;;  %v1321_v2 = vadd.s32 %v1320_v44, %v1310_v52 }
 0x240   : > { %v1497_v43 = vshrl.u32 %v1479_v31, %v1495_v33  ;;  %v2858_v13 = vadd.s32 %v1315_v6, %v1311_v17  ;;  %v1685_v30 = vand.u32 3, %v1684_v35  ;;  %v1496_v28 = vshll.u32 %v2825_v56, %v1494_v7 }
 0x241   : > { %v1670_v45 = vadd.f32 0.041655596, %v1669_v26  ;;  %v1677_v61 = vadd.f32 0.008332121, %v1676_v55  ;;  %v1500_v63 = vadd.s32 127, %v1499_v16  ;;  %v1322_v9 = vadd.s32 %v1321_v2, %v1312_v37 }
 0x242   : > { %v2866_v34 = vsel %vm1110_vm13, %v1106_v50, 1326507024  ;;  %vm1325_vm6 = vc.u32 %v2855_v20, %v2858_v13  ;;  %v1498_v19 = vor.u32 %v1497_v43, %v1496_v28  ;;  %v1510_v56 = vsel %vm1387_vm12, %v1509_v8, %v2810_v54 }
 0x243   : > { %v1671_v3 = vmul.f32 %v1670_v45, %v1668_v49  ;;  %v1678_v25 = vmul.f32 %v1677_v61, %v1668_v49  ;;  %v1501_v11 = vshll.u32 %v1500_v63, 23  ;;  %v1326_v21 = vadd.s32 1, %v1322_v9 }
 0x244   : > { %v3048_v40 = vand.u32 2147483647, %v2550_v5  ;;  %v1323_v50 = vmul.u32 %v2792_v42, %v1269_v51  ;;  %vm1687_vm14 = vcmp.eq.s32.totalorder %v1685_v30, 0  ;;  %v1075_v22 = vand.u32 2147483647, %v2544_v58 }
 0x245   : > { %v1672_v18 = vadd.f32 -0.4999988, %v1671_v3  ;;  %v1679_v23 = vadd.f32 -0.16666654, %v1678_v25  ;;  %v1502_v38 = vor.u32 4788187, %v1501_v11  ;;  %v1327_v39 = vsel %vm1325_vm6, %v1326_v21, %v1322_v9 }
 0x246   : > { %vm2875_vm11 = vcmp.le.f32.partialorder %v3048_v40, 0.7853982  ;;  %vm1686_vm1 = vcmp.lt.s32.totalorder %v1685_v30, 2  ;;  %v1328_v6 = vadd.s32 %v1327_v39, %v1323_v50  ;;  %vm1683_vm2 = vweird.f32 %v2556_v12 }
 0x247   : > { %v1673_v46 = vmul.f32 %v1672_v18, %v1668_v49  ;;  %v1680_v17 = vmul.f32 %v1679_v23, %v1668_v49  ;;  %v1512_v54 = vsel %vm2875_vm11, 0, %v1510_v56  ;;  %v1503_v27 = vand.u32 2147483647, %v1502_v38 }
 0x248   : > { %v1505_v62 = vcvt.s32.f32 %v1498_v19  ;;  %v1096_v24 = vshrl.u32 %v1919_v32, %v2578_v60  ;;  %v1099_v42 = vshrl.u32 %v1914_v47, %v2578_v60  ;;  %v1329_v31 = vadd.s32 536870912, %v1328_v6 }
 0x249   : > { %v1674_v0 = vadd.f32 1.0, %v1673_v46  ;;  %v1681_v35 = vadd.f32 1.0, %v1680_v17  ;;  %v1093_v49 = vshrl.u32 %v3037_v48, %v2578_v60  ;;  %v1082_v41 = vand.u32 8388607, %v1075_v22 }
 0x24a   : > { %v1506_v57 = vmul.f32 %v1505_v62, %v1503_v27  ;;  %v1095_v7 = vshll.u32 %v3037_v48, %v2566_v4  ;;  %v1098_v51 = vshll.u32 %v1919_v32, %v2566_v4  ;;  %v2896_v26 = vshrl.u32 %v1329_v31, 30 }
 0x24b   : > { %v1682_v52 = vmul.f32 %v1681_v35, %v1666_v29  ;;  %v1691_v44 = vxor.u32 2147483648, %v1674_v0  ;;  %v1092_v47 = vshll.u32 %v1917_v14, %v2566_v4  ;;  %vm1690_vm3 = vcmp.eq.s32.totalorder %v1685_v30, 2 }
 0x24c   : > { %v1507_v55 = vxor.u32 2147483648, %v1506_v57  ;;  %v2900_v33 = vor.u32 %v1096_v24, %v1095_v7  ;;  %v2902_v16 = vor.u32 %v1099_v42, %v1098_v51  ;;  %v1529_v37 = vadd.s32 3, %v1512_v54 }
 0x24d   : > { %v1688_v8 = vxor.u32 2147483648, %v1682_v52  ;;  %v1331_v48 = vshll.u32 %v2896_v26, 30  ;;  %v2905_v2 = vor.u32 %v1093_v49, %v1092_v47  ;;  %v1083_v29 = vor.u32 8388608, %v1082_v41 }
 0x24e   : > { %v1508_v32 = vsel %vm1387_vm12, %v1507_v55, %v1506_v57  ;;  %vm1107_vm5 = vcmp.lt.s32.totalorder %v2575_v36, 1  ;;  %vm1108_vm7 = vcmp.lt.s32.totalorder %v2575_v36, 2  ;;  %v1692_v45 = vsel %vm1690_vm3, %v1691_v44, %v1682_v52 }
 0x24f   : > { %v1689_v4 = vsel %vm1687_vm14, %v1674_v0, %v1688_v8  ;;  %v1511_v61 = vsel %vm2875_vm11, %v2550_v5, %v1508_v32  ;;  %v1332_v43 = vsub.s32 %v1328_v6, %v1331_v48  ;;  %vm1109_vm15 = vcmp.lt.s32.totalorder %v2575_v36, 3 }
 0x250   : > { %v1693_v28 = vsel %vm1686_vm1, %v1689_v4, %v1692_v45  ;;  %v1513_v63 = vmul.f32 %v1511_v61, %v1511_v61  ;;  %v1119_v9 = vsel %vm1107_vm5, %v2900_v33, %v2902_v16  ;;  %v1115_v19 = vsel %vm1107_vm5, %v2905_v2, %v2900_v33 }
 0x251   : > { %v1694_v3 = vsel %vm1683_vm2, nan, %v1693_v28  ;;  %vm1333_vm4 = vcmp.lt.s32.totalorder %v1332_v43, 0  ;;  %v1334_v25 = vsub.s32 0, %v1332_v43  ;;  %v1117_v56 = vsel %vm1109_vm15, %v2902_v16, %v2799_v59 }
 0x252   : > { %1717 = vmatpush.msra.mxu2 %v1694_v3  ;;  %v1514_v30 = vmul.f32 -0.001358992, %v1513_v63  ;;  %v1521_v11 = vmul.f32 -0.00019511016, %v1513_v63  ;;  %v1121_v12 = vsel %vm1109_vm15, %v2749_v53, %v2866_v34  ;;  %v2937_v23 = vshll.u32 %v1083_v29, 8 }
 0x253   : > { %v1335_v21 = vsel %vm1333_vm4, %v1334_v25, %v1332_v43  ;;  %v1122_v18 = vsel %vm1108_vm7, %v1119_v9, %v1121_v12  ;;  %v1530_v38 = vand.u32 3, %v1529_v37  ;;  %v1118_v39 = vsel %vm1108_vm7, %v1115_v19, %v1117_v56 }
 0x254   : > { %v1515_v40 = vadd.f32 0.041655596, %v1514_v30  ;;  %v1522_v15 = vadd.f32 0.008332121, %v1521_v11  ;;  %v1336_v50 = vclz %v1335_v21  ;;  %v1126_v54 = vand.u32 65535, %v1122_v18 }
 0x255   : > { %v1324_v53 = vadd.s32 %v2858_v13, %v2855_v20  ;;  %v1124_v34 = vand.u32 65535, %v2937_v23  ;;  %v1125_v6 = vshrl.u32 %v2937_v23, 16  ;;  %v1127_v27 = vshrl.u32 %v1122_v18, 16 }
 0x256   : > { %v1516_v46 = vmul.f32 %v1515_v40, %v1513_v63  ;;  %v1523_v59 = vmul.f32 %v1522_v15, %v1513_v63  ;;  %v1835_v17 = vadd.s32 4294967294, %v1336_v50  ;;  %v1148_v42 = vand.u32 65535, %v1118_v39 }
 0x257   : > { %v1129_v35 = vmul.u32 %v1127_v27, %v1124_v34  ;;  %v2945_v31 = vmul.u32 %v1126_v54, %v1125_v6  ;;  %v1149_v49 = vshrl.u32 %v1118_v39, 16  ;;  %vm1531_vm12 = vcmp.lt.s32.totalorder %v1530_v38, 2 }
 0x258   : > { %v1517_v62 = vadd.f32 -0.4999988, %v1516_v46  ;;  %v1524_v24 = vadd.f32 -0.16666654, %v1523_v59  ;;  %vm1836_vm8 = vcmp.lt.s32.totalorder %v1835_v17, 0  ;;  %v1128_v51 = vmul.u32 %v1126_v54, %v1124_v34 }
 0x259   : > { %v1339_v0 = vsel %vm1836_vm8, 0, %v1835_v17  ;;  %vm1528_vm9 = vweird.f32 %v2550_v5  ;;  %v1131_v52 = vmul.u32 %v1127_v27, %v1125_v6  ;;  %v1132_v44 = vshll.u32 %v1129_v35, 16 }
 0x25a   : > { %v1518_v57 = vmul.f32 %v1517_v62, %v1513_v63  ;;  %v1525_v41 = vmul.f32 %v1524_v24, %v1513_v63  ;;  %v1340_v7 = vsub.s32 32, %v1339_v0  ;;  %v1341_v20 = vshll.u32 %v1332_v43, %v1339_v0 }
 0x25b   : > { %v1344_v13 = vsub.s32 4294967266, %v1339_v0  ;;  %v1134_v37 = vshll.u32 %v2945_v31, 16  ;;  %vm1136_vm10 = vc.u32 %v1128_v51, %v1132_v44  ;;  %v1138_v32 = vadd.s32 %v1132_v44, %v1128_v51 }
 0x25c   : > { %v1519_v47 = vadd.f32 1.0, %v1518_v57  ;;  %v1526_v55 = vadd.f32 1.0, %v1525_v41  ;;  %v1342_v8 = vshrl.u32 %v1324_v53, %v1340_v7  ;;  %v1151_v29 = vmul.u32 %v1149_v49, %v1124_v34 }
 0x25d   : > { %v1345_v48 = vadd.s32 127, %v1344_v13  ;;  %vm1532_vm6 = vcmp.eq.s32.totalorder %v1530_v38, 0  ;;  %v1137_v28 = vsel %vm1136_vm10, 1, %v1913_v1  ;;  %vm1140_vm11 = vc.u32 %v1138_v32, %v1134_v37 }
 0x25e   : > { %v1527_v4 = vmul.f32 %v1526_v55, %v1511_v61  ;;  %v1536_v45 = vxor.u32 2147483648, %v1519_v47  ;;  %v1343_v63 = vor.u32 %v1342_v8, %v1341_v20  ;;  %v1139_v43 = vadd.s32 %v1137_v28, %v1131_v52 }
 0x25f   : > { %v1346_v9 = vshll.u32 %v1345_v48, 23  ;;  %vm1535_vm14 = vcmp.eq.s32.totalorder %v1530_v38, 2  ;;  %v1141_v25 = vsel %vm1140_vm11, 1, %v1913_v1  ;;  %v1152_v19 = vmul.u32 %v1148_v42, %v1125_v6 }
 0x260   : > { %v1533_v3 = vxor.u32 2147483648, %v1527_v4  ;;  %v1143_v11 = vadd.s32 %v1141_v25, %v1139_v43  ;;  %v1150_v56 = vmul.u32 %v1148_v42, %v1124_v34  ;;  %v1154_v12 = vshll.u32 %v1151_v29, 16 }
 0x261   : > { %v1347_v30 = vor.u32 4788187, %v1346_v9  ;;  %v1537_v18 = vsel %vm1535_vm14, %v1536_v45, %v1527_v4  ;;  %v1133_v61 = vshrl.u32 %v1129_v35, 16  ;;  %v1153_v40 = vmul.u32 %v1149_v49, %v1125_v6 }
 0x262   : > { %v1534_v21 = vsel %vm1532_vm6, %v1519_v47, %v1533_v3  ;;  %v1350_v39 = vcvt.s32.f32 %v1343_v63  ;;  %vm1158_vm1 = vc.u32 %v1150_v56, %v1154_v12  ;;  %v1156_v59 = vshll.u32 %v1152_v19, 16 }
 0x263   : > { %v1538_v15 = vsel %vm1531_vm12, %v1534_v21, %v1537_v18  ;;  %v1348_v50 = vand.u32 2147483647, %v1347_v30  ;;  %v1159_v17 = vsel %vm1158_vm1, 1, %v1913_v1  ;;  %v1160_v54 = vadd.s32 %v1154_v12, %v1150_v56 }
 0x264   : > { %v1539_v46 = vsel %vm1528_vm9, nan, %v1538_v15  ;;  %v1144_v34 = vadd.s32 %v1143_v11, %v1133_v61  ;;  %v1161_v27 = vadd.s32 %v1159_v17, %v1153_v40  ;;  %v1112_v6 = vsel %vm1110_vm13, %v2902_v16, 2102212464 }
 0x265   : > { %1718 = vmatpush.msra.mxu2 %v1539_v46  ;;  %v1351_v53 = vmul.f32 %v1350_v39, %v1348_v50  ;;  %vm1162_vm2 = vc.u32 %v1160_v54, %v1156_v59  ;;  %v1091_v62 = vshrl.u32 %v1917_v14, %v2578_v60  ;;  %v1135_v5 = vshrl.u32 %v2945_v31, 16 }
 0x266   : > { %v1163_v24 = vsel %vm1162_vm2, 1, %v1913_v1  ;;  %v3051_v42 = vand.u32 2147483647, %v2546_v10  ;;  %vm1232_vm4 = vcmp.lt.s32.totalorder %v2546_v10, 0  ;;  %v1155_v35 = vshrl.u32 %v1151_v29, 16 }
 0x267   : > { %v1352_v38 = vxor.u32 2147483648, %v1351_v53  ;;  %v1165_v49 = vadd.s32 %v1163_v24, %v1161_v27  ;;  %v1111_v14 = vsel %vm1107_vm5, %v1091_v62, %v2905_v2  ;;  %v1113_v1 = vsel %vm1109_vm15, %v2900_v33, %v1112_v6 }
 0x268   : > { %vm2964_vm3 = vcmp.le.f32.partialorder %v3051_v42, 0.7853982  ;;  %v1145_v60 = vadd.s32 %v1144_v34, %v1135_v5  ;;  %v1354_v31 = vsub.s32 4, %v2896_v26  ;;  %v1157_v41 = vshrl.u32 %v1152_v19, 16 }
 0x269   : > { %v1353_v16 = vsel %vm1232_vm4, %v1352_v38, %v1351_v53  ;;  %v1166_v7 = vadd.s32 %v1165_v49, %v1155_v35  ;;  %v1164_v20 = vadd.s32 %v1160_v54, %v1156_v59  ;;  %v1114_v13 = vsel %vm1108_vm7, %v1111_v14, %v1113_v1 }
 0x26a   : > { %v1356_v57 = vsel %vm2964_vm3, %v2546_v10, %v1353_v16  ;;  %v1355_v33 = vsel %vm1232_vm4, %v1354_v31, %v2896_v26  ;;  %v1168_v37 = vmul.u32 %v2937_v23, %v1114_v13  ;;  %vm1373_vm12 = vweird.f32 %v2546_v10 }
 0x26b   : > { %v1358_v51 = vmul.f32 %v1356_v57, %v1356_v57  ;;  %v1167_v52 = vadd.s32 %v1166_v7, %v1157_v41  ;;  %vm1170_vm13 = vc.u32 %v1145_v60, %v1164_v20  ;;  %v1357_v32 = vsel %vm2964_vm3, 0, %v1355_v33 }
 0x26c   : > { %v1374_v9 = vadd.s32 3, %v1357_v32  ;;  %v1169_v54 = vadd.s32 %v1164_v20, %v1145_v60  ;;  %vm1077_vm10 = vcmp.lt.s32.totalorder %v2544_v58, 0  ;;  %vm1076_vm6 = vcmp.le.f32.partialorder %v1075_v22, 0.7853982 }
 0x26d   : > { %v1359_v2 = vmul.f32 -0.001358992, %v1358_v51  ;;  %v1366_v44 = vmul.f32 -0.00019511016, %v1358_v51  ;;  %v1171_v47 = vadd.s32 1, %v1167_v52  ;;  %vm1218_vm2 = vweird.f32 %v2544_v58 }
 0x26e   : > { %v1375_v11 = vand.u32 3, %v1374_v9 }
 0x26f   : > { %v1360_v55 = vadd.f32 0.041655596, %v1359_v2  ;;  %v1367_v8 = vadd.f32 0.008332121, %v1366_v44  ;;  %v1172_v48 = vsel %vm1170_vm13, %v1171_v47, %v1167_v52 }
 0x270   : > { %v1173_v4 = vadd.s32 %v1172_v48, %v1168_v37  ;;  %vm1377_vm7 = vcmp.eq.s32.totalorder %v1375_v11, 0  ;;  %vm1380_vm15 = vcmp.eq.s32.totalorder %v1375_v11, 2  ;;  %vm1376_vm8 = vcmp.lt.s32.totalorder %v1375_v11, 2 }
 0x271   : > { %v1361_v29 = vmul.f32 %v1360_v55, %v1358_v51  ;;  %v1368_v36 = vmul.f32 %v1367_v8, %v1358_v51 }
 0x272   : > { %v1174_v63 = vadd.s32 536870912, %v1173_v4 }
 0x273   : > { %v1362_v45 = vadd.f32 -0.4999988, %v1361_v29  ;;  %v1369_v28 = vadd.f32 -0.16666654, %v1368_v36 }
 0x274   : > { %v1175_v25 = vshrl.u32 %v1174_v63, 30  ;;  %v1700_v63 = vpop.permute.xlu2 %1699 }
 0x275   : > { %v1363_v43 = vmul.f32 %v1362_v45, %v1358_v51  ;;  %v1370_v3 = vmul.f32 %v1369_v28, %v1358_v51  ;;  %v1695_v45 = vld [vmem:[%s3017_s5] sm:$0x7] }
 0x276   : > { %v1176_v30 = vshll.u32 %v1175_v25, 30  ;;  %v1199_v16 = vsub.s32 4, %v1175_v25 }
 0x277   : > { %v1364_v26 = vadd.f32 1.0, %v1363_v43  ;;  %v1371_v19 = vadd.f32 1.0, %v1370_v3 }
 0x278   : > { %v1177_v12 = vsub.s32 %v1173_v4, %v1176_v30 }
 0x279   : > { %v1372_v56 = vmul.f32 %v1371_v19, %v1356_v57  ;;  %v1381_v23 = vxor.u32 2147483648, %v1364_v26  ;;  %v1200_v57 = vsel %vm1077_vm10, %v1199_v16, %v1175_v25 }
 0x27a   : > { %vm1178_vm5 = vcmp.lt.s32.totalorder %v1177_v12, 0  ;;  %v1179_v18 = vsub.s32 0, %v1177_v12  ;;  %v1202_v51 = vsel %vm1076_vm6, 0, %v1200_v57 }
 0x27b   : > { %v1378_v21 = vxor.u32 2147483648, %v1372_v56  ;;  %v1382_v40 = vsel %vm1380_vm15, %v1381_v23, %v1372_v56  ;;  %v1219_v44 = vadd.s32 3, %v1202_v51 }
 0x27c   : > { %v1180_v15 = vsel %vm1178_vm5, %v1179_v18, %v1177_v12 }
 0x27d   : > { %v1379_v61 = vsel %vm1377_vm7, %v1364_v26, %v1378_v21  ;;  %v1181_v39 = vclz %v1180_v15  ;;  %v1220_v8 = vand.u32 3, %v1219_v44 }
 0x27e   : > { %v1383_v50 = vsel %vm1376_vm8, %v1379_v61, %v1382_v40 }
 0x27f   : > { %v1384_v46 = vsel %vm1373_vm12, nan, %v1383_v50  ;;  %v1832_v59 = vadd.s32 4294967294, %v1181_v39  ;;  %vm1222_vm11 = vcmp.eq.s32.totalorder %v1220_v8, 0  ;;  %vm1225_vm14 = vcmp.eq.s32.totalorder %v1220_v8, 2 }
 0x280   : > { %1719 = vmatpush.msra.mxu2 %v1384_v46  ;;  %vm1221_vm1 = vcmp.lt.s32.totalorder %v1220_v8, 2 }
 0x281   : > { %vm1833_vm9 = vcmp.lt.s32.totalorder %v1832_v59, 0 }
 0x282   : > { %v1184_v17 = vsel %vm1833_vm9, 0, %v1832_v59 }
 0x283   : > { %v1185_v53 = vsub.s32 32, %v1184_v17  ;;  %v1189_v34 = vsub.s32 4294967266, %v1184_v17  ;;  %v1186_v27 = vshll.u32 %v1177_v12, %v1184_v17 }
 0x285   : > { %v1187_v6 = vshrl.u32 %v1169_v54, %v1185_v53  ;;  %v1190_v38 = vadd.s32 127, %v1189_v34 }
 0x287   : > { %v1188_v62 = vor.u32 %v1187_v6, %v1186_v27  ;;  %v1191_v5 = vshll.u32 %v1190_v38, 23 }
 0x289   : > { %v1192_v24 = vor.u32 4788187, %v1191_v5  ;;  %v1195_v0 = vcvt.s32.f32 %v1188_v62 }
 0x28b   : > { %v1193_v42 = vand.u32 2147483647, %v1192_v24 }
 0x28d   : > { %v1196_v35 = vmul.f32 %v1195_v0, %v1193_v42 }
 0x28f   : > { %v1197_v10 = vxor.u32 2147483648, %v1196_v35 }
 0x291   : > { %v1198_v49 = vsel %vm1077_vm10, %v1197_v10, %v1196_v35 }
 0x292   : > { %v1201_v14 = vsel %vm1076_vm6, %v2544_v58, %v1198_v49 }
 0x293   : > { %v1203_v1 = vmul.f32 %v1201_v14, %v1201_v14 }
 0x295   : > { %v1204_v60 = vmul.f32 -0.001358992, %v1203_v1  ;;  %v1211_v31 = vmul.f32 -0.00019511016, %v1203_v1 }
 0x297   : > { %v1205_v41 = vadd.f32 0.041655596, %v1204_v60  ;;  %v1212_v7 = vadd.f32 0.008332121, %v1211_v31 }
 0x299   : > { %v1206_v20 = vmul.f32 %v1205_v41, %v1203_v1  ;;  %v1213_v13 = vmul.f32 %v1212_v7, %v1203_v1 }
 0x29b   : > { %v1207_v52 = vadd.f32 -0.4999988, %v1206_v20  ;;  %v1214_v2 = vadd.f32 -0.16666654, %v1213_v13 }
 0x29d   : > { %v1208_v33 = vmul.f32 %v1207_v52, %v1203_v1  ;;  %v1215_v47 = vmul.f32 %v1214_v2, %v1203_v1 }
 0x29f   : > { %v1209_v55 = vadd.f32 1.0, %v1208_v33  ;;  %v1216_v22 = vadd.f32 1.0, %v1215_v47 }
 0x2a1   : > { %v1217_v37 = vmul.f32 %v1216_v22, %v1201_v14  ;;  %v1226_v48 = vxor.u32 2147483648, %v1209_v55 }
 0x2a3   : > { %v1223_v32 = vxor.u32 2147483648, %v1217_v37  ;;  %v1227_v36 = vsel %vm1225_vm14, %v1226_v48, %v1217_v37 }
 0x2a5   : > { %v1224_v29 = vsel %vm1222_vm11, %v1209_v55, %v1223_v32 }
 0x2a6   : > { %v1228_v4 = vsel %vm1221_vm1, %v1224_v29, %v1227_v36 }
 0x2a7   : > { %v1229_v28 = vsel %vm1218_vm2, nan, %v1228_v4 }
 0x2a8   : > { %1720 = vmatpush.msra.mxu2 %v1229_v28 }
 0x2a9   : > { %1843 = vmatmul.msk.f32.vlgmr.msra.gmra.mxu2 %vm320_vm0, %v1695_v45 }
 0x32c   : > { %v1722_v9 = vpop.f32.mrf.mxu2 }
 0x32d   : > { %v1723_v43 = vadd.f32 %v1722_v9, %v1700_v63 }
 0x32f   : > { %1725 = vst [vmem:[%s307_s10] sm:$0x7] %v1723_v43 }
 0x330 PF: > { %s17_s26 = sadd.s32 1, %s1911_s26   ;;  %s3054_s24 = smov %s1907_s25 }
 0x331   : > { %p14_p5 = scmp.ge.s32.totalorder %s17_s26, 4   ;;  %s3055_s25 = smov %s3057_s27 }
 0x333   :  { %16 = sbr.rel (!%p14_p5) target bundleno = 2 (0x2), region = 78 }

</bundles_post_ra>
